<compile_context>
chip_gen: v5e
topology: v5e:2x2
jax: 0.10.0
libtpu: 0.0.40
codegen_flags: <defaults>
</compile_context>

<pallas_src>
import jax
import jax.numpy as jnp
from jax.experimental import pallas as pl
from jax.experimental.pallas import tpu as pltpu

BATCH_SIZE = 4
NUM_PARTIAL_TRAJECTORY = 8
HIDDEN_DIM = 2
INPUT_DIM = 28 * 28          # 784
PAD_DIM = 896                # 7 * 128: lane-dense padding of INPUT_DIM


def autoencoder_kernel(x3_ref, e_wih_t_ref, e_whh_t_ref, e_b_ref,
                       d_wih_t_ref, d_b_ref, d_whh_hbm_ref,
                       out_ref,
                       d_whh_vmem, dma_sem):
    # refs:
    #   x3_ref:       (8, 784)   VMEM  encoder input, batch row 3 only
    #   e_wih_t:      (784, 2)   VMEM  encoder W_ih^T
    #   e_whh_t:      (2, 2)     VMEM  encoder W_hh^T
    #   e_b:          (1, 2)     VMEM  b_ih + b_hh (encoder)
    #   d_wih_t:      (2, 896)   VMEM  decoder W_ih^T, zero-padded 784->896
    #   d_b:          (1, 896)   VMEM  b_ih + b_hh (decoder), zero-padded
    #   d_whh_hbm:    (896, 896) HBM   decoder W_hh^T, zero-padded (manual DMA)
    #   out_ref:      (4, 896)   VMEM  decoder rows that survive [:, -1, :]
    #   d_whh_vmem:   (896, 896) VMEM scratch
    #   dma_sem:      DMA semaphore

    # Kick off the big recurrent-weight DMA immediately; it overlaps with the
    # whole encoder phase and is only waited on right before the decoder.
    whh_cp = pltpu.make_async_copy(d_whh_hbm_ref, d_whh_vmem, dma_sem)
    whh_cp.start()

    # ---------------- encoder (only batch row 3 is live) ----------------
    # Hoisted input projection: one (8,784)@(784,2) matmul instead of 8
    # serialized, data-dependent K=784/N=2 matmuls inside the recurrence.
    xw = jnp.dot(x3_ref[...], e_wih_t_ref[...],
                 preferred_element_type=jnp.float32)            # (8, 2)
    e_b = e_b_ref[...]                                          # (1, 2)
    ew0 = e_whh_t_ref[0:1, :]                                   # rows of W_hh^T
    ew1 = e_whh_t_ref[1:2, :]

    h = jnp.zeros((1, HIDDEN_DIM), jnp.float32)
    latents = []   # encoder states after odd steps == decoder inputs (row 7)
    for s in range(NUM_PARTIAL_TRAJECTORY):          # static unroll, VPU-only body
        rec = h[:, 0:1] * ew0 + h[:, 1:2] * ew1      # h @ W_hh^T  (2x2) on the VPU
        h = jnp.tanh(xw[s:s + 1, :] + e_b + rec)
        if s % 2 == 1:
            latents.append(h)

    # ---------------- decoder (only "batch" row 7 is live) ----------------
    # Input projection latent @ W_ih^T has K=2: two rank-1 VPU updates per step,
    # precomputed off the serial MXU chain, bias folded in.
    dw0 = d_wih_t_ref[0:1, :]                                   # (1, 896)
    dw1 = d_wih_t_ref[1:2, :]
    d_b = d_b_ref[...]                                          # (1, 896)
    pre = [lat[:, 0:1] * dw0 + lat[:, 1:2] * dw1 + d_b for lat in latents]

    whh_cp.wait()                                               # need W_hh now

    # Step 0: initial hidden state is exactly zero -> skip the matmul.
    hd = jnp.tanh(pre[0])                                       # (1, 896)
    out_ref[0:1, :] = hd
    for t in range(1, BATCH_SIZE):                              # 3 serialized matmuls
        hd = jnp.tanh(pre[t] + jnp.dot(hd, d_whh_vmem[...],
                                       preferred_element_type=jnp.float32))
        out_ref[t:t + 1, :] = hd                                # direct row store


def _pad_cols(a, width):
    return jnp.pad(a, ((0, 0), (0, width - a.shape[1])))


@jax.jit
def autoencoder_forward(x, params):
    """x: (BATCH_SIZE, NUM_PARTIAL_TRAJECTORY, INPUT_DIM) f32 -> (BATCH_SIZE, 28, 28)."""
    e_wih, e_whh, e_bih, e_bhh, d_wih, d_whh, d_bih, d_bhh = params

    # torch: x.view(NUM_PARTIAL_TRAJECTORY, BATCH_SIZE, INPUT_DIM) — flat reinterpret.
    x_seq = x.reshape(NUM_PARTIAL_TRAJECTORY, BATCH_SIZE, INPUT_DIM)
    # Only encoder batch element 3 feeds the surviving output rows -> DMA 1/4 of x.
    x3 = x_seq[:, 3, :]                                          # (8, 784)

    e_b = (e_bih + e_bhh).reshape(1, HIDDEN_DIM)
    d_b = _pad_cols((d_bih + d_bhh).reshape(1, INPUT_DIM), PAD_DIM)
    d_wih_t = _pad_cols(d_wih.T, PAD_DIM)                        # (2, 896)
    d_whh_t = jnp.pad(d_whh.T, ((0, PAD_DIM - INPUT_DIM),
                                (0, PAD_DIM - INPUT_DIM)))       # (896, 896)

    vmem = pl.BlockSpec(memory_space=pltpu.MemorySpace.VMEM)
    out = pl.pallas_call(
        autoencoder_kernel,
        out_shape=jax.ShapeDtypeStruct((BATCH_SIZE, PAD_DIM), jnp.float32),
        in_specs=[vmem, vmem, vmem, vmem, vmem, vmem,
                  pl.BlockSpec(memory_space=pl.ANY)],            # d_whh stays in HBM
        out_specs=vmem,
        scratch_shapes=[pltpu.VMEM((PAD_DIM, PAD_DIM), jnp.float32),
                        pltpu.SemaphoreType.DMA],
    )(x3, e_wih.T, e_whh.T, e_b, d_wih_t, d_b, d_whh_t)

    return out[:, :INPUT_DIM].reshape(BATCH_SIZE, 28, 28)


def reference_forward(x, params):
    """Pure-JAX replica of the full PyTorch forward (for correctness checking)."""
    e_wih, e_whh, e_bih, e_bhh, d_wih, d_whh, d_bih, d_bhh = params
    HI = jax.lax.Precision.HIGHEST   # exact-f32 for the tiny dots the kernel does on the VPU
    xs = x.reshape(NUM_PARTIAL_TRAJECTORY, BATCH_SIZE, INPUT_DIM)
    h = jnp.zeros((BATCH_SIZE, HIDDEN_DIM), jnp.float32)
    enc = []
    for s in range(NUM_PARTIAL_TRAJECTORY):
        h = jnp.tanh(xs[s] @ e_wih.T + e_bih
                     + jnp.dot(h, e_whh.T, precision=HI) + e_bhh)
        enc.append(h)
    enc = jnp.stack(enc, axis=0)                                     # (8, 4, 2)
    latent = enc.reshape(BATCH_SIZE, NUM_PARTIAL_TRAJECTORY, HIDDEN_DIM)   # torch .view
    hd = jnp.zeros((NUM_PARTIAL_TRAJECTORY, INPUT_DIM), jnp.float32)
    dec = []
    for t in range(BATCH_SIZE):
        hd = jnp.tanh(jnp.dot(latent[t], d_wih.T, precision=HI) + d_bih
                      + hd @ d_whh.T + d_bhh)
        dec.append(hd)
    dec = jnp.stack(dec, axis=0)                                     # (4, 8, 784)
    out = dec.reshape(BATCH_SIZE, NUM_PARTIAL_TRAJECTORY, -1)[:, -1, :]
    return out.reshape(BATCH_SIZE, 28, 28)


if __name__ == "__main__":
    key = jax.random.PRNGKey(0)
    keys = jax.random.split(key, 9)
    # deterministic init mirroring nn.RNN's U(-1/sqrt(hidden), 1/sqrt(hidden))
    k_e = 1.0 / (HIDDEN_DIM ** 0.5)
    k_d = 1.0 / (INPUT_DIM ** 0.5)
    e_wih = jax.random.uniform(keys[0], (HIDDEN_DIM, INPUT_DIM), jnp.float32, -k_e, k_e)
    e_whh = jax.random.uniform(keys[1], (HIDDEN_DIM, HIDDEN_DIM), jnp.float32, -k_e, k_e)
    e_bih = jax.random.uniform(keys[2], (HIDDEN_DIM,), jnp.float32, -k_e, k_e)
    e_bhh = jax.random.uniform(keys[3], (HIDDEN_DIM,), jnp.float32, -k_e, k_e)
    d_wih = jax.random.uniform(keys[4], (INPUT_DIM, HIDDEN_DIM), jnp.float32, -k_d, k_d)
    d_whh = jax.random.uniform(keys[5], (INPUT_DIM, INPUT_DIM), jnp.float32, -k_d, k_d)
    d_bih = jax.random.uniform(keys[6], (INPUT_DIM,), jnp.float32, -k_d, k_d)
    d_bhh = jax.random.uniform(keys[7], (INPUT_DIM,), jnp.float32, -k_d, k_d)
    params = (e_wih, e_whh, e_bih, e_bhh, d_wih, d_whh, d_bih, d_bhh)

    x = jax.random.normal(keys[8], (BATCH_SIZE, NUM_PARTIAL_TRAJECTORY, INPUT_DIM),
                          jnp.float32)

    out = autoencoder_forward(x, params)
    out = jax.block_until_ready(out)

    ref = reference_forward(x, params)
    assert out.shape == (BATCH_SIZE, 28, 28)
    assert jnp.allclose(out, ref, atol=1e-4, rtol=1e-4)
    print("KERNEL_OK")
</pallas_src>

<mosaic_0001>
module attributes {stable_mosaic.version = 11 : i64} {
  func.func @autoencoder_kernel(%arg0: memref<8x784xf32, #tpu.memory_space<vmem>>, %arg1: memref<784x2xf32, #tpu.memory_space<vmem>>, %arg2: memref<2x2xf32, #tpu.memory_space<vmem>>, %arg3: memref<1x2xf32, #tpu.memory_space<vmem>>, %arg4: memref<2x896xf32, #tpu.memory_space<vmem>>, %arg5: memref<1x896xf32, #tpu.memory_space<vmem>>, %arg6: memref<896x896xf32, #tpu.memory_space<any>>, %arg7: memref<4x896xf32, #tpu.memory_space<vmem>>, %arg8: memref<896x896xf32, #tpu.memory_space<vmem>>, %arg9: memref<!tpu.dma_semaphore, #tpu.memory_space<semaphore_mem>>) attributes {dimension_semantics = [], scalar_prefetch = 0 : i64, scratch_operands = 2 : i64, tpu.core_type = #tpu.core_type<tc>} {
    tpu.enqueue_dma source(%arg6 : memref<896x896xf32, #tpu.memory_space<any>>) target(%arg8 : memref<896x896xf32, #tpu.memory_space<vmem>>) target_semaphore(%arg9 : memref<!tpu.dma_semaphore, #tpu.memory_space<semaphore_mem>>)
    %c0 = arith.constant 0 : index
    %c0_0 = arith.constant 0 : index
    %0 = vector.load %arg0[%c0, %c0_0] : memref<8x784xf32, #tpu.memory_space<vmem>>, vector<8x784xf32>
    %c0_1 = arith.constant 0 : index
    %c0_2 = arith.constant 0 : index
    %1 = vector.load %arg1[%c0_1, %c0_2] : memref<784x2xf32, #tpu.memory_space<vmem>>, vector<784x2xf32>
    %cst = arith.constant dense<0.000000e+00> : vector<8x2xf32>
    %2 = tpu.matmul %0, %1, %cst {dimension_numbers = #tpu.dot_dimension_numbers<[1], [0], [0], [1], [0, 0, 1, 1], [], []>} : vector<8x784xf32>, vector<784x2xf32>, vector<8x2xf32> -> vector<8x2xf32>
    %c0_3 = arith.constant 0 : index
    %c0_4 = arith.constant 0 : index
    %3 = vector.load %arg3[%c0_3, %c0_4] : memref<1x2xf32, #tpu.memory_space<vmem>>, vector<1x2xf32>
    %c0_5 = arith.constant 0 : index
    %c0_6 = arith.constant 0 : index
    %4 = vector.load %arg2[%c0_5, %c0_6] : memref<2x2xf32, #tpu.memory_space<vmem>>, vector<1x2xf32>
    %c1 = arith.constant 1 : index
    %c0_7 = arith.constant 0 : index
    %5 = vector.load %arg2[%c1, %c0_7] : memref<2x2xf32, #tpu.memory_space<vmem>>, vector<1x2xf32>
    %cst_8 = arith.constant 0.000000e+00 : f32
    %6 = vector.broadcast %cst_8 : f32 to vector<1x2xf32>
    %7 = vector.extract_strided_slice %6 {offsets = [0, 0], sizes = [1, 1], strides = [1, 1]} : vector<1x2xf32> to vector<1x1xf32>
    %8 = vector.broadcast %7 : vector<1x1xf32> to vector<1x2xf32>
    %9 = arith.mulf %8, %4 : vector<1x2xf32>
    %10 = vector.extract_strided_slice %6 {offsets = [0, 1], sizes = [1, 1], strides = [1, 1]} : vector<1x2xf32> to vector<1x1xf32>
    %11 = vector.broadcast %10 : vector<1x1xf32> to vector<1x2xf32>
    %12 = arith.mulf %11, %5 : vector<1x2xf32>
    %13 = arith.addf %9, %12 : vector<1x2xf32>
    %14 = vector.extract_strided_slice %2 {offsets = [0, 0], sizes = [1, 2], strides = [1, 1]} : vector<8x2xf32> to vector<1x2xf32>
    %15 = arith.addf %14, %3 : vector<1x2xf32>
    %16 = arith.addf %15, %13 : vector<1x2xf32>
    %17 = math.tanh %16 : vector<1x2xf32>
    %18 = vector.extract_strided_slice %17 {offsets = [0, 0], sizes = [1, 1], strides = [1, 1]} : vector<1x2xf32> to vector<1x1xf32>
    %19 = vector.broadcast %18 : vector<1x1xf32> to vector<1x2xf32>
    %20 = arith.mulf %19, %4 : vector<1x2xf32>
    %21 = vector.extract_strided_slice %17 {offsets = [0, 1], sizes = [1, 1], strides = [1, 1]} : vector<1x2xf32> to vector<1x1xf32>
    %22 = vector.broadcast %21 : vector<1x1xf32> to vector<1x2xf32>
    %23 = arith.mulf %22, %5 : vector<1x2xf32>
    %24 = arith.addf %20, %23 : vector<1x2xf32>
    %25 = vector.extract_strided_slice %2 {offsets = [1, 0], sizes = [1, 2], strides = [1, 1]} : vector<8x2xf32> to vector<1x2xf32>
    %26 = arith.addf %25, %3 : vector<1x2xf32>
    %27 = arith.addf %26, %24 : vector<1x2xf32>
    %28 = math.tanh %27 : vector<1x2xf32>
    %29 = vector.extract_strided_slice %28 {offsets = [0, 0], sizes = [1, 1], strides = [1, 1]} : vector<1x2xf32> to vector<1x1xf32>
    %30 = vector.broadcast %29 : vector<1x1xf32> to vector<1x2xf32>
    %31 = arith.mulf %30, %4 : vector<1x2xf32>
    %32 = vector.extract_strided_slice %28 {offsets = [0, 1], sizes = [1, 1], strides = [1, 1]} : vector<1x2xf32> to vector<1x1xf32>
    %33 = vector.broadcast %32 : vector<1x1xf32> to vector<1x2xf32>
    %34 = arith.mulf %33, %5 : vector<1x2xf32>
    %35 = arith.addf %31, %34 : vector<1x2xf32>
    %36 = vector.extract_strided_slice %2 {offsets = [2, 0], sizes = [1, 2], strides = [1, 1]} : vector<8x2xf32> to vector<1x2xf32>
    %37 = arith.addf %36, %3 : vector<1x2xf32>
    %38 = arith.addf %37, %35 : vector<1x2xf32>
    %39 = math.tanh %38 : vector<1x2xf32>
    %40 = vector.extract_strided_slice %39 {offsets = [0, 0], sizes = [1, 1], strides = [1, 1]} : vector<1x2xf32> to vector<1x1xf32>
    %41 = vector.broadcast %40 : vector<1x1xf32> to vector<1x2xf32>
    %42 = arith.mulf %41, %4 : vector<1x2xf32>
    %43 = vector.extract_strided_slice %39 {offsets = [0, 1], sizes = [1, 1], strides = [1, 1]} : vector<1x2xf32> to vector<1x1xf32>
    %44 = vector.broadcast %43 : vector<1x1xf32> to vector<1x2xf32>
    %45 = arith.mulf %44, %5 : vector<1x2xf32>
    %46 = arith.addf %42, %45 : vector<1x2xf32>
    %47 = vector.extract_strided_slice %2 {offsets = [3, 0], sizes = [1, 2], strides = [1, 1]} : vector<8x2xf32> to vector<1x2xf32>
    %48 = arith.addf %47, %3 : vector<1x2xf32>
    %49 = arith.addf %48, %46 : vector<1x2xf32>
    %50 = math.tanh %49 : vector<1x2xf32>
    %51 = vector.extract_strided_slice %50 {offsets = [0, 0], sizes = [1, 1], strides = [1, 1]} : vector<1x2xf32> to vector<1x1xf32>
    %52 = vector.broadcast %51 : vector<1x1xf32> to vector<1x2xf32>
    %53 = arith.mulf %52, %4 : vector<1x2xf32>
    %54 = vector.extract_strided_slice %50 {offsets = [0, 1], sizes = [1, 1], strides = [1, 1]} : vector<1x2xf32> to vector<1x1xf32>
    %55 = vector.broadcast %54 : vector<1x1xf32> to vector<1x2xf32>
    %56 = arith.mulf %55, %5 : vector<1x2xf32>
    %57 = arith.addf %53, %56 : vector<1x2xf32>
    %58 = vector.extract_strided_slice %2 {offsets = [4, 0], sizes = [1, 2], strides = [1, 1]} : vector<8x2xf32> to vector<1x2xf32>
    %59 = arith.addf %58, %3 : vector<1x2xf32>
    %60 = arith.addf %59, %57 : vector<1x2xf32>
    %61 = math.tanh %60 : vector<1x2xf32>
    %62 = vector.extract_strided_slice %61 {offsets = [0, 0], sizes = [1, 1], strides = [1, 1]} : vector<1x2xf32> to vector<1x1xf32>
    %63 = vector.broadcast %62 : vector<1x1xf32> to vector<1x2xf32>
    %64 = arith.mulf %63, %4 : vector<1x2xf32>
    %65 = vector.extract_strided_slice %61 {offsets = [0, 1], sizes = [1, 1], strides = [1, 1]} : vector<1x2xf32> to vector<1x1xf32>
    %66 = vector.broadcast %65 : vector<1x1xf32> to vector<1x2xf32>
    %67 = arith.mulf %66, %5 : vector<1x2xf32>
    %68 = arith.addf %64, %67 : vector<1x2xf32>
    %69 = vector.extract_strided_slice %2 {offsets = [5, 0], sizes = [1, 2], strides = [1, 1]} : vector<8x2xf32> to vector<1x2xf32>
    %70 = arith.addf %69, %3 : vector<1x2xf32>
    %71 = arith.addf %70, %68 : vector<1x2xf32>
    %72 = math.tanh %71 : vector<1x2xf32>
    %73 = vector.extract_strided_slice %72 {offsets = [0, 0], sizes = [1, 1], strides = [1, 1]} : vector<1x2xf32> to vector<1x1xf32>
    %74 = vector.broadcast %73 : vector<1x1xf32> to vector<1x2xf32>
    %75 = arith.mulf %74, %4 : vector<1x2xf32>
    %76 = vector.extract_strided_slice %72 {offsets = [0, 1], sizes = [1, 1], strides = [1, 1]} : vector<1x2xf32> to vector<1x1xf32>
    %77 = vector.broadcast %76 : vector<1x1xf32> to vector<1x2xf32>
    %78 = arith.mulf %77, %5 : vector<1x2xf32>
    %79 = arith.addf %75, %78 : vector<1x2xf32>
    %80 = vector.extract_strided_slice %2 {offsets = [6, 0], sizes = [1, 2], strides = [1, 1]} : vector<8x2xf32> to vector<1x2xf32>
    %81 = arith.addf %80, %3 : vector<1x2xf32>
    %82 = arith.addf %81, %79 : vector<1x2xf32>
    %83 = math.tanh %82 : vector<1x2xf32>
    %84 = vector.extract_strided_slice %83 {offsets = [0, 0], sizes = [1, 1], strides = [1, 1]} : vector<1x2xf32> to vector<1x1xf32>
    %85 = vector.broadcast %84 : vector<1x1xf32> to vector<1x2xf32>
    %86 = arith.mulf %85, %4 : vector<1x2xf32>
    %87 = vector.extract_strided_slice %83 {offsets = [0, 1], sizes = [1, 1], strides = [1, 1]} : vector<1x2xf32> to vector<1x1xf32>
    %88 = vector.broadcast %87 : vector<1x1xf32> to vector<1x2xf32>
    %89 = arith.mulf %88, %5 : vector<1x2xf32>
    %90 = arith.addf %86, %89 : vector<1x2xf32>
    %91 = vector.extract_strided_slice %2 {offsets = [7, 0], sizes = [1, 2], strides = [1, 1]} : vector<8x2xf32> to vector<1x2xf32>
    %92 = arith.addf %91, %3 : vector<1x2xf32>
    %93 = arith.addf %92, %90 : vector<1x2xf32>
    %94 = math.tanh %93 : vector<1x2xf32>
    %c0_9 = arith.constant 0 : index
    %c0_10 = arith.constant 0 : index
    %95 = vector.load %arg4[%c0_9, %c0_10] : memref<2x896xf32, #tpu.memory_space<vmem>>, vector<1x896xf32>
    %c1_11 = arith.constant 1 : index
    %c0_12 = arith.constant 0 : index
    %96 = vector.load %arg4[%c1_11, %c0_12] : memref<2x896xf32, #tpu.memory_space<vmem>>, vector<1x896xf32>
    %c0_13 = arith.constant 0 : index
    %c0_14 = arith.constant 0 : index
    %97 = vector.load %arg5[%c0_13, %c0_14] : memref<1x896xf32, #tpu.memory_space<vmem>>, vector<1x896xf32>
    %98 = vector.extract_strided_slice %28 {offsets = [0, 0], sizes = [1, 1], strides = [1, 1]} : vector<1x2xf32> to vector<1x1xf32>
    %99 = vector.broadcast %98 : vector<1x1xf32> to vector<1x896xf32>
    %100 = arith.mulf %99, %95 : vector<1x896xf32>
    %101 = vector.extract_strided_slice %28 {offsets = [0, 1], sizes = [1, 1], strides = [1, 1]} : vector<1x2xf32> to vector<1x1xf32>
    %102 = vector.broadcast %101 : vector<1x1xf32> to vector<1x896xf32>
    %103 = arith.mulf %102, %96 : vector<1x896xf32>
    %104 = arith.addf %100, %103 : vector<1x896xf32>
    %105 = arith.addf %104, %97 : vector<1x896xf32>
    %106 = vector.extract_strided_slice %50 {offsets = [0, 0], sizes = [1, 1], strides = [1, 1]} : vector<1x2xf32> to vector<1x1xf32>
    %107 = vector.broadcast %106 : vector<1x1xf32> to vector<1x896xf32>
    %108 = arith.mulf %107, %95 : vector<1x896xf32>
    %109 = vector.extract_strided_slice %50 {offsets = [0, 1], sizes = [1, 1], strides = [1, 1]} : vector<1x2xf32> to vector<1x1xf32>
    %110 = vector.broadcast %109 : vector<1x1xf32> to vector<1x896xf32>
    %111 = arith.mulf %110, %96 : vector<1x896xf32>
    %112 = arith.addf %108, %111 : vector<1x896xf32>
    %113 = arith.addf %112, %97 : vector<1x896xf32>
    %114 = vector.extract_strided_slice %72 {offsets = [0, 0], sizes = [1, 1], strides = [1, 1]} : vector<1x2xf32> to vector<1x1xf32>
    %115 = vector.broadcast %114 : vector<1x1xf32> to vector<1x896xf32>
    %116 = arith.mulf %115, %95 : vector<1x896xf32>
    %117 = vector.extract_strided_slice %72 {offsets = [0, 1], sizes = [1, 1], strides = [1, 1]} : vector<1x2xf32> to vector<1x1xf32>
    %118 = vector.broadcast %117 : vector<1x1xf32> to vector<1x896xf32>
    %119 = arith.mulf %118, %96 : vector<1x896xf32>
    %120 = arith.addf %116, %119 : vector<1x896xf32>
    %121 = arith.addf %120, %97 : vector<1x896xf32>
    %122 = vector.extract_strided_slice %94 {offsets = [0, 0], sizes = [1, 1], strides = [1, 1]} : vector<1x2xf32> to vector<1x1xf32>
    %123 = vector.broadcast %122 : vector<1x1xf32> to vector<1x896xf32>
    %124 = arith.mulf %123, %95 : vector<1x896xf32>
    %125 = vector.extract_strided_slice %94 {offsets = [0, 1], sizes = [1, 1], strides = [1, 1]} : vector<1x2xf32> to vector<1x1xf32>
    %126 = vector.broadcast %125 : vector<1x1xf32> to vector<1x896xf32>
    %127 = arith.mulf %126, %96 : vector<1x896xf32>
    %128 = arith.addf %124, %127 : vector<1x896xf32>
    %129 = arith.addf %128, %97 : vector<1x896xf32>
    tpu.wait_dma2 semaphore(%arg9 : memref<!tpu.dma_semaphore, #tpu.memory_space<semaphore_mem>>) src(%arg6 : memref<896x896xf32, #tpu.memory_space<any>>) dst(%arg8 : memref<896x896xf32, #tpu.memory_space<vmem>>)
    %130 = math.tanh %105 : vector<1x896xf32>
    %c0_15 = arith.constant 0 : index
    %c0_16 = arith.constant 0 : index
    %131 = vector.load %arg7[%c0_15, %c0_16] : memref<4x896xf32, #tpu.memory_space<vmem>>, vector<1x896xf32>
    tpu.vector_store %arg7[%c0_15, %c0_16], %130 {strides = array<i32>} : memref<4x896xf32, #tpu.memory_space<vmem>>, vector<1x896xf32>,
    %c0_17 = arith.constant 0 : index
    %c0_18 = arith.constant 0 : index
    %132 = vector.load %arg8[%c0_17, %c0_18] : memref<896x896xf32, #tpu.memory_space<vmem>>, vector<896x896xf32>
    %cst_19 = arith.constant dense<0.000000e+00> : vector<1x896xf32>
    %133 = tpu.matmul %130, %132, %cst_19 {dimension_numbers = #tpu.dot_dimension_numbers<[1], [0], [0], [1], [0, 0, 1, 1], [], []>} : vector<1x896xf32>, vector<896x896xf32>, vector<1x896xf32> -> vector<1x896xf32>
    %134 = arith.addf %113, %133 : vector<1x896xf32>
    %135 = math.tanh %134 : vector<1x896xf32>
    %c1_20 = arith.constant 1 : index
    %c0_21 = arith.constant 0 : index
    %136 = vector.load %arg7[%c1_20, %c0_21] : memref<4x896xf32, #tpu.memory_space<vmem>>, vector<1x896xf32>
    tpu.vector_store %arg7[%c1_20, %c0_21], %135 {strides = array<i32>} : memref<4x896xf32, #tpu.memory_space<vmem>>, vector<1x896xf32>,
    %c0_22 = arith.constant 0 : index
    %c0_23 = arith.constant 0 : index
    %137 = vector.load %arg8[%c0_22, %c0_23] : memref<896x896xf32, #tpu.memory_space<vmem>>, vector<896x896xf32>
    %cst_24 = arith.constant dense<0.000000e+00> : vector<1x896xf32>
    %138 = tpu.matmul %135, %137, %cst_24 {dimension_numbers = #tpu.dot_dimension_numbers<[1], [0], [0], [1], [0, 0, 1, 1], [], []>} : vector<1x896xf32>, vector<896x896xf32>, vector<1x896xf32> -> vector<1x896xf32>
    %139 = arith.addf %121, %138 : vector<1x896xf32>
    %140 = math.tanh %139 : vector<1x896xf32>
    %c2 = arith.constant 2 : index
    %c0_25 = arith.constant 0 : index
    %141 = vector.load %arg7[%c2, %c0_25] : memref<4x896xf32, #tpu.memory_space<vmem>>, vector<1x896xf32>
    tpu.vector_store %arg7[%c2, %c0_25], %140 {strides = array<i32>} : memref<4x896xf32, #tpu.memory_space<vmem>>, vector<1x896xf32>,
    %c0_26 = arith.constant 0 : index
    %c0_27 = arith.constant 0 : index
    %142 = vector.load %arg8[%c0_26, %c0_27] : memref<896x896xf32, #tpu.memory_space<vmem>>, vector<896x896xf32>
    %cst_28 = arith.constant dense<0.000000e+00> : vector<1x896xf32>
    %143 = tpu.matmul %140, %142, %cst_28 {dimension_numbers = #tpu.dot_dimension_numbers<[1], [0], [0], [1], [0, 0, 1, 1], [], []>} : vector<1x896xf32>, vector<896x896xf32>, vector<1x896xf32> -> vector<1x896xf32>
    %144 = arith.addf %129, %143 : vector<1x896xf32>
    %145 = math.tanh %144 : vector<1x896xf32>
    %c3 = arith.constant 3 : index
    %c0_29 = arith.constant 0 : index
    %146 = vector.load %arg7[%c3, %c0_29] : memref<4x896xf32, #tpu.memory_space<vmem>>, vector<1x896xf32>
    tpu.vector_store %arg7[%c3, %c0_29], %145 {strides = array<i32>} : memref<4x896xf32, #tpu.memory_space<vmem>>, vector<1x896xf32>,
    return
  }
}

</mosaic_0001>

<bundles_post_ra>
// kernel: autoencoder_forward.1
= control target key start
LH: loop header
LB: loop body
LE: loop exit
PB: predicated region body
PF: predicated region fallthrough
CT: control target
= control target key end

     0   :  { %s14998_s0 = inlined_call_operand.vmem [shape: f32[8,784], index: 0, kind: input, shape index: {}]   ;;  %s14999_s1 = inlined_call_operand.vmem [shape: f32[784,2], index: 1, kind: input, shape index: {}]   ;;  %s15000_s2 = inlined_call_operand.vmem [shape: f32[2,2], index: 2, kind: input, shape index: {}]   ;;  %s15001_s3 = inlined_call_operand.vmem [shape: f32[1,2], index: 3, kind: input, shape index: {}]   ;;  %s15002_s4 = inlined_call_operand.vmem [shape: f32[2,896], index: 4, kind: input, shape index: {}]   ;;  %s15003_s5 = inlined_call_operand.vmem [shape: f32[1,896], index: 5, kind: input, shape index: {}]   ;;  %s15004_s6 = inlined_call_operand.vmem [shape: f32[896,896], index: 6, kind: input, shape index: {}]   ;;  %s15005_s7 = inlined_call_operand.vmem [shape: f32[4,896], index: 7, kind: output, shape index: {}]  }
   0x1   :  { %v7869_v0 = vld [vmem:[%s15004_s6] sm:$0xff]  ;;  %v7874_v1 = vld [vmem:[%s15004_s6 + $0x8] sm:$0xff]  ;;  %v7879_v2 = vld [vmem:[%s15004_s6 + $0x10] sm:$0xff] }
   0x2   :  { %15835 = vst [vmem:[#allocation6_spill] sm:$0xff] %v7869_v0  ;;  %v7884_v3 = vld [vmem:[%s15004_s6 + $0x18] sm:$0xff]  ;;  %v7889_v4 = vld [vmem:[%s15004_s6 + $0x20] sm:$0xff]  ;;  %v7894_v5 = vld [vmem:[%s15004_s6 + $0x28] sm:$0xff] }
   0x3   :  { %15836 = vst [vmem:[#allocation7_spill] sm:$0xff] %v7874_v1  ;;  %v7899_v6 = vld [vmem:[%s15004_s6 + $0x30] sm:$0xff]  ;;  %v7904_v7 = vld [vmem:[%s15004_s6 + $0x38] sm:$0xff]  ;;  %v7909_v8 = vld [vmem:[%s15004_s6 + $0x40] sm:$0xff] }
   0x4   :  { %15837 = vst [vmem:[#allocation8_spill] sm:$0xff] %v7879_v2  ;;  %v7914_v9 = vld [vmem:[%s15004_s6 + $0x48] sm:$0xff]  ;;  %v7919_v10 = vld [vmem:[%s15004_s6 + $0x50] sm:$0xff]  ;;  %v7924_v11 = vld [vmem:[%s15004_s6 + $0x58] sm:$0xff] }
   0x5   :  { %15838 = vst [vmem:[#allocation9_spill] sm:$0xff] %v7884_v3  ;;  %v7929_v12 = vld [vmem:[%s15004_s6 + $0x60] sm:$0xff]  ;;  %v7934_v13 = vld [vmem:[%s15004_s6 + $0x68] sm:$0xff]  ;;  %v7939_v14 = vld [vmem:[%s15004_s6 + $0x70] sm:$0xff] }
   0x6   :  { %15839 = vst [vmem:[#allocation10_spill] sm:$0xff] %v7889_v4  ;;  %v7944_v15 = vld [vmem:[%s15004_s6 + $0x78] sm:$0xff]  ;;  %v7949_v16 = vld [vmem:[%s15004_s6 + $0x80] sm:$0xff]  ;;  %v7954_v17 = vld [vmem:[%s15004_s6 + $0x88] sm:$0xff] }
   0x7   :  { %15840 = vst [vmem:[#allocation11_spill] sm:$0xff] %v7894_v5  ;;  %v7959_v18 = vld [vmem:[%s15004_s6 + $0x90] sm:$0xff]  ;;  %v7964_v19 = vld [vmem:[%s15004_s6 + $0x98] sm:$0xff]  ;;  %v7969_v20 = vld [vmem:[%s15004_s6 + $0xa0] sm:$0xff] }
   0x8   :  { %15841 = vst [vmem:[#allocation12_spill] sm:$0xff] %v7899_v6  ;;  %v7974_v21 = vld [vmem:[%s15004_s6 + $0xa8] sm:$0xff]  ;;  %v7979_v22 = vld [vmem:[%s15004_s6 + $0xb0] sm:$0xff]  ;;  %v7984_v23 = vld [vmem:[%s15004_s6 + $0xb8] sm:$0xff] }
   0x9   :  { %15842 = vst [vmem:[#allocation13_spill] sm:$0xff] %v7904_v7  ;;  %v7989_v24 = vld [vmem:[%s15004_s6 + $0xc0] sm:$0xff]  ;;  %v7994_v25 = vld [vmem:[%s15004_s6 + $0xc8] sm:$0xff]  ;;  %v7999_v26 = vld [vmem:[%s15004_s6 + $0xd0] sm:$0xff] }
   0xa   :  { %15843 = vst [vmem:[#allocation14_spill] sm:$0xff] %v7909_v8  ;;  %v8004_v27 = vld [vmem:[%s15004_s6 + $0xd8] sm:$0xff]  ;;  %v8009_v28 = vld [vmem:[%s15004_s6 + $0xe0] sm:$0xff]  ;;  %v8014_v29 = vld [vmem:[%s15004_s6 + $0xe8] sm:$0xff] }
   0xb   :  { %15844 = vst [vmem:[#allocation15_spill] sm:$0xff] %v7914_v9  ;;  %v8019_v30 = vld [vmem:[%s15004_s6 + $0xf0] sm:$0xff]  ;;  %v8024_v31 = vld [vmem:[%s15004_s6 + $0xf8] sm:$0xff]  ;;  %v8029_v32 = vld [vmem:[%s15004_s6 + $0x100] sm:$0xff] }
   0xc   :  { %15845 = vst [vmem:[#allocation16_spill] sm:$0xff] %v7919_v10  ;;  %v8034_v33 = vld [vmem:[%s15004_s6 + $0x108] sm:$0xff]  ;;  %v8039_v34 = vld [vmem:[%s15004_s6 + $0x110] sm:$0xff]  ;;  %v8044_v35 = vld [vmem:[%s15004_s6 + $0x118] sm:$0xff] }
   0xd   :  { %15846 = vst [vmem:[#allocation17_spill] sm:$0xff] %v7924_v11  ;;  %v8049_v36 = vld [vmem:[%s15004_s6 + $0x120] sm:$0xff]  ;;  %v8054_v37 = vld [vmem:[%s15004_s6 + $0x128] sm:$0xff]  ;;  %v8059_v38 = vld [vmem:[%s15004_s6 + $0x130] sm:$0xff] }
   0xe   :  { %15847 = vst [vmem:[#allocation18_spill] sm:$0xff] %v7929_v12  ;;  %v8064_v39 = vld [vmem:[%s15004_s6 + $0x138] sm:$0xff]  ;;  %v8069_v40 = vld [vmem:[%s15004_s6 + $0x140] sm:$0xff]  ;;  %v8074_v41 = vld [vmem:[%s15004_s6 + $0x148] sm:$0xff] }
   0xf   :  { %15848 = vst [vmem:[#allocation19_spill] sm:$0xff] %v7934_v13  ;;  %v8079_v42 = vld [vmem:[%s15004_s6 + $0x150] sm:$0xff]  ;;  %v8084_v43 = vld [vmem:[%s15004_s6 + $0x158] sm:$0xff]  ;;  %v8089_v44 = vld [vmem:[%s15004_s6 + $0x160] sm:$0xff] }
  0x10   :  { %15849 = vst [vmem:[#allocation20_spill] sm:$0xff] %v7939_v14  ;;  %v8094_v45 = vld [vmem:[%s15004_s6 + $0x168] sm:$0xff]  ;;  %v8099_v46 = vld [vmem:[%s15004_s6 + $0x170] sm:$0xff]  ;;  %v8104_v47 = vld [vmem:[%s15004_s6 + $0x178] sm:$0xff] }
  0x11   :  { %15850 = vst [vmem:[#allocation21_spill] sm:$0xff] %v7944_v15  ;;  %v8109_v48 = vld [vmem:[%s15004_s6 + $0x180] sm:$0xff]  ;;  %v8114_v49 = vld [vmem:[%s15004_s6 + $0x188] sm:$0xff]  ;;  %v8119_v50 = vld [vmem:[%s15004_s6 + $0x190] sm:$0xff] }
  0x12   :  { %15851 = vst [vmem:[#allocation22_spill] sm:$0xff] %v7949_v16  ;;  %v8124_v51 = vld [vmem:[%s15004_s6 + $0x198] sm:$0xff]  ;;  %v8129_v52 = vld [vmem:[%s15004_s6 + $0x1a0] sm:$0xff]  ;;  %v8134_v53 = vld [vmem:[%s15004_s6 + $0x1a8] sm:$0xff] }
  0x13   :  { %15852 = vst [vmem:[#allocation23_spill] sm:$0xff] %v7954_v17  ;;  %v8139_v54 = vld [vmem:[%s15004_s6 + $0x1b0] sm:$0xff]  ;;  %v8144_v55 = vld [vmem:[%s15004_s6 + $0x1b8] sm:$0xff]  ;;  %v8149_v56 = vld [vmem:[%s15004_s6 + $0x1c0] sm:$0xff] }
  0x14   :  { %15853 = vst [vmem:[#allocation24_spill] sm:$0xff] %v7959_v18  ;;  %v8154_v57 = vld [vmem:[%s15004_s6 + $0x1c8] sm:$0xff]  ;;  %v8159_v58 = vld [vmem:[%s15004_s6 + $0x1d0] sm:$0xff]  ;;  %v8164_v59 = vld [vmem:[%s15004_s6 + $0x1d8] sm:$0xff] }
  0x15   :  { %15854 = vst [vmem:[#allocation25_spill] sm:$0xff] %v7964_v19  ;;  %v8169_v60 = vld [vmem:[%s15004_s6 + $0x1e0] sm:$0xff]  ;;  %v8174_v61 = vld [vmem:[%s15004_s6 + $0x1e8] sm:$0xff]  ;;  %v8179_v62 = vld [vmem:[%s15004_s6 + $0x1f0] sm:$0xff] }
  0x16   :  { %15855 = vst [vmem:[#allocation26_spill] sm:$0xff] %v7969_v20  ;;  %v8184_v63 = vld [vmem:[%s15004_s6 + $0x1f8] sm:$0xff]  ;;  %v8189_v6 = vld [vmem:[%s15004_s6 + $0x200] sm:$0xff]  ;;  %v8194_v13 = vld [vmem:[%s15004_s6 + $0x208] sm:$0xff] }
  0x17   :  { %15856 = vst [vmem:[#allocation27_spill] sm:$0xff] %v7974_v21  ;;  %v8199_v20 = vld [vmem:[%s15004_s6 + $0x210] sm:$0xff]  ;;  %v8234_v5 = vld [vmem:[%s15004_s6 + $0x248] sm:$0xff]  ;;  %v8244_v12 = vld [vmem:[%s15004_s6 + $0x258] sm:$0xff] }
  0x18   :  { %15857 = vst [vmem:[#allocation28_spill] sm:$0xff] %v7979_v22  ;;  %v8249_v19 = vld [vmem:[%s15004_s6 + $0x260] sm:$0xff]  ;;  %v8299_v4 = vld [vmem:[%s15004_s6 + $0x2b0] sm:$0xff]  ;;  %v8314_v11 = vld [vmem:[%s15004_s6 + $0x2c8] sm:$0xff] }
  0x19   :  { %15858 = vst [vmem:[#allocation29_spill] sm:$0xff] %v7984_v23  ;;  %v8319_v18 = vld [vmem:[%s15004_s6 + $0x2d0] sm:$0xff]  ;;  %v8424_v17 = vld [vmem:[%s15004_s6 + $0x378] sm:$0xff]  ;;  %v8594_v2 = vld [vmem:[%s15004_s6 + $0x488] sm:$0xff] }
  0x1a   :  { %15859 = vst [vmem:[#allocation30_spill] sm:$0xff] %v7989_v24  ;;  %v8399_v3 = vld [vmem:[%s15004_s6 + $0x350] sm:$0xff]  ;;  %v8429_v24 = vld [vmem:[%s15004_s6 + $0x380] sm:$0xff]  ;;  %v8604_v9 = vld [vmem:[%s15004_s6 + $0x498] sm:$0xff] }
  0x1b   :  { %15860 = vst [vmem:[#allocation31_spill] sm:$0xff] %v7994_v25  ;;  %v8324_v25 = vld [vmem:[%s15004_s6 + $0x2d8] sm:$0xff]  ;;  %v8419_v10 = vld [vmem:[%s15004_s6 + $0x370] sm:$0xff]  ;;  %v8634_v16 = vld [vmem:[%s15004_s6 + $0x4c8] sm:$0xff] }
  0x1c   :  { %15861 = vst [vmem:[#allocation32_spill] sm:$0xff] %v7999_v26  ;;  %v8254_v26 = vld [vmem:[%s15004_s6 + $0x268] sm:$0xff]  ;;  %v8664_v23 = vld [vmem:[%s15004_s6 + $0x4f8] sm:$0xff]  ;;  %v9399_v1 = vld [vmem:[%s15004_s6 + $0x990] sm:$0xff] }
  0x1d   :  { %15862 = vst [vmem:[#allocation33_spill] sm:$0xff] %v8004_v27  ;;  %v8204_v27 = vld [vmem:[%s15004_s6 + $0x218] sm:$0xff]  ;;  %v9434_v8 = vld [vmem:[%s15004_s6 + $0x9c8] sm:$0xff]  ;;  %v9469_v15 = vld [vmem:[%s15004_s6 + $0xa00] sm:$0xff] }
  0x1e   :  { %15863 = vst [vmem:[#allocation34_spill] sm:$0xff] %v8009_v28  ;;  %v9504_v22 = vld [vmem:[%s15004_s6 + $0xa38] sm:$0xff] }
  0x1f   :  { %15864 = vst [vmem:[#allocation35_spill] sm:$0xff] %v8014_v29  ;;  %v9539_v29 = vld [vmem:[%s15004_s6 + $0xa70] sm:$0xff]  ;;  %v10064_v0 = vld [vmem:[%s15004_s6 + $0xdb8] sm:$0xff] }
  0x20   :  { %15865 = vst [vmem:[#allocation36_spill] sm:$0xff] %v8019_v30  ;;  %v8674_v30 = vld [vmem:[%s15004_s6 + $0x508] sm:$0xff] }
  0x21   :  { %15866 = vst [vmem:[#allocation37_spill] sm:$0xff] %v8024_v31  ;;  %v8434_v31 = vld [vmem:[%s15004_s6 + $0x388] sm:$0xff] }
  0x22   :  { %15867 = vst [vmem:[#allocation38_spill] sm:$0xff] %v8029_v32  ;;  %v8329_v32 = vld [vmem:[%s15004_s6 + $0x2e0] sm:$0xff] }
  0x23   :  { %15868 = vst [vmem:[#allocation39_spill] sm:$0xff] %v8034_v33  ;;  %v8259_v33 = vld [vmem:[%s15004_s6 + $0x270] sm:$0xff] }
  0x24   :  { %15869 = vst [vmem:[#allocation40_spill] sm:$0xff] %v8039_v34  ;;  %v8209_v34 = vld [vmem:[%s15004_s6 + $0x220] sm:$0xff] }
  0x25   :  { %15870 = vst [vmem:[#allocation41_spill] sm:$0xff] %v8044_v35 }
  0x26   :  { %15871 = vst [vmem:[#allocation42_spill] sm:$0xff] %v8049_v36  ;;  %v9574_v36 = vld [vmem:[%s15004_s6 + $0xaa8] sm:$0xff] }
  0x27   :  { %15872 = vst [vmem:[#allocation43_spill] sm:$0xff] %v8054_v37  ;;  %v8704_v37 = vld [vmem:[%s15004_s6 + $0x538] sm:$0xff] }
  0x28   :  { %15873 = vst [vmem:[#allocation44_spill] sm:$0xff] %v8059_v38  ;;  %v8454_v38 = vld [vmem:[%s15004_s6 + $0x3a8] sm:$0xff] }
  0x29   :  { %15874 = vst [vmem:[#allocation45_spill] sm:$0xff] %v8064_v39  ;;  %v8334_v39 = vld [vmem:[%s15004_s6 + $0x2e8] sm:$0xff] }
  0x2a   :  { %15875 = vst [vmem:[#allocation46_spill] sm:$0xff] %v8069_v40  ;;  %v8264_v40 = vld [vmem:[%s15004_s6 + $0x278] sm:$0xff] }
  0x2b   :  { %15876 = vst [vmem:[#allocation47_spill] sm:$0xff] %v8074_v41  ;;  %v8214_v41 = vld [vmem:[%s15004_s6 + $0x228] sm:$0xff] }
  0x2c   :  { %15877 = vst [vmem:[#allocation48_spill] sm:$0xff] %v8079_v42 }
  0x2d   :  { %15878 = vst [vmem:[#allocation49_spill] sm:$0xff] %v8084_v43  ;;  %v9609_v43 = vld [vmem:[%s15004_s6 + $0xae0] sm:$0xff] }
  0x2e   :  { %15879 = vst [vmem:[#allocation50_spill] sm:$0xff] %v8089_v44  ;;  %v8734_v44 = vld [vmem:[%s15004_s6 + $0x568] sm:$0xff] }
  0x2f   :  { %15880 = vst [vmem:[#allocation51_spill] sm:$0xff] %v8094_v45  ;;  %v8459_v45 = vld [vmem:[%s15004_s6 + $0x3b0] sm:$0xff] }
  0x30   :  { %15881 = vst [vmem:[#allocation52_spill] sm:$0xff] %v8099_v46  ;;  %v8349_v46 = vld [vmem:[%s15004_s6 + $0x300] sm:$0xff] }
  0x31   :  { %15882 = vst [vmem:[#allocation53_spill] sm:$0xff] %v8104_v47  ;;  %v8269_v47 = vld [vmem:[%s15004_s6 + $0x280] sm:$0xff] }
  0x32   :  { %15883 = vst [vmem:[#allocation54_spill] sm:$0xff] %v8109_v48  ;;  %v8219_v48 = vld [vmem:[%s15004_s6 + $0x230] sm:$0xff] }
  0x33   :  { %15884 = vst [vmem:[#allocation55_spill] sm:$0xff] %v8114_v49 }
  0x34   :  { %15885 = vst [vmem:[#allocation56_spill] sm:$0xff] %v8119_v50  ;;  %v9644_v50 = vld [vmem:[%s15004_s6 + $0xb18] sm:$0xff] }
  0x35   :  { %15886 = vst [vmem:[#allocation57_spill] sm:$0xff] %v8124_v51  ;;  %v8744_v51 = vld [vmem:[%s15004_s6 + $0x578] sm:$0xff] }
  0x36   :  { %15887 = vst [vmem:[#allocation58_spill] sm:$0xff] %v8129_v52  ;;  %v8464_v52 = vld [vmem:[%s15004_s6 + $0x3b8] sm:$0xff] }
  0x37   :  { %15888 = vst [vmem:[#allocation59_spill] sm:$0xff] %v8134_v53  ;;  %v8354_v53 = vld [vmem:[%s15004_s6 + $0x308] sm:$0xff] }
  0x38   :  { %15889 = vst [vmem:[#allocation60_spill] sm:$0xff] %v8139_v54  ;;  %v8279_v54 = vld [vmem:[%s15004_s6 + $0x290] sm:$0xff] }
  0x39   :  { %15890 = vst [vmem:[#allocation61_spill] sm:$0xff] %v8144_v55  ;;  %v8224_v55 = vld [vmem:[%s15004_s6 + $0x238] sm:$0xff] }
  0x3a   :  { %15891 = vst [vmem:[#allocation62_spill] sm:$0xff] %v8149_v56 }
  0x3b   :  { %15892 = vst [vmem:[#allocation63_spill] sm:$0xff] %v8154_v57  ;;  %v9679_v57 = vld [vmem:[%s15004_s6 + $0xb50] sm:$0xff] }
  0x3c   :  { %15893 = vst [vmem:[#allocation64_spill] sm:$0xff] %v8159_v58  ;;  %v8774_v58 = vld [vmem:[%s15004_s6 + $0x5a8] sm:$0xff] }
  0x3d   :  { %15894 = vst [vmem:[#allocation65_spill] sm:$0xff] %v8164_v59  ;;  %v8489_v59 = vld [vmem:[%s15004_s6 + $0x3e0] sm:$0xff] }
  0x3e   :  { %15895 = vst [vmem:[#allocation66_spill] sm:$0xff] %v8169_v60  ;;  %v8359_v60 = vld [vmem:[%s15004_s6 + $0x310] sm:$0xff] }
  0x3f   :  { %15896 = vst [vmem:[#allocation67_spill] sm:$0xff] %v8174_v61  ;;  %v8284_v61 = vld [vmem:[%s15004_s6 + $0x298] sm:$0xff] }
  0x40   :  { %15897 = vst [vmem:[#allocation68_spill] sm:$0xff] %v8179_v62  ;;  %v8229_v62 = vld [vmem:[%s15004_s6 + $0x240] sm:$0xff] }
  0x41   :  { %15898 = vst [vmem:[#allocation69_spill] sm:$0xff] %v8184_v63 }
  0x42   :  { %15899 = vst [vmem:[#allocation70_spill] sm:$0xff] %v8189_v6  ;;  %v9714_v6 = vld [vmem:[%s15004_s6 + $0xb88] sm:$0xff] }
  0x43   :  { %15900 = vst [vmem:[#allocation71_spill] sm:$0xff] %v8194_v13  ;;  %v8804_v13 = vld [vmem:[%s15004_s6 + $0x5d8] sm:$0xff] }
  0x44   :  { %15901 = vst [vmem:[#allocation72_spill] sm:$0xff] %v8199_v20  ;;  %v8494_v20 = vld [vmem:[%s15004_s6 + $0x3e8] sm:$0xff] }
  0x45   :  { %15902 = vst [vmem:[#allocation73_spill] sm:$0xff] %v8204_v27  ;;  %v8364_v27 = vld [vmem:[%s15004_s6 + $0x318] sm:$0xff] }
  0x46   :  { %15903 = vst [vmem:[#allocation74_spill] sm:$0xff] %v8209_v34  ;;  %v8289_v34 = vld [vmem:[%s15004_s6 + $0x2a0] sm:$0xff] }
  0x47   :  { %15904 = vst [vmem:[#allocation75_spill] sm:$0xff] %v8214_v41  ;;  %v8239_v41 = vld [vmem:[%s15004_s6 + $0x250] sm:$0xff] }
  0x48   :  { %15905 = vst [vmem:[#allocation76_spill] sm:$0xff] %v8219_v48 }
  0x49   :  { %15906 = vst [vmem:[#allocation77_spill] sm:$0xff] %v8224_v55  ;;  %v9749_v55 = vld [vmem:[%s15004_s6 + $0xbc0] sm:$0xff] }
  0x4a   :  { %15907 = vst [vmem:[#allocation78_spill] sm:$0xff] %v8229_v62  ;;  %v8809_v62 = vld [vmem:[%s15004_s6 + $0x5e0] sm:$0xff] }
  0x4b   :  { %15908 = vst [vmem:[#allocation79_spill] sm:$0xff] %v8234_v5  ;;  %v8499_v5 = vld [vmem:[%s15004_s6 + $0x3f0] sm:$0xff] }
  0x4c   :  { %15909 = vst [vmem:[#allocation80_spill] sm:$0xff] %v8239_v41  ;;  %v8369_v41 = vld [vmem:[%s15004_s6 + $0x320] sm:$0xff] }
  0x4d   :  { %15910 = vst [vmem:[#allocation81_spill] sm:$0xff] %v8244_v12  ;;  %v8294_v12 = vld [vmem:[%s15004_s6 + $0x2a8] sm:$0xff] }
  0x4e   :  { %15911 = vst [vmem:[#allocation82_spill] sm:$0xff] %v8249_v19  ;;  %v8274_v19 = vld [vmem:[%s15004_s6 + $0x288] sm:$0xff] }
  0x4f   :  { %15912 = vst [vmem:[#allocation83_spill] sm:$0xff] %v8254_v26 }
  0x50   :  { %15913 = vst [vmem:[#allocation84_spill] sm:$0xff] %v8259_v33  ;;  %v9784_v33 = vld [vmem:[%s15004_s6 + $0xbf8] sm:$0xff] }
  0x51   :  { %15914 = vst [vmem:[#allocation85_spill] sm:$0xff] %v8264_v40  ;;  %v8839_v40 = vld [vmem:[%s15004_s6 + $0x610] sm:$0xff] }
  0x52   :  { %15915 = vst [vmem:[#allocation86_spill] sm:$0xff] %v8269_v47  ;;  %v8524_v47 = vld [vmem:[%s15004_s6 + $0x418] sm:$0xff] }
  0x53   :  { %15916 = vst [vmem:[#allocation87_spill] sm:$0xff] %v8274_v19  ;;  %v8384_v19 = vld [vmem:[%s15004_s6 + $0x338] sm:$0xff] }
  0x54   :  { %15917 = vst [vmem:[#allocation88_spill] sm:$0xff] %v8279_v54  ;;  %v8304_v54 = vld [vmem:[%s15004_s6 + $0x2b8] sm:$0xff] }
  0x55   :  { %15918 = vst [vmem:[#allocation89_spill] sm:$0xff] %v8284_v61  ;;  %v8309_v61 = vld [vmem:[%s15004_s6 + $0x2c0] sm:$0xff] }
  0x56   :  { %15919 = vst [vmem:[#allocation90_spill] sm:$0xff] %v8289_v34 }
  0x57   :  { %15920 = vst [vmem:[#allocation91_spill] sm:$0xff] %v8294_v12  ;;  %v9819_v12 = vld [vmem:[%s15004_s6 + $0xc30] sm:$0xff] }
  0x58   :  { %15921 = vst [vmem:[#allocation92_spill] sm:$0xff] %v8299_v4  ;;  %v8844_v4 = vld [vmem:[%s15004_s6 + $0x618] sm:$0xff] }
  0x59   :  { %15922 = vst [vmem:[#allocation93_spill] sm:$0xff] %v8304_v54  ;;  %v8529_v54 = vld [vmem:[%s15004_s6 + $0x420] sm:$0xff] }
  0x5a   :  { %15923 = vst [vmem:[#allocation94_spill] sm:$0xff] %v8309_v61  ;;  %v8389_v61 = vld [vmem:[%s15004_s6 + $0x340] sm:$0xff] }
  0x5b   :  { %15924 = vst [vmem:[#allocation95_spill] sm:$0xff] %v8314_v11  ;;  %v8339_v11 = vld [vmem:[%s15004_s6 + $0x2f0] sm:$0xff] }
  0x5c   :  { %15925 = vst [vmem:[#allocation96_spill] sm:$0xff] %v8319_v18  ;;  %v8344_v18 = vld [vmem:[%s15004_s6 + $0x2f8] sm:$0xff] }
  0x5d   :  { %15926 = vst [vmem:[#allocation97_spill] sm:$0xff] %v8329_v32  ;;  %v9854_v32 = vld [vmem:[%s15004_s6 + $0xc68] sm:$0xff] }
  0x5e   :  { %15927 = vst [vmem:[#allocation98_spill] sm:$0xff] %v8334_v39  ;;  %v8874_v39 = vld [vmem:[%s15004_s6 + $0x648] sm:$0xff] }
  0x5f   :  { %15928 = vst [vmem:[#allocation99_spill] sm:$0xff] %v8339_v11  ;;  %v8534_v11 = vld [vmem:[%s15004_s6 + $0x428] sm:$0xff] }
  0x60   :  { %15929 = vst [vmem:[#allocation100_spill] sm:$0xff] %v8344_v18  ;;  %v8394_v18 = vld [vmem:[%s15004_s6 + $0x348] sm:$0xff] }
  0x61   :  { %15930 = vst [vmem:[#allocation101_spill] sm:$0xff] %v8349_v46  ;;  %v8374_v46 = vld [vmem:[%s15004_s6 + $0x328] sm:$0xff] }
  0x62   :  { %15931 = vst [vmem:[#allocation102_spill] sm:$0xff] %v8354_v53  ;;  %v8379_v53 = vld [vmem:[%s15004_s6 + $0x330] sm:$0xff] }
  0x63   :  { %15932 = vst [vmem:[#allocation103_spill] sm:$0xff] %v8364_v27  ;;  %v9889_v27 = vld [vmem:[%s15004_s6 + $0xca0] sm:$0xff] }
  0x64   :  { %15933 = vst [vmem:[#allocation104_spill] sm:$0xff] %v8369_v41  ;;  %v8879_v41 = vld [vmem:[%s15004_s6 + $0x650] sm:$0xff] }
  0x65   :  { %15934 = vst [vmem:[#allocation105_spill] sm:$0xff] %v8374_v46  ;;  %v8559_v46 = vld [vmem:[%s15004_s6 + $0x450] sm:$0xff] }
  0x66   :  { %15935 = vst [vmem:[#allocation106_spill] sm:$0xff] %v8379_v53  ;;  %v8404_v53 = vld [vmem:[%s15004_s6 + $0x358] sm:$0xff] }
  0x67   :  { %15936 = vst [vmem:[#allocation107_spill] sm:$0xff] %v8384_v19  ;;  %v8409_v19 = vld [vmem:[%s15004_s6 + $0x360] sm:$0xff] }
  0x68   :  { %15937 = vst [vmem:[#allocation108_spill] sm:$0xff] %v8389_v61  ;;  %v8414_v61 = vld [vmem:[%s15004_s6 + $0x368] sm:$0xff] }
  0x69   :  { %15938 = vst [vmem:[#allocation109_spill] sm:$0xff] %v8399_v3  ;;  %v9924_v3 = vld [vmem:[%s15004_s6 + $0xcd8] sm:$0xff] }
  0x6a   :  { %15939 = vst [vmem:[#allocation110_spill] sm:$0xff] %v8404_v53  ;;  %v8909_v53 = vld [vmem:[%s15004_s6 + $0x680] sm:$0xff] }
  0x6b   :  { %15940 = vst [vmem:[#allocation111_spill] sm:$0xff] %v8409_v19  ;;  %v8564_v19 = vld [vmem:[%s15004_s6 + $0x458] sm:$0xff] }
  0x6c   :  { %15941 = vst [vmem:[#allocation112_spill] sm:$0xff] %v8414_v61  ;;  %v8439_v61 = vld [vmem:[%s15004_s6 + $0x390] sm:$0xff] }
  0x6d   :  { %15942 = vst [vmem:[#allocation113_spill] sm:$0xff] %v8419_v10  ;;  %v8444_v10 = vld [vmem:[%s15004_s6 + $0x398] sm:$0xff] }
  0x6e   :  { %15943 = vst [vmem:[#allocation114_spill] sm:$0xff] %v8424_v17  ;;  %v8449_v17 = vld [vmem:[%s15004_s6 + $0x3a0] sm:$0xff] }
  0x6f   :  { %15944 = vst [vmem:[#allocation115_spill] sm:$0xff] %v8429_v24  ;;  %v10029_v24 = vld [vmem:[%s15004_s6 + $0xd80] sm:$0xff] }
  0x70   :  { %15945 = vst [vmem:[#allocation116_spill] sm:$0xff] %v8434_v31  ;;  %v8914_v31 = vld [vmem:[%s15004_s6 + $0x688] sm:$0xff] }
  0x71   :  { %15946 = vst [vmem:[#allocation117_spill] sm:$0xff] %v8439_v61  ;;  %v8569_v61 = vld [vmem:[%s15004_s6 + $0x460] sm:$0xff] }
  0x72   :  { %15947 = vst [vmem:[#allocation118_spill] sm:$0xff] %v8444_v10  ;;  %v8469_v10 = vld [vmem:[%s15004_s6 + $0x3c0] sm:$0xff] }
  0x73   :  { %15948 = vst [vmem:[#allocation119_spill] sm:$0xff] %v8449_v17  ;;  %v8474_v17 = vld [vmem:[%s15004_s6 + $0x3c8] sm:$0xff] }
  0x74   :  { %15949 = vst [vmem:[#allocation120_spill] sm:$0xff] %v8454_v38  ;;  %v8479_v38 = vld [vmem:[%s15004_s6 + $0x3d0] sm:$0xff] }
  0x75   :  { %15950 = vst [vmem:[#allocation121_spill] sm:$0xff] %v8459_v45  ;;  %v8484_v45 = vld [vmem:[%s15004_s6 + $0x3d8] sm:$0xff] }
  0x76   :  { %15951 = vst [vmem:[#allocation122_spill] sm:$0xff] %v8464_v52 }
  0x77   :  { %15952 = vst [vmem:[#allocation123_spill] sm:$0xff] %v8469_v10  ;;  %v8944_v10 = vld [vmem:[%s15004_s6 + $0x6b8] sm:$0xff] }
  0x78   :  { %15953 = vst [vmem:[#allocation124_spill] sm:$0xff] %v8474_v17  ;;  %v8599_v17 = vld [vmem:[%s15004_s6 + $0x490] sm:$0xff] }
  0x79   :  { %15954 = vst [vmem:[#allocation125_spill] sm:$0xff] %v8479_v38  ;;  %v8504_v38 = vld [vmem:[%s15004_s6 + $0x3f8] sm:$0xff] }
  0x7a   :  { %15955 = vst [vmem:[#allocation126_spill] sm:$0xff] %v8484_v45  ;;  %v8509_v45 = vld [vmem:[%s15004_s6 + $0x400] sm:$0xff] }
  0x7b   :  { %15956 = vst [vmem:[#allocation127_spill] sm:$0xff] %v8489_v59  ;;  %v8514_v59 = vld [vmem:[%s15004_s6 + $0x408] sm:$0xff] }
  0x7c   :  { %15957 = vst [vmem:[#allocation128_spill] sm:$0xff] %v8494_v20  ;;  %v8519_v20 = vld [vmem:[%s15004_s6 + $0x410] sm:$0xff] }
  0x7d   :  { %15958 = vst [vmem:[#allocation129_spill] sm:$0xff] %v8499_v5 }
  0x7e   :  { %15959 = vst [vmem:[#allocation130_spill] sm:$0xff] %v8504_v38  ;;  %v8949_v38 = vld [vmem:[%s15004_s6 + $0x6c0] sm:$0xff] }
  0x7f   :  { %15960 = vst [vmem:[#allocation131_spill] sm:$0xff] %v8509_v45  ;;  %v8629_v45 = vld [vmem:[%s15004_s6 + $0x4c0] sm:$0xff] }
  0x80   :  { %15961 = vst [vmem:[#allocation132_spill] sm:$0xff] %v8514_v59  ;;  %v8539_v59 = vld [vmem:[%s15004_s6 + $0x430] sm:$0xff] }
  0x81   :  { %15962 = vst [vmem:[#allocation133_spill] sm:$0xff] %v8519_v20  ;;  %v8544_v20 = vld [vmem:[%s15004_s6 + $0x438] sm:$0xff] }
  0x82   :  { %15963 = vst [vmem:[#allocation134_spill] sm:$0xff] %v8524_v47  ;;  %v8549_v47 = vld [vmem:[%s15004_s6 + $0x440] sm:$0xff] }
  0x83   :  { %15964 = vst [vmem:[#allocation135_spill] sm:$0xff] %v8529_v54  ;;  %v8554_v54 = vld [vmem:[%s15004_s6 + $0x448] sm:$0xff] }
  0x84   :  { %15965 = vst [vmem:[#allocation136_spill] sm:$0xff] %v8534_v11 }
  0x85   :  { %15966 = vst [vmem:[#allocation137_spill] sm:$0xff] %v8539_v59  ;;  %v8979_v59 = vld [vmem:[%s15004_s6 + $0x6f0] sm:$0xff] }
  0x86   :  { %15967 = vst [vmem:[#allocation138_spill] sm:$0xff] %v8544_v20  ;;  %v8639_v20 = vld [vmem:[%s15004_s6 + $0x4d0] sm:$0xff] }
  0x87   :  { %15968 = vst [vmem:[#allocation139_spill] sm:$0xff] %v8549_v47  ;;  %v8574_v47 = vld [vmem:[%s15004_s6 + $0x468] sm:$0xff] }
  0x88   :  { %15969 = vst [vmem:[#allocation140_spill] sm:$0xff] %v8554_v54  ;;  %v8579_v54 = vld [vmem:[%s15004_s6 + $0x470] sm:$0xff] }
  0x89   :  { %15970 = vst [vmem:[#allocation141_spill] sm:$0xff] %v8559_v46  ;;  %v8584_v46 = vld [vmem:[%s15004_s6 + $0x478] sm:$0xff] }
  0x8a   :  { %15971 = vst [vmem:[#allocation142_spill] sm:$0xff] %v8564_v19  ;;  %v8589_v19 = vld [vmem:[%s15004_s6 + $0x480] sm:$0xff] }
  0x8b   :  { %15972 = vst [vmem:[#allocation143_spill] sm:$0xff] %v8569_v61 }
  0x8c   :  { %15973 = vst [vmem:[#allocation144_spill] sm:$0xff] %v8574_v47  ;;  %v8984_v47 = vld [vmem:[%s15004_s6 + $0x6f8] sm:$0xff] }
  0x8d   :  { %15974 = vst [vmem:[#allocation145_spill] sm:$0xff] %v8579_v54  ;;  %v8669_v54 = vld [vmem:[%s15004_s6 + $0x500] sm:$0xff] }
  0x8e   :  { %15975 = vst [vmem:[#allocation146_spill] sm:$0xff] %v8584_v46  ;;  %v8609_v46 = vld [vmem:[%s15004_s6 + $0x4a0] sm:$0xff] }
  0x8f   :  { %15976 = vst [vmem:[#allocation147_spill] sm:$0xff] %v8589_v19  ;;  %v8614_v19 = vld [vmem:[%s15004_s6 + $0x4a8] sm:$0xff] }
  0x90   :  { %15977 = vst [vmem:[#allocation148_spill] sm:$0xff] %v8594_v2  ;;  %v8619_v2 = vld [vmem:[%s15004_s6 + $0x4b0] sm:$0xff] }
  0x91   :  { %15978 = vst [vmem:[#allocation149_spill] sm:$0xff] %v8599_v17  ;;  %v8624_v17 = vld [vmem:[%s15004_s6 + $0x4b8] sm:$0xff] }
  0x92   :  { %15979 = vst [vmem:[#allocation150_spill] sm:$0xff] %v8604_v9 }
  0x93   :  { %15980 = vst [vmem:[#allocation151_spill] sm:$0xff] %v8609_v46  ;;  %v9014_v46 = vld [vmem:[%s15004_s6 + $0x728] sm:$0xff] }
  0x94   :  { %15981 = vst [vmem:[#allocation152_spill] sm:$0xff] %v8614_v19  ;;  %v8699_v19 = vld [vmem:[%s15004_s6 + $0x530] sm:$0xff] }
  0x95   :  { %15982 = vst [vmem:[#allocation153_spill] sm:$0xff] %v8619_v2  ;;  %v8644_v2 = vld [vmem:[%s15004_s6 + $0x4d8] sm:$0xff] }
  0x96   :  { %15983 = vst [vmem:[#allocation154_spill] sm:$0xff] %v8624_v17  ;;  %v8649_v17 = vld [vmem:[%s15004_s6 + $0x4e0] sm:$0xff] }
  0x97   :  { %15984 = vst [vmem:[#allocation155_spill] sm:$0xff] %v8629_v45  ;;  %v8654_v45 = vld [vmem:[%s15004_s6 + $0x4e8] sm:$0xff] }
  0x98   :  { %15985 = vst [vmem:[#allocation156_spill] sm:$0xff] %v8634_v16  ;;  %v8659_v16 = vld [vmem:[%s15004_s6 + $0x4f0] sm:$0xff] }
  0x99   :  { %15986 = vst [vmem:[#allocation157_spill] sm:$0xff] %v8639_v20 }
  0x9a   :  { %15987 = vst [vmem:[#allocation158_spill] sm:$0xff] %v8644_v2  ;;  %v9049_v2 = vld [vmem:[%s15004_s6 + $0x760] sm:$0xff] }
  0x9b   :  { %15988 = vst [vmem:[#allocation159_spill] sm:$0xff] %v8649_v17  ;;  %v8709_v17 = vld [vmem:[%s15004_s6 + $0x540] sm:$0xff] }
  0x9c   :  { %15989 = vst [vmem:[#allocation160_spill] sm:$0xff] %v8654_v45  ;;  %v8679_v45 = vld [vmem:[%s15004_s6 + $0x510] sm:$0xff] }
  0x9d   :  { %15990 = vst [vmem:[#allocation161_spill] sm:$0xff] %v8659_v16  ;;  %v8684_v16 = vld [vmem:[%s15004_s6 + $0x518] sm:$0xff] }
  0x9e   :  { %15991 = vst [vmem:[#allocation162_spill] sm:$0xff] %v8664_v23  ;;  %v8689_v23 = vld [vmem:[%s15004_s6 + $0x520] sm:$0xff] }
  0x9f   :  { %15992 = vst [vmem:[#allocation163_spill] sm:$0xff] %v8669_v54  ;;  %v8694_v54 = vld [vmem:[%s15004_s6 + $0x528] sm:$0xff] }
  0xa0   :  { %15993 = vst [vmem:[#allocation164_spill] sm:$0xff] %v8674_v30 }
  0xa1   :  { %15994 = vst [vmem:[#allocation165_spill] sm:$0xff] %v8679_v45  ;;  %v9084_v45 = vld [vmem:[%s15004_s6 + $0x798] sm:$0xff] }
  0xa2   :  { %15995 = vst [vmem:[#allocation166_spill] sm:$0xff] %v8684_v16  ;;  %v8739_v16 = vld [vmem:[%s15004_s6 + $0x570] sm:$0xff] }
  0xa3   :  { %15996 = vst [vmem:[#allocation167_spill] sm:$0xff] %v8689_v23  ;;  %v8714_v23 = vld [vmem:[%s15004_s6 + $0x548] sm:$0xff] }
  0xa4   :  { %15997 = vst [vmem:[#allocation168_spill] sm:$0xff] %v8694_v54  ;;  %v8719_v54 = vld [vmem:[%s15004_s6 + $0x550] sm:$0xff] }
  0xa5   :  { %15998 = vst [vmem:[#allocation169_spill] sm:$0xff] %v8699_v19  ;;  %v8724_v19 = vld [vmem:[%s15004_s6 + $0x558] sm:$0xff] }
  0xa6   :  { %15999 = vst [vmem:[#allocation170_spill] sm:$0xff] %v8704_v37  ;;  %v8729_v37 = vld [vmem:[%s15004_s6 + $0x560] sm:$0xff] }
  0xa7   :  { %16000 = vst [vmem:[#allocation171_spill] sm:$0xff] %v8709_v17 }
  0xa8   :  { %16001 = vst [vmem:[#allocation172_spill] sm:$0xff] %v8714_v23  ;;  %v9119_v23 = vld [vmem:[%s15004_s6 + $0x7d0] sm:$0xff] }
  0xa9   :  { %16002 = vst [vmem:[#allocation173_spill] sm:$0xff] %v8719_v54  ;;  %v8769_v54 = vld [vmem:[%s15004_s6 + $0x5a0] sm:$0xff] }
  0xaa   :  { %16003 = vst [vmem:[#allocation174_spill] sm:$0xff] %v8724_v19  ;;  %v8749_v19 = vld [vmem:[%s15004_s6 + $0x580] sm:$0xff] }
  0xab   :  { %16004 = vst [vmem:[#allocation175_spill] sm:$0xff] %v8729_v37  ;;  %v8754_v37 = vld [vmem:[%s15004_s6 + $0x588] sm:$0xff] }
  0xac   :  { %16005 = vst [vmem:[#allocation176_spill] sm:$0xff] %v8734_v44  ;;  %v8759_v44 = vld [vmem:[%s15004_s6 + $0x590] sm:$0xff] }
  0xad   :  { %16006 = vst [vmem:[#allocation177_spill] sm:$0xff] %v8739_v16  ;;  %v8764_v16 = vld [vmem:[%s15004_s6 + $0x598] sm:$0xff] }
  0xae   :  { %16007 = vst [vmem:[#allocation178_spill] sm:$0xff] %v8744_v51 }
  0xaf   :  { %16008 = vst [vmem:[#allocation179_spill] sm:$0xff] %v8749_v19  ;;  %v9154_v19 = vld [vmem:[%s15004_s6 + $0x808] sm:$0xff] }
  0xb0   :  { %16009 = vst [vmem:[#allocation180_spill] sm:$0xff] %v8754_v37  ;;  %v8779_v37 = vld [vmem:[%s15004_s6 + $0x5b0] sm:$0xff] }
  0xb1   :  { %16010 = vst [vmem:[#allocation181_spill] sm:$0xff] %v8759_v44  ;;  %v8784_v44 = vld [vmem:[%s15004_s6 + $0x5b8] sm:$0xff] }
  0xb2   :  { %16011 = vst [vmem:[#allocation182_spill] sm:$0xff] %v8764_v16  ;;  %v8789_v16 = vld [vmem:[%s15004_s6 + $0x5c0] sm:$0xff] }
  0xb3   :  { %16012 = vst [vmem:[#allocation183_spill] sm:$0xff] %v8769_v54  ;;  %v8794_v54 = vld [vmem:[%s15004_s6 + $0x5c8] sm:$0xff] }
  0xb4   :  { %16013 = vst [vmem:[#allocation184_spill] sm:$0xff] %v8774_v58  ;;  %v8799_v58 = vld [vmem:[%s15004_s6 + $0x5d0] sm:$0xff] }
  0xb5   :  { %16014 = vst [vmem:[#allocation185_spill] sm:$0xff] %v8779_v37 }
  0xb6   :  { %16015 = vst [vmem:[#allocation186_spill] sm:$0xff] %v8784_v44  ;;  %v9189_v44 = vld [vmem:[%s15004_s6 + $0x840] sm:$0xff] }
  0xb7   :  { %16016 = vst [vmem:[#allocation187_spill] sm:$0xff] %v8789_v16  ;;  %v8814_v16 = vld [vmem:[%s15004_s6 + $0x5e8] sm:$0xff] }
  0xb8   :  { %16017 = vst [vmem:[#allocation188_spill] sm:$0xff] %v8794_v54  ;;  %v8819_v54 = vld [vmem:[%s15004_s6 + $0x5f0] sm:$0xff] }
  0xb9   :  { %16018 = vst [vmem:[#allocation189_spill] sm:$0xff] %v8799_v58  ;;  %v8824_v58 = vld [vmem:[%s15004_s6 + $0x5f8] sm:$0xff] }
  0xba   :  { %16019 = vst [vmem:[#allocation190_spill] sm:$0xff] %v8804_v13  ;;  %v8829_v13 = vld [vmem:[%s15004_s6 + $0x600] sm:$0xff] }
  0xbb   :  { %16020 = vst [vmem:[#allocation191_spill] sm:$0xff] %v8809_v62  ;;  %v8834_v62 = vld [vmem:[%s15004_s6 + $0x608] sm:$0xff] }
  0xbc   :  { %16021 = vst [vmem:[#allocation192_spill] sm:$0xff] %v8814_v16 }
  0xbd   :  { %16022 = vst [vmem:[#allocation193_spill] sm:$0xff] %v8819_v54  ;;  %v9224_v54 = vld [vmem:[%s15004_s6 + $0x878] sm:$0xff] }
  0xbe   :  { %16023 = vst [vmem:[#allocation194_spill] sm:$0xff] %v8824_v58  ;;  %v8849_v58 = vld [vmem:[%s15004_s6 + $0x620] sm:$0xff] }
  0xbf   :  { %16024 = vst [vmem:[#allocation195_spill] sm:$0xff] %v8829_v13  ;;  %v8854_v13 = vld [vmem:[%s15004_s6 + $0x628] sm:$0xff] }
  0xc0   :  { %16025 = vst [vmem:[#allocation196_spill] sm:$0xff] %v8834_v62  ;;  %v8859_v62 = vld [vmem:[%s15004_s6 + $0x630] sm:$0xff] }
  0xc1   :  { %16026 = vst [vmem:[#allocation197_spill] sm:$0xff] %v8839_v40  ;;  %v8864_v40 = vld [vmem:[%s15004_s6 + $0x638] sm:$0xff] }
  0xc2   :  { %16027 = vst [vmem:[#allocation198_spill] sm:$0xff] %v8844_v4  ;;  %v8869_v4 = vld [vmem:[%s15004_s6 + $0x640] sm:$0xff] }
  0xc3   :  { %16028 = vst [vmem:[#allocation199_spill] sm:$0xff] %v8849_v58 }
  0xc4   :  { %16029 = vst [vmem:[#allocation200_spill] sm:$0xff] %v8854_v13  ;;  %v9259_v13 = vld [vmem:[%s15004_s6 + $0x8b0] sm:$0xff] }
  0xc5   :  { %16030 = vst [vmem:[#allocation201_spill] sm:$0xff] %v8859_v62  ;;  %v8884_v62 = vld [vmem:[%s15004_s6 + $0x658] sm:$0xff] }
  0xc6   :  { %16031 = vst [vmem:[#allocation202_spill] sm:$0xff] %v8864_v40  ;;  %v8889_v40 = vld [vmem:[%s15004_s6 + $0x660] sm:$0xff] }
  0xc7   :  { %16032 = vst [vmem:[#allocation203_spill] sm:$0xff] %v8869_v4  ;;  %v8894_v4 = vld [vmem:[%s15004_s6 + $0x668] sm:$0xff] }
  0xc8   :  { %16033 = vst [vmem:[#allocation204_spill] sm:$0xff] %v8874_v39  ;;  %v8899_v39 = vld [vmem:[%s15004_s6 + $0x670] sm:$0xff] }
  0xc9   :  { %16034 = vst [vmem:[#allocation205_spill] sm:$0xff] %v8879_v41  ;;  %v8904_v41 = vld [vmem:[%s15004_s6 + $0x678] sm:$0xff] }
  0xca   :  { %16035 = vst [vmem:[#allocation206_spill] sm:$0xff] %v8884_v62 }
  0xcb   :  { %16036 = vst [vmem:[#allocation207_spill] sm:$0xff] %v8889_v40  ;;  %v9294_v40 = vld [vmem:[%s15004_s6 + $0x8e8] sm:$0xff] }
  0xcc   :  { %16037 = vst [vmem:[#allocation208_spill] sm:$0xff] %v8894_v4  ;;  %v8919_v4 = vld [vmem:[%s15004_s6 + $0x690] sm:$0xff] }
  0xcd   :  { %16038 = vst [vmem:[#allocation209_spill] sm:$0xff] %v8899_v39  ;;  %v8924_v39 = vld [vmem:[%s15004_s6 + $0x698] sm:$0xff] }
  0xce   :  { %16039 = vst [vmem:[#allocation210_spill] sm:$0xff] %v8904_v41  ;;  %v8929_v41 = vld [vmem:[%s15004_s6 + $0x6a0] sm:$0xff] }
  0xcf   :  { %16040 = vst [vmem:[#allocation211_spill] sm:$0xff] %v8909_v53  ;;  %v8934_v53 = vld [vmem:[%s15004_s6 + $0x6a8] sm:$0xff] }
  0xd0   :  { %16041 = vst [vmem:[#allocation212_spill] sm:$0xff] %v8914_v31  ;;  %v8939_v31 = vld [vmem:[%s15004_s6 + $0x6b0] sm:$0xff] }
  0xd1   :  { %16042 = vst [vmem:[#allocation213_spill] sm:$0xff] %v8919_v4 }
  0xd2   :  { %16043 = vst [vmem:[#allocation214_spill] sm:$0xff] %v8924_v39  ;;  %v9329_v39 = vld [vmem:[%s15004_s6 + $0x920] sm:$0xff] }
  0xd3   :  { %16044 = vst [vmem:[#allocation215_spill] sm:$0xff] %v8929_v41  ;;  %v8954_v41 = vld [vmem:[%s15004_s6 + $0x6c8] sm:$0xff] }
  0xd4   :  { %16045 = vst [vmem:[#allocation216_spill] sm:$0xff] %v8934_v53  ;;  %v8959_v53 = vld [vmem:[%s15004_s6 + $0x6d0] sm:$0xff] }
  0xd5   :  { %16046 = vst [vmem:[#allocation217_spill] sm:$0xff] %v8939_v31  ;;  %v8964_v31 = vld [vmem:[%s15004_s6 + $0x6d8] sm:$0xff] }
  0xd6   :  { %16047 = vst [vmem:[#allocation218_spill] sm:$0xff] %v8944_v10  ;;  %v8969_v10 = vld [vmem:[%s15004_s6 + $0x6e0] sm:$0xff] }
  0xd7   :  { %16048 = vst [vmem:[#allocation219_spill] sm:$0xff] %v8949_v38  ;;  %v8974_v38 = vld [vmem:[%s15004_s6 + $0x6e8] sm:$0xff] }
  0xd8   :  { %16049 = vst [vmem:[#allocation220_spill] sm:$0xff] %v8954_v41 }
  0xd9   :  { %16050 = vst [vmem:[#allocation221_spill] sm:$0xff] %v8959_v53  ;;  %v9364_v53 = vld [vmem:[%s15004_s6 + $0x958] sm:$0xff] }
  0xda   :  { %16051 = vst [vmem:[#allocation222_spill] sm:$0xff] %v8964_v31  ;;  %v8989_v31 = vld [vmem:[%s15004_s6 + $0x700] sm:$0xff] }
  0xdb   :  { %16052 = vst [vmem:[#allocation223_spill] sm:$0xff] %v8969_v10  ;;  %v8994_v10 = vld [vmem:[%s15004_s6 + $0x708] sm:$0xff] }
  0xdc   :  { %16053 = vst [vmem:[#allocation224_spill] sm:$0xff] %v8974_v38  ;;  %v8999_v38 = vld [vmem:[%s15004_s6 + $0x710] sm:$0xff] }
  0xdd   :  { %16054 = vst [vmem:[#allocation225_spill] sm:$0xff] %v8979_v59  ;;  %v9004_v59 = vld [vmem:[%s15004_s6 + $0x718] sm:$0xff] }
  0xde   :  { %16055 = vst [vmem:[#allocation226_spill] sm:$0xff] %v8984_v47  ;;  %v9009_v47 = vld [vmem:[%s15004_s6 + $0x720] sm:$0xff] }
  0xdf   :  { %16056 = vst [vmem:[#allocation227_spill] sm:$0xff] %v8989_v31  ;;  %v9994_v31 = vld [vmem:[%s15004_s6 + $0xd48] sm:$0xff] }
  0xe0   :  { %16057 = vst [vmem:[#allocation228_spill] sm:$0xff] %v8994_v10  ;;  %v9019_v10 = vld [vmem:[%s15004_s6 + $0x730] sm:$0xff] }
  0xe1   :  { %16058 = vst [vmem:[#allocation229_spill] sm:$0xff] %v8999_v38  ;;  %v9024_v38 = vld [vmem:[%s15004_s6 + $0x738] sm:$0xff] }
  0xe2   :  { %16059 = vst [vmem:[#allocation230_spill] sm:$0xff] %v9004_v59  ;;  %v9029_v59 = vld [vmem:[%s15004_s6 + $0x740] sm:$0xff] }
  0xe3   :  { %16060 = vst [vmem:[#allocation231_spill] sm:$0xff] %v9009_v47  ;;  %v9034_v47 = vld [vmem:[%s15004_s6 + $0x748] sm:$0xff] }
  0xe4   :  { %16061 = vst [vmem:[#allocation232_spill] sm:$0xff] %v9014_v46  ;;  %v9039_v46 = vld [vmem:[%s15004_s6 + $0x750] sm:$0xff] }
  0xe5   :  { %16062 = vst [vmem:[#allocation233_spill] sm:$0xff] %v9019_v10  ;;  %v9044_v10 = vld [vmem:[%s15004_s6 + $0x758] sm:$0xff] }
  0xe6   :  { %16063 = vst [vmem:[#allocation234_spill] sm:$0xff] %v9024_v38 }
  0xe7   :  { %16064 = vst [vmem:[#allocation235_spill] sm:$0xff] %v9029_v59  ;;  %v9054_v59 = vld [vmem:[%s15004_s6 + $0x768] sm:$0xff] }
  0xe8   :  { %16065 = vst [vmem:[#allocation236_spill] sm:$0xff] %v9034_v47  ;;  %v9059_v47 = vld [vmem:[%s15004_s6 + $0x770] sm:$0xff] }
  0xe9   :  { %16066 = vst [vmem:[#allocation237_spill] sm:$0xff] %v9039_v46  ;;  %v9064_v46 = vld [vmem:[%s15004_s6 + $0x778] sm:$0xff] }
  0xea   :  { %16067 = vst [vmem:[#allocation238_spill] sm:$0xff] %v9044_v10  ;;  %v9069_v10 = vld [vmem:[%s15004_s6 + $0x780] sm:$0xff] }
  0xeb   :  { %16068 = vst [vmem:[#allocation239_spill] sm:$0xff] %v9049_v2  ;;  %v9074_v2 = vld [vmem:[%s15004_s6 + $0x788] sm:$0xff] }
  0xec   :  { %16069 = vst [vmem:[#allocation240_spill] sm:$0xff] %v9054_v59  ;;  %v9079_v59 = vld [vmem:[%s15004_s6 + $0x790] sm:$0xff] }
  0xed   :  { %16070 = vst [vmem:[#allocation241_spill] sm:$0xff] %v9059_v47 }
  0xee   :  { %16071 = vst [vmem:[#allocation242_spill] sm:$0xff] %v9064_v46  ;;  %v9089_v46 = vld [vmem:[%s15004_s6 + $0x7a0] sm:$0xff] }
  0xef   :  { %16072 = vst [vmem:[#allocation243_spill] sm:$0xff] %v9069_v10  ;;  %v9094_v10 = vld [vmem:[%s15004_s6 + $0x7a8] sm:$0xff] }
  0xf0   :  { %16073 = vst [vmem:[#allocation244_spill] sm:$0xff] %v9074_v2  ;;  %v9099_v2 = vld [vmem:[%s15004_s6 + $0x7b0] sm:$0xff] }
  0xf1   :  { %16074 = vst [vmem:[#allocation245_spill] sm:$0xff] %v9079_v59  ;;  %v9104_v59 = vld [vmem:[%s15004_s6 + $0x7b8] sm:$0xff] }
  0xf2   :  { %16075 = vst [vmem:[#allocation246_spill] sm:$0xff] %v9084_v45  ;;  %v9109_v45 = vld [vmem:[%s15004_s6 + $0x7c0] sm:$0xff] }
  0xf3   :  { %16076 = vst [vmem:[#allocation247_spill] sm:$0xff] %v9089_v46  ;;  %v9114_v46 = vld [vmem:[%s15004_s6 + $0x7c8] sm:$0xff] }
  0xf4   :  { %16077 = vst [vmem:[#allocation248_spill] sm:$0xff] %v9094_v10 }
  0xf5   :  { %16078 = vst [vmem:[#allocation249_spill] sm:$0xff] %v9099_v2  ;;  %v9124_v2 = vld [vmem:[%s15004_s6 + $0x7d8] sm:$0xff] }
  0xf6   :  { %16079 = vst [vmem:[#allocation250_spill] sm:$0xff] %v9104_v59  ;;  %v9129_v59 = vld [vmem:[%s15004_s6 + $0x7e0] sm:$0xff] }
  0xf7   :  { %16080 = vst [vmem:[#allocation251_spill] sm:$0xff] %v9109_v45  ;;  %v9134_v45 = vld [vmem:[%s15004_s6 + $0x7e8] sm:$0xff] }
  0xf8   :  { %16081 = vst [vmem:[#allocation252_spill] sm:$0xff] %v9114_v46  ;;  %v9139_v46 = vld [vmem:[%s15004_s6 + $0x7f0] sm:$0xff] }
  0xf9   :  { %16082 = vst [vmem:[#allocation253_spill] sm:$0xff] %v9119_v23  ;;  %v9144_v23 = vld [vmem:[%s15004_s6 + $0x7f8] sm:$0xff] }
  0xfa   :  { %16083 = vst [vmem:[#allocation254_spill] sm:$0xff] %v9124_v2  ;;  %v9149_v2 = vld [vmem:[%s15004_s6 + $0x800] sm:$0xff] }
  0xfb   :  { %16084 = vst [vmem:[#allocation255_spill] sm:$0xff] %v9129_v59 }
  0xfc   :  { %16085 = vst [vmem:[#allocation256_spill] sm:$0xff] %v9134_v45  ;;  %v9159_v45 = vld [vmem:[%s15004_s6 + $0x810] sm:$0xff] }
  0xfd   :  { %16086 = vst [vmem:[#allocation257_spill] sm:$0xff] %v9139_v46  ;;  %v9164_v46 = vld [vmem:[%s15004_s6 + $0x818] sm:$0xff] }
  0xfe   :  { %16087 = vst [vmem:[#allocation258_spill] sm:$0xff] %v9144_v23  ;;  %v9169_v23 = vld [vmem:[%s15004_s6 + $0x820] sm:$0xff] }
  0xff   :  { %16088 = vst [vmem:[#allocation259_spill] sm:$0xff] %v9149_v2  ;;  %v9174_v2 = vld [vmem:[%s15004_s6 + $0x828] sm:$0xff] }
 0x100   :  { %16089 = vst [vmem:[#allocation260_spill] sm:$0xff] %v9154_v19  ;;  %v9179_v19 = vld [vmem:[%s15004_s6 + $0x830] sm:$0xff] }
 0x101   :  { %16090 = vst [vmem:[#allocation261_spill] sm:$0xff] %v9159_v45  ;;  %v9184_v45 = vld [vmem:[%s15004_s6 + $0x838] sm:$0xff] }
 0x102   :  { %16091 = vst [vmem:[#allocation262_spill] sm:$0xff] %v9164_v46 }
 0x103   :  { %16092 = vst [vmem:[#allocation263_spill] sm:$0xff] %v9169_v23  ;;  %v9194_v23 = vld [vmem:[%s15004_s6 + $0x848] sm:$0xff] }
 0x104   :  { %16093 = vst [vmem:[#allocation264_spill] sm:$0xff] %v9174_v2  ;;  %v9199_v2 = vld [vmem:[%s15004_s6 + $0x850] sm:$0xff] }
 0x105   :  { %16094 = vst [vmem:[#allocation265_spill] sm:$0xff] %v9179_v19  ;;  %v9204_v19 = vld [vmem:[%s15004_s6 + $0x858] sm:$0xff] }
 0x106   :  { %16095 = vst [vmem:[#allocation266_spill] sm:$0xff] %v9184_v45  ;;  %v9209_v45 = vld [vmem:[%s15004_s6 + $0x860] sm:$0xff] }
 0x107   :  { %16096 = vst [vmem:[#allocation267_spill] sm:$0xff] %v9189_v44  ;;  %v9214_v44 = vld [vmem:[%s15004_s6 + $0x868] sm:$0xff] }
 0x108   :  { %16097 = vst [vmem:[#allocation268_spill] sm:$0xff] %v9194_v23  ;;  %v9219_v23 = vld [vmem:[%s15004_s6 + $0x870] sm:$0xff] }
 0x109   :  { %16098 = vst [vmem:[#allocation269_spill] sm:$0xff] %v9199_v2 }
 0x10a   :  { %16099 = vst [vmem:[#allocation270_spill] sm:$0xff] %v9204_v19  ;;  %v9229_v19 = vld [vmem:[%s15004_s6 + $0x880] sm:$0xff] }
 0x10b   :  { %16100 = vst [vmem:[#allocation271_spill] sm:$0xff] %v9209_v45  ;;  %v9234_v45 = vld [vmem:[%s15004_s6 + $0x888] sm:$0xff] }
 0x10c   :  { %16101 = vst [vmem:[#allocation272_spill] sm:$0xff] %v9214_v44  ;;  %v9239_v44 = vld [vmem:[%s15004_s6 + $0x890] sm:$0xff] }
 0x10d   :  { %16102 = vst [vmem:[#allocation273_spill] sm:$0xff] %v9219_v23  ;;  %v9244_v23 = vld [vmem:[%s15004_s6 + $0x898] sm:$0xff] }
 0x10e   :  { %16103 = vst [vmem:[#allocation274_spill] sm:$0xff] %v9224_v54  ;;  %v9249_v54 = vld [vmem:[%s15004_s6 + $0x8a0] sm:$0xff] }
 0x10f   :  { %16104 = vst [vmem:[#allocation275_spill] sm:$0xff] %v9229_v19  ;;  %v9254_v19 = vld [vmem:[%s15004_s6 + $0x8a8] sm:$0xff] }
 0x110   :  { %16105 = vst [vmem:[#allocation276_spill] sm:$0xff] %v9234_v45 }
 0x111   :  { %16106 = vst [vmem:[#allocation277_spill] sm:$0xff] %v9239_v44  ;;  %v9264_v44 = vld [vmem:[%s15004_s6 + $0x8b8] sm:$0xff] }
 0x112   :  { %16107 = vst [vmem:[#allocation278_spill] sm:$0xff] %v9244_v23  ;;  %v9269_v23 = vld [vmem:[%s15004_s6 + $0x8c0] sm:$0xff] }
 0x113   :  { %16108 = vst [vmem:[#allocation279_spill] sm:$0xff] %v9249_v54  ;;  %v9274_v54 = vld [vmem:[%s15004_s6 + $0x8c8] sm:$0xff] }
 0x114   :  { %16109 = vst [vmem:[#allocation280_spill] sm:$0xff] %v9254_v19  ;;  %v9279_v19 = vld [vmem:[%s15004_s6 + $0x8d0] sm:$0xff] }
 0x115   :  { %16110 = vst [vmem:[#allocation281_spill] sm:$0xff] %v9259_v13  ;;  %v9284_v13 = vld [vmem:[%s15004_s6 + $0x8d8] sm:$0xff] }
 0x116   :  { %16111 = vst [vmem:[#allocation282_spill] sm:$0xff] %v9264_v44  ;;  %v9289_v44 = vld [vmem:[%s15004_s6 + $0x8e0] sm:$0xff] }
 0x117   :  { %16112 = vst [vmem:[#allocation283_spill] sm:$0xff] %v9269_v23 }
 0x118   :  { %16113 = vst [vmem:[#allocation284_spill] sm:$0xff] %v9274_v54  ;;  %v9299_v54 = vld [vmem:[%s15004_s6 + $0x8f0] sm:$0xff] }
 0x119   :  { %16114 = vst [vmem:[#allocation285_spill] sm:$0xff] %v9279_v19  ;;  %v9304_v19 = vld [vmem:[%s15004_s6 + $0x8f8] sm:$0xff] }
 0x11a   :  { %16115 = vst [vmem:[#allocation286_spill] sm:$0xff] %v9284_v13  ;;  %v9309_v13 = vld [vmem:[%s15004_s6 + $0x900] sm:$0xff] }
 0x11b   :  { %16116 = vst [vmem:[#allocation287_spill] sm:$0xff] %v9289_v44  ;;  %v9314_v44 = vld [vmem:[%s15004_s6 + $0x908] sm:$0xff] }
 0x11c   :  { %16117 = vst [vmem:[#allocation288_spill] sm:$0xff] %v9294_v40  ;;  %v9319_v40 = vld [vmem:[%s15004_s6 + $0x910] sm:$0xff] }
 0x11d   :  { %16118 = vst [vmem:[#allocation289_spill] sm:$0xff] %v9299_v54  ;;  %v9324_v54 = vld [vmem:[%s15004_s6 + $0x918] sm:$0xff] }
 0x11e   :  { %16119 = vst [vmem:[#allocation290_spill] sm:$0xff] %v9304_v19 }
 0x11f   :  { %16120 = vst [vmem:[#allocation291_spill] sm:$0xff] %v9309_v13  ;;  %v9334_v13 = vld [vmem:[%s15004_s6 + $0x928] sm:$0xff] }
 0x120   :  { %16121 = vst [vmem:[#allocation292_spill] sm:$0xff] %v9314_v44  ;;  %v9339_v44 = vld [vmem:[%s15004_s6 + $0x930] sm:$0xff] }
 0x121   :  { %16122 = vst [vmem:[#allocation293_spill] sm:$0xff] %v9319_v40  ;;  %v9344_v40 = vld [vmem:[%s15004_s6 + $0x938] sm:$0xff] }
 0x122   :  { %16123 = vst [vmem:[#allocation294_spill] sm:$0xff] %v9324_v54  ;;  %v9349_v54 = vld [vmem:[%s15004_s6 + $0x940] sm:$0xff] }
 0x123   :  { %16124 = vst [vmem:[#allocation295_spill] sm:$0xff] %v9329_v39  ;;  %v9354_v39 = vld [vmem:[%s15004_s6 + $0x948] sm:$0xff] }
 0x124   :  { %16125 = vst [vmem:[#allocation296_spill] sm:$0xff] %v9334_v13  ;;  %v9359_v13 = vld [vmem:[%s15004_s6 + $0x950] sm:$0xff] }
 0x125   :  { %16126 = vst [vmem:[#allocation297_spill] sm:$0xff] %v9339_v44 }
 0x126   :  { %16127 = vst [vmem:[#allocation298_spill] sm:$0xff] %v9344_v40  ;;  %v9369_v40 = vld [vmem:[%s15004_s6 + $0x960] sm:$0xff] }
 0x127   :  { %16128 = vst [vmem:[#allocation299_spill] sm:$0xff] %v9349_v54  ;;  %v9374_v54 = vld [vmem:[%s15004_s6 + $0x968] sm:$0xff] }
 0x128   :  { %16129 = vst [vmem:[#allocation300_spill] sm:$0xff] %v9354_v39  ;;  %v9379_v39 = vld [vmem:[%s15004_s6 + $0x970] sm:$0xff] }
 0x129   :  { %16130 = vst [vmem:[#allocation301_spill] sm:$0xff] %v9359_v13  ;;  %v9384_v13 = vld [vmem:[%s15004_s6 + $0x978] sm:$0xff] }
 0x12a   :  { %16131 = vst [vmem:[#allocation302_spill] sm:$0xff] %v9364_v53  ;;  %v9389_v53 = vld [vmem:[%s15004_s6 + $0x980] sm:$0xff] }
 0x12b   :  { %16132 = vst [vmem:[#allocation303_spill] sm:$0xff] %v9369_v40  ;;  %v9394_v40 = vld [vmem:[%s15004_s6 + $0x988] sm:$0xff] }
 0x12c   :  { %16133 = vst [vmem:[#allocation304_spill] sm:$0xff] %v9374_v54 }
 0x12d   :  { %16134 = vst [vmem:[#allocation305_spill] sm:$0xff] %v9379_v39  ;;  %v9404_v39 = vld [vmem:[%s15004_s6 + $0x998] sm:$0xff] }
 0x12e   :  { %16135 = vst [vmem:[#allocation306_spill] sm:$0xff] %v9384_v13  ;;  %v9409_v13 = vld [vmem:[%s15004_s6 + $0x9a0] sm:$0xff] }
 0x12f   :  { %16136 = vst [vmem:[#allocation307_spill] sm:$0xff] %v9389_v53  ;;  %v9414_v53 = vld [vmem:[%s15004_s6 + $0x9a8] sm:$0xff] }
 0x130   :  { %16137 = vst [vmem:[#allocation308_spill] sm:$0xff] %v9394_v40  ;;  %v9419_v40 = vld [vmem:[%s15004_s6 + $0x9b0] sm:$0xff] }
 0x131   :  { %16138 = vst [vmem:[#allocation309_spill] sm:$0xff] %v9399_v1  ;;  %v9424_v1 = vld [vmem:[%s15004_s6 + $0x9b8] sm:$0xff] }
 0x132   :  { %16139 = vst [vmem:[#allocation310_spill] sm:$0xff] %v9404_v39  ;;  %v9429_v39 = vld [vmem:[%s15004_s6 + $0x9c0] sm:$0xff] }
 0x133   :  { %16140 = vst [vmem:[#allocation311_spill] sm:$0xff] %v9409_v13 }
 0x134   :  { %16141 = vst [vmem:[#allocation312_spill] sm:$0xff] %v9414_v53  ;;  %v9439_v53 = vld [vmem:[%s15004_s6 + $0x9d0] sm:$0xff] }
 0x135   :  { %16142 = vst [vmem:[#allocation313_spill] sm:$0xff] %v9419_v40  ;;  %v9444_v40 = vld [vmem:[%s15004_s6 + $0x9d8] sm:$0xff] }
 0x136   :  { %16143 = vst [vmem:[#allocation314_spill] sm:$0xff] %v9424_v1  ;;  %v9449_v1 = vld [vmem:[%s15004_s6 + $0x9e0] sm:$0xff] }
 0x137   :  { %16144 = vst [vmem:[#allocation315_spill] sm:$0xff] %v9429_v39  ;;  %v9454_v39 = vld [vmem:[%s15004_s6 + $0x9e8] sm:$0xff] }
 0x138   :  { %16145 = vst [vmem:[#allocation316_spill] sm:$0xff] %v9434_v8  ;;  %v9459_v8 = vld [vmem:[%s15004_s6 + $0x9f0] sm:$0xff] }
 0x139   :  { %16146 = vst [vmem:[#allocation317_spill] sm:$0xff] %v9439_v53  ;;  %v9464_v53 = vld [vmem:[%s15004_s6 + $0x9f8] sm:$0xff] }
 0x13a   :  { %16147 = vst [vmem:[#allocation318_spill] sm:$0xff] %v9444_v40 }
 0x13b   :  { %16148 = vst [vmem:[#allocation319_spill] sm:$0xff] %v9449_v1  ;;  %v9474_v1 = vld [vmem:[%s15004_s6 + $0xa08] sm:$0xff] }
 0x13c   :  { %16149 = vst [vmem:[#allocation320_spill] sm:$0xff] %v9454_v39  ;;  %v9479_v39 = vld [vmem:[%s15004_s6 + $0xa10] sm:$0xff] }
 0x13d   :  { %16150 = vst [vmem:[#allocation321_spill] sm:$0xff] %v9459_v8  ;;  %v9484_v8 = vld [vmem:[%s15004_s6 + $0xa18] sm:$0xff] }
 0x13e   :  { %16151 = vst [vmem:[#allocation322_spill] sm:$0xff] %v9464_v53  ;;  %v9489_v53 = vld [vmem:[%s15004_s6 + $0xa20] sm:$0xff] }
 0x13f   :  { %16152 = vst [vmem:[#allocation323_spill] sm:$0xff] %v9469_v15  ;;  %v9494_v15 = vld [vmem:[%s15004_s6 + $0xa28] sm:$0xff] }
 0x140   :  { %16153 = vst [vmem:[#allocation324_spill] sm:$0xff] %v9474_v1  ;;  %v9499_v1 = vld [vmem:[%s15004_s6 + $0xa30] sm:$0xff] }
 0x141   :  { %16154 = vst [vmem:[#allocation325_spill] sm:$0xff] %v9484_v8  ;;  %v9509_v8 = vld [vmem:[%s15004_s6 + $0xa40] sm:$0xff] }
 0x142   :  { %16155 = vst [vmem:[#allocation326_spill] sm:$0xff] %v9489_v53  ;;  %v9514_v53 = vld [vmem:[%s15004_s6 + $0xa48] sm:$0xff] }
 0x143   :  { %16156 = vst [vmem:[#allocation327_spill] sm:$0xff] %v9494_v15  ;;  %v9519_v15 = vld [vmem:[%s15004_s6 + $0xa50] sm:$0xff] }
 0x144   :  { %16157 = vst [vmem:[#allocation328_spill] sm:$0xff] %v9499_v1  ;;  %v9524_v1 = vld [vmem:[%s15004_s6 + $0xa58] sm:$0xff] }
 0x145   :  { %16158 = vst [vmem:[#allocation329_spill] sm:$0xff] %v9504_v22  ;;  %v9529_v22 = vld [vmem:[%s15004_s6 + $0xa60] sm:$0xff] }
 0x146   :  { %16159 = vst [vmem:[#allocation330_spill] sm:$0xff] %v9509_v8  ;;  %v9534_v8 = vld [vmem:[%s15004_s6 + $0xa68] sm:$0xff] }
 0x147   :  { %16160 = vst [vmem:[#allocation331_spill] sm:$0xff] %v9519_v15  ;;  %v9544_v15 = vld [vmem:[%s15004_s6 + $0xa78] sm:$0xff] }
 0x148   :  { %16161 = vst [vmem:[#allocation332_spill] sm:$0xff] %v9524_v1  ;;  %v9549_v1 = vld [vmem:[%s15004_s6 + $0xa80] sm:$0xff] }
 0x149   :  { %16162 = vst [vmem:[#allocation333_spill] sm:$0xff] %v9529_v22  ;;  %v9554_v22 = vld [vmem:[%s15004_s6 + $0xa88] sm:$0xff] }
 0x14a   :  { %16163 = vst [vmem:[#allocation334_spill] sm:$0xff] %v9534_v8  ;;  %v9559_v8 = vld [vmem:[%s15004_s6 + $0xa90] sm:$0xff] }
 0x14b   :  { %16164 = vst [vmem:[#allocation335_spill] sm:$0xff] %v9539_v29  ;;  %v9564_v29 = vld [vmem:[%s15004_s6 + $0xa98] sm:$0xff] }
 0x14c   :  { %16165 = vst [vmem:[#allocation336_spill] sm:$0xff] %v9544_v15  ;;  %v9569_v15 = vld [vmem:[%s15004_s6 + $0xaa0] sm:$0xff] }
 0x14d   :  { %16166 = vst [vmem:[#allocation337_spill] sm:$0xff] %v9549_v1  ;;  %v9959_v1 = vld [vmem:[%s15004_s6 + $0xd10] sm:$0xff] }
 0x14e   :  { %16167 = vst [vmem:[#allocation338_spill] sm:$0xff] %v9554_v22  ;;  %v9579_v22 = vld [vmem:[%s15004_s6 + $0xab0] sm:$0xff] }
 0x14f   :  { %16168 = vst [vmem:[#allocation339_spill] sm:$0xff] %v9559_v8  ;;  %v9584_v8 = vld [vmem:[%s15004_s6 + $0xab8] sm:$0xff] }
 0x150   :  { %16169 = vst [vmem:[#allocation340_spill] sm:$0xff] %v9564_v29  ;;  %v9589_v29 = vld [vmem:[%s15004_s6 + $0xac0] sm:$0xff] }
 0x151   :  { %16170 = vst [vmem:[#allocation341_spill] sm:$0xff] %v9569_v15  ;;  %v9594_v15 = vld [vmem:[%s15004_s6 + $0xac8] sm:$0xff] }
 0x152   :  { %16171 = vst [vmem:[#allocation342_spill] sm:$0xff] %v9574_v36  ;;  %v9599_v36 = vld [vmem:[%s15004_s6 + $0xad0] sm:$0xff] }
 0x153   :  { %16172 = vst [vmem:[#allocation343_spill] sm:$0xff] %v9579_v22  ;;  %v9604_v22 = vld [vmem:[%s15004_s6 + $0xad8] sm:$0xff] }
 0x154   :  { %16173 = vst [vmem:[#allocation344_spill] sm:$0xff] %v9584_v8  ;;  %v10099_v8 = vld [vmem:[%s15004_s6 + $0xdf0] sm:$0xff] }
 0x155   :  { %16174 = vst [vmem:[#allocation345_spill] sm:$0xff] %v9589_v29  ;;  %v9614_v29 = vld [vmem:[%s15004_s6 + $0xae8] sm:$0xff] }
 0x156   :  { %16175 = vst [vmem:[#allocation346_spill] sm:$0xff] %v9594_v15  ;;  %v9619_v15 = vld [vmem:[%s15004_s6 + $0xaf0] sm:$0xff] }
 0x157   :  { %16176 = vst [vmem:[#allocation347_spill] sm:$0xff] %v9599_v36  ;;  %v9624_v36 = vld [vmem:[%s15004_s6 + $0xaf8] sm:$0xff] }
 0x158   :  { %16177 = vst [vmem:[#allocation348_spill] sm:$0xff] %v9604_v22  ;;  %v9629_v22 = vld [vmem:[%s15004_s6 + $0xb00] sm:$0xff] }
 0x159   :  { %16178 = vst [vmem:[#allocation349_spill] sm:$0xff] %v9609_v43  ;;  %v9634_v43 = vld [vmem:[%s15004_s6 + $0xb08] sm:$0xff] }
 0x15a   :  { %16179 = vst [vmem:[#allocation350_spill] sm:$0xff] %v9614_v29  ;;  %v9639_v29 = vld [vmem:[%s15004_s6 + $0xb10] sm:$0xff] }
 0x15b   :  { %16180 = vst [vmem:[#allocation351_spill] sm:$0xff] %v9619_v15 }
 0x15c   :  { %16181 = vst [vmem:[#allocation352_spill] sm:$0xff] %v9624_v36  ;;  %v9649_v36 = vld [vmem:[%s15004_s6 + $0xb20] sm:$0xff] }
 0x15d   :  { %16182 = vst [vmem:[#allocation353_spill] sm:$0xff] %v9629_v22  ;;  %v9654_v22 = vld [vmem:[%s15004_s6 + $0xb28] sm:$0xff] }
 0x15e   :  { %16183 = vst [vmem:[#allocation354_spill] sm:$0xff] %v9634_v43  ;;  %v9659_v43 = vld [vmem:[%s15004_s6 + $0xb30] sm:$0xff] }
 0x15f   :  { %16184 = vst [vmem:[#allocation355_spill] sm:$0xff] %v9639_v29  ;;  %v9664_v29 = vld [vmem:[%s15004_s6 + $0xb38] sm:$0xff] }
 0x160   :  { %16185 = vst [vmem:[#allocation356_spill] sm:$0xff] %v9644_v50  ;;  %v9669_v50 = vld [vmem:[%s15004_s6 + $0xb40] sm:$0xff] }
 0x161   :  { %16186 = vst [vmem:[#allocation357_spill] sm:$0xff] %v9649_v36  ;;  %v9674_v36 = vld [vmem:[%s15004_s6 + $0xb48] sm:$0xff] }
 0x162   :  { %16187 = vst [vmem:[#allocation358_spill] sm:$0xff] %v9654_v22 }
 0x163   :  { %16188 = vst [vmem:[#allocation359_spill] sm:$0xff] %v9659_v43  ;;  %v9684_v43 = vld [vmem:[%s15004_s6 + $0xb58] sm:$0xff] }
 0x164   :  { %16189 = vst [vmem:[#allocation360_spill] sm:$0xff] %v9664_v29  ;;  %v9689_v29 = vld [vmem:[%s15004_s6 + $0xb60] sm:$0xff] }
 0x165   :  { %16190 = vst [vmem:[#allocation361_spill] sm:$0xff] %v9669_v50  ;;  %v9694_v50 = vld [vmem:[%s15004_s6 + $0xb68] sm:$0xff] }
 0x166   :  { %16191 = vst [vmem:[#allocation362_spill] sm:$0xff] %v9674_v36  ;;  %v9699_v36 = vld [vmem:[%s15004_s6 + $0xb70] sm:$0xff] }
 0x167   :  { %16192 = vst [vmem:[#allocation363_spill] sm:$0xff] %v9679_v57  ;;  %v9704_v57 = vld [vmem:[%s15004_s6 + $0xb78] sm:$0xff] }
 0x168   :  { %16193 = vst [vmem:[#allocation364_spill] sm:$0xff] %v9684_v43  ;;  %v9709_v43 = vld [vmem:[%s15004_s6 + $0xb80] sm:$0xff] }
 0x169   :  { %16194 = vst [vmem:[#allocation365_spill] sm:$0xff] %v9689_v29 }
 0x16a   :  { %16195 = vst [vmem:[#allocation366_spill] sm:$0xff] %v9694_v50  ;;  %v9719_v50 = vld [vmem:[%s15004_s6 + $0xb90] sm:$0xff] }
 0x16b   :  { %16196 = vst [vmem:[#allocation367_spill] sm:$0xff] %v9699_v36  ;;  %v9724_v36 = vld [vmem:[%s15004_s6 + $0xb98] sm:$0xff] }
 0x16c   :  { %16197 = vst [vmem:[#allocation368_spill] sm:$0xff] %v9704_v57  ;;  %v9729_v57 = vld [vmem:[%s15004_s6 + $0xba0] sm:$0xff] }
 0x16d   :  { %16198 = vst [vmem:[#allocation369_spill] sm:$0xff] %v9709_v43  ;;  %v9734_v43 = vld [vmem:[%s15004_s6 + $0xba8] sm:$0xff] }
 0x16e   :  { %16199 = vst [vmem:[#allocation370_spill] sm:$0xff] %v9714_v6  ;;  %v9739_v6 = vld [vmem:[%s15004_s6 + $0xbb0] sm:$0xff] }
 0x16f   :  { %16200 = vst [vmem:[#allocation371_spill] sm:$0xff] %v9719_v50  ;;  %v9744_v50 = vld [vmem:[%s15004_s6 + $0xbb8] sm:$0xff] }
 0x170   :  { %16201 = vst [vmem:[#allocation372_spill] sm:$0xff] %v9724_v36 }
 0x171   :  { %16202 = vst [vmem:[#allocation373_spill] sm:$0xff] %v9729_v57  ;;  %v9754_v57 = vld [vmem:[%s15004_s6 + $0xbc8] sm:$0xff] }
 0x172   :  { %16203 = vst [vmem:[#allocation374_spill] sm:$0xff] %v9734_v43  ;;  %v9759_v43 = vld [vmem:[%s15004_s6 + $0xbd0] sm:$0xff] }
 0x173   :  { %16204 = vst [vmem:[#allocation375_spill] sm:$0xff] %v9739_v6  ;;  %v9764_v6 = vld [vmem:[%s15004_s6 + $0xbd8] sm:$0xff] }
 0x174   :  { %16205 = vst [vmem:[#allocation376_spill] sm:$0xff] %v9744_v50  ;;  %v9769_v50 = vld [vmem:[%s15004_s6 + $0xbe0] sm:$0xff] }
 0x175   :  { %16206 = vst [vmem:[#allocation377_spill] sm:$0xff] %v9749_v55  ;;  %v9774_v55 = vld [vmem:[%s15004_s6 + $0xbe8] sm:$0xff] }
 0x176   :  { %16207 = vst [vmem:[#allocation378_spill] sm:$0xff] %v9754_v57  ;;  %v9779_v57 = vld [vmem:[%s15004_s6 + $0xbf0] sm:$0xff] }
 0x177   :  { %16208 = vst [vmem:[#allocation379_spill] sm:$0xff] %v9759_v43 }
 0x178   :  { %16209 = vst [vmem:[#allocation380_spill] sm:$0xff] %v9764_v6  ;;  %v9789_v6 = vld [vmem:[%s15004_s6 + $0xc00] sm:$0xff] }
 0x179   :  { %16210 = vst [vmem:[#allocation381_spill] sm:$0xff] %v9769_v50  ;;  %v9794_v50 = vld [vmem:[%s15004_s6 + $0xc08] sm:$0xff] }
 0x17a   :  { %16211 = vst [vmem:[#allocation382_spill] sm:$0xff] %v9774_v55  ;;  %v9799_v55 = vld [vmem:[%s15004_s6 + $0xc10] sm:$0xff] }
 0x17b   :  { %16212 = vst [vmem:[#allocation383_spill] sm:$0xff] %v9779_v57  ;;  %v9804_v57 = vld [vmem:[%s15004_s6 + $0xc18] sm:$0xff] }
 0x17c   :  { %16213 = vst [vmem:[#allocation384_spill] sm:$0xff] %v9784_v33  ;;  %v9809_v33 = vld [vmem:[%s15004_s6 + $0xc20] sm:$0xff] }
 0x17d   :  { %16214 = vst [vmem:[#allocation385_spill] sm:$0xff] %v9789_v6  ;;  %v9814_v6 = vld [vmem:[%s15004_s6 + $0xc28] sm:$0xff] }
 0x17e   :  { %16215 = vst [vmem:[#allocation386_spill] sm:$0xff] %v9794_v50 }
 0x17f   :  { %16216 = vst [vmem:[#allocation387_spill] sm:$0xff] %v9799_v55  ;;  %v9824_v55 = vld [vmem:[%s15004_s6 + $0xc38] sm:$0xff] }
 0x180   :  { %16217 = vst [vmem:[#allocation388_spill] sm:$0xff] %v9804_v57  ;;  %v9829_v57 = vld [vmem:[%s15004_s6 + $0xc40] sm:$0xff] }
 0x181   :  { %16218 = vst [vmem:[#allocation389_spill] sm:$0xff] %v9809_v33  ;;  %v9834_v33 = vld [vmem:[%s15004_s6 + $0xc48] sm:$0xff] }
 0x182   :  { %16219 = vst [vmem:[#allocation390_spill] sm:$0xff] %v9814_v6  ;;  %v9839_v6 = vld [vmem:[%s15004_s6 + $0xc50] sm:$0xff] }
 0x183   :  { %16220 = vst [vmem:[#allocation391_spill] sm:$0xff] %v9819_v12  ;;  %v9844_v12 = vld [vmem:[%s15004_s6 + $0xc58] sm:$0xff] }
 0x184   :  { %16221 = vst [vmem:[#allocation392_spill] sm:$0xff] %v9824_v55  ;;  %v9849_v55 = vld [vmem:[%s15004_s6 + $0xc60] sm:$0xff] }
 0x185   :  { %16222 = vst [vmem:[#allocation393_spill] sm:$0xff] %v9829_v57 }
 0x186   :  { %16223 = vst [vmem:[#allocation394_spill] sm:$0xff] %v9834_v33  ;;  %v9859_v33 = vld [vmem:[%s15004_s6 + $0xc70] sm:$0xff] }
 0x187   :  { %16224 = vst [vmem:[#allocation395_spill] sm:$0xff] %v9839_v6  ;;  %v9864_v6 = vld [vmem:[%s15004_s6 + $0xc78] sm:$0xff] }
 0x188   :  { %16225 = vst [vmem:[#allocation396_spill] sm:$0xff] %v9844_v12  ;;  %v9869_v12 = vld [vmem:[%s15004_s6 + $0xc80] sm:$0xff] }
 0x189   :  { %16226 = vst [vmem:[#allocation397_spill] sm:$0xff] %v9849_v55  ;;  %v9874_v55 = vld [vmem:[%s15004_s6 + $0xc88] sm:$0xff] }
 0x18a   :  { %16227 = vst [vmem:[#allocation398_spill] sm:$0xff] %v9854_v32  ;;  %v9879_v32 = vld [vmem:[%s15004_s6 + $0xc90] sm:$0xff] }
 0x18b   :  { %16228 = vst [vmem:[#allocation399_spill] sm:$0xff] %v9859_v33  ;;  %v9884_v33 = vld [vmem:[%s15004_s6 + $0xc98] sm:$0xff] }
 0x18c   :  { %16229 = vst [vmem:[#allocation400_spill] sm:$0xff] %v9864_v6 }
 0x18d   :  { %16230 = vst [vmem:[#allocation401_spill] sm:$0xff] %v9869_v12  ;;  %v9894_v12 = vld [vmem:[%s15004_s6 + $0xca8] sm:$0xff] }
 0x18e   :  { %16231 = vst [vmem:[#allocation402_spill] sm:$0xff] %v9874_v55  ;;  %v9899_v55 = vld [vmem:[%s15004_s6 + $0xcb0] sm:$0xff] }
 0x18f   :  { %16232 = vst [vmem:[#allocation403_spill] sm:$0xff] %v9879_v32  ;;  %v9904_v32 = vld [vmem:[%s15004_s6 + $0xcb8] sm:$0xff] }
 0x190   :  { %16233 = vst [vmem:[#allocation404_spill] sm:$0xff] %v9884_v33  ;;  %v9909_v33 = vld [vmem:[%s15004_s6 + $0xcc0] sm:$0xff] }
 0x191   :  { %16234 = vst [vmem:[#allocation405_spill] sm:$0xff] %v9889_v27  ;;  %v9914_v27 = vld [vmem:[%s15004_s6 + $0xcc8] sm:$0xff] }
 0x192   :  { %16235 = vst [vmem:[#allocation406_spill] sm:$0xff] %v9894_v12  ;;  %v9919_v12 = vld [vmem:[%s15004_s6 + $0xcd0] sm:$0xff] }
 0x193   :  { %16236 = vst [vmem:[#allocation407_spill] sm:$0xff] %v9899_v55 }
 0x194   :  { %16237 = vst [vmem:[#allocation408_spill] sm:$0xff] %v9904_v32  ;;  %v9929_v32 = vld [vmem:[%s15004_s6 + $0xce0] sm:$0xff] }
 0x195   :  { %16238 = vst [vmem:[#allocation409_spill] sm:$0xff] %v9909_v33  ;;  %v9934_v33 = vld [vmem:[%s15004_s6 + $0xce8] sm:$0xff] }
 0x196   :  { %16239 = vst [vmem:[#allocation410_spill] sm:$0xff] %v9914_v27  ;;  %v9939_v27 = vld [vmem:[%s15004_s6 + $0xcf0] sm:$0xff] }
 0x197   :  { %16240 = vst [vmem:[#allocation411_spill] sm:$0xff] %v9919_v12  ;;  %v9944_v12 = vld [vmem:[%s15004_s6 + $0xcf8] sm:$0xff] }
 0x198   :  { %16241 = vst [vmem:[#allocation412_spill] sm:$0xff] %v9924_v3  ;;  %v9949_v3 = vld [vmem:[%s15004_s6 + $0xd00] sm:$0xff] }
 0x199   :  { %16242 = vst [vmem:[#allocation413_spill] sm:$0xff] %v9929_v32  ;;  %v9954_v32 = vld [vmem:[%s15004_s6 + $0xd08] sm:$0xff] }
 0x19a   :  { %16243 = vst [vmem:[#allocation414_spill] sm:$0xff] %v9934_v33 }
 0x19b   :  { %16244 = vst [vmem:[#allocation415_spill] sm:$0xff] %v9939_v27  ;;  %v9964_v27 = vld [vmem:[%s15004_s6 + $0xd18] sm:$0xff] }
 0x19c   :  { %16245 = vst [vmem:[#allocation416_spill] sm:$0xff] %v9944_v12  ;;  %v9969_v12 = vld [vmem:[%s15004_s6 + $0xd20] sm:$0xff] }
 0x19d   :  { %16246 = vst [vmem:[#allocation417_spill] sm:$0xff] %v9949_v3  ;;  %v9974_v3 = vld [vmem:[%s15004_s6 + $0xd28] sm:$0xff] }
 0x19e   :  { %16247 = vst [vmem:[#allocation418_spill] sm:$0xff] %v9954_v32  ;;  %v9979_v32 = vld [vmem:[%s15004_s6 + $0xd30] sm:$0xff] }
 0x19f   :  { %16248 = vst [vmem:[#allocation419_spill] sm:$0xff] %v9959_v1  ;;  %v9984_v1 = vld [vmem:[%s15004_s6 + $0xd38] sm:$0xff] }
 0x1a0   :  { %16249 = vst [vmem:[#allocation420_spill] sm:$0xff] %v9964_v27  ;;  %v9989_v27 = vld [vmem:[%s15004_s6 + $0xd40] sm:$0xff] }
 0x1a1   :  { %16250 = vst [vmem:[#allocation421_spill] sm:$0xff] %v9969_v12 }
 0x1a2   :  { %16251 = vst [vmem:[#allocation422_spill] sm:$0xff] %v9974_v3  ;;  %v9999_v3 = vld [vmem:[%s15004_s6 + $0xd50] sm:$0xff] }
 0x1a3   :  { %16252 = vst [vmem:[#allocation423_spill] sm:$0xff] %v9979_v32  ;;  %v10004_v32 = vld [vmem:[%s15004_s6 + $0xd58] sm:$0xff] }
 0x1a4   :  { %16253 = vst [vmem:[#allocation424_spill] sm:$0xff] %v9984_v1  ;;  %v10009_v1 = vld [vmem:[%s15004_s6 + $0xd60] sm:$0xff] }
 0x1a5   :  { %16254 = vst [vmem:[#allocation425_spill] sm:$0xff] %v9989_v27  ;;  %v10014_v27 = vld [vmem:[%s15004_s6 + $0xd68] sm:$0xff] }
 0x1a6   :  { %16255 = vst [vmem:[#allocation426_spill] sm:$0xff] %v9994_v31  ;;  %v10019_v31 = vld [vmem:[%s15004_s6 + $0xd70] sm:$0xff] }
 0x1a7   :  { %16256 = vst [vmem:[#allocation427_spill] sm:$0xff] %v9999_v3  ;;  %v10024_v3 = vld [vmem:[%s15004_s6 + $0xd78] sm:$0xff] }
 0x1a8   :  { %16257 = vst [vmem:[#allocation428_spill] sm:$0xff] %v10004_v32 }
 0x1a9   :  { %16258 = vst [vmem:[#allocation429_spill] sm:$0xff] %v10009_v1  ;;  %v10034_v1 = vld [vmem:[%s15004_s6 + $0xd88] sm:$0xff] }
 0x1aa   :  { %16259 = vst [vmem:[#allocation430_spill] sm:$0xff] %v10014_v27  ;;  %v10039_v27 = vld [vmem:[%s15004_s6 + $0xd90] sm:$0xff] }
 0x1ab   :  { %16260 = vst [vmem:[#allocation431_spill] sm:$0xff] %v10019_v31  ;;  %v10044_v31 = vld [vmem:[%s15004_s6 + $0xd98] sm:$0xff] }
 0x1ac   :  { %16261 = vst [vmem:[#allocation432_spill] sm:$0xff] %v10024_v3  ;;  %v10049_v3 = vld [vmem:[%s15004_s6 + $0xda0] sm:$0xff] }
 0x1ad   :  { %16262 = vst [vmem:[#allocation433_spill] sm:$0xff] %v10029_v24  ;;  %v10054_v24 = vld [vmem:[%s15004_s6 + $0xda8] sm:$0xff] }
 0x1ae   :  { %16263 = vst [vmem:[#allocation434_spill] sm:$0xff] %v10034_v1  ;;  %v10059_v1 = vld [vmem:[%s15004_s6 + $0xdb0] sm:$0xff] }
 0x1af   :  { %16264 = vst [vmem:[#allocation435_spill] sm:$0xff] %v10039_v27 }
 0x1b0   :  { %16265 = vst [vmem:[#allocation436_spill] sm:$0xff] %v10044_v31  ;;  %v10069_v31 = vld [vmem:[%s15004_s6 + $0xdc0] sm:$0xff] }
 0x1b1   :  { %16266 = vst [vmem:[#allocation437_spill] sm:$0xff] %v10049_v3  ;;  %v10074_v3 = vld [vmem:[%s15004_s6 + $0xdc8] sm:$0xff] }
 0x1b2   :  { %16267 = vst [vmem:[#allocation438_spill] sm:$0xff] %v10054_v24  ;;  %v10079_v24 = vld [vmem:[%s15004_s6 + $0xdd0] sm:$0xff] }
 0x1b3   :  { %16268 = vst [vmem:[#allocation439_spill] sm:$0xff] %v10059_v1  ;;  %v10084_v1 = vld [vmem:[%s15004_s6 + $0xdd8] sm:$0xff] }
 0x1b4   :  { %16269 = vst [vmem:[#allocation440_spill] sm:$0xff] %v10064_v0  ;;  %v10089_v0 = vld [vmem:[%s15004_s6 + $0xde0] sm:$0xff] }
 0x1b5   :  { %16270 = vst [vmem:[#allocation441_spill] sm:$0xff] %v10069_v31  ;;  %v10094_v31 = vld [vmem:[%s15004_s6 + $0xde8] sm:$0xff] }
 0x1b6   :  { %16271 = vst [vmem:[#allocation442_spill] sm:$0xff] %v10074_v3 }
 0x1b7   :  { %16272 = vst [vmem:[#allocation443_spill] sm:$0xff] %v10079_v24  ;;  %v10104_v24 = vld [vmem:[%s15004_s6 + $0xdf8] sm:$0xff] }
 0x1b8   :  { %16273 = vst [vmem:[#allocation444_spill] sm:$0xff] %v10084_v1  ;;  %v10109_v1 = vld [vmem:[%s15004_s6 + $0xe00] sm:$0xff] }
 0x1b9   :  { %16274 = vst [vmem:[#allocation445_spill] sm:$0xff] %v10089_v0  ;;  %v10114_v0 = vld [vmem:[%s15004_s6 + $0xe08] sm:$0xff] }
 0x1ba   :  { %16275 = vst [vmem:[#allocation446_spill] sm:$0xff] %v10094_v31  ;;  %v10119_v31 = vld [vmem:[%s15004_s6 + $0xe10] sm:$0xff] }
 0x1bb   :  { %16276 = vst [vmem:[#allocation447_spill] sm:$0xff] %v10099_v8  ;;  %v10124_v8 = vld [vmem:[%s15004_s6 + $0xe18] sm:$0xff] }
 0x1bc   :  { %16277 = vst [vmem:[#allocation448_spill] sm:$0xff] %v10104_v24  ;;  %v10129_v24 = vld [vmem:[%s15004_s6 + $0xe20] sm:$0xff] }
 0x1bd   :  { %16278 = vst [vmem:[#allocation449_spill] sm:$0xff] %v10109_v1  ;;  %v10134_v1 = vld [vmem:[%s15004_s6 + $0xe28] sm:$0xff] }
 0x1be   :  { %16279 = vst [vmem:[#allocation450_spill] sm:$0xff] %v10114_v0  ;;  %v10139_v0 = vld [vmem:[%s15004_s6 + $0xe30] sm:$0xff] }
 0x1bf   :  { %16280 = vst [vmem:[#allocation451_spill] sm:$0xff] %v10119_v31  ;;  %v10144_v31 = vld [vmem:[%s15004_s6 + $0xe38] sm:$0xff] }
 0x1c0   :  { %16281 = vst [vmem:[#allocation452_spill] sm:$0xff] %v10124_v8  ;;  %v10149_v8 = vld [vmem:[%s15004_s6 + $0xe40] sm:$0xff] }
 0x1c1   :  { %16282 = vst [vmem:[#allocation453_spill] sm:$0xff] %v10129_v24  ;;  %v10154_v24 = vld [vmem:[%s15004_s6 + $0xe48] sm:$0xff] }
 0x1c2   :  { %16283 = vst [vmem:[#allocation454_spill] sm:$0xff] %v10134_v1  ;;  %v10159_v1 = vld [vmem:[%s15004_s6 + $0xe50] sm:$0xff] }
 0x1c3   :  { %16284 = vst [vmem:[#allocation455_spill] sm:$0xff] %v10139_v0  ;;  %v10164_v0 = vld [vmem:[%s15004_s6 + $0xe58] sm:$0xff] }
 0x1c4   :  { %16285 = vst [vmem:[#allocation456_spill] sm:$0xff] %v10144_v31  ;;  %v10169_v31 = vld [vmem:[%s15004_s6 + $0xe60] sm:$0xff] }
 0x1c5   :  { %16286 = vst [vmem:[#allocation457_spill] sm:$0xff] %v10149_v8  ;;  %v10174_v8 = vld [vmem:[%s15004_s6 + $0xe68] sm:$0xff] }
 0x1c6   :  { %16287 = vst [vmem:[#allocation458_spill] sm:$0xff] %v10154_v24  ;;  %v10179_v24 = vld [vmem:[%s15004_s6 + $0xe70] sm:$0xff] }
 0x1c7   :  { %16288 = vst [vmem:[#allocation459_spill] sm:$0xff] %v10159_v1  ;;  %v10184_v1 = vld [vmem:[%s15004_s6 + $0xe78] sm:$0xff] }
 0x1c8   :  { %16289 = vst [vmem:[#allocation460_spill] sm:$0xff] %v10164_v0  ;;  %v10189_v0 = vld [vmem:[%s15004_s6 + $0xe80] sm:$0xff] }
 0x1c9   :  { %16290 = vst [vmem:[#allocation461_spill] sm:$0xff] %v10169_v31  ;;  %v10194_v31 = vld [vmem:[%s15004_s6 + $0xe88] sm:$0xff] }
 0x1ca   :  { %16291 = vst [vmem:[#allocation462_spill] sm:$0xff] %v10174_v8  ;;  %v10199_v8 = vld [vmem:[%s15004_s6 + $0xe90] sm:$0xff] }
 0x1cb   :  { %16292 = vst [vmem:[#allocation463_spill] sm:$0xff] %v10179_v24  ;;  %v10204_v24 = vld [vmem:[%s15004_s6 + $0xe98] sm:$0xff] }
 0x1cc   :  { %16293 = vst [vmem:[#allocation464_spill] sm:$0xff] %v10184_v1  ;;  %v10209_v1 = vld [vmem:[%s15004_s6 + $0xea0] sm:$0xff] }
 0x1cd   :  { %16294 = vst [vmem:[#allocation465_spill] sm:$0xff] %v10189_v0  ;;  %v10214_v0 = vld [vmem:[%s15004_s6 + $0xea8] sm:$0xff] }
 0x1ce   :  { %16295 = vst [vmem:[#allocation466_spill] sm:$0xff] %v10194_v31  ;;  %v10219_v31 = vld [vmem:[%s15004_s6 + $0xeb0] sm:$0xff] }
 0x1cf   :  { %16296 = vst [vmem:[#allocation467_spill] sm:$0xff] %v10199_v8  ;;  %v10224_v8 = vld [vmem:[%s15004_s6 + $0xeb8] sm:$0xff] }
 0x1d0   :  { %16297 = vst [vmem:[#allocation468_spill] sm:$0xff] %v10204_v24  ;;  %v10229_v24 = vld [vmem:[%s15004_s6 + $0xec0] sm:$0xff] }
 0x1d1   :  { %16298 = vst [vmem:[#allocation469_spill] sm:$0xff] %v10209_v1  ;;  %v10234_v1 = vld [vmem:[%s15004_s6 + $0xec8] sm:$0xff] }
 0x1d2   :  { %16299 = vst [vmem:[#allocation470_spill] sm:$0xff] %v10214_v0  ;;  %v10239_v0 = vld [vmem:[%s15004_s6 + $0xed0] sm:$0xff] }
 0x1d3   :  { %16300 = vst [vmem:[#allocation471_spill] sm:$0xff] %v10219_v31  ;;  %v10244_v31 = vld [vmem:[%s15004_s6 + $0xed8] sm:$0xff] }
 0x1d4   :  { %16301 = vst [vmem:[#allocation472_spill] sm:$0xff] %v10224_v8  ;;  %v10249_v8 = vld [vmem:[%s15004_s6 + $0xee0] sm:$0xff] }
 0x1d5   :  { %16302 = vst [vmem:[#allocation473_spill] sm:$0xff] %v10229_v24  ;;  %v10254_v24 = vld [vmem:[%s15004_s6 + $0xee8] sm:$0xff] }
 0x1d6   :  { %16303 = vst [vmem:[#allocation474_spill] sm:$0xff] %v10234_v1  ;;  %v10259_v1 = vld [vmem:[%s15004_s6 + $0xef0] sm:$0xff] }
 0x1d7   :  { %16304 = vst [vmem:[#allocation475_spill] sm:$0xff] %v10239_v0  ;;  %v10264_v0 = vld [vmem:[%s15004_s6 + $0xef8] sm:$0xff] }
 0x1d8   :  { %16305 = vst [vmem:[#allocation476_spill] sm:$0xff] %v10244_v31  ;;  %v10269_v31 = vld [vmem:[%s15004_s6 + $0xf00] sm:$0xff] }
 0x1d9   :  { %16306 = vst [vmem:[#allocation477_spill] sm:$0xff] %v10249_v8  ;;  %v10274_v8 = vld [vmem:[%s15004_s6 + $0xf08] sm:$0xff] }
 0x1da   :  { %16307 = vst [vmem:[#allocation478_spill] sm:$0xff] %v10254_v24  ;;  %v10279_v24 = vld [vmem:[%s15004_s6 + $0xf10] sm:$0xff] }
 0x1db   :  { %16308 = vst [vmem:[#allocation479_spill] sm:$0xff] %v10259_v1  ;;  %v10284_v1 = vld [vmem:[%s15004_s6 + $0xf18] sm:$0xff] }
 0x1dc   :  { %16309 = vst [vmem:[#allocation480_spill] sm:$0xff] %v10264_v0  ;;  %v10289_v0 = vld [vmem:[%s15004_s6 + $0xf20] sm:$0xff] }
 0x1dd   :  { %16310 = vst [vmem:[#allocation481_spill] sm:$0xff] %v10269_v31  ;;  %v10294_v31 = vld [vmem:[%s15004_s6 + $0xf28] sm:$0xff] }
 0x1de   :  { %16311 = vst [vmem:[#allocation482_spill] sm:$0xff] %v10274_v8  ;;  %v10299_v8 = vld [vmem:[%s15004_s6 + $0xf30] sm:$0xff] }
 0x1df   :  { %16312 = vst [vmem:[#allocation483_spill] sm:$0xff] %v10279_v24  ;;  %v10304_v24 = vld [vmem:[%s15004_s6 + $0xf38] sm:$0xff] }
 0x1e0   :  { %16313 = vst [vmem:[#allocation484_spill] sm:$0xff] %v10284_v1  ;;  %v10309_v1 = vld [vmem:[%s15004_s6 + $0xf40] sm:$0xff] }
 0x1e1   :  { %16314 = vst [vmem:[#allocation485_spill] sm:$0xff] %v10289_v0  ;;  %v10314_v0 = vld [vmem:[%s15004_s6 + $0xf48] sm:$0xff] }
 0x1e2   :  { %16315 = vst [vmem:[#allocation486_spill] sm:$0xff] %v10294_v31  ;;  %v10319_v31 = vld [vmem:[%s15004_s6 + $0xf50] sm:$0xff] }
 0x1e3   :  { %16316 = vst [vmem:[#allocation487_spill] sm:$0xff] %v10299_v8  ;;  %v10324_v8 = vld [vmem:[%s15004_s6 + $0xf58] sm:$0xff] }
 0x1e4   :  { %16317 = vst [vmem:[#allocation488_spill] sm:$0xff] %v10304_v24  ;;  %v10329_v24 = vld [vmem:[%s15004_s6 + $0xf60] sm:$0xff] }
 0x1e5   :  { %16318 = vst [vmem:[#allocation489_spill] sm:$0xff] %v10309_v1  ;;  %v10334_v1 = vld [vmem:[%s15004_s6 + $0xf68] sm:$0xff] }
 0x1e6   :  { %16319 = vst [vmem:[#allocation490_spill] sm:$0xff] %v10314_v0  ;;  %v10339_v0 = vld [vmem:[%s15004_s6 + $0xf70] sm:$0xff] }
 0x1e7   :  { %16320 = vst [vmem:[#allocation491_spill] sm:$0xff] %v10319_v31  ;;  %v10344_v31 = vld [vmem:[%s15004_s6 + $0xf78] sm:$0xff] }
 0x1e8   :  { %16321 = vst [vmem:[#allocation492_spill] sm:$0xff] %v10324_v8  ;;  %v10349_v8 = vld [vmem:[%s15004_s6 + $0xf80] sm:$0xff] }
 0x1e9   :  { %16322 = vst [vmem:[#allocation493_spill] sm:$0xff] %v10329_v24  ;;  %v10354_v24 = vld [vmem:[%s15004_s6 + $0xf88] sm:$0xff] }
 0x1ea   :  { %16323 = vst [vmem:[#allocation494_spill] sm:$0xff] %v10334_v1  ;;  %v10359_v1 = vld [vmem:[%s15004_s6 + $0xf90] sm:$0xff] }
 0x1eb   :  { %16324 = vst [vmem:[#allocation495_spill] sm:$0xff] %v10339_v0  ;;  %v10364_v0 = vld [vmem:[%s15004_s6 + $0xf98] sm:$0xff] }
 0x1ec   :  { %16325 = vst [vmem:[#allocation496_spill] sm:$0xff] %v10344_v31  ;;  %v10369_v31 = vld [vmem:[%s15004_s6 + $0xfa0] sm:$0xff] }
 0x1ed   :  { %16326 = vst [vmem:[#allocation497_spill] sm:$0xff] %v10349_v8  ;;  %v10374_v8 = vld [vmem:[%s15004_s6 + $0xfa8] sm:$0xff] }
 0x1ee   :  { %16327 = vst [vmem:[#allocation498_spill] sm:$0xff] %v10354_v24  ;;  %v10379_v24 = vld [vmem:[%s15004_s6 + $0xfb0] sm:$0xff] }
 0x1ef   :  { %16328 = vst [vmem:[#allocation499_spill] sm:$0xff] %v10359_v1  ;;  %v10384_v1 = vld [vmem:[%s15004_s6 + $0xfb8] sm:$0xff] }
 0x1f0   :  { %16329 = vst [vmem:[#allocation500_spill] sm:$0xff] %v10364_v0  ;;  %v10389_v0 = vld [vmem:[%s15004_s6 + $0xfc0] sm:$0xff] }
 0x1f1   :  { %16330 = vst [vmem:[#allocation501_spill] sm:$0xff] %v10369_v31  ;;  %v10394_v31 = vld [vmem:[%s15004_s6 + $0xfc8] sm:$0xff] }
 0x1f2   :  { %16331 = vst [vmem:[#allocation502_spill] sm:$0xff] %v10374_v8  ;;  %v10399_v8 = vld [vmem:[%s15004_s6 + $0xfd0] sm:$0xff] }
 0x1f3   :  { %16332 = vst [vmem:[#allocation503_spill] sm:$0xff] %v10379_v24  ;;  %v10404_v24 = vld [vmem:[%s15004_s6 + $0xfd8] sm:$0xff] }
 0x1f4   :  { %16333 = vst [vmem:[#allocation504_spill] sm:$0xff] %v10384_v1  ;;  %v10409_v1 = vld [vmem:[%s15004_s6 + $0xfe0] sm:$0xff] }
 0x1f5   :  { %16334 = vst [vmem:[#allocation505_spill] sm:$0xff] %v10389_v0  ;;  %v10414_v0 = vld [vmem:[%s15004_s6 + $0xfe8] sm:$0xff] }
 0x1f6   :  { %16335 = vst [vmem:[#allocation506_spill] sm:$0xff] %v10394_v31  ;;  %v10419_v31 = vld [vmem:[%s15004_s6 + $0xff0] sm:$0xff] }
 0x1f7   :  { %16336 = vst [vmem:[#allocation507_spill] sm:$0xff] %v10399_v8  ;;  %v10424_v8 = vld [vmem:[%s15004_s6 + $0xff8] sm:$0xff] }
 0x1f8   :  { %16337 = vst [vmem:[#allocation508_spill] sm:$0xff] %v10404_v24  ;;  %v10429_v24 = vld [vmem:[%s15004_s6 + $0x1000] sm:$0xff] }
 0x1f9   :  { %16338 = vst [vmem:[#allocation509_spill] sm:$0xff] %v10409_v1  ;;  %v10434_v1 = vld [vmem:[%s15004_s6 + $0x1008] sm:$0xff] }
 0x1fa   :  { %16339 = vst [vmem:[#allocation510_spill] sm:$0xff] %v10414_v0  ;;  %v10439_v0 = vld [vmem:[%s15004_s6 + $0x1010] sm:$0xff] }
 0x1fb   :  { %16340 = vst [vmem:[#allocation511_spill] sm:$0xff] %v10419_v31  ;;  %v10444_v31 = vld [vmem:[%s15004_s6 + $0x1018] sm:$0xff] }
 0x1fc   :  { %16341 = vst [vmem:[#allocation512_spill] sm:$0xff] %v10424_v8  ;;  %v10449_v8 = vld [vmem:[%s15004_s6 + $0x1020] sm:$0xff] }
 0x1fd   :  { %16342 = vst [vmem:[#allocation513_spill] sm:$0xff] %v10429_v24  ;;  %v10454_v24 = vld [vmem:[%s15004_s6 + $0x1028] sm:$0xff] }
 0x1fe   :  { %16343 = vst [vmem:[#allocation514_spill] sm:$0xff] %v10434_v1  ;;  %v10459_v1 = vld [vmem:[%s15004_s6 + $0x1030] sm:$0xff] }
 0x1ff   :  { %16344 = vst [vmem:[#allocation515_spill] sm:$0xff] %v10439_v0  ;;  %v10464_v0 = vld [vmem:[%s15004_s6 + $0x1038] sm:$0xff] }
 0x200   :  { %16345 = vst [vmem:[#allocation516_spill] sm:$0xff] %v10444_v31  ;;  %v10469_v31 = vld [vmem:[%s15004_s6 + $0x1040] sm:$0xff] }
 0x201   :  { %16346 = vst [vmem:[#allocation517_spill] sm:$0xff] %v10449_v8  ;;  %v10474_v8 = vld [vmem:[%s15004_s6 + $0x1048] sm:$0xff] }
 0x202   :  { %16347 = vst [vmem:[#allocation518_spill] sm:$0xff] %v10454_v24  ;;  %v10479_v24 = vld [vmem:[%s15004_s6 + $0x1050] sm:$0xff] }
 0x203   :  { %16348 = vst [vmem:[#allocation519_spill] sm:$0xff] %v10459_v1  ;;  %v10484_v1 = vld [vmem:[%s15004_s6 + $0x1058] sm:$0xff] }
 0x204   :  { %16349 = vst [vmem:[#allocation520_spill] sm:$0xff] %v10464_v0  ;;  %v10489_v0 = vld [vmem:[%s15004_s6 + $0x1060] sm:$0xff] }
 0x205   :  { %16350 = vst [vmem:[#allocation521_spill] sm:$0xff] %v10469_v31  ;;  %v10494_v31 = vld [vmem:[%s15004_s6 + $0x1068] sm:$0xff] }
 0x206   :  { %16351 = vst [vmem:[#allocation522_spill] sm:$0xff] %v10474_v8  ;;  %v10499_v8 = vld [vmem:[%s15004_s6 + $0x1070] sm:$0xff] }
 0x207   :  { %16352 = vst [vmem:[#allocation523_spill] sm:$0xff] %v10479_v24  ;;  %v10504_v24 = vld [vmem:[%s15004_s6 + $0x1078] sm:$0xff] }
 0x208   :  { %16353 = vst [vmem:[#allocation524_spill] sm:$0xff] %v10484_v1  ;;  %v10509_v1 = vld [vmem:[%s15004_s6 + $0x1080] sm:$0xff] }
 0x209   :  { %16354 = vst [vmem:[#allocation525_spill] sm:$0xff] %v10489_v0  ;;  %v10514_v0 = vld [vmem:[%s15004_s6 + $0x1088] sm:$0xff] }
 0x20a   :  { %16355 = vst [vmem:[#allocation526_spill] sm:$0xff] %v10494_v31  ;;  %v10519_v31 = vld [vmem:[%s15004_s6 + $0x1090] sm:$0xff] }
 0x20b   :  { %16356 = vst [vmem:[#allocation527_spill] sm:$0xff] %v10499_v8  ;;  %v10524_v8 = vld [vmem:[%s15004_s6 + $0x1098] sm:$0xff] }
 0x20c   :  { %16357 = vst [vmem:[#allocation528_spill] sm:$0xff] %v10504_v24  ;;  %v10529_v24 = vld [vmem:[%s15004_s6 + $0x10a0] sm:$0xff] }
 0x20d   :  { %16358 = vst [vmem:[#allocation529_spill] sm:$0xff] %v10509_v1  ;;  %v10534_v1 = vld [vmem:[%s15004_s6 + $0x10a8] sm:$0xff] }
 0x20e   :  { %16359 = vst [vmem:[#allocation530_spill] sm:$0xff] %v10514_v0  ;;  %v10539_v0 = vld [vmem:[%s15004_s6 + $0x10b0] sm:$0xff] }
 0x20f   :  { %16360 = vst [vmem:[#allocation531_spill] sm:$0xff] %v10519_v31  ;;  %v10544_v31 = vld [vmem:[%s15004_s6 + $0x10b8] sm:$0xff] }
 0x210   :  { %16361 = vst [vmem:[#allocation532_spill] sm:$0xff] %v10524_v8  ;;  %v10549_v8 = vld [vmem:[%s15004_s6 + $0x10c0] sm:$0xff] }
 0x211   :  { %16362 = vst [vmem:[#allocation533_spill] sm:$0xff] %v10529_v24  ;;  %v10554_v24 = vld [vmem:[%s15004_s6 + $0x10c8] sm:$0xff] }
 0x212   :  { %16363 = vst [vmem:[#allocation534_spill] sm:$0xff] %v10534_v1  ;;  %v10559_v1 = vld [vmem:[%s15004_s6 + $0x10d0] sm:$0xff] }
 0x213   :  { %16364 = vst [vmem:[#allocation535_spill] sm:$0xff] %v10539_v0  ;;  %v10564_v0 = vld [vmem:[%s15004_s6 + $0x10d8] sm:$0xff] }
 0x214   :  { %16365 = vst [vmem:[#allocation536_spill] sm:$0xff] %v10544_v31  ;;  %v10569_v31 = vld [vmem:[%s15004_s6 + $0x10e0] sm:$0xff] }
 0x215   :  { %16366 = vst [vmem:[#allocation537_spill] sm:$0xff] %v10549_v8  ;;  %v10574_v8 = vld [vmem:[%s15004_s6 + $0x10e8] sm:$0xff] }
 0x216   :  { %16367 = vst [vmem:[#allocation538_spill] sm:$0xff] %v10554_v24  ;;  %v10579_v24 = vld [vmem:[%s15004_s6 + $0x10f0] sm:$0xff] }
 0x217   :  { %16368 = vst [vmem:[#allocation539_spill] sm:$0xff] %v10559_v1  ;;  %v10584_v1 = vld [vmem:[%s15004_s6 + $0x10f8] sm:$0xff] }
 0x218   :  { %16369 = vst [vmem:[#allocation540_spill] sm:$0xff] %v10564_v0  ;;  %v10589_v0 = vld [vmem:[%s15004_s6 + $0x1100] sm:$0xff] }
 0x219   :  { %16370 = vst [vmem:[#allocation541_spill] sm:$0xff] %v10569_v31  ;;  %v10594_v31 = vld [vmem:[%s15004_s6 + $0x1108] sm:$0xff] }
 0x21a   :  { %16371 = vst [vmem:[#allocation542_spill] sm:$0xff] %v10574_v8  ;;  %v10599_v8 = vld [vmem:[%s15004_s6 + $0x1110] sm:$0xff] }
 0x21b   :  { %16372 = vst [vmem:[#allocation543_spill] sm:$0xff] %v10579_v24  ;;  %v10604_v24 = vld [vmem:[%s15004_s6 + $0x1118] sm:$0xff] }
 0x21c   :  { %16373 = vst [vmem:[#allocation544_spill] sm:$0xff] %v10584_v1  ;;  %v10609_v1 = vld [vmem:[%s15004_s6 + $0x1120] sm:$0xff] }
 0x21d   :  { %16374 = vst [vmem:[#allocation545_spill] sm:$0xff] %v10589_v0  ;;  %v10614_v0 = vld [vmem:[%s15004_s6 + $0x1128] sm:$0xff] }
 0x21e   :  { %16375 = vst [vmem:[#allocation546_spill] sm:$0xff] %v10594_v31  ;;  %v10619_v31 = vld [vmem:[%s15004_s6 + $0x1130] sm:$0xff] }
 0x21f   :  { %16376 = vst [vmem:[#allocation547_spill] sm:$0xff] %v10599_v8  ;;  %v10624_v8 = vld [vmem:[%s15004_s6 + $0x1138] sm:$0xff] }
 0x220   :  { %16377 = vst [vmem:[#allocation548_spill] sm:$0xff] %v10604_v24  ;;  %v10629_v24 = vld [vmem:[%s15004_s6 + $0x1140] sm:$0xff] }
 0x221   :  { %16378 = vst [vmem:[#allocation549_spill] sm:$0xff] %v10609_v1  ;;  %v10634_v1 = vld [vmem:[%s15004_s6 + $0x1148] sm:$0xff] }
 0x222   :  { %16379 = vst [vmem:[#allocation550_spill] sm:$0xff] %v10614_v0  ;;  %v10639_v0 = vld [vmem:[%s15004_s6 + $0x1150] sm:$0xff] }
 0x223   :  { %16380 = vst [vmem:[#allocation551_spill] sm:$0xff] %v10619_v31  ;;  %v10644_v31 = vld [vmem:[%s15004_s6 + $0x1158] sm:$0xff] }
 0x224   :  { %16381 = vst [vmem:[#allocation552_spill] sm:$0xff] %v10624_v8  ;;  %v10649_v8 = vld [vmem:[%s15004_s6 + $0x1160] sm:$0xff] }
 0x225   :  { %16382 = vst [vmem:[#allocation553_spill] sm:$0xff] %v10629_v24  ;;  %v10654_v24 = vld [vmem:[%s15004_s6 + $0x1168] sm:$0xff] }
 0x226   :  { %16383 = vst [vmem:[#allocation554_spill] sm:$0xff] %v10634_v1  ;;  %v10659_v1 = vld [vmem:[%s15004_s6 + $0x1170] sm:$0xff] }
 0x227   :  { %16384 = vst [vmem:[#allocation555_spill] sm:$0xff] %v10639_v0  ;;  %v10664_v0 = vld [vmem:[%s15004_s6 + $0x1178] sm:$0xff] }
 0x228   :  { %16385 = vst [vmem:[#allocation556_spill] sm:$0xff] %v10644_v31  ;;  %v10669_v31 = vld [vmem:[%s15004_s6 + $0x1180] sm:$0xff] }
 0x229   :  { %16386 = vst [vmem:[#allocation557_spill] sm:$0xff] %v10649_v8  ;;  %v10674_v8 = vld [vmem:[%s15004_s6 + $0x1188] sm:$0xff] }
 0x22a   :  { %16387 = vst [vmem:[#allocation558_spill] sm:$0xff] %v10654_v24  ;;  %v10679_v24 = vld [vmem:[%s15004_s6 + $0x1190] sm:$0xff] }
 0x22b   :  { %16388 = vst [vmem:[#allocation559_spill] sm:$0xff] %v10659_v1  ;;  %v10684_v1 = vld [vmem:[%s15004_s6 + $0x1198] sm:$0xff] }
 0x22c   :  { %16389 = vst [vmem:[#allocation560_spill] sm:$0xff] %v10664_v0  ;;  %v10689_v0 = vld [vmem:[%s15004_s6 + $0x11a0] sm:$0xff] }
 0x22d   :  { %16390 = vst [vmem:[#allocation561_spill] sm:$0xff] %v10669_v31  ;;  %v10694_v31 = vld [vmem:[%s15004_s6 + $0x11a8] sm:$0xff] }
 0x22e   :  { %16391 = vst [vmem:[#allocation562_spill] sm:$0xff] %v10674_v8  ;;  %v10699_v8 = vld [vmem:[%s15004_s6 + $0x11b0] sm:$0xff] }
 0x22f   :  { %16392 = vst [vmem:[#allocation563_spill] sm:$0xff] %v10679_v24  ;;  %v10704_v24 = vld [vmem:[%s15004_s6 + $0x11b8] sm:$0xff] }
 0x230   :  { %16393 = vst [vmem:[#allocation564_spill] sm:$0xff] %v10684_v1  ;;  %v10709_v1 = vld [vmem:[%s15004_s6 + $0x11c0] sm:$0xff] }
 0x231   :  { %16394 = vst [vmem:[#allocation565_spill] sm:$0xff] %v10689_v0  ;;  %v10714_v0 = vld [vmem:[%s15004_s6 + $0x11c8] sm:$0xff] }
 0x232   :  { %16395 = vst [vmem:[#allocation566_spill] sm:$0xff] %v10694_v31  ;;  %v10719_v31 = vld [vmem:[%s15004_s6 + $0x11d0] sm:$0xff] }
 0x233   :  { %16396 = vst [vmem:[#allocation567_spill] sm:$0xff] %v10699_v8  ;;  %v10724_v8 = vld [vmem:[%s15004_s6 + $0x11d8] sm:$0xff] }
 0x234   :  { %16397 = vst [vmem:[#allocation568_spill] sm:$0xff] %v10704_v24  ;;  %v10729_v24 = vld [vmem:[%s15004_s6 + $0x11e0] sm:$0xff] }
 0x235   :  { %16398 = vst [vmem:[#allocation569_spill] sm:$0xff] %v10709_v1  ;;  %v10734_v1 = vld [vmem:[%s15004_s6 + $0x11e8] sm:$0xff] }
 0x236   :  { %16399 = vst [vmem:[#allocation570_spill] sm:$0xff] %v10714_v0  ;;  %v10739_v0 = vld [vmem:[%s15004_s6 + $0x11f0] sm:$0xff] }
 0x237   :  { %16400 = vst [vmem:[#allocation571_spill] sm:$0xff] %v10719_v31  ;;  %v10744_v31 = vld [vmem:[%s15004_s6 + $0x11f8] sm:$0xff] }
 0x238   :  { %16401 = vst [vmem:[#allocation572_spill] sm:$0xff] %v10724_v8  ;;  %v10749_v8 = vld [vmem:[%s15004_s6 + $0x1200] sm:$0xff] }
 0x239   :  { %16402 = vst [vmem:[#allocation573_spill] sm:$0xff] %v10729_v24  ;;  %v10754_v24 = vld [vmem:[%s15004_s6 + $0x1208] sm:$0xff] }
 0x23a   :  { %16403 = vst [vmem:[#allocation574_spill] sm:$0xff] %v10734_v1  ;;  %v10759_v1 = vld [vmem:[%s15004_s6 + $0x1210] sm:$0xff] }
 0x23b   :  { %16404 = vst [vmem:[#allocation575_spill] sm:$0xff] %v10739_v0  ;;  %v10764_v0 = vld [vmem:[%s15004_s6 + $0x1218] sm:$0xff] }
 0x23c   :  { %16405 = vst [vmem:[#allocation576_spill] sm:$0xff] %v10744_v31  ;;  %v10769_v31 = vld [vmem:[%s15004_s6 + $0x1220] sm:$0xff] }
 0x23d   :  { %16406 = vst [vmem:[#allocation577_spill] sm:$0xff] %v10749_v8  ;;  %v10774_v8 = vld [vmem:[%s15004_s6 + $0x1228] sm:$0xff] }
 0x23e   :  { %16407 = vst [vmem:[#allocation578_spill] sm:$0xff] %v10754_v24  ;;  %v10779_v24 = vld [vmem:[%s15004_s6 + $0x1230] sm:$0xff] }
 0x23f   :  { %16408 = vst [vmem:[#allocation579_spill] sm:$0xff] %v10759_v1  ;;  %v10784_v1 = vld [vmem:[%s15004_s6 + $0x1238] sm:$0xff] }
 0x240   :  { %16409 = vst [vmem:[#allocation580_spill] sm:$0xff] %v10764_v0  ;;  %v10789_v0 = vld [vmem:[%s15004_s6 + $0x1240] sm:$0xff] }
 0x241   :  { %16410 = vst [vmem:[#allocation581_spill] sm:$0xff] %v10769_v31  ;;  %v10794_v31 = vld [vmem:[%s15004_s6 + $0x1248] sm:$0xff] }
 0x242   :  { %16411 = vst [vmem:[#allocation582_spill] sm:$0xff] %v10774_v8  ;;  %v10799_v8 = vld [vmem:[%s15004_s6 + $0x1250] sm:$0xff] }
 0x243   :  { %16412 = vst [vmem:[#allocation583_spill] sm:$0xff] %v10779_v24  ;;  %v10804_v24 = vld [vmem:[%s15004_s6 + $0x1258] sm:$0xff] }
 0x244   :  { %16413 = vst [vmem:[#allocation584_spill] sm:$0xff] %v10784_v1  ;;  %v10809_v1 = vld [vmem:[%s15004_s6 + $0x1260] sm:$0xff] }
 0x245   :  { %16414 = vst [vmem:[#allocation585_spill] sm:$0xff] %v10789_v0  ;;  %v10814_v0 = vld [vmem:[%s15004_s6 + $0x1268] sm:$0xff] }
 0x246   :  { %16415 = vst [vmem:[#allocation586_spill] sm:$0xff] %v10794_v31  ;;  %v10819_v31 = vld [vmem:[%s15004_s6 + $0x1270] sm:$0xff] }
 0x247   :  { %16416 = vst [vmem:[#allocation587_spill] sm:$0xff] %v10799_v8  ;;  %v10824_v8 = vld [vmem:[%s15004_s6 + $0x1278] sm:$0xff] }
 0x248   :  { %16417 = vst [vmem:[#allocation588_spill] sm:$0xff] %v10804_v24  ;;  %v10829_v24 = vld [vmem:[%s15004_s6 + $0x1280] sm:$0xff] }
 0x249   :  { %16418 = vst [vmem:[#allocation589_spill] sm:$0xff] %v10809_v1  ;;  %v10834_v1 = vld [vmem:[%s15004_s6 + $0x1288] sm:$0xff] }
 0x24a   :  { %16419 = vst [vmem:[#allocation590_spill] sm:$0xff] %v10814_v0  ;;  %v10839_v0 = vld [vmem:[%s15004_s6 + $0x1290] sm:$0xff] }
 0x24b   :  { %16420 = vst [vmem:[#allocation591_spill] sm:$0xff] %v10819_v31  ;;  %v10844_v31 = vld [vmem:[%s15004_s6 + $0x1298] sm:$0xff] }
 0x24c   :  { %16421 = vst [vmem:[#allocation592_spill] sm:$0xff] %v10824_v8  ;;  %v10849_v8 = vld [vmem:[%s15004_s6 + $0x12a0] sm:$0xff] }
 0x24d   :  { %16422 = vst [vmem:[#allocation593_spill] sm:$0xff] %v10829_v24  ;;  %v10854_v24 = vld [vmem:[%s15004_s6 + $0x12a8] sm:$0xff] }
 0x24e   :  { %16423 = vst [vmem:[#allocation594_spill] sm:$0xff] %v10834_v1  ;;  %v10859_v1 = vld [vmem:[%s15004_s6 + $0x12b0] sm:$0xff] }
 0x24f   :  { %16424 = vst [vmem:[#allocation595_spill] sm:$0xff] %v10839_v0  ;;  %v10864_v0 = vld [vmem:[%s15004_s6 + $0x12b8] sm:$0xff] }
 0x250   :  { %16425 = vst [vmem:[#allocation596_spill] sm:$0xff] %v10844_v31  ;;  %v10869_v31 = vld [vmem:[%s15004_s6 + $0x12c0] sm:$0xff] }
 0x251   :  { %16426 = vst [vmem:[#allocation597_spill] sm:$0xff] %v10849_v8  ;;  %v10874_v8 = vld [vmem:[%s15004_s6 + $0x12c8] sm:$0xff] }
 0x252   :  { %16427 = vst [vmem:[#allocation598_spill] sm:$0xff] %v10854_v24  ;;  %v10879_v24 = vld [vmem:[%s15004_s6 + $0x12d0] sm:$0xff] }
 0x253   :  { %16428 = vst [vmem:[#allocation599_spill] sm:$0xff] %v10859_v1  ;;  %v10884_v1 = vld [vmem:[%s15004_s6 + $0x12d8] sm:$0xff] }
 0x254   :  { %16429 = vst [vmem:[#allocation600_spill] sm:$0xff] %v10864_v0  ;;  %v10889_v0 = vld [vmem:[%s15004_s6 + $0x12e0] sm:$0xff] }
 0x255   :  { %16430 = vst [vmem:[#allocation601_spill] sm:$0xff] %v10869_v31  ;;  %v10894_v31 = vld [vmem:[%s15004_s6 + $0x12e8] sm:$0xff] }
 0x256   :  { %16431 = vst [vmem:[#allocation602_spill] sm:$0xff] %v10874_v8  ;;  %v10899_v8 = vld [vmem:[%s15004_s6 + $0x12f0] sm:$0xff] }
 0x257   :  { %16432 = vst [vmem:[#allocation603_spill] sm:$0xff] %v10879_v24  ;;  %v10904_v24 = vld [vmem:[%s15004_s6 + $0x12f8] sm:$0xff] }
 0x258   :  { %16433 = vst [vmem:[#allocation604_spill] sm:$0xff] %v10884_v1  ;;  %v10909_v1 = vld [vmem:[%s15004_s6 + $0x1300] sm:$0xff] }
 0x259   :  { %16434 = vst [vmem:[#allocation605_spill] sm:$0xff] %v10889_v0  ;;  %v10914_v0 = vld [vmem:[%s15004_s6 + $0x1308] sm:$0xff] }
 0x25a   :  { %16435 = vst [vmem:[#allocation606_spill] sm:$0xff] %v10894_v31  ;;  %v10919_v31 = vld [vmem:[%s15004_s6 + $0x1310] sm:$0xff] }
 0x25b   :  { %16436 = vst [vmem:[#allocation607_spill] sm:$0xff] %v10899_v8  ;;  %v10924_v8 = vld [vmem:[%s15004_s6 + $0x1318] sm:$0xff] }
 0x25c   :  { %16437 = vst [vmem:[#allocation608_spill] sm:$0xff] %v10904_v24  ;;  %v10929_v24 = vld [vmem:[%s15004_s6 + $0x1320] sm:$0xff] }
 0x25d   :  { %16438 = vst [vmem:[#allocation609_spill] sm:$0xff] %v10909_v1  ;;  %v10934_v1 = vld [vmem:[%s15004_s6 + $0x1328] sm:$0xff] }
 0x25e   :  { %16439 = vst [vmem:[#allocation610_spill] sm:$0xff] %v10914_v0  ;;  %v10939_v0 = vld [vmem:[%s15004_s6 + $0x1330] sm:$0xff] }
 0x25f   :  { %16440 = vst [vmem:[#allocation611_spill] sm:$0xff] %v10919_v31  ;;  %v10944_v31 = vld [vmem:[%s15004_s6 + $0x1338] sm:$0xff] }
 0x260   :  { %16441 = vst [vmem:[#allocation612_spill] sm:$0xff] %v10924_v8  ;;  %v10949_v8 = vld [vmem:[%s15004_s6 + $0x1340] sm:$0xff] }
 0x261   :  { %16442 = vst [vmem:[#allocation613_spill] sm:$0xff] %v10929_v24  ;;  %v10954_v24 = vld [vmem:[%s15004_s6 + $0x1348] sm:$0xff] }
 0x262   :  { %16443 = vst [vmem:[#allocation614_spill] sm:$0xff] %v10934_v1  ;;  %v10959_v1 = vld [vmem:[%s15004_s6 + $0x1350] sm:$0xff] }
 0x263   :  { %16444 = vst [vmem:[#allocation615_spill] sm:$0xff] %v10939_v0  ;;  %v10964_v0 = vld [vmem:[%s15004_s6 + $0x1358] sm:$0xff] }
 0x264   :  { %16445 = vst [vmem:[#allocation616_spill] sm:$0xff] %v10944_v31  ;;  %v10969_v31 = vld [vmem:[%s15004_s6 + $0x1360] sm:$0xff] }
 0x265   :  { %16446 = vst [vmem:[#allocation617_spill] sm:$0xff] %v10949_v8  ;;  %v10974_v8 = vld [vmem:[%s15004_s6 + $0x1368] sm:$0xff] }
 0x266   :  { %16447 = vst [vmem:[#allocation618_spill] sm:$0xff] %v10954_v24  ;;  %v10979_v24 = vld [vmem:[%s15004_s6 + $0x1370] sm:$0xff] }
 0x267   :  { %16448 = vst [vmem:[#allocation619_spill] sm:$0xff] %v10959_v1  ;;  %v10984_v1 = vld [vmem:[%s15004_s6 + $0x1378] sm:$0xff] }
 0x268   :  { %16449 = vst [vmem:[#allocation620_spill] sm:$0xff] %v10964_v0  ;;  %v10989_v0 = vld [vmem:[%s15004_s6 + $0x1380] sm:$0xff] }
 0x269   :  { %16450 = vst [vmem:[#allocation621_spill] sm:$0xff] %v10969_v31  ;;  %v10994_v31 = vld [vmem:[%s15004_s6 + $0x1388] sm:$0xff] }
 0x26a   :  { %16451 = vst [vmem:[#allocation622_spill] sm:$0xff] %v10974_v8  ;;  %v10999_v8 = vld [vmem:[%s15004_s6 + $0x1390] sm:$0xff] }
 0x26b   :  { %16452 = vst [vmem:[#allocation623_spill] sm:$0xff] %v10979_v24  ;;  %v11004_v24 = vld [vmem:[%s15004_s6 + $0x1398] sm:$0xff] }
 0x26c   :  { %16453 = vst [vmem:[#allocation624_spill] sm:$0xff] %v10984_v1  ;;  %v11009_v1 = vld [vmem:[%s15004_s6 + $0x13a0] sm:$0xff] }
 0x26d   :  { %16454 = vst [vmem:[#allocation625_spill] sm:$0xff] %v10989_v0  ;;  %v11014_v0 = vld [vmem:[%s15004_s6 + $0x13a8] sm:$0xff] }
 0x26e   :  { %16455 = vst [vmem:[#allocation626_spill] sm:$0xff] %v10994_v31  ;;  %v11019_v31 = vld [vmem:[%s15004_s6 + $0x13b0] sm:$0xff] }
 0x26f   :  { %16456 = vst [vmem:[#allocation627_spill] sm:$0xff] %v10999_v8  ;;  %v11024_v8 = vld [vmem:[%s15004_s6 + $0x13b8] sm:$0xff] }
 0x270   :  { %16457 = vst [vmem:[#allocation628_spill] sm:$0xff] %v11004_v24  ;;  %v11029_v24 = vld [vmem:[%s15004_s6 + $0x13c0] sm:$0xff] }
 0x271   :  { %16458 = vst [vmem:[#allocation629_spill] sm:$0xff] %v11009_v1  ;;  %v11034_v1 = vld [vmem:[%s15004_s6 + $0x13c8] sm:$0xff] }
 0x272   :  { %16459 = vst [vmem:[#allocation630_spill] sm:$0xff] %v11014_v0  ;;  %v11039_v0 = vld [vmem:[%s15004_s6 + $0x13d0] sm:$0xff] }
 0x273   :  { %16460 = vst [vmem:[#allocation631_spill] sm:$0xff] %v11019_v31  ;;  %v11044_v31 = vld [vmem:[%s15004_s6 + $0x13d8] sm:$0xff] }
 0x274   :  { %16461 = vst [vmem:[#allocation632_spill] sm:$0xff] %v11024_v8  ;;  %v11049_v8 = vld [vmem:[%s15004_s6 + $0x13e0] sm:$0xff] }
 0x275   :  { %16462 = vst [vmem:[#allocation633_spill] sm:$0xff] %v11029_v24  ;;  %v11054_v24 = vld [vmem:[%s15004_s6 + $0x13e8] sm:$0xff] }
 0x276   :  { %16463 = vst [vmem:[#allocation634_spill] sm:$0xff] %v11034_v1  ;;  %v11059_v1 = vld [vmem:[%s15004_s6 + $0x13f0] sm:$0xff] }
 0x277   :  { %16464 = vst [vmem:[#allocation635_spill] sm:$0xff] %v11039_v0  ;;  %v11064_v0 = vld [vmem:[%s15004_s6 + $0x13f8] sm:$0xff] }
 0x278   :  { %16465 = vst [vmem:[#allocation636_spill] sm:$0xff] %v11044_v31  ;;  %v11069_v31 = vld [vmem:[%s15004_s6 + $0x1400] sm:$0xff] }
 0x279   :  { %16466 = vst [vmem:[#allocation637_spill] sm:$0xff] %v11049_v8  ;;  %v11074_v8 = vld [vmem:[%s15004_s6 + $0x1408] sm:$0xff] }
 0x27a   :  { %16467 = vst [vmem:[#allocation638_spill] sm:$0xff] %v11054_v24  ;;  %v11079_v24 = vld [vmem:[%s15004_s6 + $0x1410] sm:$0xff] }
 0x27b   :  { %16468 = vst [vmem:[#allocation639_spill] sm:$0xff] %v11059_v1  ;;  %v11084_v1 = vld [vmem:[%s15004_s6 + $0x1418] sm:$0xff] }
 0x27c   :  { %16469 = vst [vmem:[#allocation640_spill] sm:$0xff] %v11064_v0  ;;  %v11089_v0 = vld [vmem:[%s15004_s6 + $0x1420] sm:$0xff] }
 0x27d   :  { %16470 = vst [vmem:[#allocation641_spill] sm:$0xff] %v11069_v31  ;;  %v11094_v31 = vld [vmem:[%s15004_s6 + $0x1428] sm:$0xff] }
 0x27e   :  { %16471 = vst [vmem:[#allocation642_spill] sm:$0xff] %v11074_v8  ;;  %v11099_v8 = vld [vmem:[%s15004_s6 + $0x1430] sm:$0xff] }
 0x27f   :  { %16472 = vst [vmem:[#allocation643_spill] sm:$0xff] %v11079_v24  ;;  %v11104_v24 = vld [vmem:[%s15004_s6 + $0x1438] sm:$0xff] }
 0x280   :  { %16473 = vst [vmem:[#allocation644_spill] sm:$0xff] %v11084_v1  ;;  %v11109_v1 = vld [vmem:[%s15004_s6 + $0x1440] sm:$0xff] }
 0x281   :  { %16474 = vst [vmem:[#allocation645_spill] sm:$0xff] %v11089_v0  ;;  %v11114_v0 = vld [vmem:[%s15004_s6 + $0x1448] sm:$0xff] }
 0x282   :  { %16475 = vst [vmem:[#allocation646_spill] sm:$0xff] %v11094_v31  ;;  %v11119_v31 = vld [vmem:[%s15004_s6 + $0x1450] sm:$0xff] }
 0x283   :  { %16476 = vst [vmem:[#allocation647_spill] sm:$0xff] %v11099_v8  ;;  %v11124_v8 = vld [vmem:[%s15004_s6 + $0x1458] sm:$0xff] }
 0x284   :  { %16477 = vst [vmem:[#allocation648_spill] sm:$0xff] %v11104_v24  ;;  %v11129_v24 = vld [vmem:[%s15004_s6 + $0x1460] sm:$0xff] }
 0x285   :  { %16478 = vst [vmem:[#allocation649_spill] sm:$0xff] %v11109_v1  ;;  %v11134_v1 = vld [vmem:[%s15004_s6 + $0x1468] sm:$0xff] }
 0x286   :  { %16479 = vst [vmem:[#allocation650_spill] sm:$0xff] %v11114_v0  ;;  %v11139_v0 = vld [vmem:[%s15004_s6 + $0x1470] sm:$0xff] }
 0x287   :  { %16480 = vst [vmem:[#allocation651_spill] sm:$0xff] %v11119_v31  ;;  %v11144_v31 = vld [vmem:[%s15004_s6 + $0x1478] sm:$0xff] }
 0x288   :  { %16481 = vst [vmem:[#allocation652_spill] sm:$0xff] %v11124_v8  ;;  %v11149_v8 = vld [vmem:[%s15004_s6 + $0x1480] sm:$0xff] }
 0x289   :  { %16482 = vst [vmem:[#allocation653_spill] sm:$0xff] %v11129_v24  ;;  %v11154_v24 = vld [vmem:[%s15004_s6 + $0x1488] sm:$0xff] }
 0x28a   :  { %16483 = vst [vmem:[#allocation654_spill] sm:$0xff] %v11134_v1  ;;  %v11159_v1 = vld [vmem:[%s15004_s6 + $0x1490] sm:$0xff] }
 0x28b   :  { %16484 = vst [vmem:[#allocation655_spill] sm:$0xff] %v11139_v0  ;;  %v11164_v0 = vld [vmem:[%s15004_s6 + $0x1498] sm:$0xff] }
 0x28c   :  { %16485 = vst [vmem:[#allocation656_spill] sm:$0xff] %v11144_v31  ;;  %v11169_v31 = vld [vmem:[%s15004_s6 + $0x14a0] sm:$0xff] }
 0x28d   :  { %16486 = vst [vmem:[#allocation657_spill] sm:$0xff] %v11149_v8  ;;  %v11174_v8 = vld [vmem:[%s15004_s6 + $0x14a8] sm:$0xff] }
 0x28e   :  { %16487 = vst [vmem:[#allocation658_spill] sm:$0xff] %v11154_v24  ;;  %v11179_v24 = vld [vmem:[%s15004_s6 + $0x14b0] sm:$0xff] }
 0x28f   :  { %16488 = vst [vmem:[#allocation659_spill] sm:$0xff] %v11159_v1  ;;  %v11184_v1 = vld [vmem:[%s15004_s6 + $0x14b8] sm:$0xff] }
 0x290   :  { %16489 = vst [vmem:[#allocation660_spill] sm:$0xff] %v11164_v0  ;;  %v11189_v0 = vld [vmem:[%s15004_s6 + $0x14c0] sm:$0xff] }
 0x291   :  { %16490 = vst [vmem:[#allocation661_spill] sm:$0xff] %v11169_v31  ;;  %v11194_v31 = vld [vmem:[%s15004_s6 + $0x14c8] sm:$0xff] }
 0x292   :  { %16491 = vst [vmem:[#allocation662_spill] sm:$0xff] %v11174_v8  ;;  %v11199_v8 = vld [vmem:[%s15004_s6 + $0x14d0] sm:$0xff] }
 0x293   :  { %16492 = vst [vmem:[#allocation663_spill] sm:$0xff] %v11179_v24  ;;  %v11204_v24 = vld [vmem:[%s15004_s6 + $0x14d8] sm:$0xff] }
 0x294   :  { %16493 = vst [vmem:[#allocation664_spill] sm:$0xff] %v11184_v1  ;;  %v11209_v1 = vld [vmem:[%s15004_s6 + $0x14e0] sm:$0xff] }
 0x295   :  { %16494 = vst [vmem:[#allocation665_spill] sm:$0xff] %v11189_v0  ;;  %v11214_v0 = vld [vmem:[%s15004_s6 + $0x14e8] sm:$0xff] }
 0x296   :  { %16495 = vst [vmem:[#allocation666_spill] sm:$0xff] %v11194_v31  ;;  %v11219_v31 = vld [vmem:[%s15004_s6 + $0x14f0] sm:$0xff] }
 0x297   :  { %16496 = vst [vmem:[#allocation667_spill] sm:$0xff] %v11199_v8  ;;  %v11224_v8 = vld [vmem:[%s15004_s6 + $0x14f8] sm:$0xff] }
 0x298   :  { %16497 = vst [vmem:[#allocation668_spill] sm:$0xff] %v11204_v24  ;;  %v11229_v24 = vld [vmem:[%s15004_s6 + $0x1500] sm:$0xff] }
 0x299   :  { %16498 = vst [vmem:[#allocation669_spill] sm:$0xff] %v11209_v1  ;;  %v11234_v1 = vld [vmem:[%s15004_s6 + $0x1508] sm:$0xff] }
 0x29a   :  { %16499 = vst [vmem:[#allocation670_spill] sm:$0xff] %v11214_v0  ;;  %v11239_v0 = vld [vmem:[%s15004_s6 + $0x1510] sm:$0xff] }
 0x29b   :  { %16500 = vst [vmem:[#allocation671_spill] sm:$0xff] %v11219_v31  ;;  %v11244_v31 = vld [vmem:[%s15004_s6 + $0x1518] sm:$0xff] }
 0x29c   :  { %16501 = vst [vmem:[#allocation672_spill] sm:$0xff] %v11224_v8  ;;  %v11249_v8 = vld [vmem:[%s15004_s6 + $0x1520] sm:$0xff] }
 0x29d   :  { %16502 = vst [vmem:[#allocation673_spill] sm:$0xff] %v11229_v24  ;;  %v11254_v24 = vld [vmem:[%s15004_s6 + $0x1528] sm:$0xff] }
 0x29e   :  { %16503 = vst [vmem:[#allocation674_spill] sm:$0xff] %v11234_v1  ;;  %v11259_v1 = vld [vmem:[%s15004_s6 + $0x1530] sm:$0xff] }
 0x29f   :  { %16504 = vst [vmem:[#allocation675_spill] sm:$0xff] %v11239_v0  ;;  %v11264_v0 = vld [vmem:[%s15004_s6 + $0x1538] sm:$0xff] }
 0x2a0   :  { %16505 = vst [vmem:[#allocation676_spill] sm:$0xff] %v11244_v31  ;;  %v11269_v31 = vld [vmem:[%s15004_s6 + $0x1540] sm:$0xff] }
 0x2a1   :  { %16506 = vst [vmem:[#allocation677_spill] sm:$0xff] %v11249_v8  ;;  %v11274_v8 = vld [vmem:[%s15004_s6 + $0x1548] sm:$0xff] }
 0x2a2   :  { %16507 = vst [vmem:[#allocation678_spill] sm:$0xff] %v11254_v24  ;;  %v11279_v24 = vld [vmem:[%s15004_s6 + $0x1550] sm:$0xff] }
 0x2a3   :  { %16508 = vst [vmem:[#allocation679_spill] sm:$0xff] %v11259_v1  ;;  %v11284_v1 = vld [vmem:[%s15004_s6 + $0x1558] sm:$0xff] }
 0x2a4   :  { %16509 = vst [vmem:[#allocation680_spill] sm:$0xff] %v11264_v0  ;;  %v11289_v0 = vld [vmem:[%s15004_s6 + $0x1560] sm:$0xff] }
 0x2a5   :  { %16510 = vst [vmem:[#allocation681_spill] sm:$0xff] %v11269_v31  ;;  %v11294_v31 = vld [vmem:[%s15004_s6 + $0x1568] sm:$0xff] }
 0x2a6   :  { %16511 = vst [vmem:[#allocation682_spill] sm:$0xff] %v11274_v8  ;;  %v11299_v8 = vld [vmem:[%s15004_s6 + $0x1570] sm:$0xff] }
 0x2a7   :  { %16512 = vst [vmem:[#allocation683_spill] sm:$0xff] %v11279_v24  ;;  %v11304_v24 = vld [vmem:[%s15004_s6 + $0x1578] sm:$0xff] }
 0x2a8   :  { %16513 = vst [vmem:[#allocation684_spill] sm:$0xff] %v11284_v1  ;;  %v11309_v1 = vld [vmem:[%s15004_s6 + $0x1580] sm:$0xff] }
 0x2a9   :  { %16514 = vst [vmem:[#allocation685_spill] sm:$0xff] %v11289_v0  ;;  %v11314_v0 = vld [vmem:[%s15004_s6 + $0x1588] sm:$0xff] }
 0x2aa   :  { %16515 = vst [vmem:[#allocation686_spill] sm:$0xff] %v11294_v31  ;;  %v11319_v31 = vld [vmem:[%s15004_s6 + $0x1590] sm:$0xff] }
 0x2ab   :  { %16516 = vst [vmem:[#allocation687_spill] sm:$0xff] %v11299_v8  ;;  %v11324_v8 = vld [vmem:[%s15004_s6 + $0x1598] sm:$0xff] }
 0x2ac   :  { %16517 = vst [vmem:[#allocation688_spill] sm:$0xff] %v11304_v24  ;;  %v11329_v24 = vld [vmem:[%s15004_s6 + $0x15a0] sm:$0xff] }
 0x2ad   :  { %16518 = vst [vmem:[#allocation689_spill] sm:$0xff] %v11309_v1  ;;  %v11334_v1 = vld [vmem:[%s15004_s6 + $0x15a8] sm:$0xff] }
 0x2ae   :  { %16519 = vst [vmem:[#allocation690_spill] sm:$0xff] %v11314_v0  ;;  %v11339_v0 = vld [vmem:[%s15004_s6 + $0x15b0] sm:$0xff] }
 0x2af   :  { %16520 = vst [vmem:[#allocation691_spill] sm:$0xff] %v11319_v31  ;;  %v11344_v31 = vld [vmem:[%s15004_s6 + $0x15b8] sm:$0xff] }
 0x2b0   :  { %16521 = vst [vmem:[#allocation692_spill] sm:$0xff] %v11324_v8  ;;  %v11349_v8 = vld [vmem:[%s15004_s6 + $0x15c0] sm:$0xff] }
 0x2b1   :  { %16522 = vst [vmem:[#allocation693_spill] sm:$0xff] %v11329_v24  ;;  %v11354_v24 = vld [vmem:[%s15004_s6 + $0x15c8] sm:$0xff] }
 0x2b2   :  { %16523 = vst [vmem:[#allocation694_spill] sm:$0xff] %v11334_v1  ;;  %v11359_v1 = vld [vmem:[%s15004_s6 + $0x15d0] sm:$0xff] }
 0x2b3   :  { %16524 = vst [vmem:[#allocation695_spill] sm:$0xff] %v11339_v0  ;;  %v11364_v0 = vld [vmem:[%s15004_s6 + $0x15d8] sm:$0xff] }
 0x2b4   :  { %16525 = vst [vmem:[#allocation696_spill] sm:$0xff] %v11344_v31  ;;  %v11369_v31 = vld [vmem:[%s15004_s6 + $0x15e0] sm:$0xff] }
 0x2b5   :  { %16526 = vst [vmem:[#allocation697_spill] sm:$0xff] %v11349_v8  ;;  %v11374_v8 = vld [vmem:[%s15004_s6 + $0x15e8] sm:$0xff] }
 0x2b6   :  { %16527 = vst [vmem:[#allocation698_spill] sm:$0xff] %v11354_v24  ;;  %v11379_v24 = vld [vmem:[%s15004_s6 + $0x15f0] sm:$0xff] }
 0x2b7   :  { %16528 = vst [vmem:[#allocation699_spill] sm:$0xff] %v11359_v1  ;;  %v11384_v1 = vld [vmem:[%s15004_s6 + $0x15f8] sm:$0xff] }
 0x2b8   :  { %16529 = vst [vmem:[#allocation700_spill] sm:$0xff] %v11364_v0  ;;  %v11389_v0 = vld [vmem:[%s15004_s6 + $0x1600] sm:$0xff] }
 0x2b9   :  { %16530 = vst [vmem:[#allocation701_spill] sm:$0xff] %v11369_v31  ;;  %v11394_v31 = vld [vmem:[%s15004_s6 + $0x1608] sm:$0xff] }
 0x2ba   :  { %16531 = vst [vmem:[#allocation702_spill] sm:$0xff] %v11374_v8  ;;  %v11399_v8 = vld [vmem:[%s15004_s6 + $0x1610] sm:$0xff] }
 0x2bb   :  { %16532 = vst [vmem:[#allocation703_spill] sm:$0xff] %v11379_v24  ;;  %v11404_v24 = vld [vmem:[%s15004_s6 + $0x1618] sm:$0xff] }
 0x2bc   :  { %16533 = vst [vmem:[#allocation704_spill] sm:$0xff] %v11384_v1  ;;  %v11409_v1 = vld [vmem:[%s15004_s6 + $0x1620] sm:$0xff] }
 0x2bd   :  { %16534 = vst [vmem:[#allocation705_spill] sm:$0xff] %v11389_v0  ;;  %v11414_v0 = vld [vmem:[%s15004_s6 + $0x1628] sm:$0xff] }
 0x2be   :  { %16535 = vst [vmem:[#allocation706_spill] sm:$0xff] %v11394_v31  ;;  %v11419_v31 = vld [vmem:[%s15004_s6 + $0x1630] sm:$0xff] }
 0x2bf   :  { %16536 = vst [vmem:[#allocation707_spill] sm:$0xff] %v11399_v8  ;;  %v11424_v8 = vld [vmem:[%s15004_s6 + $0x1638] sm:$0xff] }
 0x2c0   :  { %16537 = vst [vmem:[#allocation708_spill] sm:$0xff] %v11404_v24  ;;  %v11429_v24 = vld [vmem:[%s15004_s6 + $0x1640] sm:$0xff] }
 0x2c1   :  { %16538 = vst [vmem:[#allocation709_spill] sm:$0xff] %v11409_v1  ;;  %v11434_v1 = vld [vmem:[%s15004_s6 + $0x1648] sm:$0xff] }
 0x2c2   :  { %16539 = vst [vmem:[#allocation710_spill] sm:$0xff] %v11414_v0  ;;  %v11439_v0 = vld [vmem:[%s15004_s6 + $0x1650] sm:$0xff] }
 0x2c3   :  { %16540 = vst [vmem:[#allocation711_spill] sm:$0xff] %v11419_v31  ;;  %v11444_v31 = vld [vmem:[%s15004_s6 + $0x1658] sm:$0xff] }
 0x2c4   :  { %16541 = vst [vmem:[#allocation712_spill] sm:$0xff] %v11424_v8  ;;  %v11449_v8 = vld [vmem:[%s15004_s6 + $0x1660] sm:$0xff] }
 0x2c5   :  { %16542 = vst [vmem:[#allocation713_spill] sm:$0xff] %v11429_v24  ;;  %v11454_v24 = vld [vmem:[%s15004_s6 + $0x1668] sm:$0xff] }
 0x2c6   :  { %16543 = vst [vmem:[#allocation714_spill] sm:$0xff] %v11434_v1  ;;  %v11459_v1 = vld [vmem:[%s15004_s6 + $0x1670] sm:$0xff] }
 0x2c7   :  { %16544 = vst [vmem:[#allocation715_spill] sm:$0xff] %v11439_v0  ;;  %v11464_v0 = vld [vmem:[%s15004_s6 + $0x1678] sm:$0xff] }
 0x2c8   :  { %16545 = vst [vmem:[#allocation716_spill] sm:$0xff] %v11444_v31  ;;  %v11469_v31 = vld [vmem:[%s15004_s6 + $0x1680] sm:$0xff] }
 0x2c9   :  { %16546 = vst [vmem:[#allocation717_spill] sm:$0xff] %v11449_v8  ;;  %v11474_v8 = vld [vmem:[%s15004_s6 + $0x1688] sm:$0xff] }
 0x2ca   :  { %16547 = vst [vmem:[#allocation718_spill] sm:$0xff] %v11454_v24  ;;  %v11479_v24 = vld [vmem:[%s15004_s6 + $0x1690] sm:$0xff] }
 0x2cb   :  { %16548 = vst [vmem:[#allocation719_spill] sm:$0xff] %v11459_v1  ;;  %v11484_v1 = vld [vmem:[%s15004_s6 + $0x1698] sm:$0xff] }
 0x2cc   :  { %16549 = vst [vmem:[#allocation720_spill] sm:$0xff] %v11464_v0  ;;  %v11489_v0 = vld [vmem:[%s15004_s6 + $0x16a0] sm:$0xff] }
 0x2cd   :  { %16550 = vst [vmem:[#allocation721_spill] sm:$0xff] %v11469_v31  ;;  %v11494_v31 = vld [vmem:[%s15004_s6 + $0x16a8] sm:$0xff] }
 0x2ce   :  { %16551 = vst [vmem:[#allocation722_spill] sm:$0xff] %v11474_v8  ;;  %v11499_v8 = vld [vmem:[%s15004_s6 + $0x16b0] sm:$0xff] }
 0x2cf   :  { %16552 = vst [vmem:[#allocation723_spill] sm:$0xff] %v11479_v24  ;;  %v11504_v24 = vld [vmem:[%s15004_s6 + $0x16b8] sm:$0xff] }
 0x2d0   :  { %16553 = vst [vmem:[#allocation724_spill] sm:$0xff] %v11484_v1  ;;  %v11509_v1 = vld [vmem:[%s15004_s6 + $0x16c0] sm:$0xff] }
 0x2d1   :  { %16554 = vst [vmem:[#allocation725_spill] sm:$0xff] %v11489_v0  ;;  %v11514_v0 = vld [vmem:[%s15004_s6 + $0x16c8] sm:$0xff] }
 0x2d2   :  { %16555 = vst [vmem:[#allocation726_spill] sm:$0xff] %v11494_v31  ;;  %v11519_v31 = vld [vmem:[%s15004_s6 + $0x16d0] sm:$0xff] }
 0x2d3   :  { %16556 = vst [vmem:[#allocation727_spill] sm:$0xff] %v11499_v8  ;;  %v11524_v8 = vld [vmem:[%s15004_s6 + $0x16d8] sm:$0xff] }
 0x2d4   :  { %16557 = vst [vmem:[#allocation728_spill] sm:$0xff] %v11504_v24  ;;  %v11529_v24 = vld [vmem:[%s15004_s6 + $0x16e0] sm:$0xff] }
 0x2d5   :  { %16558 = vst [vmem:[#allocation729_spill] sm:$0xff] %v11509_v1  ;;  %v11534_v1 = vld [vmem:[%s15004_s6 + $0x16e8] sm:$0xff] }
 0x2d6   :  { %16559 = vst [vmem:[#allocation730_spill] sm:$0xff] %v11514_v0  ;;  %v11539_v0 = vld [vmem:[%s15004_s6 + $0x16f0] sm:$0xff] }
 0x2d7   :  { %16560 = vst [vmem:[#allocation731_spill] sm:$0xff] %v11519_v31  ;;  %v11544_v31 = vld [vmem:[%s15004_s6 + $0x16f8] sm:$0xff] }
 0x2d8   :  { %16561 = vst [vmem:[#allocation732_spill] sm:$0xff] %v11524_v8  ;;  %v11549_v8 = vld [vmem:[%s15004_s6 + $0x1700] sm:$0xff] }
 0x2d9   :  { %16562 = vst [vmem:[#allocation733_spill] sm:$0xff] %v11529_v24  ;;  %v11554_v24 = vld [vmem:[%s15004_s6 + $0x1708] sm:$0xff] }
 0x2da   :  { %16563 = vst [vmem:[#allocation734_spill] sm:$0xff] %v11534_v1  ;;  %v11559_v1 = vld [vmem:[%s15004_s6 + $0x1710] sm:$0xff] }
 0x2db   :  { %16564 = vst [vmem:[#allocation735_spill] sm:$0xff] %v11539_v0  ;;  %v11564_v0 = vld [vmem:[%s15004_s6 + $0x1718] sm:$0xff] }
 0x2dc   :  { %16565 = vst [vmem:[#allocation736_spill] sm:$0xff] %v11544_v31  ;;  %v11569_v31 = vld [vmem:[%s15004_s6 + $0x1720] sm:$0xff] }
 0x2dd   :  { %16566 = vst [vmem:[#allocation737_spill] sm:$0xff] %v11549_v8  ;;  %v11574_v8 = vld [vmem:[%s15004_s6 + $0x1728] sm:$0xff] }
 0x2de   :  { %16567 = vst [vmem:[#allocation738_spill] sm:$0xff] %v11554_v24  ;;  %v11579_v24 = vld [vmem:[%s15004_s6 + $0x1730] sm:$0xff] }
 0x2df   :  { %16568 = vst [vmem:[#allocation739_spill] sm:$0xff] %v11559_v1  ;;  %v11584_v1 = vld [vmem:[%s15004_s6 + $0x1738] sm:$0xff] }
 0x2e0   :  { %16569 = vst [vmem:[#allocation740_spill] sm:$0xff] %v11564_v0  ;;  %v11589_v0 = vld [vmem:[%s15004_s6 + $0x1740] sm:$0xff] }
 0x2e1   :  { %16570 = vst [vmem:[#allocation741_spill] sm:$0xff] %v11569_v31  ;;  %v11594_v31 = vld [vmem:[%s15004_s6 + $0x1748] sm:$0xff] }
 0x2e2   :  { %16571 = vst [vmem:[#allocation742_spill] sm:$0xff] %v11574_v8  ;;  %v11599_v8 = vld [vmem:[%s15004_s6 + $0x1750] sm:$0xff] }
 0x2e3   :  { %16572 = vst [vmem:[#allocation743_spill] sm:$0xff] %v11579_v24  ;;  %v11604_v24 = vld [vmem:[%s15004_s6 + $0x1758] sm:$0xff] }
 0x2e4   :  { %16573 = vst [vmem:[#allocation744_spill] sm:$0xff] %v11584_v1  ;;  %v11609_v1 = vld [vmem:[%s15004_s6 + $0x1760] sm:$0xff] }
 0x2e5   :  { %16574 = vst [vmem:[#allocation745_spill] sm:$0xff] %v11589_v0  ;;  %v11614_v0 = vld [vmem:[%s15004_s6 + $0x1768] sm:$0xff] }
 0x2e6   :  { %16575 = vst [vmem:[#allocation746_spill] sm:$0xff] %v11594_v31  ;;  %v11619_v31 = vld [vmem:[%s15004_s6 + $0x1770] sm:$0xff] }
 0x2e7   :  { %16576 = vst [vmem:[#allocation747_spill] sm:$0xff] %v11599_v8  ;;  %v11624_v8 = vld [vmem:[%s15004_s6 + $0x1778] sm:$0xff] }
 0x2e8   :  { %16577 = vst [vmem:[#allocation748_spill] sm:$0xff] %v11604_v24  ;;  %v11629_v24 = vld [vmem:[%s15004_s6 + $0x1780] sm:$0xff] }
 0x2e9   :  { %16578 = vst [vmem:[#allocation749_spill] sm:$0xff] %v11609_v1  ;;  %v11634_v1 = vld [vmem:[%s15004_s6 + $0x1788] sm:$0xff] }
 0x2ea   :  { %16579 = vst [vmem:[#allocation750_spill] sm:$0xff] %v11614_v0  ;;  %v11639_v0 = vld [vmem:[%s15004_s6 + $0x1790] sm:$0xff] }
 0x2eb   :  { %16580 = vst [vmem:[#allocation751_spill] sm:$0xff] %v11619_v31  ;;  %v11644_v31 = vld [vmem:[%s15004_s6 + $0x1798] sm:$0xff] }
 0x2ec   :  { %16581 = vst [vmem:[#allocation752_spill] sm:$0xff] %v11624_v8  ;;  %v11649_v8 = vld [vmem:[%s15004_s6 + $0x17a0] sm:$0xff] }
 0x2ed   :  { %16582 = vst [vmem:[#allocation753_spill] sm:$0xff] %v11629_v24  ;;  %v11654_v24 = vld [vmem:[%s15004_s6 + $0x17a8] sm:$0xff] }
 0x2ee   :  { %16583 = vst [vmem:[#allocation754_spill] sm:$0xff] %v11634_v1  ;;  %v11659_v1 = vld [vmem:[%s15004_s6 + $0x17b0] sm:$0xff] }
 0x2ef   :  { %16584 = vst [vmem:[#allocation755_spill] sm:$0xff] %v11639_v0  ;;  %v11664_v0 = vld [vmem:[%s15004_s6 + $0x17b8] sm:$0xff] }
 0x2f0   :  { %16585 = vst [vmem:[#allocation756_spill] sm:$0xff] %v11644_v31  ;;  %v11669_v31 = vld [vmem:[%s15004_s6 + $0x17c0] sm:$0xff] }
 0x2f1   :  { %16586 = vst [vmem:[#allocation757_spill] sm:$0xff] %v11649_v8  ;;  %v11674_v8 = vld [vmem:[%s15004_s6 + $0x17c8] sm:$0xff] }
 0x2f2   :  { %16587 = vst [vmem:[#allocation758_spill] sm:$0xff] %v11654_v24  ;;  %v11679_v24 = vld [vmem:[%s15004_s6 + $0x17d0] sm:$0xff] }
 0x2f3   :  { %16588 = vst [vmem:[#allocation759_spill] sm:$0xff] %v11659_v1  ;;  %v11684_v1 = vld [vmem:[%s15004_s6 + $0x17d8] sm:$0xff] }
 0x2f4   :  { %16589 = vst [vmem:[#allocation760_spill] sm:$0xff] %v11664_v0  ;;  %v11689_v0 = vld [vmem:[%s15004_s6 + $0x17e0] sm:$0xff] }
 0x2f5   :  { %16590 = vst [vmem:[#allocation761_spill] sm:$0xff] %v11669_v31  ;;  %v11694_v31 = vld [vmem:[%s15004_s6 + $0x17e8] sm:$0xff] }
 0x2f6   :  { %16591 = vst [vmem:[#allocation762_spill] sm:$0xff] %v11674_v8  ;;  %v11699_v8 = vld [vmem:[%s15004_s6 + $0x17f0] sm:$0xff] }
 0x2f7   :  { %16592 = vst [vmem:[#allocation763_spill] sm:$0xff] %v11679_v24  ;;  %v11704_v24 = vld [vmem:[%s15004_s6 + $0x17f8] sm:$0xff] }
 0x2f8   :  { %16593 = vst [vmem:[#allocation764_spill] sm:$0xff] %v11684_v1  ;;  %v11709_v1 = vld [vmem:[%s15004_s6 + $0x1800] sm:$0xff] }
 0x2f9   :  { %16594 = vst [vmem:[#allocation765_spill] sm:$0xff] %v11689_v0  ;;  %v11714_v0 = vld [vmem:[%s15004_s6 + $0x1808] sm:$0xff] }
 0x2fa   :  { %16595 = vst [vmem:[#allocation766_spill] sm:$0xff] %v11694_v31  ;;  %v11719_v31 = vld [vmem:[%s15004_s6 + $0x1810] sm:$0xff] }
 0x2fb   :  { %16596 = vst [vmem:[#allocation767_spill] sm:$0xff] %v11699_v8  ;;  %v11724_v8 = vld [vmem:[%s15004_s6 + $0x1818] sm:$0xff] }
 0x2fc   :  { %16597 = vst [vmem:[#allocation768_spill] sm:$0xff] %v11704_v24  ;;  %v11729_v24 = vld [vmem:[%s15004_s6 + $0x1820] sm:$0xff] }
 0x2fd   :  { %16598 = vst [vmem:[#allocation769_spill] sm:$0xff] %v11709_v1  ;;  %v11734_v1 = vld [vmem:[%s15004_s6 + $0x1828] sm:$0xff] }
 0x2fe   :  { %16599 = vst [vmem:[#allocation770_spill] sm:$0xff] %v11714_v0  ;;  %v11739_v0 = vld [vmem:[%s15004_s6 + $0x1830] sm:$0xff] }
 0x2ff   :  { %16600 = vst [vmem:[#allocation771_spill] sm:$0xff] %v11719_v31  ;;  %v11744_v31 = vld [vmem:[%s15004_s6 + $0x1838] sm:$0xff] }
 0x300   :  { %16601 = vst [vmem:[#allocation772_spill] sm:$0xff] %v11724_v8  ;;  %v11749_v8 = vld [vmem:[%s15004_s6 + $0x1840] sm:$0xff] }
 0x301   :  { %16602 = vst [vmem:[#allocation773_spill] sm:$0xff] %v11729_v24  ;;  %v11754_v24 = vld [vmem:[%s15004_s6 + $0x1848] sm:$0xff] }
 0x302   :  { %16603 = vst [vmem:[#allocation774_spill] sm:$0xff] %v11734_v1  ;;  %v11759_v1 = vld [vmem:[%s15004_s6 + $0x1850] sm:$0xff] }
 0x303   :  { %16604 = vst [vmem:[#allocation775_spill] sm:$0xff] %v11739_v0  ;;  %v11764_v0 = vld [vmem:[%s15004_s6 + $0x1858] sm:$0xff] }
 0x304   :  { %16605 = vst [vmem:[#allocation776_spill] sm:$0xff] %v11744_v31  ;;  %v11769_v31 = vld [vmem:[%s15004_s6 + $0x1860] sm:$0xff] }
 0x305   :  { %16606 = vst [vmem:[#allocation777_spill] sm:$0xff] %v11749_v8  ;;  %v11774_v8 = vld [vmem:[%s15004_s6 + $0x1868] sm:$0xff] }
 0x306   :  { %16607 = vst [vmem:[#allocation778_spill] sm:$0xff] %v11754_v24  ;;  %v11779_v24 = vld [vmem:[%s15004_s6 + $0x1870] sm:$0xff] }
 0x307   :  { %16608 = vst [vmem:[#allocation779_spill] sm:$0xff] %v11759_v1  ;;  %v11784_v1 = vld [vmem:[%s15004_s6 + $0x1878] sm:$0xff] }
 0x308   :  { %16609 = vst [vmem:[#allocation780_spill] sm:$0xff] %v11764_v0 }
 0x309   :  { %16610 = vst [vmem:[#allocation781_spill] sm:$0xff] %v11769_v31 }
 0x30a   :  { %16611 = vst [vmem:[#allocation782_spill] sm:$0xff] %v11774_v8 }
 0x30b   :  { %16612 = vst [vmem:[#allocation783_spill] sm:$0xff] %v11779_v24 }
 0x30c   :  { %16613 = vst [vmem:[#allocation784_spill] sm:$0xff] %v11784_v1 }
 0x30d   :  { %1607 = vsyncadd [#allocation3], 100352  ;;  %v1630_v31 = vld [vmem:[%s14999_s1 + $0x78] sm:$0xff]  ;;  %v1629_v0 = vld [vmem:[%s14999_s1 + $0x70] sm:$0xff]  ;;  %vm1713_vm0 = vcmask 130048  }
 0x30e   :  { %1717 = vmatpush.msra.mxu0 %v1630_v31  ;;  %v1646_v8 = vld [vmem:[%s14999_s1 + $0xf8] sm:$0xff]  ;;  %v1645_v24 = vld [vmem:[%s14999_s1 + $0xf0] sm:$0xff]  ;;  %v1628_v1 = vld [vmem:[%s14999_s1 + $0x68] sm:$0xff] }
 0x30f   :  { %1737 = vmatpush.msra.mxu1 %v1646_v8  ;;  %v1644_v38 = vld [vmem:[%s14999_s1 + $0xe8] sm:$0xff]  ;;  %v1627_v31 = vld [vmem:[%s14999_s1 + $0x60] sm:$0xff]  ;;  %v1626_v8 = vld [vmem:[%s14999_s1 + $0x58] sm:$0xff] }
 0x310   :  { %1718 = vmatpush.msra.mxu0 %v1629_v0  ;;  %v1643_v52 = vld [vmem:[%s14999_s1 + $0xe0] sm:$0xff]  ;;  %v1662_v0 = vld [vmem:[%s14999_s1 + $0x178] sm:$0xff]  ;;  %v1624_v15 = vld [vmem:[%s14999_s1 + $0x48] sm:$0xff] }
 0x311   :  { %1738 = vmatpush.msra.mxu1 %v1645_v24  ;;  %v1642_v24 = vld [vmem:[%s14999_s1 + $0xd8] sm:$0xff]  ;;  %1757 = vmatpush.msra.mxu2 %v1662_v0  ;;  %v1660_v0 = vld [vmem:[%s14999_s1 + $0x168] sm:$0xff] }
 0x312   :  { %1719 = vmatpush.msra.mxu0 %v1628_v1  ;;  %v1661_v1 = vld [vmem:[%s14999_s1 + $0x170] sm:$0xff]  ;;  %v1678_v7 = vld [vmem:[%s14999_s1 + $0x1f8] sm:$0xff]  ;;  %v1676_v47 = vld [vmem:[%s14999_s1 + $0x1e8] sm:$0xff] }
 0x313   :  { %1739 = vmatpush.msra.mxu1 %v1644_v38  ;;  %v1625_v38 = vld [vmem:[%s14999_s1 + $0x50] sm:$0xff]  ;;  %1758 = vmatpush.msra.mxu2 %v1661_v1  ;;  %v1640_v1 = vld [vmem:[%s14999_s1 + $0xc8] sm:$0xff] }
 0x314   :  { %1720 = vmatpush.msra.mxu0 %v1627_v31  ;;  %v1641_v31 = vld [vmem:[%s14999_s1 + $0xd0] sm:$0xff]  ;;  %1777 = vmatpush.msra.mxu3 %v1678_v7  ;;  %v1658_v7 = vld [vmem:[%s14999_s1 + $0x158] sm:$0xff] }
 0x315   :  { %1740 = vmatpush.msra.mxu1 %v1643_v52  ;;  %v1677_v52 = vld [vmem:[%s14999_s1 + $0x1f0] sm:$0xff]  ;;  %1759 = vmatpush.msra.mxu2 %v1660_v0  ;;  %v1675_v0 = vld [vmem:[%s14999_s1 + $0x1e0] sm:$0xff] }
 0x316   :  { %1721 = vmatpush.msra.mxu0 %v1626_v8  ;;  %v1659_v8 = vld [vmem:[%s14999_s1 + $0x160] sm:$0xff]  ;;  %1778 = vmatpush.msra.mxu3 %v1677_v52  ;;  %v1657_v52 = vld [vmem:[%s14999_s1 + $0x150] sm:$0xff] }
 0x317   :  { %1741 = vmatpush.msra.mxu1 %v1642_v24  ;;  %v1623_v24 = vld [vmem:[%s14999_s1 + $0x40] sm:$0xff]  ;;  %1760 = vmatpush.msra.mxu2 %v1659_v8  ;;  %v1674_v8 = vld [vmem:[%s14999_s1 + $0x1d8] sm:$0xff] }
 0x318   :  { %1722 = vmatpush.msra.mxu0 %v1625_v38  ;;  %v1639_v38 = vld [vmem:[%s14999_s1 + $0xc0] sm:$0xff]  ;;  %1779 = vmatpush.msra.mxu3 %v1676_v47  ;;  %v1656_v47 = vld [vmem:[%s14999_s1 + $0x148] sm:$0xff] }
 0x319   :  { %1742 = vmatpush.msra.mxu1 %v1641_v31  ;;  %v1622_v31 = vld [vmem:[%s14999_s1 + $0x38] sm:$0xff]  ;;  %1761 = vmatpush.msra.mxu2 %v1658_v7  ;;  %v1673_v7 = vld [vmem:[%s14999_s1 + $0x1d0] sm:$0xff] }
 0x31a   :  { %1723 = vmatpush.msra.mxu0 %v1624_v15  ;;  %v1638_v15 = vld [vmem:[%s14999_s1 + $0xb8] sm:$0xff]  ;;  %1780 = vmatpush.msra.mxu3 %v1675_v0  ;;  %v1655_v0 = vld [vmem:[%s14999_s1 + $0x140] sm:$0xff] }
 0x31b   :  { %1743 = vmatpush.msra.mxu1 %v1640_v1  ;;  %v1621_v1 = vld [vmem:[%s14999_s1 + $0x30] sm:$0xff]  ;;  %1762 = vmatpush.msra.mxu2 %v1657_v52  ;;  %v1672_v52 = vld [vmem:[%s14999_s1 + $0x1c8] sm:$0xff] }
 0x31c   :  { %1724 = vmatpush.msra.mxu0 %v1623_v24  ;;  %v1637_v24 = vld [vmem:[%s14999_s1 + $0xb0] sm:$0xff]  ;;  %1781 = vmatpush.msra.mxu3 %v1674_v8  ;;  %v1654_v8 = vld [vmem:[%s14999_s1 + $0x138] sm:$0xff] }
 0x31d   :  { %1744 = vmatpush.msra.mxu1 %v1639_v38  ;;  %v1620_v38 = vld [vmem:[%s14999_s1 + $0x28] sm:$0xff]  ;;  %1763 = vmatpush.msra.mxu2 %v1656_v47  ;;  %v1671_v47 = vld [vmem:[%s14999_s1 + $0x1c0] sm:$0xff] }
 0x31e   :  { %1725 = vmatpush.msra.mxu0 %v1622_v31  ;;  %v1636_v31 = vld [vmem:[%s14999_s1 + $0xa8] sm:$0xff]  ;;  %1782 = vmatpush.msra.mxu3 %v1673_v7  ;;  %v1653_v7 = vld [vmem:[%s14999_s1 + $0x130] sm:$0xff] }
 0x31f   :  { %1745 = vmatpush.msra.mxu1 %v1638_v15  ;;  %v1619_v15 = vld [vmem:[%s14999_s1 + $0x20] sm:$0xff]  ;;  %1764 = vmatpush.msra.mxu2 %v1655_v0  ;;  %v1670_v0 = vld [vmem:[%s14999_s1 + $0x1b8] sm:$0xff] }
 0x320   :  { %1726 = vmatpush.msra.mxu0 %v1621_v1  ;;  %v1635_v1 = vld [vmem:[%s14999_s1 + $0xa0] sm:$0xff]  ;;  %1783 = vmatpush.msra.mxu3 %v1672_v52  ;;  %v1652_v52 = vld [vmem:[%s14999_s1 + $0x128] sm:$0xff] }
 0x321   :  { %1746 = vmatpush.msra.mxu1 %v1637_v24  ;;  %v1618_v24 = vld [vmem:[%s14999_s1 + $0x18] sm:$0xff]  ;;  %1765 = vmatpush.msra.mxu2 %v1654_v8  ;;  %v1669_v8 = vld [vmem:[%s14999_s1 + $0x1b0] sm:$0xff] }
 0x322   :  { %1727 = vmatpush.msra.mxu0 %v1620_v38  ;;  %v1634_v38 = vld [vmem:[%s14999_s1 + $0x98] sm:$0xff]  ;;  %1784 = vmatpush.msra.mxu3 %v1671_v47  ;;  %v1651_v47 = vld [vmem:[%s14999_s1 + $0x120] sm:$0xff] }
 0x323   :  { %1747 = vmatpush.msra.mxu1 %v1636_v31  ;;  %v1617_v31 = vld [vmem:[%s14999_s1 + $0x10] sm:$0xff]  ;;  %1766 = vmatpush.msra.mxu2 %v1653_v7  ;;  %v1668_v7 = vld [vmem:[%s14999_s1 + $0x1a8] sm:$0xff] }
 0x324   :  { %1728 = vmatpush.msra.mxu0 %v1619_v15  ;;  %v1633_v15 = vld [vmem:[%s14999_s1 + $0x90] sm:$0xff]  ;;  %1785 = vmatpush.msra.mxu3 %v1670_v0  ;;  %v1650_v0 = vld [vmem:[%s14999_s1 + $0x118] sm:$0xff] }
 0x325   :  { %1748 = vmatpush.msra.mxu1 %v1635_v1  ;;  %v1616_v1 = vld [vmem:[%s14999_s1 + $0x8] sm:$0xff]  ;;  %1767 = vmatpush.msra.mxu2 %v1652_v52  ;;  %v1631_v52 = vld [vmem:[%s14999_s1 + $0x80] sm:$0xff] }
 0x326   :  { %1729 = vmatpush.msra.mxu0 %v1618_v24  ;;  %v1632_v24 = vld [vmem:[%s14999_s1 + $0x88] sm:$0xff]  ;;  %1786 = vmatpush.msra.mxu3 %v1669_v8  ;;  %v1667_v8 = vld [vmem:[%s14999_s1 + $0x1a0] sm:$0xff] }
 0x327   :  { %1749 = vmatpush.msra.mxu1 %v1634_v38  ;;  %v1615_v38 = vld [vmem:[%s14999_s1] sm:$0xff]  ;;  %1768 = vmatpush.msra.mxu2 %v1651_v47  ;;  %v1649_v47 = vld [vmem:[%s14999_s1 + $0x110] sm:$0xff] }
 0x328   :  { %1730 = vmatpush.msra.mxu0 %v1617_v31  ;;  %v1694_v31 = vld [vmem:[%s14999_s1 + $0x278] sm:$0xff]  ;;  %1787 = vmatpush.msra.mxu3 %v1668_v7 }
 0x329   :  { %1750 = vmatpush.msra.mxu1 %v1633_v15  ;;  %v1710_v15 = vld [vmem:[%s14999_s1 + $0x2f8] sm:$0xff]  ;;  %1769 = vmatpush.msra.mxu2 %v1650_v0  ;;  %v1648_v0 = vld [vmem:[%s14999_s1 + $0x108] sm:$0xff] }
 0x32a   :  { %1731 = vmatpush.msra.mxu0 %v1616_v1  ;;  %v1693_v1 = vld [vmem:[%s14999_s1 + $0x270] sm:$0xff]  ;;  %v1666_v7 = vld [vmem:[%s14999_s1 + $0x198] sm:$0xff]  ;;  %1788 = vmatpush.msra.mxu3 %v1667_v8  ;;  %v1647_v8 = vld [vmem:[%s14999_s1 + $0x100] sm:$0xff] }
 0x32b   :  { %1751 = vmatpush.msra.mxu1 %v1632_v24  ;;  %v1709_v24 = vld [vmem:[%s14999_s1 + $0x2f0] sm:$0xff]  ;;  %1770 = vmatpush.msra.mxu2 %v1649_v47  ;;  %v1664_v47 = vld [vmem:[%s14999_s1 + $0x188] sm:$0xff] }
 0x32c   :  { %1732 = vmatpush.msra.mxu0 %v1615_v38  ;;  %v1692_v38 = vld [vmem:[%s14999_s1 + $0x268] sm:$0xff]  ;;  %1789 = vmatpush.msra.mxu3 %v1666_v7  ;;  %v1610_v7 = vld [vmem:[%s14998_s0 + $0x10] sm:$0xff] }
 0x32d   :  { %1752 = vmatpush.msra.mxu1 %v1631_v52  ;;  %v1665_v52 = vld [vmem:[%s14999_s1 + $0x190] sm:$0xff]  ;;  %1771 = vmatpush.msra.mxu2 %v1648_v0  ;;  %v1663_v0 = vld [vmem:[%s14999_s1 + $0x180] sm:$0xff] }
 0x32e   :  { %1797 = vmatpush.msrb.mxu0 %v1694_v31  ;;  %v1708_v31 = vld [vmem:[%s14999_s1 + $0x2e8] sm:$0xff]  ;;  %1790 = vmatpush.msra.mxu3 %v1665_v52  ;;  %v1611_v52 = vld [vmem:[%s14998_s0 + $0x18] sm:$0xff] }
 0x32f   :  { %1817 = vmatpush.msrb.mxu1 %v1710_v15  ;;  %v1691_v15 = vld [vmem:[%s14999_s1 + $0x260] sm:$0xff]  ;;  %1772 = vmatpush.msra.mxu2 %v1647_v8  ;;  %v1712_v8 = vld [vmem:[%s14999_s1 + $0x308] sm:$0xff] }
 0x330   :  { %1798 = vmatpush.msrb.mxu0 %v1693_v1  ;;  %v1707_v1 = vld [vmem:[%s14999_s1 + $0x2e0] sm:$0xff]  ;;  %1791 = vmatpush.msra.mxu3 %v1664_v47  ;;  %v1609_v47 = vld [vmem:[%s14998_s0 + $0x8] sm:$0xff] }
 0x331   :  { %1818 = vmatpush.msrb.mxu1 %v1709_v24  ;;  %v1690_v24 = vld [vmem:[%s14999_s1 + $0x258] sm:$0xff]  ;;  %1773 = vmatmul.f32.vlgmr.msra.gmra.mxu2 %v1610_v7  ;;  %v1608_v7 = vld [vmem:[%s14998_s0] sm:$0xff] }
 0x332   :  { %1799 = vmatpush.msrb.mxu0 %v1692_v38  ;;  %v1706_v38 = vld [vmem:[%s14999_s1 + $0x2d8] sm:$0xff]  ;;  %1792 = vmatpush.msra.mxu3 %v1663_v0  ;;  %v1711_v0 = vld [vmem:[%s14999_s1 + $0x300] sm:$0xff] }
 0x333   :  { %1819 = vmatpush.msrb.mxu1 %v1708_v31  ;;  %v1689_v31 = vld [vmem:[%s14999_s1 + $0x250] sm:$0xff]  ;;  %1793 = vmatmul.f32.vlgmr.msra.gmra.mxu3 %v1611_v52  ;;  %v1686_v52 = vld [vmem:[%s14999_s1 + $0x238] sm:$0xff] }
 0x334   :  { %1800 = vmatpush.msrb.mxu0 %v1691_v15  ;;  %v1705_v15 = vld [vmem:[%s14999_s1 + $0x2d0] sm:$0xff]  ;;  %1851 = vmatpush.msrb.mxu2 %v1712_v8  ;;  %v1702_v8 = vld [vmem:[%s14999_s1 + $0x2b8] sm:$0xff] }
 0x335   :  { %1820 = vmatpush.msrb.mxu1 %v1707_v1  ;;  %v1688_v1 = vld [vmem:[%s14999_s1 + $0x248] sm:$0xff]  ;;  %1733 = vmatmul.f32.vlgmr.msra.gmra.mxu0 %v1608_v7 }
 0x336   :  { %1801 = vmatpush.msrb.mxu0 %v1690_v24  ;;  %v1704_v24 = vld [vmem:[%s14999_s1 + $0x2c8] sm:$0xff]  ;;  %1753 = vmatmul.f32.vlgmr.msra.gmra.mxu1 %v1609_v47  ;;  %v1701_v47 = vld [vmem:[%s14999_s1 + $0x2b0] sm:$0xff] }
 0x337   :  { %1821 = vmatpush.msrb.mxu1 %v1706_v38  ;;  %v1687_v38 = vld [vmem:[%s14999_s1 + $0x240] sm:$0xff]  ;;  %1852 = vmatpush.msrb.mxu2 %v1711_v0  ;;  %v1700_v7 = vld [vmem:[%s14999_s1 + $0x2a8] sm:$0xff] }
 0x338   :  { %1802 = vmatpush.msrb.mxu0 %v1689_v31  ;;  %v1703_v31 = vld [vmem:[%s14999_s1 + $0x2c0] sm:$0xff]  ;;  %3016 = vmatpush.msrb.mxu3 %v8394_v18 }
 0x339   :  { %1822 = vmatpush.msrb.mxu1 %v1705_v15  ;;  %v1614_v15 = vld [vmem:[%s14998_s0 + $0x30] sm:$0xff]  ;;  %v1699_v0 = vld [vmem:[%s14999_s1 + $0x2a0] sm:$0xff]  ;;  %3036 = vmatpush.msra.mxu2 %v8954_v41 }
 0x33a   :  { %1803 = vmatpush.msrb.mxu0 %v1688_v1  ;;  %v1685_v1 = vld [vmem:[%s14999_s1 + $0x230] sm:$0xff]  ;;  %7728 = vmatmul.msk.f32.vlgmr.msrb.gmra.mxu2 %vm1713_vm0, %v1614_v15 }
 0x33b   :  { %1823 = vmatpush.msrb.mxu1 %v1704_v24  ;;  %v1684_v24 = vld [vmem:[%s14999_s1 + $0x228] sm:$0xff]  ;;  %v1681_v15 = vld [vmem:[%s14999_s1 + $0x210] sm:$0xff] }
 0x33c   :  { %1804 = vmatpush.msrb.mxu0 %v1687_v38  ;;  %v1683_v38 = vld [vmem:[%s14999_s1 + $0x220] sm:$0xff] }
 0x33d   :  { %1824 = vmatpush.msrb.mxu1 %v1703_v31  ;;  %v1682_v31 = vld [vmem:[%s14999_s1 + $0x218] sm:$0xff] }
 0x33e   :  { %1805 = vmatpush.msrb.mxu0 %v1686_v52  ;;  %v1698_v52 = vld [vmem:[%s14999_s1 + $0x298] sm:$0xff] }
 0x33f   :  { %1825 = vmatpush.msrb.mxu1 %v1702_v8  ;;  %v1697_v8 = vld [vmem:[%s14999_s1 + $0x290] sm:$0xff] }
 0x340   :  { %1806 = vmatpush.msrb.mxu0 %v1685_v1  ;;  %v1680_v1 = vld [vmem:[%s14999_s1 + $0x208] sm:$0xff] }
 0x341   :  { %1826 = vmatpush.msrb.mxu1 %v1701_v47  ;;  %v1696_v47 = vld [vmem:[%s14999_s1 + $0x288] sm:$0xff] }
 0x342   :  { %1807 = vmatpush.msrb.mxu0 %v1684_v24  ;;  %v1679_v24 = vld [vmem:[%s14999_s1 + $0x200] sm:$0xff] }
 0x343   :  { %1827 = vmatpush.msrb.mxu1 %v1700_v7  ;;  %v1612_v7 = vld [vmem:[%s14998_s0 + $0x20] sm:$0xff] }
 0x344   :  { %1808 = vmatpush.msrb.mxu0 %v1683_v38  ;;  %v1695_v38 = vld [vmem:[%s14999_s1 + $0x280] sm:$0xff] }
 0x345   :  { %1828 = vmatpush.msrb.mxu1 %v1699_v0  ;;  %v1613_v0 = vld [vmem:[%s14998_s0 + $0x28] sm:$0xff] }
 0x346   :  { %1809 = vmatpush.msrb.mxu0 %v1682_v31  ;;  %v15738_v31 = vmov 0  }
 0x347   :  { %1829 = vmatpush.msrb.mxu1 %v1698_v52  ;;  %7736 = vset.pattern.permute.xlu0 %v15738_v31 }
 0x348   :  { %1810 = vmatpush.msrb.mxu0 %v1681_v15  ;;  %7738 = vset.pattern.permute.xlu1 %v15738_v31 }
 0x349   :  { %1830 = vmatpush.msrb.mxu1 %v1697_v8  ;;  %7740 = vset.pattern.permute.xlu2 %v15738_v31 }
 0x34a   :  { %1811 = vmatpush.msrb.mxu0 %v1680_v1 }
 0x34b   :  { %1831 = vmatpush.msrb.mxu1 %v1696_v47 }
 0x34c   :  { %1812 = vmatpush.msrb.mxu0 %v1679_v24  ;;  %v12107_v24 = vld [vmem:[%s15000_s2] sm:$0x1] }
 0x34d   :  { %1813 = vmatmul.f32.vlgmr.msrb.gmra.mxu0 %v1612_v7  ;;  %1832 = vmatpush.msrb.mxu1 %v1695_v38  ;;  %v12112_v7 = vld [vmem:[%s15000_s2 + $0x1] sm:$0x1]  ;;  %v1860_v22 = vmul.f32 0.0, %v12107_v24  ;;  %v1893_v61 = vrot.slane %v12107_v24, 7 }
 0x34e   :  { %1833 = vmatmul.f32.vlgmr.msrb.gmra.mxu1 %v1613_v0  ;;  %v1901_v45 = vrot.slane %v12112_v7, 7 }
 0x3b2   :  { %v1734_v52 = vpop.f32.mrf.mxu0 }
 0x3b3   :  { %v1754_v15 = vpop.f32.mrf.mxu1 }
 0x3b4   :  { %v1755_v8 = vadd.f32 %v1754_v15, %v1734_v52  ;;  %v1774_v1 = vpop.f32.mrf.mxu2  ;;  %v1861_v52 = vmul.f32 0.0, %v12112_v7 }
 0x3b6   :  { %v1775_v47 = vadd.f32 %v1774_v1, %v1755_v8  ;;  %v1794_v5 = vpop.f32.mrf.mxu3  ;;  %v1857_v1 = vld [vmem:[%s15001_s3] sm:$0x1]  ;;  %v1862_v11 = vadd.f32 %v1861_v52, %v1860_v22 }
 0x3b8   :  { %v1795_v38 = vadd.f32 %v1794_v5, %v1775_v47  ;;  %v15746_v5 = vmov 1   ;;  %v16614_v47 = vmov 0  }
 0x3bd   :  { %v1854_v15 = vpop.f32.mrf.mxu2 }
 0x3ca   :  { %v1814_v0 = vpop.f32.mrf.mxu0 }
 0x3cb   :  { %v1815_v14 = vadd.f32 %v1814_v0, %v1795_v38  ;;  %v1834_v31 = vpop.f32.mrf.mxu1 }
 0x3cd   :  { %v1835_v8 = vadd.f32 %v1834_v31, %v1815_v14  ;;  %v7749_v14 = vld [vmem:[%s15001_s3] ss:$0 sm:$0xff] }
 0x3cf   :  { %v1855_v10 = vadd.f32 %v1854_v15, %v1835_v8  ;;  %v2015_v15 = vld [vmem:[%s15002_s4] ss:$2 sm:$0xff] }
 0x3d1   :  { %v1863_v21 = vadd.f32 %v1857_v1, %v1855_v10  ;;  %v12137_v1 = vperm.slane %v2015_v15, 0 }
 0x3d3   :  { %v1864_v29 = vadd.f32 %v1863_v21, %v1862_v11  ;;  %v12126_v21 = vadd.f32 %v7749_v14, %v1855_v10  ;;  %v7729_v10 = vld [vmem:[%s15002_s4 + $0x1] ss:$2 sm:$0xff]  ;;  %v12143_v14 = vperm.slane %v2015_v15, 3 }
 0x3d4   :  { %v12161_v28 = vperm.slane %v7729_v10, 3  ;;  %v12163_v36 = vperm.slane %v7729_v10, 4  ;;  %v12165_v46 = vperm.slane %v7729_v10, 5 }
 0x3d5   :  { %7750 = vtanh.f32 %v1864_v29 }
 0x3db   :  { %v7751_v59 = vpop.eup %7750 }
 0x3dc   :  { %1868 = vperm.xlu0 %7736, %v7751_v59  }
 0x3e4   :  { %7737 = vset.pattern.permute.xlu0 %v15746_v5 }
 0x3e5   :  { %1873 = vperm.xlu0 %7737, %v7751_v59  }
 0x3ed   :  { %7743 = vset.pattern.permute.xlu0 %v16614_v47 }
 0x44e   :  { %v1869_v38 = vpop.permute.xlu0 %1868 }
 0x44f   :  { %v1871_v31 = vmul.f32 %v1869_v38, %v12107_v24  ;;  %v12139_v38 = vperm.slane %v2015_v15, 1 }
 0x457   :  { %v1874_v0 = vpop.permute.xlu0 %1873 }
 0x458   :  { %v1876_v22 = vmul.f32 %v1874_v0, %v12112_v7  ;;  %v12141_v0 = vperm.slane %v2015_v15, 2 }
 0x45a   :  { %v1877_v11 = vadd.f32 %v1876_v22, %v1871_v31  ;;  %v12145_v31 = vperm.slane %v2015_v15, 4  ;;  %v12147_v22 = vperm.slane %v2015_v15, 5 }
 0x45c   :  { %v1883_v29 = vrot.slane %v1877_v11, 7  ;;  %v12149_v11 = vperm.slane %v2015_v15, 6  ;;  %v12167_v15 = vperm.slane %v7729_v10, 6 }
 0x45e   :  { %v1885_v52 = vadd.f32 %v1883_v29, %v12126_v21  ;;  %v2018_v29 = vld [vmem:[%s15003_s5] sm:$0xff] }
 0x45f   :  { %v12169_v9 = vperm.slane %v2018_v29, 0  ;;  %v12171_v35 = vperm.slane %v2018_v29, 1  ;;  %v12173_v43 = vperm.slane %v2018_v29, 2  ;;  %v12175_v2 = vperm.slane %v2018_v29, 3 }
 0x460   :  { %7752 = vtanh.f32 %v1885_v52  ;;  %v12154_v52 = vperm.slane %v7729_v10, 0  ;;  %v12177_v20 = vperm.slane %v2018_v29, 4  ;;  %v12179_v42 = vperm.slane %v2018_v29, 5 }
 0x461   :  { %v12181_v50 = vperm.slane %v2018_v29, 6 }
 0x466   :  { %v7753_v59 = vpop.eup %7752 }
 0x467   :  { %1889 = vperm.xlu1 %7738, %v7753_v59  }
 0x46f   :  { %7739 = vset.pattern.permute.xlu1 %v15746_v5  ;;  %v12158_v5 = vperm.slane %v7729_v10, 2 }
 0x470   :  { %1897 = vperm.xlu1 %7739, %v7753_v59   ;;  %v12156_v59 = vperm.slane %v7729_v10, 1 }
 0x478   :  { %7742 = vset.pattern.permute.xlu1 %v16614_v47 }
 0x4d9   :  { %v1890_v8 = vpop.permute.xlu1 %1889 }
 0x4da   :  { %v2034_v30 = vmul.f32 %v12137_v1, %v1890_v8  ;;  %v2035_v10 = vmul.f32 %v12139_v38, %v1890_v8  ;;  %v2036_v49 = vmul.f32 %v12141_v0, %v1890_v8  ;;  %v2037_v57 = vmul.f32 %v12143_v14, %v1890_v8 }
 0x4db   :  { %v2038_v23 = vmul.f32 %v12145_v31, %v1890_v8  ;;  %v2039_v17 = vmul.f32 %v12147_v22, %v1890_v8  ;;  %v2040_v56 = vmul.f32 %v12149_v11, %v1890_v8  ;;  %v1895_v19 = vmul.f32 %v1893_v61, %v1890_v8 }
 0x4e2   :  { %v1898_v6 = vpop.permute.xlu1 %1897 }
 0x4e3   :  { %v2056_v29 = vmul.f32 %v12154_v52, %v1898_v6  ;;  %v2057_v51 = vmul.f32 %v12156_v59, %v1898_v6  ;;  %v2058_v63 = vmul.f32 %v12158_v5, %v1898_v6  ;;  %v2059_v55 = vmul.f32 %v12161_v28, %v1898_v6 }
 0x4e4   :  { %v2060_v44 = vmul.f32 %v12163_v36, %v1898_v6  ;;  %v2061_v37 = vmul.f32 %v12165_v46, %v1898_v6  ;;  %v2062_v48 = vmul.f32 %v12167_v15, %v1898_v6  ;;  %v1903_v33 = vmul.f32 %v1901_v45, %v1898_v6 }
 0x4e5   :  { %v2063_v54 = vadd.f32 %v2056_v29, %v2034_v30  ;;  %v2064_v16 = vadd.f32 %v2057_v51, %v2035_v10  ;;  %v2065_v26 = vadd.f32 %v2058_v63, %v2036_v49  ;;  %v2066_v12 = vadd.f32 %v2059_v55, %v2037_v57 }
 0x4e6   :  { %v2067_v61 = vadd.f32 %v2060_v44, %v2038_v23  ;;  %v2068_v8 = vadd.f32 %v2061_v37, %v2039_v17  ;;  %v2069_v13 = vadd.f32 %v2062_v48, %v2040_v56  ;;  %v1904_v58 = vadd.f32 %v1903_v33, %v1895_v19 }
 0x4e7   :  { %v12199_v34 = vadd.f32 %v12169_v9, %v2063_v54  ;;  %v12202_v32 = vadd.f32 %v12171_v35, %v2064_v16  ;;  %v12205_v40 = vadd.f32 %v12173_v43, %v2065_v26  ;;  %v12208_v62 = vadd.f32 %v12175_v2, %v2066_v12 }
 0x4e8   :  { %v12211_v6 = vadd.f32 %v12177_v20, %v2067_v61  ;;  %v12214_v23 = vadd.f32 %v12179_v42, %v2068_v8  ;;  %v12217_v17 = vadd.f32 %v12181_v50, %v2069_v13  ;;  %v1906_v19 = vrot.slane %v1904_v58, 7 }
 0x4e9   :  { %16615 = vst [vmem:[#allocation785_spill] sm:$0xff] %v12199_v34  ;;  %v16622_v26 = vmov 1   ;;  %v1915_v33 = vrot.slane %v12107_v24, 6  ;;  %v1922_v37 = vrot.slane %v12112_v7, 6  ;;  %v1943_v55 = vrot.slane %v12112_v7, 5 }
 0x4ea   :  { %16616 = vst [vmem:[#allocation786_spill] sm:$0xff] %v12202_v32  ;;  %v1908_v30 = vadd.f32 %v1906_v19, %v12126_v21  ;;  %v1936_v57 = vrot.slane %v12107_v24, 5 }
 0x4eb   :  { %16617 = vst [vmem:[#allocation787_spill] sm:$0xff] %v12205_v40 }
 0x4ec   :  { %16618 = vst [vmem:[#allocation788_spill] sm:$0xff] %v12208_v62  ;;  %7754 = vtanh.f32 %v1908_v30 }
 0x4ed   :  { %16619 = vst [vmem:[#allocation789_spill] sm:$0xff] %v12211_v6 }
 0x4ee   :  { %16620 = vst [vmem:[#allocation790_spill] sm:$0xff] %v12214_v23 }
 0x4ef   :  { %16621 = vst [vmem:[#allocation791_spill] sm:$0xff] %v12217_v17 }
 0x4f2   :  { %v7755_v16 = vpop.eup %7754 }
 0x4f3   :  { %1912 = vperm.xlu2 %7740, %v7755_v16  }
 0x4fb   :  { %7741 = vset.pattern.permute.xlu2 %v16622_v26 }
 0x4fc   :  { %1919 = vperm.xlu2 %7741, %v7755_v16  }
 0x54d   :  { %v1913_v12 = vpop.permute.xlu2 %1912 }
 0x54e   :  { %v1917_v45 = vmul.f32 %v1915_v33, %v1913_v12 }
 0x556   :  { %v1920_v44 = vpop.permute.xlu2 %1919 }
 0x557   :  { %v1924_v48 = vmul.f32 %v1922_v37, %v1920_v44 }
 0x559   :  { %v1925_v49 = vadd.f32 %v1924_v48, %v1917_v45 }
 0x55b   :  { %v1927_v13 = vrot.slane %v1925_v49, 7 }
 0x55d   :  { %v1929_v51 = vadd.f32 %v1927_v13, %v12126_v21 }
 0x55f   :  { %7756 = vtanh.f32 %v1929_v51 }
 0x565   :  { %v7757_v54 = vpop.eup %7756 }
 0x566   :  { %1940 = vperm.xlu2 %7741, %v7757_v54   ;;  %1933 = vperm.xlu1 %7742, %v7757_v54  }
 0x56e   :  { %7744 = vset.pattern.permute.xlu1 %v16622_v26  ;;  %7745 = vset.pattern.permute.xlu2 %v16614_v47 }
 0x5c0   :  { %v1941_v56 = vpop.permute.xlu2 %1940 }
 0x5c1   :  { %v1945_v58 = vmul.f32 %v1943_v55, %v1941_v56  ;;  %v2099_v63 = vmul.f32 %v12154_v52, %v1941_v56  ;;  %v2100_v10 = vmul.f32 %v12156_v59, %v1941_v56  ;;  %v2101_v29 = vmul.f32 %v12158_v5, %v1941_v56 }
 0x5c2   :  { %v2102_v61 = vmul.f32 %v12161_v28, %v1941_v56  ;;  %v2103_v8 = vmul.f32 %v12163_v36, %v1941_v56  ;;  %v2104_v19 = vmul.f32 %v12165_v46, %v1941_v56  ;;  %v2105_v30 = vmul.f32 %v12167_v15, %v1941_v56 }
 0x5d8   :  { %v1934_v16 = vpop.permute.xlu1 %1933 }
 0x5d9   :  { %v1938_v12 = vmul.f32 %v1936_v57, %v1934_v16  ;;  %v2092_v33 = vmul.f32 %v12137_v1, %v1934_v16  ;;  %v2093_v37 = vmul.f32 %v12139_v38, %v1934_v16  ;;  %v2094_v44 = vmul.f32 %v12141_v0, %v1934_v16 }
 0x5da   :  { %v2095_v45 = vmul.f32 %v12143_v14, %v1934_v16  ;;  %v2096_v48 = vmul.f32 %v12145_v31, %v1934_v16  ;;  %v2097_v49 = vmul.f32 %v12147_v22, %v1934_v16  ;;  %v2098_v13 = vmul.f32 %v12149_v11, %v1934_v16 }
 0x5db   :  { %v2106_v51 = vadd.f32 %v2099_v63, %v2092_v33  ;;  %v2107_v54 = vadd.f32 %v2100_v10, %v2093_v37  ;;  %v2108_v55 = vadd.f32 %v2101_v29, %v2094_v44  ;;  %v1946_v56 = vadd.f32 %v1945_v58, %v1938_v12 }
 0x5dc   :  { %v2109_v17 = vadd.f32 %v2102_v61, %v2095_v45  ;;  %v2110_v57 = vadd.f32 %v2103_v8, %v2096_v48  ;;  %v2111_v23 = vadd.f32 %v2104_v19, %v2097_v49  ;;  %v2112_v6 = vadd.f32 %v2105_v30, %v2098_v13 }
 0x5dd   :  { %v12243_v62 = vadd.f32 %v2106_v51, %v12169_v9  ;;  %v12246_v40 = vadd.f32 %v2107_v54, %v12171_v35  ;;  %v12249_v32 = vadd.f32 %v2108_v55, %v12173_v43  ;;  %v1948_v34 = vrot.slane %v1946_v56, 7 }
 0x5de   :  { %v12252_v16 = vadd.f32 %v2109_v17, %v12175_v2  ;;  %v12255_v63 = vadd.f32 %v2110_v57, %v12177_v20  ;;  %v12258_v58 = vadd.f32 %v2111_v23, %v12179_v42  ;;  %v12261_v10 = vadd.f32 %v2112_v6, %v12181_v50 }
 0x5df   :  { %16623 = vst [vmem:[#allocation792_spill] sm:$0xff] %v12246_v40  ;;  %v1950_v29 = vadd.f32 %v1948_v34, %v12126_v21  ;;  %v1964_v17 = vrot.slane %v12112_v7, 4  ;;  %v1957_v8 = vrot.slane %v12107_v24, 4  ;;  %v1978_v44 = vrot.slane %v12107_v24, 3 }
 0x5e0   :  { %16624 = vst [vmem:[#allocation793_spill] sm:$0xff] %v12249_v32  ;;  %v1985_v48 = vrot.slane %v12112_v7, 3 }
 0x5e1   :  { %16625 = vst [vmem:[#allocation794_spill] sm:$0xff] %v12252_v16  ;;  %7758 = vtanh.f32 %v1950_v29 }
 0x5e2   :  { %16626 = vst [vmem:[#allocation795_spill] sm:$0xff] %v12255_v63 }
 0x5e3   :  { %16627 = vst [vmem:[#allocation796_spill] sm:$0xff] %v12258_v58 }
 0x5e4   :  { %16628 = vst [vmem:[#allocation797_spill] sm:$0xff] %v12261_v10 }
 0x5e7   :  { %v7759_v61 = vpop.eup %7758 }
 0x5e8   :  { %1961 = vperm.xlu1 %7744, %v7759_v61   ;;  %1954 = vperm.xlu0 %7743, %v7759_v61  }
 0x5f0   :  { %7746 = vset.pattern.permute.xlu0 %v16622_v26 }
 0x65a   :  { %v1962_v19 = vpop.permute.xlu1 %1961  ;;  %v1955_v30 = vpop.permute.xlu0 %1954 }
 0x65b   :  { %v1966_v12 = vmul.f32 %v1964_v17, %v1962_v19  ;;  %v1959_v23 = vmul.f32 %v1957_v8, %v1955_v30 }
 0x65d   :  { %v1967_v33 = vadd.f32 %v1966_v12, %v1959_v23 }
 0x65f   :  { %v1969_v37 = vrot.slane %v1967_v33, 7 }
 0x661   :  { %v1971_v6 = vadd.f32 %v1969_v37, %v12126_v21 }
 0x663   :  { %7760 = vtanh.f32 %v1971_v6 }
 0x669   :  { %v7761_v34 = vpop.eup %7760 }
 0x66a   :  { %1982 = vperm.xlu1 %7744, %v7761_v34   ;;  %1975 = vperm.xlu2 %7745, %v7761_v34  }
 0x672   :  { %7747 = vset.pattern.permute.xlu1 %v16614_v47 }
 0x6c4   :  { %v1976_v45 = vpop.permute.xlu2 %1975 }
 0x6c5   :  { %v1980_v49 = vmul.f32 %v1978_v44, %v1976_v45  ;;  %v2120_v13 = vmul.f32 %v12137_v1, %v1976_v45  ;;  %v2121_v51 = vmul.f32 %v12139_v38, %v1976_v45  ;;  %v2122_v54 = vmul.f32 %v12141_v0, %v1976_v45 }
 0x6c6   :  { %v2123_v55 = vmul.f32 %v12143_v14, %v1976_v45  ;;  %v2124_v56 = vmul.f32 %v12145_v31, %v1976_v45  ;;  %v2125_v57 = vmul.f32 %v12147_v22, %v1976_v45  ;;  %v2126_v47 = vmul.f32 %v12149_v11, %v1976_v45 }
 0x6dc   :  { %v1983_v29 = vpop.permute.xlu1 %1982 }
 0x6dd   :  { %v1987_v61 = vmul.f32 %v1985_v48, %v1983_v29  ;;  %v2127_v17 = vmul.f32 %v12154_v52, %v1983_v29  ;;  %v2128_v8 = vmul.f32 %v12156_v59, %v1983_v29  ;;  %v2129_v19 = vmul.f32 %v12158_v5, %v1983_v29 }
 0x6de   :  { %v2130_v30 = vmul.f32 %v12161_v28, %v1983_v29  ;;  %v2131_v12 = vmul.f32 %v12163_v36, %v1983_v29  ;;  %v2132_v23 = vmul.f32 %v12165_v46, %v1983_v29  ;;  %v2133_v33 = vmul.f32 %v12167_v15, %v1983_v29 }
 0x6df   :  { %v2134_v37 = vadd.f32 %v2127_v17, %v2120_v13  ;;  %v2135_v6 = vadd.f32 %v2128_v8, %v2121_v51  ;;  %v2136_v34 = vadd.f32 %v2129_v19, %v2122_v54  ;;  %v1988_v44 = vadd.f32 %v1987_v61, %v1980_v49 }
 0x6e0   :  { %v2137_v45 = vadd.f32 %v2130_v30, %v2123_v55  ;;  %v2138_v48 = vadd.f32 %v2131_v12, %v2124_v56  ;;  %v2139_v10 = vadd.f32 %v2132_v23, %v2125_v57  ;;  %v2140_v58 = vadd.f32 %v2133_v33, %v2126_v47 }
 0x6e1   :  { %v12286_v63 = vadd.f32 %v2134_v37, %v12169_v9  ;;  %v12289_v16 = vadd.f32 %v2135_v6, %v12171_v35  ;;  %v12292_v32 = vadd.f32 %v2136_v34, %v12173_v43  ;;  %v1990_v40 = vrot.slane %v1988_v44, 7 }
 0x6e2   :  { %v12295_v29 = vadd.f32 %v2137_v45, %v12175_v2  ;;  %v12298_v13 = vadd.f32 %v2138_v48, %v12177_v20  ;;  %v12301_v49 = vadd.f32 %v2139_v10, %v12179_v42  ;;  %v12304_v51 = vadd.f32 %v2140_v58, %v12181_v50 }
 0x6e3   :  { %16629 = vst [vmem:[#allocation798_spill] sm:$0xff] %v12286_v63  ;;  %v1992_v54 = vadd.f32 %v1990_v40, %v12126_v21  ;;  %v1999_v56 = vrot.slane %v12107_v24, 2  ;;  %v2006_v57 = vrot.slane %v12112_v7, 2 }
 0x6e4   :  { %16630 = vst [vmem:[#allocation799_spill] sm:$0xff] %v12289_v16 }
 0x6e5   :  { %16631 = vst [vmem:[#allocation800_spill] sm:$0xff] %v12292_v32  ;;  %7762 = vtanh.f32 %v1992_v54 }
 0x6e6   :  { %16632 = vst [vmem:[#allocation801_spill] sm:$0xff] %v12295_v29 }
 0x6e7   :  { %16633 = vst [vmem:[#allocation802_spill] sm:$0xff] %v12298_v13 }
 0x6e8   :  { %16634 = vst [vmem:[#allocation803_spill] sm:$0xff] %v12301_v49 }
 0x6e9   :  { %16635 = vst [vmem:[#allocation804_spill] sm:$0xff] %v12304_v51 }
 0x6eb   :  { %v7763_v55 = vpop.eup %7762 }
 0x6ec   :  { %2003 = vperm.xlu0 %7746, %v7763_v55   ;;  %1996 = vperm.xlu2 %7745, %v7763_v55  }
 0x6f4   :  { %7748 = vset.pattern.permute.xlu2 %v16622_v26 }
 0x746   :  { %v1997_v47 = vpop.permute.xlu2 %1996 }
 0x747   :  { %v2001_v17 = vmul.f32 %v1999_v56, %v1997_v47 }
 0x75e   :  { %v2004_v61 = vpop.permute.xlu0 %2003 }
 0x75f   :  { %v2008_v10 = vmul.f32 %v2006_v57, %v2004_v61 }
 0x761   :  { %v2009_v8 = vadd.f32 %v2008_v10, %v2001_v17 }
 0x763   :  { %v2011_v19 = vrot.slane %v2009_v8, 7 }
 0x765   :  { %v2013_v58 = vadd.f32 %v2011_v19, %v12126_v21 }
 0x767   :  { %7764 = vtanh.f32 %v2013_v58 }
 0x76d   :  { %v7765_v40 = vpop.eup %7764 }
 0x76e   :  { %2161 = vperm.xlu2 %7748, %v7765_v40   ;;  %2150 = vperm.xlu1 %7747, %v7765_v40  }
 0x7c8   :  { %v2162_v30 = vpop.permute.xlu2 %2161 }
 0x7c9   :  { %v2164_v12 = vmul.f32 %v2162_v30, %v12154_v52  ;;  %v2165_v26 = vmul.f32 %v2162_v30, %v12156_v59  ;;  %v2166_v24 = vmul.f32 %v2162_v30, %v12158_v5  ;;  %v2167_v7 = vmul.f32 %v2162_v30, %v12161_v28 }
 0x7ca   :  { %v2168_v23 = vmul.f32 %v2162_v30, %v12163_v36  ;;  %v2169_v33 = vmul.f32 %v2162_v30, %v12165_v46  ;;  %v2170_v52 = vmul.f32 %v2162_v30, %v12167_v15 }
 0x7e0   :  { %v2151_v37 = vpop.permute.xlu1 %2150 }
 0x7e1   :  { %v2153_v21 = vmul.f32 %v2151_v37, %v12137_v1  ;;  %v2154_v6 = vmul.f32 %v2151_v37, %v12139_v38  ;;  %v2155_v34 = vmul.f32 %v2151_v37, %v12141_v0  ;;  %v2156_v44 = vmul.f32 %v2151_v37, %v12143_v14 }
 0x7e2   :  { %v2157_v59 = vmul.f32 %v2151_v37, %v12145_v31  ;;  %v2158_v5 = vmul.f32 %v2151_v37, %v12147_v22  ;;  %v2159_v28 = vmul.f32 %v2151_v37, %v12149_v11 }
 0x7e3   :  { %v2171_v36 = vadd.f32 %v2164_v12, %v2153_v21  ;;  %v2172_v45 = vadd.f32 %v2165_v26, %v2154_v6  ;;  %v2173_v46 = vadd.f32 %v2166_v24, %v2155_v34  ;;  %v2174_v48 = vadd.f32 %v2167_v7, %v2156_v44 }
 0x7e4   :  { %v2175_v54 = vadd.f32 %v2168_v23, %v2157_v59  ;;  %v2176_v1 = vadd.f32 %v2169_v33, %v2158_v5  ;;  %v2177_v55 = vadd.f32 %v2170_v52, %v2159_v28 }
 0x7e5   :  { %v12326_v38 = vadd.f32 %v2171_v36, %v12169_v9  ;;  %v12329_v0 = vadd.f32 %v2172_v45, %v12171_v35  ;;  %v12332_v14 = vadd.f32 %v2173_v46, %v12173_v43  ;;  %v12335_v31 = vadd.f32 %v2174_v48, %v12175_v2 }
 0x7e6   :  { %v12338_v22 = vadd.f32 %v2175_v54, %v12177_v20  ;;  %v12341_v11 = vadd.f32 %v2176_v1, %v12179_v42  ;;  %v12344_v15 = vadd.f32 %v2177_v55, %v12181_v50 }
 0x7e7   :  { %16636 = vst [vmem:[#allocation805_spill] sm:$0xff] %v12326_v38 }
 0x7e8   :  { %16637 = vst [vmem:[#allocation806_spill] sm:$0xff] %v12329_v0 }
 0x7e9   :  { %16638 = vst [vmem:[#allocation807_spill] sm:$0xff] %v12332_v14 }
 0x7ea   :  { %16639 = vst [vmem:[#allocation808_spill] sm:$0xff] %v12335_v31 }
 0x7eb   :  { %16640 = vst [vmem:[#allocation809_spill] sm:$0xff] %v12338_v22 }
 0x7ec   :  { %16641 = vst [vmem:[#allocation810_spill] sm:$0xff] %v12341_v11 }
 0x7ed   :  { %16642 = vst [vmem:[#allocation811_spill] sm:$0xff] %v12344_v15 }
 0x7ee   :  { %7822 = dma.done.wait [#allocation3], 100352 }
 0x7ef   :  { %7823 = vsyncadd [#allocation3], 4294866944  ;;  %3056 = vmatpush.msra.mxu0 %v9514_v53  ;;  %3076 = vmatpush.msra.mxu1 %v10074_v3  ;;  %v16643_v2 = vld [vmem:[#allocation206_spill] sm:$0xff]  ;;  %v16645_v20 = vld [vmem:[#allocation428_spill] sm:$0xff] }
 0x7f0   :  { %3017 = vmatpush.msrb.mxu3 %v8359_v60  ;;  %3037 = vmatpush.msra.mxu2 %v8919_v4  ;;  %v16644_v9 = vld [vmem:[#allocation318_spill] sm:$0xff]  ;;  %v16647_v42 = vld [vmem:[#allocation199_spill] sm:$0xff]  ;;  %v16649_v50 = vld [vmem:[#allocation421_spill] sm:$0xff] }
 0x7f1   :  { %3057 = vmatpush.msra.mxu0 %v9479_v39  ;;  %3077 = vmatpush.msra.mxu1 %v10039_v27  ;;  %v16646_v35 = vld [vmem:[#allocation90_spill] sm:$0xff]  ;;  %v16648_v43 = vld [vmem:[#allocation311_spill] sm:$0xff]  ;;  %v16651_v57 = vld [vmem:[#allocation192_spill] sm:$0xff] }
 0x7f2   :  { %3018 = vmatpush.msrb.mxu3 %v8324_v25  ;;  %3038 = vmatpush.msra.mxu2 %v16643_v2  ;;  %v16650_v56 = vld [vmem:[#allocation83_spill] sm:$0xff]  ;;  %v16652_v47 = vld [vmem:[#allocation304_spill] sm:$0xff]  ;;  %v16653_v61 = vld [vmem:[#allocation414_spill] sm:$0xff] }
 0x7f3   :  { %3058 = vmatpush.msra.mxu0 %v16644_v9  ;;  %3078 = vmatpush.msra.mxu1 %v16645_v20  ;;  %v16654_v17 = vld [vmem:[#allocation76_spill] sm:$0xff]  ;;  %v16655_v10 = vld [vmem:[#allocation185_spill] sm:$0xff]  ;;  %v16657_v19 = vld [vmem:[#allocation407_spill] sm:$0xff] }
 0x7f4   :  { %3019 = vmatpush.msrb.mxu3 %v16646_v35  ;;  %3039 = vmatpush.msra.mxu2 %v16647_v42  ;;  %v16656_v8 = vld [vmem:[#allocation297_spill] sm:$0xff]  ;;  %v16659_v40 = vld [vmem:[#allocation178_spill] sm:$0xff]  ;;  %v16661_v12 = vld [vmem:[#allocation400_spill] sm:$0xff] }
 0x7f5   :  { %3059 = vmatpush.msra.mxu0 %v16648_v43  ;;  %3079 = vmatpush.msra.mxu1 %v16649_v50  ;;  %v16658_v58 = vld [vmem:[#allocation69_spill] sm:$0xff]  ;;  %v16660_v30 = vld [vmem:[#allocation290_spill] sm:$0xff]  ;;  %v16663_v24 = vld [vmem:[#allocation171_spill] sm:$0xff] }
 0x7f6   :  { %3020 = vmatpush.msrb.mxu3 %v16650_v56  ;;  %3040 = vmatpush.msra.mxu2 %v16651_v57  ;;  %v16662_v26 = vld [vmem:[#allocation62_spill] sm:$0xff]  ;;  %v16664_v7 = vld [vmem:[#allocation283_spill] sm:$0xff]  ;;  %v16665_v23 = vld [vmem:[#allocation393_spill] sm:$0xff] }
 0x7f7   :  { %3060 = vmatpush.msra.mxu0 %v16652_v47  ;;  %3080 = vmatpush.msra.mxu1 %v16653_v61  ;;  %v16666_v33 = vld [vmem:[#allocation55_spill] sm:$0xff]  ;;  %v16667_v37 = vld [vmem:[#allocation164_spill] sm:$0xff]  ;;  %v16669_v6 = vld [vmem:[#allocation386_spill] sm:$0xff] }
 0x7f8   :  { %3021 = vmatpush.msrb.mxu3 %v16654_v17  ;;  %3041 = vmatpush.msra.mxu2 %v16655_v10  ;;  %v16668_v21 = vld [vmem:[#allocation276_spill] sm:$0xff]  ;;  %v16671_v44 = vld [vmem:[#allocation157_spill] sm:$0xff]  ;;  %v16673_v59 = vld [vmem:[#allocation379_spill] sm:$0xff] }
 0x7f9   :  { %3061 = vmatpush.msra.mxu0 %v16656_v8  ;;  %3081 = vmatpush.msra.mxu1 %v16657_v19  ;;  %v16670_v34 = vld [vmem:[#allocation48_spill] sm:$0xff]  ;;  %v16672_v52 = vld [vmem:[#allocation269_spill] sm:$0xff]  ;;  %v16675_v28 = vld [vmem:[#allocation150_spill] sm:$0xff] }
 0x7fa   :  { %3022 = vmatpush.msrb.mxu3 %v16658_v58  ;;  %3042 = vmatpush.msra.mxu2 %v16659_v40  ;;  %v16674_v5 = vld [vmem:[#allocation41_spill] sm:$0xff]  ;;  %v16676_v36 = vld [vmem:[#allocation262_spill] sm:$0xff]  ;;  %v16677_v45 = vld [vmem:[#allocation372_spill] sm:$0xff] }
 0x7fb   :  { %3062 = vmatpush.msra.mxu0 %v16660_v30  ;;  %3082 = vmatpush.msra.mxu1 %v16661_v12  ;;  %v16678_v46 = vld [vmem:[#allocation785_spill] sm:$0xff]  ;;  %v16679_v48 = vld [vmem:[#allocation34_spill] sm:$0xff]  ;;  %v16680_v54 = vld [vmem:[#allocation143_spill] sm:$0xff] }
 0x7fc   :  { %3023 = vmatpush.msrb.mxu3 %v16662_v26  ;;  %3043 = vmatpush.msra.mxu2 %v16663_v24  ;;  %7766 = vtanh.f32 %v16678_v46  ;;  %v16681_v1 = vld [vmem:[#allocation255_spill] sm:$0xff]  ;;  %v16682_v55 = vld [vmem:[#allocation365_spill] sm:$0xff]  ;;  %v16684_v11 = vld [vmem:[#allocation136_spill] sm:$0xff] }
 0x7fd   :  { %3063 = vmatpush.msra.mxu0 %v16664_v7  ;;  %3083 = vmatpush.msra.mxu1 %v16665_v23  ;;  %v16683_v15 = vld [vmem:[#allocation27_spill] sm:$0xff]  ;;  %v16685_v22 = vld [vmem:[#allocation786_spill] sm:$0xff]  ;;  %v16686_v31 = vld [vmem:[#allocation248_spill] sm:$0xff] }
 0x7fe   :  { %3024 = vmatpush.msrb.mxu3 %v16666_v33  ;;  %3044 = vmatpush.msra.mxu2 %v16667_v37  ;;  %7768 = vtanh.f32 %v16685_v22  ;;  %v16687_v14 = vld [vmem:[#allocation358_spill] sm:$0xff]  ;;  %v16688_v0 = vld [vmem:[#allocation787_spill] sm:$0xff]  ;;  %v16689_v46 = vld [vmem:[#allocation20_spill] sm:$0xff] }
 0x7ff   :  { %3064 = vmatpush.msra.mxu0 %v16668_v21  ;;  %3084 = vmatpush.msra.mxu1 %v16669_v6  ;;  %7770 = vtanh.f32 %v16688_v0  ;;  %v16690_v38 = vld [vmem:[#allocation129_spill] sm:$0xff]  ;;  %v16691_v51 = vld [vmem:[#allocation788_spill] sm:$0xff]  ;;  %v16693_v29 = vld [vmem:[#allocation351_spill] sm:$0xff] }
 0x800   :  { %3025 = vmatpush.msrb.mxu3 %v16670_v34  ;;  %3045 = vmatpush.msra.mxu2 %v16671_v44  ;;  %7772 = vtanh.f32 %v16691_v51  ;;  %v16692_v13 = vld [vmem:[#allocation241_spill] sm:$0xff]  ;;  %v16695_v22 = vld [vmem:[#allocation122_spill] sm:$0xff]  ;;  %v16697_v0 = vld [vmem:[#allocation344_spill] sm:$0xff] }
 0x801   :  { %3065 = vmatpush.msra.mxu0 %v16672_v52  ;;  %3085 = vmatpush.msra.mxu1 %v16673_v59  ;;  %v16694_v32 = vld [vmem:[#allocation13_spill] sm:$0xff]  ;;  %v16696_v16 = vld [vmem:[#allocation234_spill] sm:$0xff]  ;;  %v16699_v51 = vld [vmem:[#allocation115_spill] sm:$0xff] }
 0x802   :  { %3026 = vmatpush.msrb.mxu3 %v16674_v5  ;;  %3046 = vmatpush.msra.mxu2 %v16675_v28  ;;  %v12404_v49 = vpop.eup %7766  ;;  %v16702_v6 = vld [vmem:[#allocation554_spill] sm:$0xff]  ;;  %v16706_v19 = vld [vmem:[#allocation109_spill] sm:$0xff]  ;;  %v16707_v61 = vld [vmem:[#allocation547_spill] sm:$0xff] }
 0x803   :  { %3066 = vmatpush.msra.mxu0 %v16676_v36  ;;  %3086 = vmatpush.msra.mxu1 %v16677_v45  ;;  %2203 = vst [vmem:[#allocation1] sm:$0xff] %v12404_v49  ;;  %v16700_v45 = vld [vmem:[#allocation227_spill] sm:$0xff]  ;;  %v16703_v23 = vld [vmem:[#allocation666_spill] sm:$0xff]  ;;  %v16716_v3 = vld [vmem:[#allocation533_spill] sm:$0xff] }
 0x804   :  { %3027 = vmatpush.msrb.mxu3 %v16679_v48  ;;  %3047 = vmatpush.msra.mxu2 %v16680_v54  ;;  %v12413_v63 = vpop.eup %7768  ;;  %v16705_v12 = vld [vmem:[#allocation778_spill] sm:$0xff]  ;;  %v16709_v50 = vld [vmem:[#allocation771_spill] sm:$0xff] }
 0x805   :  { %3067 = vmatpush.msra.mxu0 %v16681_v1  ;;  %3087 = vmatpush.msra.mxu1 %v16682_v55  ;;  %v12417_v55 = vpop.eup %7770  ;;  %2204 = vst [vmem:[#allocation1 + $0x9] sm:$0xff] %v12413_v63  ;;  %v16710_v20 = vld [vmem:[#allocation103_spill] sm:$0xff]  ;;  %v16711_v27 = vld [vmem:[#allocation790_spill] sm:$0xff] }
 0x806   :  { %3028 = vmatpush.msrb.mxu3 %v16683_v15  ;;  %3048 = vmatpush.msra.mxu2 %v16684_v11  ;;  %v12422_v59 = vpop.eup %7772  ;;  %2205 = vst [vmem:[#allocation1 + $0x12] sm:$0xff] %v12417_v55 }
 0x807   :  { %3068 = vmatpush.msra.mxu0 %v16686_v31  ;;  %3088 = vmatpush.msra.mxu1 %v16687_v14  ;;  %v16698_v14 = vld [vmem:[#allocation6_spill] sm:$0xff]  ;;  %2206 = vst [vmem:[#allocation1 + $0x1b] sm:$0xff] %v12422_v59 }
 0x808   :  { %3029 = vmatpush.msrb.mxu3 %v16689_v46  ;;  %3049 = vmatpush.msra.mxu2 %v16690_v38 }
 0x809   :  { %3069 = vmatpush.msra.mxu0 %v16692_v13  ;;  %3089 = vmatpush.msra.mxu1 %v16693_v29  ;;  %v16701_v29 = vld [vmem:[#allocation337_spill] sm:$0xff] }
 0x80a   :  { %3030 = vmatpush.msrb.mxu3 %v16694_v32  ;;  %3050 = vmatpush.msra.mxu2 %v16695_v22  ;;  %v17020_v22 = vld [vmem:[#allocation125_spill] sm:$0xff]  ;;  %v17025_v32 = vld [vmem:[#allocation230_spill] sm:$0xff] }
 0x80b   :  { %3070 = vmatpush.msra.mxu0 %v16696_v16  ;;  %3090 = vmatpush.msra.mxu1 %v16697_v0  ;;  %v16704_v0 = vld [vmem:[#allocation789_spill] sm:$0xff] }
 0x80c   :  { %3031 = vmatpush.msrb.mxu3 %v16698_v14  ;;  %3051 = vmatpush.msra.mxu2 %v16699_v51  ;;  %7774 = vtanh.f32 %v16704_v0  ;;  %v16713_v0 = vld [vmem:[#allocation652_spill] sm:$0xff]  ;;  %v16736_v51 = vld [vmem:[#allocation63_spill] sm:$0xff]  ;;  %v16753_v14 = vld [vmem:[#allocation470_spill] sm:$0xff] }
 0x80d   :  { %3071 = vmatpush.msra.mxu0 %v16700_v45  ;;  %3091 = vmatpush.msra.mxu1 %v16701_v29  ;;  %v16708_v29 = vld [vmem:[#allocation659_spill] sm:$0xff]  ;;  %7776 = vtanh.f32 %v16711_v27  ;;  %v16720_v27 = vld [vmem:[#allocation526_spill] sm:$0xff]  ;;  %v16731_v45 = vld [vmem:[#allocation736_spill] sm:$0xff] }
 0x80e   :  { %3096 = vmatpush.msra.mxu3 %v16702_v6  ;;  %3116 = vmatpush.msrb.mxu2 %v16703_v23  ;;  %v16712_v23 = vld [vmem:[#allocation540_spill] sm:$0xff] }
 0x80f   :  { %3136 = vmatpush.msrb.mxu0 %v16705_v12  ;;  %3156 = vmatpush.msrb.mxu1 %v16706_v19  ;;  %v16714_v6 = vld [vmem:[#allocation764_spill] sm:$0xff]  ;;  %v16715_v12 = vld [vmem:[#allocation97_spill] sm:$0xff] }
 0x810   :  { %3097 = vmatpush.msra.mxu3 %v16707_v61  ;;  %3117 = vmatpush.msrb.mxu2 %v16708_v29  ;;  %v16717_v61 = vld [vmem:[#allocation645_spill] sm:$0xff] }
 0x811   :  { %3137 = vmatpush.msrb.mxu0 %v16709_v50  ;;  %3157 = vmatpush.msrb.mxu1 %v16710_v20  ;;  %v16718_v29 = vld [vmem:[#allocation757_spill] sm:$0xff]  ;;  %v16719_v50 = vld [vmem:[#allocation91_spill] sm:$0xff]  ;;  %v16721_v20 = vld [vmem:[#allocation638_spill] sm:$0xff] }
 0x812   :  { %3098 = vmatpush.msra.mxu3 %v16712_v23  ;;  %3118 = vmatpush.msrb.mxu2 %v16713_v0  ;;  %v12440_v19 = vpop.eup %7774  ;;  %v16724_v23 = vld [vmem:[#allocation519_spill] sm:$0xff] }
 0x813   :  { %3138 = vmatpush.msrb.mxu0 %v16714_v6  ;;  %3158 = vmatpush.msrb.mxu1 %v16715_v12  ;;  %2207 = vst [vmem:[#allocation1 + $0x24] sm:$0xff] %v12440_v19  ;;  %v12449_v0 = vpop.eup %7776  ;;  %v16722_v6 = vld [vmem:[#allocation750_spill] sm:$0xff]  ;;  %v16723_v12 = vld [vmem:[#allocation84_spill] sm:$0xff] }
 0x814   :  { %3099 = vmatpush.msra.mxu3 %v16716_v3  ;;  %3119 = vmatpush.msrb.mxu2 %v16717_v61  ;;  %v16725_v3 = vld [vmem:[#allocation631_spill] sm:$0xff]  ;;  %2208 = vst [vmem:[#allocation1 + $0x2d] sm:$0xff] %v12449_v0 }
 0x815   :  { %3139 = vmatpush.msrb.mxu0 %v16718_v29  ;;  %3159 = vmatpush.msrb.mxu1 %v16719_v50  ;;  %v16726_v29 = vld [vmem:[#allocation743_spill] sm:$0xff]  ;;  %v16727_v50 = vld [vmem:[#allocation77_spill] sm:$0xff] }
 0x816   :  { %3100 = vmatpush.msra.mxu3 %v16720_v27  ;;  %3120 = vmatpush.msrb.mxu2 %v16721_v20  ;;  %v16728_v61 = vld [vmem:[#allocation791_spill] sm:$0xff]  ;;  %v16729_v27 = vld [vmem:[#allocation512_spill] sm:$0xff] }
 0x817   :  { %3140 = vmatpush.msrb.mxu0 %v16722_v6  ;;  %3160 = vmatpush.msrb.mxu1 %v16723_v12  ;;  %7778 = vtanh.f32 %v16728_v61  ;;  %v16730_v20 = vld [vmem:[#allocation624_spill] sm:$0xff]  ;;  %v16732_v6 = vld [vmem:[#allocation70_spill] sm:$0xff]  ;;  %v16733_v12 = vld [vmem:[#allocation505_spill] sm:$0xff] }
 0x818   :  { %3101 = vmatpush.msra.mxu3 %v16724_v23  ;;  %3121 = vmatpush.msrb.mxu2 %v16725_v3  ;;  %v16734_v23 = vld [vmem:[#allocation617_spill] sm:$0xff] }
 0x819   :  { %3141 = vmatpush.msrb.mxu0 %v16726_v29  ;;  %3161 = vmatpush.msrb.mxu1 %v16727_v50  ;;  %v16735_v3 = vld [vmem:[#allocation729_spill] sm:$0xff]  ;;  %v16737_v29 = vld [vmem:[#allocation498_spill] sm:$0xff] }
 0x81a   :  { %3102 = vmatpush.msra.mxu3 %v16729_v27  ;;  %3122 = vmatpush.msrb.mxu2 %v16730_v20  ;;  %v16738_v50 = vld [vmem:[#allocation610_spill] sm:$0xff]  ;;  %v16740_v20 = vld [vmem:[#allocation56_spill] sm:$0xff] }
 0x81b   :  { %3142 = vmatpush.msrb.mxu0 %v16731_v45  ;;  %3162 = vmatpush.msrb.mxu1 %v16732_v6  ;;  %v16739_v27 = vld [vmem:[#allocation722_spill] sm:$0xff]  ;;  %v16741_v45 = vld [vmem:[#allocation491_spill] sm:$0xff] }
 0x81c   :  { %3103 = vmatpush.msra.mxu3 %v16733_v12  ;;  %3123 = vmatpush.msrb.mxu2 %v16734_v23  ;;  %v16742_v6 = vld [vmem:[#allocation603_spill] sm:$0xff]  ;;  %v16748_v12 = vld [vmem:[#allocation42_spill] sm:$0xff] }
 0x81d   :  { %3143 = vmatpush.msrb.mxu0 %v16735_v3  ;;  %3163 = vmatpush.msrb.mxu1 %v16736_v51  ;;  %v12469_v61 = vpop.eup %7778  ;;  %v16743_v23 = vld [vmem:[#allocation715_spill] sm:$0xff]  ;;  %v16744_v3 = vld [vmem:[#allocation49_spill] sm:$0xff]  ;;  %v16745_v51 = vld [vmem:[#allocation484_spill] sm:$0xff] }
 0x81e   :  { %3104 = vmatpush.msra.mxu3 %v16737_v29  ;;  %3124 = vmatpush.msrb.mxu2 %v16738_v50  ;;  %2209 = vst [vmem:[#allocation1 + $0x36] sm:$0xff] %v12469_v61  ;;  %v16746_v29 = vld [vmem:[#allocation596_spill] sm:$0xff] }
 0x81f   :  { %3144 = vmatpush.msrb.mxu0 %v16739_v27  ;;  %3164 = vmatpush.msrb.mxu1 %v16740_v20  ;;  %v16747_v50 = vld [vmem:[#allocation708_spill] sm:$0xff]  ;;  %v16749_v27 = vld [vmem:[#allocation477_spill] sm:$0xff] }
 0x820   :  { %3105 = vmatpush.msra.mxu3 %v16741_v45  ;;  %3125 = vmatpush.msrb.mxu2 %v16742_v6  ;;  %v16750_v20 = vld [vmem:[#allocation589_spill] sm:$0xff]  ;;  %v16752_v6 = vld [vmem:[#allocation35_spill] sm:$0xff] }
 0x821   :  { %3145 = vmatpush.msrb.mxu0 %v16743_v23  ;;  %3165 = vmatpush.msrb.mxu1 %v16744_v3  ;;  %v16751_v45 = vld [vmem:[#allocation701_spill] sm:$0xff]  ;;  %v16754_v23 = vld [vmem:[#allocation582_spill] sm:$0xff] }
 0x822   :  { %3106 = vmatpush.msra.mxu3 %v16745_v51  ;;  %3126 = vmatpush.msrb.mxu2 %v16746_v29  ;;  %v16755_v3 = vld [vmem:[#allocation694_spill] sm:$0xff]  ;;  %v16756_v51 = vld [vmem:[#allocation28_spill] sm:$0xff]  ;;  %v16757_v29 = vld [vmem:[#allocation463_spill] sm:$0xff] }
 0x823   :  { %3146 = vmatpush.msrb.mxu0 %v16747_v50  ;;  %3166 = vmatpush.msrb.mxu1 %v16748_v12  ;;  %v16758_v50 = vld [vmem:[#allocation575_spill] sm:$0xff]  ;;  %v12493_v12 = vrot.slane %v12404_v49, 1  ;;  %v12508_v49 = vrot.slane %v12422_v59, 1 }
 0x824   :  { %3107 = vmatpush.msra.mxu3 %v16749_v27  ;;  %3127 = vmatpush.msrb.mxu2 %v16750_v20  ;;  %v16759_v20 = vld [vmem:[#allocation687_spill] sm:$0xff]  ;;  %v16812_v27 = vld [vmem:[#allocation373_spill] sm:$0xff] }
 0x825   :  { %3147 = vmatpush.msrb.mxu0 %v16751_v45  ;;  %3167 = vmatpush.msrb.mxu1 %v16752_v6  ;;  %v16760_v45 = vld [vmem:[#allocation21_spill] sm:$0xff]  ;;  %v16761_v6 = vld [vmem:[#allocation456_spill] sm:$0xff]  ;;  %v16770_v59 = vld [vmem:[#allocation331_spill] sm:$0xff] }
 0x826   :  { %3108 = vmatpush.msra.mxu3 %v16753_v14  ;;  %3128 = vmatpush.msrb.mxu2 %v16754_v23  ;;  %v16762_v14 = vld [vmem:[#allocation568_spill] sm:$0xff]  ;;  %v12500_v23 = vrot.slane %v12413_v63, 1  ;;  %v16768_v63 = vld [vmem:[#allocation7_spill] sm:$0xff] }
 0x827   :  { %3148 = vmatpush.msrb.mxu0 %v16755_v3  ;;  %3168 = vmatpush.msrb.mxu1 %v16756_v51  ;;  %v16763_v3 = vld [vmem:[#allocation680_spill] sm:$0xff]  ;;  %v16764_v51 = vld [vmem:[#allocation14_spill] sm:$0xff] }
 0x828   :  { %3109 = vmatpush.msra.mxu3 %v16757_v29  ;;  %3129 = vmatpush.msrb.mxu2 %v16758_v50  ;;  %v12505_v50 = vrot.slane %v12417_v55, 1  ;;  %v16769_v55 = vld [vmem:[#allocation221_spill] sm:$0xff]  ;;  %v16777_v29 = vld [vmem:[#allocation207_spill] sm:$0xff] }
 0x829   :  { %3149 = vmatpush.msrb.mxu0 %v16759_v20  ;;  %3169 = vmatpush.msrb.mxu1 %v16760_v45  ;;  %v16765_v45 = vld [vmem:[#allocation561_spill] sm:$0xff]  ;;  %v16776_v20 = vld [vmem:[#allocation548_spill] sm:$0xff] }
 0x82a   :  { %3110 = vmatpush.msra.mxu3 %v16761_v6  ;;  %3130 = vmatpush.msrb.mxu2 %v16762_v14  ;;  %v16766_v6 = vld [vmem:[#allocation449_spill] sm:$0xff] }
 0x82b   :  { %3150 = vmatpush.msrb.mxu0 %v16763_v3  ;;  %3170 = vmatpush.msrb.mxu1 %v16764_v51  ;;  %v16767_v14 = vld [vmem:[#allocation673_spill] sm:$0xff]  ;;  %v16771_v51 = vld [vmem:[#allocation443_spill] sm:$0xff] }
 0x82c   :  { %3032 = vmatmul.f32.vlgmr.msrb.gmra.mxu3 %v12493_v12  ;;  %3131 = vmatpush.msrb.mxu2 %v16765_v45  ;;  %v16772_v3 = vld [vmem:[#allocation555_spill] sm:$0xff]  ;;  %v16773_v45 = vld [vmem:[#allocation214_spill] sm:$0xff] }
 0x82d   :  { %3111 = vmatpush.msra.mxu3 %v16766_v6  ;;  %3151 = vmatpush.msrb.mxu0 %v16767_v14  ;;  %v16774_v6 = vld [vmem:[#allocation325_spill] sm:$0xff]  ;;  %v16775_v14 = vld [vmem:[#allocation436_spill] sm:$0xff] }
 0x82e   :  { %3171 = vmatpush.msrb.mxu1 %v16768_v63  ;;  %3052 = vmatmul.f32.vlgmr.msra.gmra.mxu2 %v12500_v23  ;;  %v12525_v63 = vrot.slane %v12440_v19, 1  ;;  %v16782_v19 = vld [vmem:[#allocation200_spill] sm:$0xff] }
 0x82f   :  { %3072 = vmatmul.f32.vlgmr.msra.gmra.mxu0 %v12505_v50  ;;  %3092 = vmatmul.f32.vlgmr.msra.gmra.mxu1 %v12508_v49 }
 0x830   :  { %3176 = vmatpush.msrb.mxu3 %v16769_v55  ;;  %3196 = vmatpush.msra.mxu2 %v16770_v59  ;;  %v16778_v55 = vld [vmem:[#allocation319_spill] sm:$0xff]  ;;  %v12532_v59 = vrot.slane %v12449_v0, 1  ;;  %v16786_v0 = vld [vmem:[#allocation305_spill] sm:$0xff] }
 0x831   :  { %3216 = vmatpush.msra.mxu0 %v16771_v51  ;;  %3236 = vmatpush.msra.mxu1 %v16772_v3  ;;  %v16779_v51 = vld [vmem:[#allocation429_spill] sm:$0xff] }
 0x832   :  { %3177 = vmatpush.msrb.mxu3 %v16773_v45  ;;  %3197 = vmatpush.msra.mxu2 %v16774_v6  ;;  %v16780_v3 = vld [vmem:[#allocation541_spill] sm:$0xff]  ;;  %v16781_v6 = vld [vmem:[#allocation312_spill] sm:$0xff]  ;;  %v16790_v45 = vld [vmem:[#allocation298_spill] sm:$0xff] }
 0x833   :  { %3217 = vmatpush.msra.mxu0 %v16775_v14  ;;  %3237 = vmatpush.msra.mxu1 %v16776_v20  ;;  %v16783_v14 = vld [vmem:[#allocation422_spill] sm:$0xff] }
 0x834   :  { %3178 = vmatpush.msrb.mxu3 %v16777_v29  ;;  %3198 = vmatpush.msra.mxu2 %v16778_v55  ;;  %v16784_v20 = vld [vmem:[#allocation534_spill] sm:$0xff]  ;;  %v16785_v55 = vld [vmem:[#allocation193_spill] sm:$0xff]  ;;  %v16787_v29 = vld [vmem:[#allocation415_spill] sm:$0xff] }
 0x835   :  { %3218 = vmatpush.msra.mxu0 %v16779_v51  ;;  %3238 = vmatpush.msra.mxu1 %v16780_v3  ;;  %v16788_v51 = vld [vmem:[#allocation527_spill] sm:$0xff]  ;;  %v16789_v3 = vld [vmem:[#allocation186_spill] sm:$0xff] }
 0x836   :  { %3112 = vmatmul.f32.vlgmr.msra.gmra.mxu3 %v12525_v63  ;;  %3199 = vmatpush.msra.mxu2 %v16781_v6  ;;  %v16791_v6 = vld [vmem:[#allocation408_spill] sm:$0xff] }
 0x837   :  { %3179 = vmatpush.msrb.mxu3 %v16782_v19  ;;  %3219 = vmatpush.msra.mxu0 %v16783_v14  ;;  %v16792_v19 = vld [vmem:[#allocation520_spill] sm:$0xff]  ;;  %v16793_v14 = vld [vmem:[#allocation179_spill] sm:$0xff] }
 0x838   :  { %3239 = vmatpush.msra.mxu1 %v16784_v20  ;;  %3132 = vmatmul.f32.vlgmr.msrb.gmra.mxu2 %v12532_v59  ;;  %v16794_v20 = vld [vmem:[#allocation291_spill] sm:$0xff] }
 0x839   :  { %3180 = vmatpush.msrb.mxu3 %v16785_v55  ;;  %3200 = vmatpush.msra.mxu2 %v16786_v0  ;;  %v12553_v55 = vrot.slane %v12469_v61, 1  ;;  %v16796_v0 = vld [vmem:[#allocation401_spill] sm:$0xff]  ;;  %v16804_v61 = vld [vmem:[#allocation387_spill] sm:$0xff] }
 0x83a   :  { %3220 = vmatpush.msra.mxu0 %v16787_v29  ;;  %3240 = vmatpush.msra.mxu1 %v16788_v51  ;;  %v16797_v29 = vld [vmem:[#allocation513_spill] sm:$0xff]  ;;  %v16798_v51 = vld [vmem:[#allocation172_spill] sm:$0xff] }
 0x83b   :  { %3181 = vmatpush.msrb.mxu3 %v16789_v3  ;;  %3201 = vmatpush.msra.mxu2 %v16790_v45  ;;  %16795 = vst [vmem:[#allocation318_spill] sm:$0xff] %v12553_v55  ;;  %v16799_v3 = vld [vmem:[#allocation284_spill] sm:$0xff]  ;;  %v16800_v45 = vld [vmem:[#allocation394_spill] sm:$0xff] }
 0x83c   :  { %3221 = vmatpush.msra.mxu0 %v16791_v6  ;;  %3241 = vmatpush.msra.mxu1 %v16792_v19  ;;  %v16801_v6 = vld [vmem:[#allocation506_spill] sm:$0xff]  ;;  %v16802_v19 = vld [vmem:[#allocation165_spill] sm:$0xff] }
 0x83d   :  { %3182 = vmatpush.msrb.mxu3 %v16793_v14  ;;  %3202 = vmatpush.msra.mxu2 %v16794_v20  ;;  %v16803_v20 = vld [vmem:[#allocation277_spill] sm:$0xff]  ;;  %v16805_v14 = vld [vmem:[#allocation499_spill] sm:$0xff] }
 0x83e   :  { %3222 = vmatpush.msra.mxu0 %v16796_v0  ;;  %3242 = vmatpush.msra.mxu1 %v16797_v29  ;;  %v16806_v0 = vld [vmem:[#allocation158_spill] sm:$0xff] }
 0x83f   :  { %3183 = vmatpush.msrb.mxu3 %v16798_v51  ;;  %3203 = vmatpush.msra.mxu2 %v16799_v3  ;;  %v16807_v29 = vld [vmem:[#allocation270_spill] sm:$0xff]  ;;  %v16808_v51 = vld [vmem:[#allocation380_spill] sm:$0xff] }
 0x840   :  { %3223 = vmatpush.msra.mxu0 %v16800_v45  ;;  %3243 = vmatpush.msra.mxu1 %v16801_v6  ;;  %v16809_v3 = vld [vmem:[#allocation492_spill] sm:$0xff]  ;;  %v16810_v45 = vld [vmem:[#allocation151_spill] sm:$0xff] }
 0x841   :  { %3152 = vmatmul.f32.vlgmr.msrb.gmra.mxu0 %v12553_v55  ;;  %3184 = vmatpush.msrb.mxu3 %v16802_v19  ;;  %v16811_v6 = vld [vmem:[#allocation263_spill] sm:$0xff]  ;;  %v16813_v19 = vld [vmem:[#allocation485_spill] sm:$0xff] }
 0x842   :  { %3204 = vmatpush.msra.mxu2 %v16803_v20  ;;  %3224 = vmatpush.msra.mxu0 %v16804_v61  ;;  %v16814_v20 = vld [vmem:[#allocation144_spill] sm:$0xff] }
 0x843   :  { %3244 = vmatpush.msra.mxu1 %v16805_v14  ;;  %3185 = vmatpush.msrb.mxu3 %v16806_v0  ;;  %v16815_v61 = vld [vmem:[#allocation256_spill] sm:$0xff]  ;;  %v16816_v14 = vld [vmem:[#allocation366_spill] sm:$0xff] }
 0x844   :  { %3205 = vmatpush.msra.mxu2 %v16807_v29  ;;  %3225 = vmatpush.msra.mxu0 %v16808_v51  ;;  %v16817_v0 = vld [vmem:[#allocation478_spill] sm:$0xff]  ;;  %v16818_v29 = vld [vmem:[#allocation137_spill] sm:$0xff] }
 0x845   :  { %3245 = vmatpush.msra.mxu1 %v16809_v3  ;;  %3186 = vmatpush.msrb.mxu3 %v16810_v45  ;;  %v16819_v51 = vld [vmem:[#allocation249_spill] sm:$0xff]  ;;  %v16820_v3 = vld [vmem:[#allocation359_spill] sm:$0xff] }
 0x846   :  { %3206 = vmatpush.msra.mxu2 %v16811_v6  ;;  %3226 = vmatpush.msra.mxu0 %v16812_v27  ;;  %v16821_v45 = vld [vmem:[#allocation471_spill] sm:$0xff]  ;;  %v16822_v6 = vld [vmem:[#allocation130_spill] sm:$0xff] }
 0x847   :  { %3246 = vmatpush.msra.mxu1 %v16813_v19  ;;  %3187 = vmatpush.msrb.mxu3 %v16814_v20  ;;  %v16823_v27 = vld [vmem:[#allocation242_spill] sm:$0xff]  ;;  %v16824_v19 = vld [vmem:[#allocation352_spill] sm:$0xff] }
 0x848   :  { %3207 = vmatpush.msra.mxu2 %v16815_v61  ;;  %3227 = vmatpush.msra.mxu0 %v16816_v14  ;;  %v16825_v20 = vld [vmem:[#allocation464_spill] sm:$0xff]  ;;  %v16826_v61 = vld [vmem:[#allocation123_spill] sm:$0xff] }
 0x849   :  { %3247 = vmatpush.msra.mxu1 %v16817_v0  ;;  %3188 = vmatpush.msrb.mxu3 %v16818_v29  ;;  %v16827_v14 = vld [vmem:[#allocation235_spill] sm:$0xff]  ;;  %v16828_v0 = vld [vmem:[#allocation345_spill] sm:$0xff] }
 0x84a   :  { %3208 = vmatpush.msra.mxu2 %v16819_v51  ;;  %3228 = vmatpush.msra.mxu0 %v16820_v3  ;;  %v16829_v29 = vld [vmem:[#allocation457_spill] sm:$0xff]  ;;  %v16830_v51 = vld [vmem:[#allocation116_spill] sm:$0xff] }
 0x84b   :  { %3248 = vmatpush.msra.mxu1 %v16821_v45  ;;  %3189 = vmatpush.msrb.mxu3 %v16822_v6  ;;  %v16831_v3 = vld [vmem:[#allocation228_spill] sm:$0xff]  ;;  %v16832_v45 = vld [vmem:[#allocation338_spill] sm:$0xff] }
 0x84c   :  { %3209 = vmatpush.msra.mxu2 %v16823_v27  ;;  %3229 = vmatpush.msra.mxu0 %v16824_v19  ;;  %v16833_v6 = vld [vmem:[#allocation450_spill] sm:$0xff]  ;;  %v16834_v27 = vld [vmem:[#allocation667_spill] sm:$0xff] }
 0x84d   :  { %3249 = vmatpush.msra.mxu1 %v16825_v20  ;;  %3190 = vmatpush.msrb.mxu3 %v16826_v61  ;;  %v16835_v20 = vld [vmem:[#allocation779_spill] sm:$0xff]  ;;  %v16836_v19 = vld [vmem:[#allocation110_spill] sm:$0xff]  ;;  %v16845_v61 = vld [vmem:[#allocation208_spill] sm:$0xff] }
 0x84e   :  { %3210 = vmatpush.msra.mxu2 %v16827_v14  ;;  %3230 = vmatpush.msra.mxu0 %v16828_v0  ;;  %v16837_v14 = vld [vmem:[#allocation222_spill] sm:$0xff]  ;;  %v16838_v0 = vld [vmem:[#allocation660_spill] sm:$0xff] }
 0x84f   :  { %3250 = vmatpush.msra.mxu1 %v16829_v29  ;;  %3191 = vmatpush.msrb.mxu3 %v16830_v51  ;;  %v16839_v29 = vld [vmem:[#allocation772_spill] sm:$0xff] }
 0x850   :  { %3211 = vmatpush.msra.mxu2 %v16831_v3  ;;  %3231 = vmatpush.msra.mxu0 %v16832_v45  ;;  %v16840_v51 = vld [vmem:[#allocation104_spill] sm:$0xff]  ;;  %v16841_v3 = vld [vmem:[#allocation215_spill] sm:$0xff]  ;;  %v16842_v45 = vld [vmem:[#allocation653_spill] sm:$0xff] }
 0x851   :  { %3251 = vmatpush.msra.mxu1 %v16833_v6  ;;  %3256 = vmatpush.msra.mxu3 %v16834_v27  ;;  %v16843_v6 = vld [vmem:[#allocation765_spill] sm:$0xff]  ;;  %v16844_v27 = vld [vmem:[#allocation98_spill] sm:$0xff] }
 0x852   :  { %3172 = vmatmul.f32.vlgmr.msrb.gmra.mxu1 %v12493_v12  ;;  %3276 = vmatpush.msrb.mxu2 %v16835_v20  ;;  %v16846_v20 = vld [vmem:[#allocation646_spill] sm:$0xff] }
 0x853   :  { %3296 = vmatpush.msrb.mxu0 %v16836_v19  ;;  %3316 = vmatpush.msrb.mxu1 %v16837_v14  ;;  %v16847_v19 = vld [vmem:[#allocation758_spill] sm:$0xff]  ;;  %v16848_v14 = vld [vmem:[#allocation92_spill] sm:$0xff] }
 0x854   :  { %3257 = vmatpush.msra.mxu3 %v16838_v0  ;;  %3277 = vmatpush.msrb.mxu2 %v16839_v29  ;;  %v16849_v0 = vld [vmem:[#allocation201_spill] sm:$0xff]  ;;  %v16850_v29 = vld [vmem:[#allocation639_spill] sm:$0xff] }
 0x855   :  { %3297 = vmatpush.msrb.mxu0 %v16840_v51  ;;  %3317 = vmatpush.msrb.mxu1 %v16841_v3  ;;  %v16851_v51 = vld [vmem:[#allocation751_spill] sm:$0xff]  ;;  %v16852_v3 = vld [vmem:[#allocation85_spill] sm:$0xff] }
 0x856   :  { %3258 = vmatpush.msra.mxu3 %v16842_v45  ;;  %3278 = vmatpush.msrb.mxu2 %v16843_v6  ;;  %v16853_v45 = vld [vmem:[#allocation194_spill] sm:$0xff]  ;;  %v16854_v6 = vld [vmem:[#allocation632_spill] sm:$0xff] }
 0x857   :  { %3298 = vmatpush.msrb.mxu0 %v16844_v27  ;;  %3318 = vmatpush.msrb.mxu1 %v16845_v61  ;;  %v16855_v27 = vld [vmem:[#allocation744_spill] sm:$0xff]  ;;  %v16856_v61 = vld [vmem:[#allocation78_spill] sm:$0xff] }
 0x858   :  { %3259 = vmatpush.msra.mxu3 %v16846_v20  ;;  %3279 = vmatpush.msrb.mxu2 %v16847_v19  ;;  %v16857_v20 = vld [vmem:[#allocation187_spill] sm:$0xff]  ;;  %v16858_v19 = vld [vmem:[#allocation625_spill] sm:$0xff] }
 0x859   :  { %3299 = vmatpush.msrb.mxu0 %v16848_v14  ;;  %3319 = vmatpush.msrb.mxu1 %v16849_v0  ;;  %v16859_v14 = vld [vmem:[#allocation737_spill] sm:$0xff]  ;;  %v16860_v0 = vld [vmem:[#allocation71_spill] sm:$0xff] }
 0x85a   :  { %3260 = vmatpush.msra.mxu3 %v16850_v29  ;;  %3280 = vmatpush.msrb.mxu2 %v16851_v51  ;;  %v16861_v29 = vld [vmem:[#allocation180_spill] sm:$0xff]  ;;  %v16862_v51 = vld [vmem:[#allocation618_spill] sm:$0xff] }
 0x85b   :  { %3300 = vmatpush.msrb.mxu0 %v16852_v3  ;;  %3320 = vmatpush.msrb.mxu1 %v16853_v45  ;;  %v16863_v3 = vld [vmem:[#allocation730_spill] sm:$0xff]  ;;  %v16864_v45 = vld [vmem:[#allocation64_spill] sm:$0xff] }
 0x85c   :  { %3261 = vmatpush.msra.mxu3 %v16854_v6  ;;  %3281 = vmatpush.msrb.mxu2 %v16855_v27  ;;  %v16865_v6 = vld [vmem:[#allocation173_spill] sm:$0xff]  ;;  %v16866_v27 = vld [vmem:[#allocation611_spill] sm:$0xff] }
 0x85d   :  { %3301 = vmatpush.msrb.mxu0 %v16856_v61  ;;  %3321 = vmatpush.msrb.mxu1 %v16857_v20  ;;  %v16867_v61 = vld [vmem:[#allocation723_spill] sm:$0xff]  ;;  %v16868_v20 = vld [vmem:[#allocation57_spill] sm:$0xff] }
 0x85e   :  { %3262 = vmatpush.msra.mxu3 %v16858_v19  ;;  %3282 = vmatpush.msrb.mxu2 %v16859_v14  ;;  %v16869_v19 = vld [vmem:[#allocation166_spill] sm:$0xff]  ;;  %v16870_v14 = vld [vmem:[#allocation604_spill] sm:$0xff] }
 0x85f   :  { %3302 = vmatpush.msrb.mxu0 %v16860_v0  ;;  %3322 = vmatpush.msrb.mxu1 %v16861_v29  ;;  %v16871_v0 = vld [vmem:[#allocation716_spill] sm:$0xff]  ;;  %v16872_v29 = vld [vmem:[#allocation50_spill] sm:$0xff] }
 0x860   :  { %3263 = vmatpush.msra.mxu3 %v16862_v51  ;;  %3283 = vmatpush.msrb.mxu2 %v16863_v3  ;;  %v16873_v51 = vld [vmem:[#allocation159_spill] sm:$0xff]  ;;  %v16874_v3 = vld [vmem:[#allocation597_spill] sm:$0xff] }
 0x861   :  { %3303 = vmatpush.msrb.mxu0 %v16864_v45  ;;  %3323 = vmatpush.msrb.mxu1 %v16865_v6  ;;  %v16875_v45 = vld [vmem:[#allocation709_spill] sm:$0xff]  ;;  %v16876_v6 = vld [vmem:[#allocation43_spill] sm:$0xff] }
 0x862   :  { %3264 = vmatpush.msra.mxu3 %v16866_v27  ;;  %3284 = vmatpush.msrb.mxu2 %v16867_v61  ;;  %v16877_v27 = vld [vmem:[#allocation152_spill] sm:$0xff]  ;;  %v16878_v61 = vld [vmem:[#allocation590_spill] sm:$0xff] }
 0x863   :  { %3304 = vmatpush.msrb.mxu0 %v16868_v20  ;;  %3324 = vmatpush.msrb.mxu1 %v16869_v19  ;;  %v16879_v20 = vld [vmem:[#allocation702_spill] sm:$0xff]  ;;  %v16880_v19 = vld [vmem:[#allocation36_spill] sm:$0xff] }
 0x864   :  { %3265 = vmatpush.msra.mxu3 %v16870_v14  ;;  %3285 = vmatpush.msrb.mxu2 %v16871_v0  ;;  %v16881_v14 = vld [vmem:[#allocation145_spill] sm:$0xff]  ;;  %v16882_v0 = vld [vmem:[#allocation583_spill] sm:$0xff] }
 0x865   :  { %3305 = vmatpush.msrb.mxu0 %v16872_v29  ;;  %3325 = vmatpush.msrb.mxu1 %v16873_v51  ;;  %v16883_v29 = vld [vmem:[#allocation695_spill] sm:$0xff]  ;;  %v16884_v51 = vld [vmem:[#allocation29_spill] sm:$0xff] }
 0x866   :  { %3266 = vmatpush.msra.mxu3 %v16874_v3  ;;  %3286 = vmatpush.msrb.mxu2 %v16875_v45  ;;  %v16885_v3 = vld [vmem:[#allocation138_spill] sm:$0xff]  ;;  %v16886_v45 = vld [vmem:[#allocation576_spill] sm:$0xff] }
 0x867   :  { %3306 = vmatpush.msrb.mxu0 %v16876_v6  ;;  %3326 = vmatpush.msrb.mxu1 %v16877_v27  ;;  %v16887_v6 = vld [vmem:[#allocation688_spill] sm:$0xff]  ;;  %v16888_v27 = vld [vmem:[#allocation22_spill] sm:$0xff] }
 0x868   :  { %3267 = vmatpush.msra.mxu3 %v16878_v61  ;;  %3287 = vmatpush.msrb.mxu2 %v16879_v20  ;;  %v16889_v61 = vld [vmem:[#allocation131_spill] sm:$0xff]  ;;  %v16890_v20 = vld [vmem:[#allocation569_spill] sm:$0xff] }
 0x869   :  { %3307 = vmatpush.msrb.mxu0 %v16880_v19  ;;  %3327 = vmatpush.msrb.mxu1 %v16881_v14  ;;  %v16891_v19 = vld [vmem:[#allocation681_spill] sm:$0xff]  ;;  %v16892_v14 = vld [vmem:[#allocation15_spill] sm:$0xff] }
 0x86a   :  { %3268 = vmatpush.msra.mxu3 %v16882_v0  ;;  %3288 = vmatpush.msrb.mxu2 %v16883_v29  ;;  %v16893_v0 = vld [vmem:[#allocation124_spill] sm:$0xff] }
 0x86b   :  { %3308 = vmatpush.msrb.mxu0 %v16884_v51  ;;  %3328 = vmatpush.msrb.mxu1 %v16885_v3  ;;  %v16894_v51 = vld [vmem:[#allocation674_spill] sm:$0xff]  ;;  %v16896_v29 = vld [vmem:[#allocation8_spill] sm:$0xff] }
 0x86c   :  { %3269 = vmatpush.msra.mxu3 %v16886_v45  ;;  %3289 = vmatpush.msrb.mxu2 %v16887_v6  ;;  %v16895_v3 = vld [vmem:[#allocation562_spill] sm:$0xff]  ;;  %v16897_v6 = vld [vmem:[#allocation117_spill] sm:$0xff] }
 0x86d   :  { %3309 = vmatpush.msrb.mxu0 %v16888_v27  ;;  %3329 = vmatpush.msrb.mxu1 %v16889_v61  ;;  %v16898_v27 = vld [vmem:[#allocation332_spill] sm:$0xff]  ;;  %v16908_v45 = vld [vmem:[#allocation542_spill] sm:$0xff] }
 0x86e   :  { %3270 = vmatpush.msra.mxu3 %v16890_v20  ;;  %3290 = vmatpush.msrb.mxu2 %v16891_v19  ;;  %v16901_v61 = vld [vmem:[#allocation668_spill] sm:$0xff]  ;;  %v16903_v19 = vld [vmem:[#allocation437_spill] sm:$0xff]  ;;  %v16907_v20 = vld [vmem:[#allocation430_spill] sm:$0xff] }
 0x86f   :  { %3310 = vmatpush.msrb.mxu0 %v16892_v14  ;;  %3330 = vmatpush.msrb.mxu1 %v16893_v0  ;;  %v16899_v14 = vld [vmem:[#allocation444_spill] sm:$0xff] }
 0x870   :  { %3192 = vmatmul.f32.vlgmr.msrb.gmra.mxu3 %v12500_v23  ;;  %3291 = vmatpush.msrb.mxu2 %v16894_v51  ;;  %v16900_v0 = vld [vmem:[#allocation556_spill] sm:$0xff]  ;;  %v16902_v51 = vld [vmem:[#allocation326_spill] sm:$0xff] }
 0x871   :  { %3271 = vmatpush.msra.mxu3 %v16895_v3  ;;  %3311 = vmatpush.msrb.mxu0 %v16896_v29  ;;  %v16904_v29 = vld [vmem:[#allocation549_spill] sm:$0xff]  ;;  %v16906_v3 = vld [vmem:[#allocation320_spill] sm:$0xff] }
 0x872   :  { %3331 = vmatpush.msrb.mxu1 %v16897_v6  ;;  %3212 = vmatmul.f32.vlgmr.msra.gmra.mxu2 %v12505_v50  ;;  %v16905_v6 = vld [vmem:[#allocation661_spill] sm:$0xff] }
 0x873   :  { %3232 = vmatmul.f32.vlgmr.msra.gmra.mxu0 %v12508_v49  ;;  %3252 = vmatmul.f32.vlgmr.msra.gmra.mxu1 %v12525_v63 }
 0x874   :  { %3336 = vmatpush.msrb.mxu3 %v16898_v27  ;;  %3356 = vmatpush.msra.mxu2 %v16899_v14  ;;  %v16909_v27 = vld [vmem:[#allocation654_spill] sm:$0xff]  ;;  %v16912_v14 = vld [vmem:[#allocation535_spill] sm:$0xff] }
 0x875   :  { %3376 = vmatpush.msra.mxu0 %v16900_v0  ;;  %3396 = vmatpush.msra.mxu1 %v16901_v61  ;;  %v16910_v0 = vld [vmem:[#allocation423_spill] sm:$0xff]  ;;  %v16911_v61 = vld [vmem:[#allocation313_spill] sm:$0xff] }
 0x876   :  { %3337 = vmatpush.msrb.mxu3 %v16902_v51  ;;  %3357 = vmatpush.msra.mxu2 %v16903_v19  ;;  %v16913_v19 = vld [vmem:[#allocation647_spill] sm:$0xff]  ;;  %v16924_v51 = vld [vmem:[#allocation514_spill] sm:$0xff] }
 0x877   :  { %3377 = vmatpush.msra.mxu0 %v16904_v29  ;;  %3397 = vmatpush.msra.mxu1 %v16905_v6  ;;  %v16914_v29 = vld [vmem:[#allocation306_spill] sm:$0xff]  ;;  %v16915_v6 = vld [vmem:[#allocation416_spill] sm:$0xff] }
 0x878   :  { %3338 = vmatpush.msrb.mxu3 %v16906_v3  ;;  %3358 = vmatpush.msra.mxu2 %v16907_v20  ;;  %v16916_v20 = vld [vmem:[#allocation528_spill] sm:$0xff]  ;;  %v16919_v3 = vld [vmem:[#allocation409_spill] sm:$0xff] }
 0x879   :  { %3378 = vmatpush.msra.mxu0 %v16908_v45  ;;  %3398 = vmatpush.msra.mxu1 %v16909_v27  ;;  %v16917_v45 = vld [vmem:[#allocation640_spill] sm:$0xff]  ;;  %v16918_v27 = vld [vmem:[#allocation299_spill] sm:$0xff] }
 0x87a   :  { %3272 = vmatmul.f32.vlgmr.msra.gmra.mxu3 %v12532_v59  ;;  %3359 = vmatpush.msra.mxu2 %v16910_v0  ;;  %v16920_v0 = vld [vmem:[#allocation521_spill] sm:$0xff] }
 0x87b   :  { %3339 = vmatpush.msrb.mxu3 %v16911_v61  ;;  %3379 = vmatpush.msra.mxu0 %v16912_v14  ;;  %v16921_v61 = vld [vmem:[#allocation633_spill] sm:$0xff]  ;;  %v16922_v14 = vld [vmem:[#allocation292_spill] sm:$0xff] }
 0x87c   :  { %3399 = vmatpush.msra.mxu1 %v16913_v19  ;;  %3292 = vmatmul.f32.vlgmr.msrb.gmra.mxu2 %v12553_v55  ;;  %v16923_v19 = vld [vmem:[#allocation402_spill] sm:$0xff] }
 0x87d   :  { %3340 = vmatpush.msrb.mxu3 %v16914_v29  ;;  %3360 = vmatpush.msra.mxu2 %v16915_v6  ;;  %v16925_v29 = vld [vmem:[#allocation626_spill] sm:$0xff]  ;;  %v16926_v6 = vld [vmem:[#allocation285_spill] sm:$0xff] }
 0x87e   :  { %3380 = vmatpush.msra.mxu0 %v16916_v20  ;;  %3400 = vmatpush.msra.mxu1 %v16917_v45  ;;  %v16927_v20 = vld [vmem:[#allocation395_spill] sm:$0xff] }
 0x87f   :  { %3341 = vmatpush.msrb.mxu3 %v16918_v27  ;;  %3361 = vmatpush.msra.mxu2 %v16919_v3  ;;  %v16928_v45 = vld [vmem:[#allocation507_spill] sm:$0xff]  ;;  %v16930_v3 = vld [vmem:[#allocation278_spill] sm:$0xff] }
 0x880   :  { %3381 = vmatpush.msra.mxu0 %v16920_v0  ;;  %3401 = vmatpush.msra.mxu1 %v16921_v61  ;;  %v16929_v27 = vld [vmem:[#allocation619_spill] sm:$0xff]  ;;  %v16931_v0 = vld [vmem:[#allocation388_spill] sm:$0xff] }
 0x881   :  { %3342 = vmatpush.msrb.mxu3 %v16922_v14  ;;  %3362 = vmatpush.msra.mxu2 %v16923_v19  ;;  %v16932_v61 = vld [vmem:[#allocation500_spill] sm:$0xff]  ;;  %v16934_v19 = vld [vmem:[#allocation271_spill] sm:$0xff] }
 0x882   :  { %3382 = vmatpush.msra.mxu0 %v16924_v51  ;;  %3402 = vmatpush.msra.mxu1 %v16925_v29  ;;  %v16933_v14 = vld [vmem:[#allocation612_spill] sm:$0xff]  ;;  %v16935_v51 = vld [vmem:[#allocation381_spill] sm:$0xff] }
 0x883   :  { %3343 = vmatpush.msrb.mxu3 %v16926_v6  ;;  %3363 = vmatpush.msra.mxu2 %v16927_v20  ;;  %v16936_v29 = vld [vmem:[#allocation493_spill] sm:$0xff]  ;;  %v16938_v20 = vld [vmem:[#allocation264_spill] sm:$0xff] }
 0x884   :  { %3383 = vmatpush.msra.mxu0 %v16928_v45  ;;  %3403 = vmatpush.msra.mxu1 %v16929_v27  ;;  %v16937_v6 = vld [vmem:[#allocation605_spill] sm:$0xff]  ;;  %v16939_v45 = vld [vmem:[#allocation374_spill] sm:$0xff] }
 0x885   :  { %3344 = vmatpush.msrb.mxu3 %v16930_v3  ;;  %3364 = vmatpush.msra.mxu2 %v16931_v0  ;;  %v16940_v27 = vld [vmem:[#allocation486_spill] sm:$0xff]  ;;  %v16942_v0 = vld [vmem:[#allocation257_spill] sm:$0xff] }
 0x886   :  { %3384 = vmatpush.msra.mxu0 %v16932_v61  ;;  %3404 = vmatpush.msra.mxu1 %v16933_v14  ;;  %v16941_v3 = vld [vmem:[#allocation598_spill] sm:$0xff]  ;;  %v16943_v61 = vld [vmem:[#allocation367_spill] sm:$0xff] }
 0x887   :  { %3345 = vmatpush.msrb.mxu3 %v16934_v19  ;;  %3365 = vmatpush.msra.mxu2 %v16935_v51  ;;  %v16944_v14 = vld [vmem:[#allocation479_spill] sm:$0xff]  ;;  %v16946_v51 = vld [vmem:[#allocation250_spill] sm:$0xff] }
 0x888   :  { %3385 = vmatpush.msra.mxu0 %v16936_v29  ;;  %3405 = vmatpush.msra.mxu1 %v16937_v6  ;;  %v16945_v19 = vld [vmem:[#allocation591_spill] sm:$0xff]  ;;  %v16947_v29 = vld [vmem:[#allocation360_spill] sm:$0xff] }
 0x889   :  { %3346 = vmatpush.msrb.mxu3 %v16938_v20  ;;  %3366 = vmatpush.msra.mxu2 %v16939_v45  ;;  %v16948_v6 = vld [vmem:[#allocation472_spill] sm:$0xff]  ;;  %v16950_v45 = vld [vmem:[#allocation243_spill] sm:$0xff] }
 0x88a   :  { %3386 = vmatpush.msra.mxu0 %v16940_v27  ;;  %3406 = vmatpush.msra.mxu1 %v16941_v3  ;;  %v16949_v20 = vld [vmem:[#allocation584_spill] sm:$0xff]  ;;  %v16951_v27 = vld [vmem:[#allocation353_spill] sm:$0xff] }
 0x88b   :  { %3347 = vmatpush.msrb.mxu3 %v16942_v0  ;;  %3367 = vmatpush.msra.mxu2 %v16943_v61  ;;  %v16952_v3 = vld [vmem:[#allocation465_spill] sm:$0xff]  ;;  %v16954_v61 = vld [vmem:[#allocation236_spill] sm:$0xff] }
 0x88c   :  { %3387 = vmatpush.msra.mxu0 %v16944_v14  ;;  %3407 = vmatpush.msra.mxu1 %v16945_v19  ;;  %v16953_v0 = vld [vmem:[#allocation577_spill] sm:$0xff]  ;;  %v16955_v14 = vld [vmem:[#allocation346_spill] sm:$0xff] }
 0x88d   :  { %3348 = vmatpush.msrb.mxu3 %v16946_v51  ;;  %3368 = vmatpush.msra.mxu2 %v16947_v29  ;;  %v16956_v19 = vld [vmem:[#allocation458_spill] sm:$0xff]  ;;  %v16958_v29 = vld [vmem:[#allocation229_spill] sm:$0xff] }
 0x88e   :  { %3388 = vmatpush.msra.mxu0 %v16948_v6  ;;  %3408 = vmatpush.msra.mxu1 %v16949_v20  ;;  %v16957_v51 = vld [vmem:[#allocation570_spill] sm:$0xff]  ;;  %v16959_v6 = vld [vmem:[#allocation339_spill] sm:$0xff] }
 0x88f   :  { %3349 = vmatpush.msrb.mxu3 %v16950_v45  ;;  %3369 = vmatpush.msra.mxu2 %v16951_v27  ;;  %v16960_v20 = vld [vmem:[#allocation451_spill] sm:$0xff]  ;;  %v16967_v27 = vld [vmem:[#allocation105_spill] sm:$0xff] }
 0x890   :  { %3389 = vmatpush.msra.mxu0 %v16952_v3  ;;  %3409 = vmatpush.msra.mxu1 %v16953_v0  ;;  %v16961_v45 = vld [vmem:[#allocation563_spill] sm:$0xff]  ;;  %v16962_v3 = vld [vmem:[#allocation780_spill] sm:$0xff] }
 0x891   :  { %3350 = vmatpush.msrb.mxu3 %v16954_v61  ;;  %3370 = vmatpush.msra.mxu2 %v16955_v14  ;;  %v16963_v0 = vld [vmem:[#allocation111_spill] sm:$0xff]  ;;  %v16972_v61 = vld [vmem:[#allocation209_spill] sm:$0xff] }
 0x892   :  { %3390 = vmatpush.msra.mxu0 %v16956_v19  ;;  %3410 = vmatpush.msra.mxu1 %v16957_v51  ;;  %v16964_v14 = vld [vmem:[#allocation223_spill] sm:$0xff]  ;;  %v16965_v19 = vld [vmem:[#allocation333_spill] sm:$0xff] }
 0x893   :  { %3351 = vmatpush.msrb.mxu3 %v16958_v29  ;;  %3371 = vmatpush.msra.mxu2 %v16959_v6  ;;  %v16966_v51 = vld [vmem:[#allocation773_spill] sm:$0xff]  ;;  %v16968_v6 = vld [vmem:[#allocation216_spill] sm:$0xff]  ;;  %v16971_v29 = vld [vmem:[#allocation99_spill] sm:$0xff] }
 0x894   :  { %3391 = vmatpush.msra.mxu0 %v16960_v20  ;;  %3411 = vmatpush.msra.mxu1 %v16961_v45  ;;  %v16969_v20 = vld [vmem:[#allocation327_spill] sm:$0xff]  ;;  %v16970_v45 = vld [vmem:[#allocation766_spill] sm:$0xff] }
 0x895   :  { %3312 = vmatmul.f32.vlgmr.msrb.gmra.mxu0 %v12493_v12  ;;  %3332 = vmatmul.f32.vlgmr.msrb.gmra.mxu1 %v12500_v23 }
 0x896   :  { %3416 = vmatpush.msra.mxu3 %v16962_v3  ;;  %3436 = vmatpush.msrb.mxu2 %v16963_v0  ;;  %v16973_v3 = vld [vmem:[#allocation321_spill] sm:$0xff]  ;;  %v16974_v0 = vld [vmem:[#allocation759_spill] sm:$0xff] }
 0x897   :  { %3456 = vmatpush.msrb.mxu0 %v16964_v14  ;;  %3476 = vmatpush.msrb.mxu1 %v16965_v19  ;;  %v16975_v14 = vld [vmem:[#allocation93_spill] sm:$0xff]  ;;  %v16976_v19 = vld [vmem:[#allocation202_spill] sm:$0xff] }
 0x898   :  { %3417 = vmatpush.msra.mxu3 %v16966_v51  ;;  %3437 = vmatpush.msrb.mxu2 %v16967_v27  ;;  %v16977_v51 = vld [vmem:[#allocation314_spill] sm:$0xff]  ;;  %v16978_v27 = vld [vmem:[#allocation752_spill] sm:$0xff] }
 0x899   :  { %3457 = vmatpush.msrb.mxu0 %v16968_v6  ;;  %3477 = vmatpush.msrb.mxu1 %v16969_v20  ;;  %v16979_v6 = vld [vmem:[#allocation86_spill] sm:$0xff]  ;;  %v16980_v20 = vld [vmem:[#allocation195_spill] sm:$0xff] }
 0x89a   :  { %3418 = vmatpush.msra.mxu3 %v16970_v45  ;;  %3438 = vmatpush.msrb.mxu2 %v16971_v29  ;;  %v16981_v45 = vld [vmem:[#allocation307_spill] sm:$0xff]  ;;  %v16982_v29 = vld [vmem:[#allocation745_spill] sm:$0xff] }
 0x89b   :  { %3458 = vmatpush.msrb.mxu0 %v16972_v61  ;;  %3478 = vmatpush.msrb.mxu1 %v16973_v3  ;;  %v16983_v61 = vld [vmem:[#allocation79_spill] sm:$0xff]  ;;  %v16984_v3 = vld [vmem:[#allocation188_spill] sm:$0xff] }
 0x89c   :  { %3419 = vmatpush.msra.mxu3 %v16974_v0  ;;  %3439 = vmatpush.msrb.mxu2 %v16975_v14  ;;  %v16985_v0 = vld [vmem:[#allocation300_spill] sm:$0xff]  ;;  %v16986_v14 = vld [vmem:[#allocation738_spill] sm:$0xff] }
 0x89d   :  { %3459 = vmatpush.msrb.mxu0 %v16976_v19  ;;  %3479 = vmatpush.msrb.mxu1 %v16977_v51  ;;  %v16987_v19 = vld [vmem:[#allocation72_spill] sm:$0xff]  ;;  %v16988_v51 = vld [vmem:[#allocation181_spill] sm:$0xff] }
 0x89e   :  { %3420 = vmatpush.msra.mxu3 %v16978_v27  ;;  %3440 = vmatpush.msrb.mxu2 %v16979_v6  ;;  %v16989_v27 = vld [vmem:[#allocation293_spill] sm:$0xff]  ;;  %v16990_v6 = vld [vmem:[#allocation731_spill] sm:$0xff] }
 0x89f   :  { %3460 = vmatpush.msrb.mxu0 %v16980_v20  ;;  %3480 = vmatpush.msrb.mxu1 %v16981_v45  ;;  %v16991_v20 = vld [vmem:[#allocation65_spill] sm:$0xff]  ;;  %v16992_v45 = vld [vmem:[#allocation174_spill] sm:$0xff] }
 0x8a0   :  { %3421 = vmatpush.msra.mxu3 %v16982_v29  ;;  %3441 = vmatpush.msrb.mxu2 %v16983_v61  ;;  %v16993_v29 = vld [vmem:[#allocation286_spill] sm:$0xff]  ;;  %v16994_v61 = vld [vmem:[#allocation724_spill] sm:$0xff] }
 0x8a1   :  { %3461 = vmatpush.msrb.mxu0 %v16984_v3  ;;  %3481 = vmatpush.msrb.mxu1 %v16985_v0  ;;  %v16995_v3 = vld [vmem:[#allocation58_spill] sm:$0xff]  ;;  %v16996_v0 = vld [vmem:[#allocation167_spill] sm:$0xff] }
 0x8a2   :  { %3422 = vmatpush.msra.mxu3 %v16986_v14  ;;  %3442 = vmatpush.msrb.mxu2 %v16987_v19  ;;  %v16997_v14 = vld [vmem:[#allocation279_spill] sm:$0xff]  ;;  %v16998_v19 = vld [vmem:[#allocation717_spill] sm:$0xff] }
 0x8a3   :  { %3462 = vmatpush.msrb.mxu0 %v16988_v51  ;;  %3482 = vmatpush.msrb.mxu1 %v16989_v27  ;;  %v16999_v51 = vld [vmem:[#allocation51_spill] sm:$0xff]  ;;  %v17000_v27 = vld [vmem:[#allocation160_spill] sm:$0xff] }
 0x8a4   :  { %3423 = vmatpush.msra.mxu3 %v16990_v6  ;;  %3443 = vmatpush.msrb.mxu2 %v16991_v20  ;;  %v17001_v6 = vld [vmem:[#allocation272_spill] sm:$0xff]  ;;  %v17002_v20 = vld [vmem:[#allocation710_spill] sm:$0xff] }
 0x8a5   :  { %3463 = vmatpush.msrb.mxu0 %v16992_v45  ;;  %3483 = vmatpush.msrb.mxu1 %v16993_v29  ;;  %v17003_v45 = vld [vmem:[#allocation44_spill] sm:$0xff]  ;;  %v17004_v29 = vld [vmem:[#allocation153_spill] sm:$0xff] }
 0x8a6   :  { %3424 = vmatpush.msra.mxu3 %v16994_v61  ;;  %3444 = vmatpush.msrb.mxu2 %v16995_v3  ;;  %v17005_v61 = vld [vmem:[#allocation265_spill] sm:$0xff]  ;;  %v17006_v3 = vld [vmem:[#allocation703_spill] sm:$0xff] }
 0x8a7   :  { %3464 = vmatpush.msrb.mxu0 %v16996_v0  ;;  %3484 = vmatpush.msrb.mxu1 %v16997_v14  ;;  %v17007_v0 = vld [vmem:[#allocation37_spill] sm:$0xff]  ;;  %v17008_v14 = vld [vmem:[#allocation146_spill] sm:$0xff] }
 0x8a8   :  { %3425 = vmatpush.msra.mxu3 %v16998_v19  ;;  %3445 = vmatpush.msrb.mxu2 %v16999_v51  ;;  %v17009_v19 = vld [vmem:[#allocation258_spill] sm:$0xff]  ;;  %v17010_v51 = vld [vmem:[#allocation696_spill] sm:$0xff] }
 0x8a9   :  { %3465 = vmatpush.msrb.mxu0 %v17000_v27  ;;  %3485 = vmatpush.msrb.mxu1 %v17001_v6  ;;  %v17011_v27 = vld [vmem:[#allocation30_spill] sm:$0xff]  ;;  %v17012_v6 = vld [vmem:[#allocation139_spill] sm:$0xff] }
 0x8aa   :  { %3426 = vmatpush.msra.mxu3 %v17002_v20  ;;  %3446 = vmatpush.msrb.mxu2 %v17003_v45  ;;  %v17013_v20 = vld [vmem:[#allocation251_spill] sm:$0xff] }
 0x8ab   :  { %3466 = vmatpush.msrb.mxu0 %v17004_v29  ;;  %3486 = vmatpush.msrb.mxu1 %v17005_v61  ;;  %v17014_v29 = vld [vmem:[#allocation689_spill] sm:$0xff]  ;;  %v17015_v61 = vld [vmem:[#allocation23_spill] sm:$0xff] }
 0x8ac   :  { %3427 = vmatpush.msra.mxu3 %v17006_v3  ;;  %3447 = vmatpush.msrb.mxu2 %v17007_v0  ;;  %v17016_v3 = vld [vmem:[#allocation132_spill] sm:$0xff]  ;;  %v3073_v16 = vpop.f32.mrf.mxu0 }
 0x8ad   :  { %3467 = vmatpush.msrb.mxu0 %v17008_v14  ;;  %3487 = vmatpush.msrb.mxu1 %v17009_v19  ;;  %v17017_v0 = vld [vmem:[#allocation244_spill] sm:$0xff]  ;;  %v17018_v19 = vld [vmem:[#allocation682_spill] sm:$0xff] }
 0x8ae   :  { %3428 = vmatpush.msra.mxu3 %v17010_v51  ;;  %3448 = vmatpush.msrb.mxu2 %v17011_v27  ;;  %v17019_v51 = vld [vmem:[#allocation16_spill] sm:$0xff] }
 0x8af   :  { %3468 = vmatpush.msrb.mxu0 %v17012_v6  ;;  %3488 = vmatpush.msrb.mxu1 %v17013_v20  ;;  %v3033_v45 = vpop.f32.mrf.mxu3  ;;  %v17021_v6 = vld [vmem:[#allocation237_spill] sm:$0xff]  ;;  %v3093_v20 = vpop.f32.mrf.mxu1 }
 0x8b0   :  { %3429 = vmatpush.msra.mxu3 %v17014_v29  ;;  %3449 = vmatpush.msrb.mxu2 %v17015_v61  ;;  %v17022_v29 = vld [vmem:[#allocation9_spill] sm:$0xff] }
 0x8b1   :  { %3469 = vmatpush.msrb.mxu0 %v17016_v3  ;;  %3489 = vmatpush.msrb.mxu1 %v17017_v0  ;;  %v3053_v14 = vpop.f32.mrf.mxu2  ;;  %v17023_v3 = vld [vmem:[#allocation675_spill] sm:$0xff]  ;;  %v17024_v0 = vld [vmem:[#allocation118_spill] sm:$0xff] }
 0x8b2   :  { %3430 = vmatpush.msra.mxu3 %v17018_v19  ;;  %3450 = vmatpush.msrb.mxu2 %v17019_v51  ;;  %v3054_v27 = vadd.f32 %v3053_v14, %v3033_v45  ;;  %v17026_v14 = vld [vmem:[#allocation445_spill] sm:$0xff]  ;;  %v17036_v19 = vld [vmem:[#allocation655_spill] sm:$0xff] }
 0x8b3   :  { %3470 = vmatpush.msrb.mxu0 %v17020_v22  ;;  %3490 = vmatpush.msrb.mxu1 %v17021_v6  ;;  %v17027_v45 = vld [vmem:[#allocation557_spill] sm:$0xff]  ;;  %v17030_v6 = vld [vmem:[#allocation438_spill] sm:$0xff] }
 0x8b4   :  { %3352 = vmatmul.f32.vlgmr.msrb.gmra.mxu3 %v12505_v50  ;;  %3451 = vmatpush.msrb.mxu2 %v17022_v29  ;;  %v3074_v61 = vadd.f32 %v3073_v16, %v3054_v27  ;;  %v17028_v22 = vld [vmem:[#allocation669_spill] sm:$0xff]  ;;  %v17032_v29 = vld [vmem:[#allocation662_spill] sm:$0xff] }
 0x8b5   :  { %3431 = vmatpush.msra.mxu3 %v17023_v3  ;;  %3471 = vmatpush.msrb.mxu0 %v17024_v0  ;;  %v17029_v16 = vld [vmem:[#allocation781_spill] sm:$0xff]  ;;  %v17031_v0 = vld [vmem:[#allocation550_spill] sm:$0xff]  ;;  %v17034_v3 = vld [vmem:[#allocation431_spill] sm:$0xff] }
 0x8b6   :  { %3491 = vmatpush.msrb.mxu1 %v17025_v32  ;;  %3372 = vmatmul.f32.vlgmr.msra.gmra.mxu2 %v12508_v49  ;;  %v3094_v51 = vadd.f32 %v3093_v20, %v3074_v61  ;;  %v17033_v20 = vld [vmem:[#allocation774_spill] sm:$0xff] }
 0x8b7   :  { %3392 = vmatmul.f32.vlgmr.msra.gmra.mxu0 %v12525_v63  ;;  %3412 = vmatmul.f32.vlgmr.msra.gmra.mxu1 %v12532_v59 }
 0x8b8   :  { %3496 = vmatpush.msrb.mxu3 %v17026_v14  ;;  %3516 = vmatpush.msra.mxu2 %v17027_v45  ;;  %v17035_v14 = vld [vmem:[#allocation543_spill] sm:$0xff] }
 0x8b9   :  { %3536 = vmatpush.msra.mxu0 %v17028_v22  ;;  %3556 = vmatpush.msra.mxu1 %v17029_v16  ;;  %v3113_v27 = vpop.f32.mrf.mxu3  ;;  %v17037_v22 = vld [vmem:[#allocation767_spill] sm:$0xff]  ;;  %v17038_v16 = vld [vmem:[#allocation536_spill] sm:$0xff] }
 0x8ba   :  { %3497 = vmatpush.msrb.mxu3 %v17030_v6  ;;  %3517 = vmatpush.msra.mxu2 %v17031_v0  ;;  %v3114_v32 = vadd.f32 %v3113_v27, %v3094_v51  ;;  %v17039_v51 = vld [vmem:[#allocation424_spill] sm:$0xff]  ;;  %v17048_v6 = vld [vmem:[#allocation634_spill] sm:$0xff] }
 0x8bb   :  { %3537 = vmatpush.msra.mxu0 %v17032_v29  ;;  %3557 = vmatpush.msra.mxu1 %v17033_v20  ;;  %v3133_v61 = vpop.f32.mrf.mxu2  ;;  %v17040_v27 = vld [vmem:[#allocation648_spill] sm:$0xff] }
 0x8bc   :  { %3498 = vmatpush.msrb.mxu3 %v17034_v3  ;;  %3518 = vmatpush.msra.mxu2 %v17035_v14  ;;  %v3134_v45 = vadd.f32 %v3133_v61, %v3114_v32  ;;  %v17041_v20 = vld [vmem:[#allocation760_spill] sm:$0xff]  ;;  %v17042_v3 = vld [vmem:[#allocation529_spill] sm:$0xff] }
 0x8bd   :  { %3538 = vmatpush.msra.mxu0 %v17036_v19  ;;  %3558 = vmatpush.msra.mxu1 %v17037_v22  ;;  %v17043_v14 = vld [vmem:[#allocation417_spill] sm:$0xff]  ;;  %v17046_v22 = vld [vmem:[#allocation522_spill] sm:$0xff] }
 0x8be   :  { %3432 = vmatmul.f32.vlgmr.msra.gmra.mxu3 %v12553_v55  ;;  %3519 = vmatpush.msra.mxu2 %v17038_v16  ;;  %v3153_v0 = vpop.f32.mrf.mxu0  ;;  %v17044_v32 = vld [vmem:[#allocation641_spill] sm:$0xff]  ;;  %v17047_v16 = vld [vmem:[#allocation410_spill] sm:$0xff] }
 0x8bf   :  { %3499 = vmatpush.msrb.mxu3 %v17039_v51  ;;  %3539 = vmatpush.msra.mxu0 %v17040_v27  ;;  %v3154_v29 = vadd.f32 %v3153_v0, %v3134_v45  ;;  %v17045_v19 = vld [vmem:[#allocation753_spill] sm:$0xff]  ;;  %v17049_v0 = vld [vmem:[#allocation746_spill] sm:$0xff]  ;;  %v17050_v45 = vld [vmem:[#allocation515_spill] sm:$0xff] }
 0x8c0   :  { %3559 = vmatpush.msra.mxu1 %v17041_v20  ;;  %3520 = vmatpush.msra.mxu2 %v17042_v3  ;;  %v17051_v20 = vld [vmem:[#allocation403_spill] sm:$0xff]  ;;  %v17146_v51 = vld [vmem:[#allocation245_spill] sm:$0xff] }
 0x8c1   :  { %3500 = vmatpush.msrb.mxu3 %v17043_v14  ;;  %3540 = vmatpush.msra.mxu0 %v17044_v32  ;;  %v4003_v61 = vrot.slane %v3154_v29, 5  ;;  %v17052_v3 = vld [vmem:[#allocation627_spill] sm:$0xff]  ;;  %v17054_v32 = vld [vmem:[#allocation508_spill] sm:$0xff] }
 0x8c2   :  { %3560 = vmatpush.msra.mxu1 %v17045_v19  ;;  %3521 = vmatpush.msra.mxu2 %v17046_v22  ;;  %v17053_v29 = vld [vmem:[#allocation739_spill] sm:$0xff]  ;;  %v17055_v19 = vld [vmem:[#allocation396_spill] sm:$0xff] }
 0x8c3   :  { %3501 = vmatpush.msrb.mxu3 %v17047_v16  ;;  %3541 = vmatpush.msra.mxu0 %v17048_v6  ;;  %v4017_v27 = vadd.f32 %v4003_v61, %v12243_v62  ;;  %v17056_v22 = vld [vmem:[#allocation620_spill] sm:$0xff]  ;;  %v17058_v62 = vld [vmem:[#allocation501_spill] sm:$0xff] }
 0x8c4   :  { %3561 = vmatpush.msra.mxu1 %v17049_v0  ;;  %3522 = vmatpush.msra.mxu2 %v17050_v45  ;;  %v17057_v6 = vld [vmem:[#allocation732_spill] sm:$0xff]  ;;  %v17059_v61 = vld [vmem:[#allocation389_spill] sm:$0xff] }
 0x8c5   :  { %3502 = vmatpush.msrb.mxu3 %v17051_v20  ;;  %3542 = vmatpush.msra.mxu0 %v17052_v3  ;;  %7780 = vtanh.f32 %v4017_v27  ;;  %v17060_v0 = vld [vmem:[#allocation613_spill] sm:$0xff]  ;;  %v17063_v27 = vld [vmem:[#allocation494_spill] sm:$0xff]  ;;  %v17074_v20 = vld [vmem:[#allocation592_spill] sm:$0xff] }
 0x8c6   :  { %3562 = vmatpush.msra.mxu1 %v17053_v29  ;;  %3523 = vmatpush.msra.mxu2 %v17054_v32  ;;  %v12836_v45 = vld [vmem:[#allocation1 + $0x1] ss:$9 sm:$0xff] }
 0x8c7   :  { %3503 = vmatpush.msrb.mxu3 %v17055_v19  ;;  %3543 = vmatpush.msra.mxu0 %v17056_v22  ;;  %17061 = vst [vmem:[#allocation90_spill] sm:$0xff] %v12836_v45  ;;  %v17062_v3 = vld [vmem:[#allocation725_spill] sm:$0xff]  ;;  %v17065_v32 = vld [vmem:[#allocation382_spill] sm:$0xff]  ;;  %v17142_v14 = vld [vmem:[#allocation252_spill] sm:$0xff] }
 0x8c8   :  { %3563 = vmatpush.msra.mxu1 %v17057_v6  ;;  %3524 = vmatpush.msra.mxu2 %v17058_v62  ;;  %v17066_v19 = vld [vmem:[#allocation606_spill] sm:$0xff]  ;;  %v17068_v6 = vld [vmem:[#allocation487_spill] sm:$0xff]  ;;  %v17079_v16 = vld [vmem:[#allocation697_spill] sm:$0xff] }
 0x8c9   :  { %3504 = vmatpush.msrb.mxu3 %v17059_v61  ;;  %3544 = vmatpush.msra.mxu0 %v17060_v0  ;;  %v17067_v22 = vld [vmem:[#allocation718_spill] sm:$0xff]  ;;  %v17069_v62 = vld [vmem:[#allocation375_spill] sm:$0xff]  ;;  %v17148_v45 = vld [vmem:[#allocation17_spill] sm:$0xff] }
 0x8ca   :  { %3564 = vmatpush.msra.mxu1 %v17062_v3  ;;  %3525 = vmatpush.msra.mxu2 %v17063_v27  ;;  %v17070_v0 = vld [vmem:[#allocation599_spill] sm:$0xff]  ;;  %v17072_v3 = vld [vmem:[#allocation480_spill] sm:$0xff] }
 0x8cb   :  { %v12840_v29 = vpop.eup %7780  ;;  %3505 = vmatpush.msrb.mxu3 %v17065_v32  ;;  %3545 = vmatpush.msra.mxu0 %v17066_v19  ;;  %v17071_v61 = vld [vmem:[#allocation711_spill] sm:$0xff]  ;;  %v17073_v27 = vld [vmem:[#allocation368_spill] sm:$0xff]  ;;  %v17076_v19 = vld [vmem:[#allocation473_spill] sm:$0xff] }
 0x8cc   :  { %17064 = vst [vmem:[#allocation311_spill] sm:$0xff] %v12840_v29  ;;  %3565 = vmatpush.msra.mxu1 %v17067_v22  ;;  %3526 = vmatpush.msra.mxu2 %v17068_v6  ;;  %v17075_v32 = vld [vmem:[#allocation704_spill] sm:$0xff]  ;;  %v17077_v22 = vld [vmem:[#allocation361_spill] sm:$0xff] }
 0x8cd   :  { %4038 = vst [vmem:[#allocation1] sm:$0xff] %v12840_v29  ;;  %3506 = vmatpush.msrb.mxu3 %v17069_v62  ;;  %3546 = vmatpush.msra.mxu0 %v17070_v0  ;;  %v17078_v6 = vld [vmem:[#allocation585_spill] sm:$0xff]  ;;  %v17080_v62 = vld [vmem:[#allocation466_spill] sm:$0xff] }
 0x8ce   :  { %3566 = vmatpush.msra.mxu1 %v17071_v61  ;;  %3527 = vmatpush.msra.mxu2 %v17072_v3  ;;  %v17081_v0 = vld [vmem:[#allocation354_spill] sm:$0xff] }
 0x8cf   :  { %3507 = vmatpush.msrb.mxu3 %v17073_v27  ;;  %3547 = vmatpush.msra.mxu0 %v17074_v20  ;;  %v17082_v61 = vld [vmem:[#allocation578_spill] sm:$0xff]  ;;  %v17084_v27 = vld [vmem:[#allocation459_spill] sm:$0xff] }
 0x8d0   :  { %3567 = vmatpush.msra.mxu1 %v17075_v32  ;;  %3528 = vmatpush.msra.mxu2 %v17076_v19  ;;  %v17083_v3 = vld [vmem:[#allocation690_spill] sm:$0xff]  ;;  %v17085_v20 = vld [vmem:[#allocation347_spill] sm:$0xff] }
 0x8d1   :  { %3508 = vmatpush.msrb.mxu3 %v17077_v22  ;;  %3548 = vmatpush.msra.mxu0 %v17078_v6  ;;  %v17086_v32 = vld [vmem:[#allocation571_spill] sm:$0xff]  ;;  %v17088_v22 = vld [vmem:[#allocation452_spill] sm:$0xff] }
 0x8d2   :  { %3568 = vmatpush.msra.mxu1 %v17079_v16  ;;  %3529 = vmatpush.msra.mxu2 %v17080_v62  ;;  %v17087_v19 = vld [vmem:[#allocation683_spill] sm:$0xff]  ;;  %v17089_v6 = vld [vmem:[#allocation340_spill] sm:$0xff] }
 0x8d3   :  { %3509 = vmatpush.msrb.mxu3 %v17081_v0  ;;  %3549 = vmatpush.msra.mxu0 %v17082_v61  ;;  %v17090_v16 = vld [vmem:[#allocation564_spill] sm:$0xff]  ;;  %v17102_v0 = vld [vmem:[#allocation322_spill] sm:$0xff] }
 0x8d4   :  { %3569 = vmatpush.msra.mxu1 %v17083_v3  ;;  %3530 = vmatpush.msra.mxu2 %v17084_v27  ;;  %v17091_v62 = vld [vmem:[#allocation676_spill] sm:$0xff]  ;;  %v17097_v27 = vld [vmem:[#allocation217_spill] sm:$0xff] }
 0x8d5   :  { %3510 = vmatpush.msrb.mxu3 %v17085_v20  ;;  %3550 = vmatpush.msra.mxu0 %v17086_v32  ;;  %v17092_v61 = vld [vmem:[#allocation112_spill] sm:$0xff]  ;;  %v17094_v32 = vld [vmem:[#allocation334_spill] sm:$0xff] }
 0x8d6   :  { %3570 = vmatpush.msra.mxu1 %v17087_v19  ;;  %3531 = vmatpush.msra.mxu2 %v17088_v22  ;;  %v17093_v3 = vld [vmem:[#allocation224_spill] sm:$0xff]  ;;  %v17095_v19 = vld [vmem:[#allocation446_spill] sm:$0xff] }
 0x8d7   :  { %3511 = vmatpush.msrb.mxu3 %v17089_v6  ;;  %3551 = vmatpush.msra.mxu0 %v17090_v16  ;;  %v17096_v22 = vld [vmem:[#allocation106_spill] sm:$0xff]  ;;  %v17098_v16 = vld [vmem:[#allocation328_spill] sm:$0xff] }
 0x8d8   :  { %3571 = vmatpush.msra.mxu1 %v17091_v62  ;;  %3452 = vmatmul.f32.vlgmr.msrb.gmra.mxu2 %v12493_v12  ;;  %v17099_v62 = vld [vmem:[#allocation439_spill] sm:$0xff]  ;;  %v17100_v6 = vld [vmem:[#allocation100_spill] sm:$0xff]  ;;  %v17101_v20 = vld [vmem:[#allocation210_spill] sm:$0xff] }
 0x8d9   :  { %3472 = vmatmul.f32.vlgmr.msrb.gmra.mxu0 %v12500_v23  ;;  %3492 = vmatmul.f32.vlgmr.msrb.gmra.mxu1 %v12505_v50 }
 0x8da   :  { %3576 = vmatpush.msra.mxu3 %v17092_v61  ;;  %3596 = vmatpush.msrb.mxu2 %v17093_v3  ;;  %v17103_v61 = vld [vmem:[#allocation432_spill] sm:$0xff]  ;;  %v17104_v3 = vld [vmem:[#allocation94_spill] sm:$0xff] }
 0x8db   :  { %3616 = vmatpush.msrb.mxu0 %v17094_v32  ;;  %3636 = vmatpush.msrb.mxu1 %v17095_v19  ;;  %v17105_v32 = vld [vmem:[#allocation203_spill] sm:$0xff] }
 0x8dc   :  { %3577 = vmatpush.msra.mxu3 %v17096_v22  ;;  %3597 = vmatpush.msrb.mxu2 %v17097_v27  ;;  %v17106_v19 = vld [vmem:[#allocation315_spill] sm:$0xff]  ;;  %v17107_v22 = vld [vmem:[#allocation425_spill] sm:$0xff] }
 0x8dd   :  { %3617 = vmatpush.msrb.mxu0 %v17098_v16  ;;  %3637 = vmatpush.msrb.mxu1 %v17099_v62  ;;  %v17108_v27 = vld [vmem:[#allocation87_spill] sm:$0xff]  ;;  %v17109_v16 = vld [vmem:[#allocation196_spill] sm:$0xff] }
 0x8de   :  { %3578 = vmatpush.msra.mxu3 %v17100_v6  ;;  %3598 = vmatpush.msrb.mxu2 %v17101_v20  ;;  %v17110_v62 = vld [vmem:[#allocation308_spill] sm:$0xff]  ;;  %v17111_v6 = vld [vmem:[#allocation418_spill] sm:$0xff] }
 0x8df   :  { %3618 = vmatpush.msrb.mxu0 %v17102_v0  ;;  %3638 = vmatpush.msrb.mxu1 %v17103_v61  ;;  %v17112_v20 = vld [vmem:[#allocation80_spill] sm:$0xff]  ;;  %v17113_v0 = vld [vmem:[#allocation189_spill] sm:$0xff] }
 0x8e0   :  { %3579 = vmatpush.msra.mxu3 %v17104_v3  ;;  %3599 = vmatpush.msrb.mxu2 %v17105_v32  ;;  %v17114_v61 = vld [vmem:[#allocation301_spill] sm:$0xff]  ;;  %v17115_v3 = vld [vmem:[#allocation411_spill] sm:$0xff] }
 0x8e1   :  { %3619 = vmatpush.msrb.mxu0 %v17106_v19  ;;  %3639 = vmatpush.msrb.mxu1 %v17107_v22  ;;  %v17116_v32 = vld [vmem:[#allocation73_spill] sm:$0xff]  ;;  %v17117_v19 = vld [vmem:[#allocation182_spill] sm:$0xff] }
 0x8e2   :  { %3580 = vmatpush.msra.mxu3 %v17108_v27  ;;  %3600 = vmatpush.msrb.mxu2 %v17109_v16  ;;  %v17118_v22 = vld [vmem:[#allocation294_spill] sm:$0xff]  ;;  %v17119_v27 = vld [vmem:[#allocation404_spill] sm:$0xff] }
 0x8e3   :  { %3620 = vmatpush.msrb.mxu0 %v17110_v62  ;;  %3640 = vmatpush.msrb.mxu1 %v17111_v6  ;;  %v17120_v16 = vld [vmem:[#allocation66_spill] sm:$0xff]  ;;  %v17121_v62 = vld [vmem:[#allocation175_spill] sm:$0xff] }
 0x8e4   :  { %3581 = vmatpush.msra.mxu3 %v17112_v20  ;;  %3601 = vmatpush.msrb.mxu2 %v17113_v0  ;;  %v17122_v6 = vld [vmem:[#allocation287_spill] sm:$0xff]  ;;  %v17123_v20 = vld [vmem:[#allocation397_spill] sm:$0xff] }
 0x8e5   :  { %3621 = vmatpush.msrb.mxu0 %v17114_v61  ;;  %3641 = vmatpush.msrb.mxu1 %v17115_v3  ;;  %v17124_v0 = vld [vmem:[#allocation59_spill] sm:$0xff]  ;;  %v17125_v61 = vld [vmem:[#allocation168_spill] sm:$0xff] }
 0x8e6   :  { %3582 = vmatpush.msra.mxu3 %v17116_v32  ;;  %3602 = vmatpush.msrb.mxu2 %v17117_v19  ;;  %v17126_v3 = vld [vmem:[#allocation280_spill] sm:$0xff]  ;;  %v17127_v32 = vld [vmem:[#allocation390_spill] sm:$0xff] }
 0x8e7   :  { %3622 = vmatpush.msrb.mxu0 %v17118_v22  ;;  %3642 = vmatpush.msrb.mxu1 %v17119_v27  ;;  %v17128_v19 = vld [vmem:[#allocation52_spill] sm:$0xff]  ;;  %v17129_v22 = vld [vmem:[#allocation161_spill] sm:$0xff] }
 0x8e8   :  { %3583 = vmatpush.msra.mxu3 %v17120_v16  ;;  %3603 = vmatpush.msrb.mxu2 %v17121_v62  ;;  %v17130_v27 = vld [vmem:[#allocation273_spill] sm:$0xff]  ;;  %v17131_v16 = vld [vmem:[#allocation383_spill] sm:$0xff]  ;;  %v3173_v62 = vpop.f32.mrf.mxu1 }
 0x8e9   :  { %3623 = vmatpush.msrb.mxu0 %v17122_v6  ;;  %3643 = vmatpush.msrb.mxu1 %v17123_v20  ;;  %v17132_v6 = vld [vmem:[#allocation45_spill] sm:$0xff]  ;;  %v17133_v20 = vld [vmem:[#allocation154_spill] sm:$0xff] }
 0x8ea   :  { %3584 = vmatpush.msra.mxu3 %v17124_v0  ;;  %3604 = vmatpush.msrb.mxu2 %v17125_v61  ;;  %v17134_v0 = vld [vmem:[#allocation266_spill] sm:$0xff]  ;;  %v17135_v61 = vld [vmem:[#allocation376_spill] sm:$0xff] }
 0x8eb   :  { %3624 = vmatpush.msrb.mxu0 %v17126_v3  ;;  %3644 = vmatpush.msrb.mxu1 %v17127_v32  ;;  %v17136_v3 = vld [vmem:[#allocation38_spill] sm:$0xff]  ;;  %v17137_v32 = vld [vmem:[#allocation147_spill] sm:$0xff] }
 0x8ec   :  { %3585 = vmatpush.msra.mxu3 %v17128_v19  ;;  %3605 = vmatpush.msrb.mxu2 %v17129_v22  ;;  %v17138_v19 = vld [vmem:[#allocation259_spill] sm:$0xff]  ;;  %v17139_v22 = vld [vmem:[#allocation369_spill] sm:$0xff] }
 0x8ed   :  { %3625 = vmatpush.msrb.mxu0 %v17130_v27  ;;  %3645 = vmatpush.msrb.mxu1 %v17131_v16  ;;  %v17140_v27 = vld [vmem:[#allocation31_spill] sm:$0xff]  ;;  %v17141_v16 = vld [vmem:[#allocation140_spill] sm:$0xff] }
 0x8ee   :  { %3586 = vmatpush.msra.mxu3 %v17132_v6  ;;  %3606 = vmatpush.msrb.mxu2 %v17133_v20  ;;  %v17143_v6 = vld [vmem:[#allocation362_spill] sm:$0xff] }
 0x8ef   :  { %3626 = vmatpush.msrb.mxu0 %v17134_v0  ;;  %3646 = vmatpush.msrb.mxu1 %v17135_v61  ;;  %v17144_v0 = vld [vmem:[#allocation24_spill] sm:$0xff]  ;;  %v17145_v61 = vld [vmem:[#allocation133_spill] sm:$0xff] }
 0x8f0   :  { %3587 = vmatpush.msra.mxu3 %v17136_v3  ;;  %3607 = vmatpush.msrb.mxu2 %v17137_v32  ;;  %v17147_v32 = vld [vmem:[#allocation355_spill] sm:$0xff]  ;;  %v3253_v29 = vpop.f32.mrf.mxu1 }
 0x8f1   :  { %3627 = vmatpush.msrb.mxu0 %v17138_v19  ;;  %3647 = vmatpush.msrb.mxu1 %v17139_v22  ;;  %v3233_v22 = vpop.f32.mrf.mxu0 }
 0x8f2   :  { %3588 = vmatpush.msra.mxu3 %v17140_v27  ;;  %3608 = vmatpush.msrb.mxu2 %v17141_v16  ;;  %v17149_v27 = vld [vmem:[#allocation126_spill] sm:$0xff] }
 0x8f3   :  { %3628 = vmatpush.msrb.mxu0 %v17142_v14  ;;  %3648 = vmatpush.msrb.mxu1 %v17143_v6  ;;  %v3193_v20 = vpop.f32.mrf.mxu3  ;;  %v17150_v14 = vld [vmem:[#allocation238_spill] sm:$0xff]  ;;  %v17151_v6 = vld [vmem:[#allocation348_spill] sm:$0xff] }
 0x8f4   :  { %3589 = vmatpush.msra.mxu3 %v17144_v0  ;;  %3609 = vmatpush.msrb.mxu2 %v17145_v61  ;;  %v3194_v3 = vadd.f32 %v3193_v20, %v3173_v62  ;;  %v17152_v61 = vld [vmem:[#allocation119_spill] sm:$0xff]  ;;  %v17153_v62 = vld [vmem:[#allocation10_spill] sm:$0xff]  ;;  %v17271_v0 = vld [vmem:[#allocation253_spill] sm:$0xff] }
 0x8f5   :  { %3629 = vmatpush.msrb.mxu0 %v17146_v51  ;;  %3649 = vmatpush.msrb.mxu1 %v17147_v32  ;;  %v3213_v19 = vpop.f32.mrf.mxu2  ;;  %v17154_v51 = vld [vmem:[#allocation231_spill] sm:$0xff]  ;;  %v17155_v32 = vld [vmem:[#allocation341_spill] sm:$0xff] }
 0x8f6   :  { %3590 = vmatpush.msra.mxu3 %v17148_v45  ;;  %3610 = vmatpush.msrb.mxu2 %v17149_v27  ;;  %v3214_v16 = vadd.f32 %v3213_v19, %v3194_v3  ;;  %v17156_v3 = vld [vmem:[#allocation558_spill] sm:$0xff]  ;;  %v17166_v45 = vld [vmem:[#allocation768_spill] sm:$0xff] }
 0x8f7   :  { %3630 = vmatpush.msrb.mxu0 %v17150_v14  ;;  %3650 = vmatpush.msrb.mxu1 %v17151_v6  ;;  %v17157_v19 = vld [vmem:[#allocation670_spill] sm:$0xff]  ;;  %v17160_v6 = vld [vmem:[#allocation551_spill] sm:$0xff] }
 0x8f8   :  { %3512 = vmatmul.f32.vlgmr.msrb.gmra.mxu3 %v12508_v49  ;;  %3611 = vmatpush.msrb.mxu2 %v17152_v61  ;;  %v3234_v20 = vadd.f32 %v3233_v22, %v3214_v16  ;;  %v17158_v14 = vld [vmem:[#allocation782_spill] sm:$0xff]  ;;  %v17159_v22 = vld [vmem:[#allocation113_spill] sm:$0xff]  ;;  %v17162_v61 = vld [vmem:[#allocation775_spill] sm:$0xff] }
 0x8f9   :  { %3591 = vmatpush.msra.mxu3 %v17153_v62  ;;  %3631 = vmatpush.msrb.mxu0 %v17154_v51  ;;  %v17161_v51 = vld [vmem:[#allocation663_spill] sm:$0xff]  ;;  %v17164_v62 = vld [vmem:[#allocation544_spill] sm:$0xff] }
 0x8fa   :  { %3651 = vmatpush.msrb.mxu1 %v17155_v32  ;;  %3532 = vmatmul.f32.vlgmr.msra.gmra.mxu2 %v12525_v63  ;;  %v3254_v27 = vadd.f32 %v3253_v29, %v3234_v20  ;;  %v17163_v29 = vld [vmem:[#allocation107_spill] sm:$0xff] }
 0x8fb   :  { %3552 = vmatmul.f32.vlgmr.msra.gmra.mxu0 %v12532_v59  ;;  %3572 = vmatmul.f32.vlgmr.msra.gmra.mxu1 %v12553_v55 }
 0x8fc   :  { %3656 = vmatpush.msrb.mxu3 %v17156_v3  ;;  %3676 = vmatpush.msra.mxu2 %v17157_v19  ;;  %v17165_v3 = vld [vmem:[#allocation656_spill] sm:$0xff] }
 0x8fd   :  { %3696 = vmatpush.msra.mxu0 %v17158_v14  ;;  %3716 = vmatpush.msra.mxu1 %v17159_v22  ;;  %v3273_v16 = vpop.f32.mrf.mxu3  ;;  %v17167_v14 = vld [vmem:[#allocation101_spill] sm:$0xff] }
 0x8fe   :  { %3657 = vmatpush.msrb.mxu3 %v17160_v6  ;;  %3677 = vmatpush.msra.mxu2 %v17161_v51  ;;  %v3274_v32 = vadd.f32 %v3273_v16, %v3254_v27  ;;  %v17168_v22 = vld [vmem:[#allocation537_spill] sm:$0xff]  ;;  %v17171_v16 = vld [vmem:[#allocation95_spill] sm:$0xff] }
 0x8ff   :  { %3697 = vmatpush.msra.mxu0 %v17162_v61  ;;  %3717 = vmatpush.msra.mxu1 %v17163_v29  ;;  %v3293_v20 = vpop.f32.mrf.mxu2  ;;  %v17169_v6 = vld [vmem:[#allocation649_spill] sm:$0xff]  ;;  %v17172_v61 = vld [vmem:[#allocation530_spill] sm:$0xff] }
 0x900   :  { %3658 = vmatpush.msrb.mxu3 %v17164_v62  ;;  %3678 = vmatpush.msra.mxu2 %v17165_v3  ;;  %v3294_v19 = vadd.f32 %v3293_v20, %v3274_v32  ;;  %v17170_v27 = vld [vmem:[#allocation761_spill] sm:$0xff]  ;;  %v17173_v29 = vld [vmem:[#allocation642_spill] sm:$0xff]  ;;  %v17174_v62 = vld [vmem:[#allocation792_spill] sm:$0xff] }
 0x901   :  { %3698 = vmatpush.msra.mxu0 %v17166_v45  ;;  %3718 = vmatpush.msra.mxu1 %v17167_v14  ;;  %v17175_v32 = vld [vmem:[#allocation754_spill] sm:$0xff]  ;;  %v17176_v20 = vld [vmem:[#allocation88_spill] sm:$0xff]  ;;  %v17177_v45 = vld [vmem:[#allocation523_spill] sm:$0xff] }
 0x902   :  { %3659 = vmatpush.msrb.mxu3 %v17168_v22  ;;  %3679 = vmatpush.msra.mxu2 %v17169_v6  ;;  %v4004_v51 = vrot.slane %v3294_v19, 5  ;;  %v17178_v14 = vld [vmem:[#allocation635_spill] sm:$0xff]  ;;  %v17182_v6 = vld [vmem:[#allocation628_spill] sm:$0xff]  ;;  %v17265_v22 = vld [vmem:[#allocation489_spill] sm:$0xff] }
 0x903   :  { %3699 = vmatpush.msra.mxu0 %v17170_v27  ;;  %3719 = vmatpush.msra.mxu1 %v17171_v16  ;;  %v17179_v19 = vld [vmem:[#allocation747_spill] sm:$0xff]  ;;  %v17180_v27 = vld [vmem:[#allocation81_spill] sm:$0xff]  ;;  %v17181_v16 = vld [vmem:[#allocation516_spill] sm:$0xff] }
 0x904   :  { %3660 = vmatpush.msrb.mxu3 %v17172_v61  ;;  %3680 = vmatpush.msra.mxu2 %v17173_v29  ;;  %v4018_v3 = vadd.f32 %v4004_v51, %v17174_v62  ;;  %v17183_v29 = vld [vmem:[#allocation740_spill] sm:$0xff]  ;;  %v17184_v51 = vld [vmem:[#allocation74_spill] sm:$0xff]  ;;  %v17185_v62 = vld [vmem:[#allocation509_spill] sm:$0xff] }
 0x905   :  { %3700 = vmatpush.msra.mxu0 %v17175_v32  ;;  %3720 = vmatpush.msra.mxu1 %v17176_v20  ;;  %v17186_v32 = vld [vmem:[#allocation621_spill] sm:$0xff]  ;;  %v17263_v61 = vld [vmem:[#allocation267_spill] sm:$0xff] }
 0x906   :  { %3661 = vmatpush.msrb.mxu3 %v17177_v45  ;;  %3681 = vmatpush.msra.mxu2 %v17178_v14  ;;  %7782 = vtanh.f32 %v4018_v3  ;;  %v17187_v20 = vld [vmem:[#allocation733_spill] sm:$0xff]  ;;  %v17188_v14 = vld [vmem:[#allocation67_spill] sm:$0xff] }
 0x907   :  { %3701 = vmatpush.msra.mxu0 %v17179_v19  ;;  %3721 = vmatpush.msra.mxu1 %v17180_v27  ;;  %v17190_v19 = vld [vmem:[#allocation502_spill] sm:$0xff]  ;;  %v17202_v45 = vld [vmem:[#allocation481_spill] sm:$0xff] }
 0x908   :  { %3662 = vmatpush.msrb.mxu3 %v17181_v16  ;;  %3682 = vmatpush.msra.mxu2 %v17182_v6  ;;  %v17191_v27 = vld [vmem:[#allocation614_spill] sm:$0xff]  ;;  %v17199_v16 = vld [vmem:[#allocation600_spill] sm:$0xff] }
 0x909   :  { %3702 = vmatpush.msra.mxu0 %v17183_v29  ;;  %3722 = vmatpush.msra.mxu1 %v17184_v51  ;;  %v17192_v6 = vld [vmem:[#allocation726_spill] sm:$0xff]  ;;  %v17193_v29 = vld [vmem:[#allocation60_spill] sm:$0xff]  ;;  %v17194_v51 = vld [vmem:[#allocation495_spill] sm:$0xff] }
 0x90a   :  { %3663 = vmatpush.msrb.mxu3 %v17185_v62  ;;  %3683 = vmatpush.msra.mxu2 %v17186_v32  ;;  %v17195_v62 = vld [vmem:[#allocation607_spill] sm:$0xff] }
 0x90b   :  { %3703 = vmatpush.msra.mxu0 %v17187_v20  ;;  %3723 = vmatpush.msra.mxu1 %v17188_v14  ;;  %v17196_v32 = vld [vmem:[#allocation719_spill] sm:$0xff]  ;;  %v17197_v20 = vld [vmem:[#allocation53_spill] sm:$0xff]  ;;  %v17198_v14 = vld [vmem:[#allocation488_spill] sm:$0xff] }
 0x90c   :  { %v12974_v3 = vpop.eup %7782  ;;  %3664 = vmatpush.msrb.mxu3 %v17190_v19  ;;  %3684 = vmatpush.msra.mxu2 %v17191_v27  ;;  %v17200_v19 = vld [vmem:[#allocation712_spill] sm:$0xff]  ;;  %v17201_v27 = vld [vmem:[#allocation46_spill] sm:$0xff] }
 0x90d   :  { %17189 = vst [vmem:[#allocation83_spill] sm:$0xff] %v12974_v3  ;;  %3704 = vmatpush.msra.mxu0 %v17192_v6  ;;  %3724 = vmatpush.msra.mxu1 %v17193_v29  ;;  %v17203_v6 = vld [vmem:[#allocation593_spill] sm:$0xff] }
 0x90e   :  { %4039 = vst [vmem:[#allocation1 + $0x9] sm:$0xff] %v12974_v3  ;;  %3665 = vmatpush.msrb.mxu3 %v17194_v51  ;;  %3685 = vmatpush.msra.mxu2 %v17195_v62  ;;  %v17204_v29 = vld [vmem:[#allocation705_spill] sm:$0xff]  ;;  %v17205_v51 = vld [vmem:[#allocation39_spill] sm:$0xff]  ;;  %v17206_v62 = vld [vmem:[#allocation474_spill] sm:$0xff] }
 0x90f   :  { %3705 = vmatpush.msra.mxu0 %v17196_v32  ;;  %3725 = vmatpush.msra.mxu1 %v17197_v20  ;;  %v17207_v32 = vld [vmem:[#allocation586_spill] sm:$0xff] }
 0x910   :  { %3666 = vmatpush.msrb.mxu3 %v17198_v14  ;;  %3686 = vmatpush.msra.mxu2 %v17199_v16  ;;  %v17208_v20 = vld [vmem:[#allocation698_spill] sm:$0xff]  ;;  %v17209_v14 = vld [vmem:[#allocation32_spill] sm:$0xff]  ;;  %v17210_v16 = vld [vmem:[#allocation467_spill] sm:$0xff] }
 0x911   :  { %3706 = vmatpush.msra.mxu0 %v17200_v19  ;;  %3726 = vmatpush.msra.mxu1 %v17201_v27  ;;  %v17211_v19 = vld [vmem:[#allocation579_spill] sm:$0xff] }
 0x912   :  { %3667 = vmatpush.msrb.mxu3 %v17202_v45  ;;  %3687 = vmatpush.msra.mxu2 %v17203_v6  ;;  %v17212_v27 = vld [vmem:[#allocation691_spill] sm:$0xff]  ;;  %v17213_v45 = vld [vmem:[#allocation25_spill] sm:$0xff]  ;;  %v17214_v6 = vld [vmem:[#allocation460_spill] sm:$0xff] }
 0x913   :  { %3707 = vmatpush.msra.mxu0 %v17204_v29  ;;  %3727 = vmatpush.msra.mxu1 %v17205_v51  ;;  %v17215_v29 = vld [vmem:[#allocation572_spill] sm:$0xff] }
 0x914   :  { %3668 = vmatpush.msrb.mxu3 %v17206_v62  ;;  %3688 = vmatpush.msra.mxu2 %v17207_v32  ;;  %v17216_v51 = vld [vmem:[#allocation684_spill] sm:$0xff]  ;;  %v17217_v62 = vld [vmem:[#allocation18_spill] sm:$0xff]  ;;  %v17220_v32 = vld [vmem:[#allocation677_spill] sm:$0xff] }
 0x915   :  { %3708 = vmatpush.msra.mxu0 %v17208_v20  ;;  %3728 = vmatpush.msra.mxu1 %v17209_v14  ;;  %v17218_v20 = vld [vmem:[#allocation565_spill] sm:$0xff] }
 0x916   :  { %3669 = vmatpush.msrb.mxu3 %v17210_v16  ;;  %3689 = vmatpush.msra.mxu2 %v17211_v19  ;;  %v17219_v14 = vld [vmem:[#allocation453_spill] sm:$0xff]  ;;  %v17221_v19 = vld [vmem:[#allocation11_spill] sm:$0xff] }
 0x917   :  { %3709 = vmatpush.msra.mxu0 %v17212_v27  ;;  %3729 = vmatpush.msra.mxu1 %v17213_v45  ;;  %v17222_v27 = vld [vmem:[#allocation225_spill] sm:$0xff]  ;;  %v17225_v45 = vld [vmem:[#allocation559_spill] sm:$0xff] }
 0x918   :  { %3670 = vmatpush.msrb.mxu3 %v17214_v6  ;;  %3690 = vmatpush.msra.mxu2 %v17215_v29  ;;  %v17227_v29 = vld [vmem:[#allocation329_spill] sm:$0xff]  ;;  %v17231_v6 = vld [vmem:[#allocation323_spill] sm:$0xff] }
 0x919   :  { %3710 = vmatpush.msra.mxu0 %v17216_v51  ;;  %3730 = vmatpush.msra.mxu1 %v17217_v62  ;;  %v17223_v51 = vld [vmem:[#allocation335_spill] sm:$0xff]  ;;  %v17232_v16 = vld [vmem:[#allocation433_spill] sm:$0xff] }
 0x91a   :  { %3592 = vmatmul.f32.vlgmr.msra.gmra.mxu3 %v12493_v12  ;;  %3691 = vmatpush.msra.mxu2 %v17218_v20  ;;  %v17224_v62 = vld [vmem:[#allocation447_spill] sm:$0xff]  ;;  %v17226_v20 = vld [vmem:[#allocation218_spill] sm:$0xff] }
 0x91b   :  { %3671 = vmatpush.msrb.mxu3 %v17219_v14  ;;  %3711 = vmatpush.msra.mxu0 %v17220_v32  ;;  %v17228_v32 = vld [vmem:[#allocation440_spill] sm:$0xff]  ;;  %v17230_v14 = vld [vmem:[#allocation211_spill] sm:$0xff] }
 0x91c   :  { %3731 = vmatpush.msra.mxu1 %v17221_v19  ;;  %3612 = vmatmul.f32.vlgmr.msrb.gmra.mxu2 %v12500_v23  ;;  %v17229_v19 = vld [vmem:[#allocation552_spill] sm:$0xff] }
 0x91d   :  { %3632 = vmatmul.f32.vlgmr.msrb.gmra.mxu0 %v12505_v50  ;;  %3652 = vmatmul.f32.vlgmr.msrb.gmra.mxu1 %v12508_v49 }
 0x91e   :  { %3736 = vmatpush.msra.mxu3 %v17222_v27  ;;  %3756 = vmatpush.msrb.mxu2 %v17223_v51  ;;  %v17233_v27 = vld [vmem:[#allocation545_spill] sm:$0xff]  ;;  %v17236_v51 = vld [vmem:[#allocation426_spill] sm:$0xff] }
 0x91f   :  { %3776 = vmatpush.msrb.mxu0 %v17224_v62  ;;  %3796 = vmatpush.msrb.mxu1 %v17225_v45  ;;  %v17234_v62 = vld [vmem:[#allocation316_spill] sm:$0xff] }
 0x920   :  { %3737 = vmatpush.msra.mxu3 %v17226_v20  ;;  %3757 = vmatpush.msrb.mxu2 %v17227_v29  ;;  %v17235_v45 = vld [vmem:[#allocation204_spill] sm:$0xff]  ;;  %v17237_v29 = vld [vmem:[#allocation538_spill] sm:$0xff]  ;;  %v17248_v20 = vld [vmem:[#allocation405_spill] sm:$0xff] }
 0x921   :  { %3777 = vmatpush.msrb.mxu0 %v17228_v32  ;;  %3797 = vmatpush.msrb.mxu1 %v17229_v19  ;;  %v17238_v32 = vld [vmem:[#allocation197_spill] sm:$0xff] }
 0x922   :  { %3738 = vmatpush.msra.mxu3 %v17230_v14  ;;  %3758 = vmatpush.msrb.mxu2 %v17231_v6  ;;  %v17239_v19 = vld [vmem:[#allocation309_spill] sm:$0xff]  ;;  %v17240_v6 = vld [vmem:[#allocation419_spill] sm:$0xff]  ;;  %v17243_v14 = vld [vmem:[#allocation302_spill] sm:$0xff] }
 0x923   :  { %3778 = vmatpush.msrb.mxu0 %v17232_v16  ;;  %3798 = vmatpush.msrb.mxu1 %v17233_v27  ;;  %v17241_v16 = vld [vmem:[#allocation531_spill] sm:$0xff]  ;;  %v17242_v27 = vld [vmem:[#allocation190_spill] sm:$0xff] }
 0x924   :  { %3672 = vmatmul.f32.vlgmr.msrb.gmra.mxu3 %v12525_v63  ;;  %3759 = vmatpush.msrb.mxu2 %v17234_v62  ;;  %v17244_v62 = vld [vmem:[#allocation412_spill] sm:$0xff] }
 0x925   :  { %3739 = vmatpush.msra.mxu3 %v17235_v45  ;;  %3779 = vmatpush.msrb.mxu0 %v17236_v51  ;;  %v17245_v45 = vld [vmem:[#allocation524_spill] sm:$0xff]  ;;  %v17246_v51 = vld [vmem:[#allocation183_spill] sm:$0xff] }
 0x926   :  { %3799 = vmatpush.msrb.mxu1 %v17237_v29  ;;  %3692 = vmatmul.f32.vlgmr.msra.gmra.mxu2 %v12532_v59  ;;  %v17247_v29 = vld [vmem:[#allocation295_spill] sm:$0xff] }
 0x927   :  { %3740 = vmatpush.msra.mxu3 %v17238_v32  ;;  %3760 = vmatpush.msrb.mxu2 %v17239_v19  ;;  %v17249_v32 = vld [vmem:[#allocation517_spill] sm:$0xff]  ;;  %v17250_v19 = vld [vmem:[#allocation176_spill] sm:$0xff] }
 0x928   :  { %3780 = vmatpush.msrb.mxu0 %v17240_v6  ;;  %3800 = vmatpush.msrb.mxu1 %v17241_v16  ;;  %v17251_v6 = vld [vmem:[#allocation288_spill] sm:$0xff]  ;;  %v17252_v16 = vld [vmem:[#allocation398_spill] sm:$0xff] }
 0x929   :  { %3741 = vmatpush.msra.mxu3 %v17242_v27  ;;  %3761 = vmatpush.msrb.mxu2 %v17243_v14  ;;  %v17253_v27 = vld [vmem:[#allocation510_spill] sm:$0xff]  ;;  %v17255_v14 = vld [vmem:[#allocation281_spill] sm:$0xff] }
 0x92a   :  { %3781 = vmatpush.msrb.mxu0 %v17244_v62  ;;  %3801 = vmatpush.msrb.mxu1 %v17245_v45  ;;  %v17254_v62 = vld [vmem:[#allocation169_spill] sm:$0xff]  ;;  %v3313_v45 = vpop.f32.mrf.mxu0 }
 0x92b   :  { %3742 = vmatpush.msra.mxu3 %v17246_v51  ;;  %3762 = vmatpush.msrb.mxu2 %v17247_v29  ;;  %v17256_v29 = vld [vmem:[#allocation391_spill] sm:$0xff]  ;;  %v17259_v51 = vld [vmem:[#allocation274_spill] sm:$0xff] }
 0x92c   :  { %3782 = vmatpush.msrb.mxu0 %v17248_v20  ;;  %3802 = vmatpush.msrb.mxu1 %v17249_v32  ;;  %v17257_v20 = vld [vmem:[#allocation503_spill] sm:$0xff]  ;;  %v17258_v32 = vld [vmem:[#allocation162_spill] sm:$0xff] }
 0x92d   :  { %3743 = vmatpush.msra.mxu3 %v17250_v19  ;;  %3763 = vmatpush.msrb.mxu2 %v17251_v6  ;;  %v3333_v19 = vpop.f32.mrf.mxu1  ;;  %v17260_v6 = vld [vmem:[#allocation384_spill] sm:$0xff] }
 0x92e   :  { %3783 = vmatpush.msrb.mxu0 %v17252_v16  ;;  %3803 = vmatpush.msrb.mxu1 %v17253_v27  ;;  %v17261_v16 = vld [vmem:[#allocation496_spill] sm:$0xff]  ;;  %v17262_v27 = vld [vmem:[#allocation155_spill] sm:$0xff] }
 0x92f   :  { %3712 = vmatmul.f32.vlgmr.msra.gmra.mxu0 %v12553_v55  ;;  %3744 = vmatpush.msra.mxu3 %v17254_v62  ;;  %v17264_v62 = vld [vmem:[#allocation377_spill] sm:$0xff] }
 0x930   :  { %3764 = vmatpush.msrb.mxu2 %v17255_v14  ;;  %3784 = vmatpush.msrb.mxu0 %v17256_v29  ;;  %v3334_v14 = vadd.f32 %v3333_v19, %v3313_v45  ;;  %v17266_v29 = vld [vmem:[#allocation148_spill] sm:$0xff]  ;;  %v17274_v45 = vld [vmem:[#allocation134_spill] sm:$0xff] }
 0x931   :  { %3804 = vmatpush.msrb.mxu1 %v17257_v20  ;;  %3745 = vmatpush.msra.mxu3 %v17258_v32  ;;  %v17267_v20 = vld [vmem:[#allocation260_spill] sm:$0xff]  ;;  %v17268_v32 = vld [vmem:[#allocation370_spill] sm:$0xff] }
 0x932   :  { %3765 = vmatpush.msrb.mxu2 %v17259_v51  ;;  %3785 = vmatpush.msrb.mxu0 %v17260_v6  ;;  %v17269_v51 = vld [vmem:[#allocation482_spill] sm:$0xff]  ;;  %v17270_v6 = vld [vmem:[#allocation141_spill] sm:$0xff] }
 0x933   :  { %3805 = vmatpush.msrb.mxu1 %v17261_v16  ;;  %3746 = vmatpush.msra.mxu3 %v17262_v27  ;;  %v17272_v27 = vld [vmem:[#allocation363_spill] sm:$0xff] }
 0x934   :  { %3766 = vmatpush.msrb.mxu2 %v17263_v61  ;;  %3786 = vmatpush.msrb.mxu0 %v17264_v62  ;;  %v17273_v62 = vld [vmem:[#allocation475_spill] sm:$0xff] }
 0x935   :  { %3806 = vmatpush.msrb.mxu1 %v17265_v22  ;;  %3747 = vmatpush.msra.mxu3 %v17266_v29  ;;  %v3393_v22 = vpop.f32.mrf.mxu0  ;;  %v17275_v29 = vld [vmem:[#allocation246_spill] sm:$0xff]  ;;  %v3413_v3 = vpop.f32.mrf.mxu1 }
 0x936   :  { %3767 = vmatpush.msrb.mxu2 %v17267_v20  ;;  %3787 = vmatpush.msrb.mxu0 %v17268_v32  ;;  %v17276_v20 = vld [vmem:[#allocation356_spill] sm:$0xff] }
 0x937   :  { %3807 = vmatpush.msrb.mxu1 %v17269_v51  ;;  %3748 = vmatpush.msra.mxu3 %v17270_v6  ;;  %v3353_v16 = vpop.f32.mrf.mxu3  ;;  %v17277_v51 = vld [vmem:[#allocation468_spill] sm:$0xff]  ;;  %v17278_v6 = vld [vmem:[#allocation127_spill] sm:$0xff] }
 0x938   :  { %3768 = vmatpush.msrb.mxu2 %v17271_v0  ;;  %3788 = vmatpush.msrb.mxu0 %v17272_v27  ;;  %v3354_v61 = vadd.f32 %v3353_v16, %v3334_v14  ;;  %v17279_v0 = vld [vmem:[#allocation239_spill] sm:$0xff]  ;;  %v17280_v27 = vld [vmem:[#allocation349_spill] sm:$0xff] }
 0x939   :  { %3808 = vmatpush.msrb.mxu1 %v17273_v62  ;;  %3749 = vmatpush.msra.mxu3 %v17274_v45  ;;  %v3373_v19 = vpop.f32.mrf.mxu2  ;;  %v17281_v16 = vld [vmem:[#allocation461_spill] sm:$0xff]  ;;  %v17282_v62 = vld [vmem:[#allocation120_spill] sm:$0xff] }
 0x93a   :  { %3769 = vmatpush.msrb.mxu2 %v17275_v29  ;;  %3789 = vmatpush.msrb.mxu0 %v17276_v20  ;;  %v3374_v32 = vadd.f32 %v3373_v19, %v3354_v61  ;;  %v17283_v45 = vld [vmem:[#allocation232_spill] sm:$0xff]  ;;  %v17284_v29 = vld [vmem:[#allocation342_spill] sm:$0xff]  ;;  %v17286_v19 = vld [vmem:[#allocation671_spill] sm:$0xff] }
 0x93b   :  { %3809 = vmatpush.msrb.mxu1 %v17277_v51  ;;  %3750 = vmatpush.msra.mxu3 %v17278_v6  ;;  %v17285_v61 = vld [vmem:[#allocation454_spill] sm:$0xff]  ;;  %v17287_v51 = vld [vmem:[#allocation783_spill] sm:$0xff] }
 0x93c   :  { %3770 = vmatpush.msrb.mxu2 %v17279_v0  ;;  %3790 = vmatpush.msrb.mxu0 %v17280_v27  ;;  %v3394_v14 = vadd.f32 %v3393_v22, %v3374_v32  ;;  %v17288_v0 = vld [vmem:[#allocation114_spill] sm:$0xff]  ;;  %v17290_v27 = vld [vmem:[#allocation664_spill] sm:$0xff] }
 0x93d   :  { %3810 = vmatpush.msrb.mxu1 %v17281_v16  ;;  %3751 = vmatpush.msra.mxu3 %v17282_v62  ;;  %v17289_v22 = vld [vmem:[#allocation226_spill] sm:$0xff]  ;;  %v17291_v16 = vld [vmem:[#allocation776_spill] sm:$0xff] }
 0x93e   :  { %3771 = vmatpush.msrb.mxu2 %v17283_v45  ;;  %3791 = vmatpush.msrb.mxu0 %v17284_v29  ;;  %v3414_v20 = vadd.f32 %v3413_v3, %v3394_v14  ;;  %v17292_v29 = vld [vmem:[#allocation108_spill] sm:$0xff]  ;;  %v17293_v3 = vld [vmem:[#allocation219_spill] sm:$0xff]  ;;  %v17294_v14 = vld [vmem:[#allocation657_spill] sm:$0xff] }
 0x93f   :  { %3811 = vmatpush.msrb.mxu1 %v17285_v61  ;;  %3816 = vmatpush.msrb.mxu3 %v17286_v19  ;;  %v17295_v61 = vld [vmem:[#allocation769_spill] sm:$0xff]  ;;  %v17299_v62 = vld [vmem:[#allocation762_spill] sm:$0xff] }
 0x940   :  { %3732 = vmatmul.f32.vlgmr.msra.gmra.mxu1 %v12493_v12  ;;  %3836 = vmatpush.msra.mxu2 %v17287_v51  ;;  %v17296_v51 = vld [vmem:[#allocation102_spill] sm:$0xff] }
 0x941   :  { %3856 = vmatpush.msra.mxu0 %v17288_v0  ;;  %3876 = vmatpush.msra.mxu1 %v17289_v22  ;;  %v3433_v32 = vpop.f32.mrf.mxu3  ;;  %v17297_v0 = vld [vmem:[#allocation212_spill] sm:$0xff]  ;;  %v17298_v22 = vld [vmem:[#allocation650_spill] sm:$0xff] }
 0x942   :  { %3817 = vmatpush.msrb.mxu3 %v17290_v27  ;;  %3837 = vmatpush.msra.mxu2 %v17291_v16  ;;  %v3434_v45 = vadd.f32 %v3433_v32, %v3414_v20  ;;  %v17300_v27 = vld [vmem:[#allocation793_spill] sm:$0xff]  ;;  %v17301_v20 = vld [vmem:[#allocation96_spill] sm:$0xff]  ;;  %v17394_v6 = vld [vmem:[#allocation602_spill] sm:$0xff] }
 0x943   :  { %3857 = vmatpush.msra.mxu0 %v17292_v29  ;;  %3877 = vmatpush.msra.mxu1 %v17293_v3  ;;  %v17302_v32 = vld [vmem:[#allocation205_spill] sm:$0xff]  ;;  %v17303_v29 = vld [vmem:[#allocation643_spill] sm:$0xff] }
 0x944   :  { %3818 = vmatpush.msrb.mxu3 %v17294_v14  ;;  %3838 = vmatpush.msra.mxu2 %v17295_v61  ;;  %v4005_v19 = vrot.slane %v3434_v45, 5  ;;  %v17304_v3 = vld [vmem:[#allocation755_spill] sm:$0xff]  ;;  %v17305_v45 = vld [vmem:[#allocation89_spill] sm:$0xff]  ;;  %v17308_v61 = vld [vmem:[#allocation748_spill] sm:$0xff] }
 0x945   :  { %3858 = vmatpush.msra.mxu0 %v17296_v51  ;;  %3878 = vmatpush.msra.mxu1 %v17297_v0  ;;  %v17306_v51 = vld [vmem:[#allocation198_spill] sm:$0xff]  ;;  %v17307_v0 = vld [vmem:[#allocation636_spill] sm:$0xff]  ;;  %v17389_v14 = vld [vmem:[#allocation497_spill] sm:$0xff] }
 0x946   :  { %3819 = vmatpush.msrb.mxu3 %v17298_v22  ;;  %3839 = vmatpush.msra.mxu2 %v17299_v62  ;;  %v4019_v16 = vadd.f32 %v4005_v19, %v17300_v27  ;;  %v17309_v62 = vld [vmem:[#allocation82_spill] sm:$0xff]  ;;  %v17310_v27 = vld [vmem:[#allocation191_spill] sm:$0xff]  ;;  %v17311_v19 = vld [vmem:[#allocation629_spill] sm:$0xff] }
 0x947   :  { %3859 = vmatpush.msra.mxu0 %v17301_v20  ;;  %3879 = vmatpush.msra.mxu1 %v17302_v32  ;;  %v17312_v20 = vld [vmem:[#allocation741_spill] sm:$0xff]  ;;  %v17313_v32 = vld [vmem:[#allocation75_spill] sm:$0xff]  ;;  %v17385_v22 = vld [vmem:[#allocation504_spill] sm:$0xff] }
 0x948   :  { %3820 = vmatpush.msrb.mxu3 %v17303_v29  ;;  %3840 = vmatpush.msra.mxu2 %v17304_v3  ;;  %7784 = vtanh.f32 %v4019_v16  ;;  %v17314_v3 = vld [vmem:[#allocation184_spill] sm:$0xff]  ;;  %v17327_v29 = vld [vmem:[#allocation601_spill] sm:$0xff] }
 0x949   :  { %3860 = vmatpush.msra.mxu0 %v17305_v45  ;;  %3880 = vmatpush.msra.mxu1 %v17306_v51  ;;  %v17315_v45 = vld [vmem:[#allocation622_spill] sm:$0xff] }
 0x94a   :  { %3821 = vmatpush.msrb.mxu3 %v17307_v0  ;;  %3841 = vmatpush.msra.mxu2 %v17308_v61  ;;  %v17316_v51 = vld [vmem:[#allocation734_spill] sm:$0xff]  ;;  %v17317_v61 = vld [vmem:[#allocation68_spill] sm:$0xff] }
 0x94b   :  { %3861 = vmatpush.msra.mxu0 %v17309_v62  ;;  %3881 = vmatpush.msra.mxu1 %v17310_v27  ;;  %v17318_v62 = vld [vmem:[#allocation177_spill] sm:$0xff]  ;;  %v17319_v27 = vld [vmem:[#allocation615_spill] sm:$0xff]  ;;  %v17324_v0 = vld [vmem:[#allocation720_spill] sm:$0xff] }
 0x94c   :  { %3822 = vmatpush.msrb.mxu3 %v17311_v19  ;;  %3842 = vmatpush.msra.mxu2 %v17312_v20  ;;  %v17320_v19 = vld [vmem:[#allocation727_spill] sm:$0xff]  ;;  %v17321_v20 = vld [vmem:[#allocation61_spill] sm:$0xff] }
 0x94d   :  { %3862 = vmatpush.msra.mxu0 %v17313_v32  ;;  %3882 = vmatpush.msra.mxu1 %v17314_v3  ;;  %v17322_v32 = vld [vmem:[#allocation170_spill] sm:$0xff]  ;;  %v17323_v3 = vld [vmem:[#allocation608_spill] sm:$0xff] }
 0x94e   :  { %v13110_v16 = vpop.eup %7784  ;;  %3823 = vmatpush.msrb.mxu3 %v17315_v45  ;;  %3843 = vmatpush.msra.mxu2 %v17316_v51  ;;  %v17325_v45 = vld [vmem:[#allocation54_spill] sm:$0xff]  ;;  %v17326_v51 = vld [vmem:[#allocation163_spill] sm:$0xff] }
 0x94f   :  { %4040 = vst [vmem:[#allocation1 + $0x12] sm:$0xff] %v13110_v16  ;;  %3863 = vmatpush.msra.mxu0 %v17317_v61  ;;  %3883 = vmatpush.msra.mxu1 %v17318_v62  ;;  %v17328_v61 = vld [vmem:[#allocation713_spill] sm:$0xff]  ;;  %v17329_v62 = vld [vmem:[#allocation47_spill] sm:$0xff] }
 0x950   :  { %3824 = vmatpush.msrb.mxu3 %v17319_v27  ;;  %3844 = vmatpush.msra.mxu2 %v17320_v19  ;;  %v17330_v27 = vld [vmem:[#allocation156_spill] sm:$0xff]  ;;  %v17331_v19 = vld [vmem:[#allocation594_spill] sm:$0xff] }
 0x951   :  { %3864 = vmatpush.msra.mxu0 %v17321_v20  ;;  %3884 = vmatpush.msra.mxu1 %v17322_v32  ;;  %v17332_v20 = vld [vmem:[#allocation706_spill] sm:$0xff]  ;;  %v17333_v32 = vld [vmem:[#allocation40_spill] sm:$0xff] }
 0x952   :  { %3825 = vmatpush.msrb.mxu3 %v17323_v3  ;;  %3845 = vmatpush.msra.mxu2 %v17324_v0  ;;  %v17334_v3 = vld [vmem:[#allocation149_spill] sm:$0xff] }
 0x953   :  { %3865 = vmatpush.msra.mxu0 %v17325_v45  ;;  %3885 = vmatpush.msra.mxu1 %v17326_v51  ;;  %v17335_v45 = vld [vmem:[#allocation699_spill] sm:$0xff]  ;;  %v17337_v0 = vld [vmem:[#allocation33_spill] sm:$0xff] }
 0x954   :  { %3826 = vmatpush.msrb.mxu3 %v17327_v29  ;;  %3846 = vmatpush.msra.mxu2 %v17328_v61  ;;  %v17336_v51 = vld [vmem:[#allocation587_spill] sm:$0xff]  ;;  %v17338_v61 = vld [vmem:[#allocation142_spill] sm:$0xff]  ;;  %v17349_v29 = vld [vmem:[#allocation12_spill] sm:$0xff] }
 0x955   :  { %3866 = vmatpush.msra.mxu0 %v17329_v62  ;;  %3886 = vmatpush.msra.mxu1 %v17330_v27  ;;  %v17339_v62 = vld [vmem:[#allocation580_spill] sm:$0xff] }
 0x956   :  { %3827 = vmatpush.msrb.mxu3 %v17331_v19  ;;  %3847 = vmatpush.msra.mxu2 %v17332_v20  ;;  %v17340_v27 = vld [vmem:[#allocation692_spill] sm:$0xff]  ;;  %v17341_v20 = vld [vmem:[#allocation26_spill] sm:$0xff]  ;;  %v17344_v19 = vld [vmem:[#allocation685_spill] sm:$0xff] }
 0x957   :  { %3867 = vmatpush.msra.mxu0 %v17333_v32  ;;  %3887 = vmatpush.msra.mxu1 %v17334_v3  ;;  %v17342_v32 = vld [vmem:[#allocation135_spill] sm:$0xff]  ;;  %v17343_v3 = vld [vmem:[#allocation573_spill] sm:$0xff] }
 0x958   :  { %3752 = vmatmul.f32.vlgmr.msra.gmra.mxu3 %v12500_v23  ;;  %3848 = vmatpush.msra.mxu2 %v17335_v45  ;;  %v17345_v45 = vld [vmem:[#allocation19_spill] sm:$0xff] }
 0x959   :  { %3828 = vmatpush.msrb.mxu3 %v17336_v51  ;;  %3868 = vmatpush.msra.mxu0 %v17337_v0  ;;  %v17346_v51 = vld [vmem:[#allocation128_spill] sm:$0xff]  ;;  %v17347_v0 = vld [vmem:[#allocation566_spill] sm:$0xff] }
 0x95a   :  { %3888 = vmatpush.msra.mxu1 %v17338_v61  ;;  %3772 = vmatmul.f32.vlgmr.msrb.gmra.mxu2 %v12505_v50  ;;  %v17348_v61 = vld [vmem:[#allocation678_spill] sm:$0xff] }
 0x95b   :  { %3829 = vmatpush.msrb.mxu3 %v17339_v62  ;;  %3849 = vmatpush.msra.mxu2 %v17340_v27  ;;  %v17350_v62 = vld [vmem:[#allocation121_spill] sm:$0xff]  ;;  %v17359_v27 = vld [vmem:[#allocation324_spill] sm:$0xff] }
 0x95c   :  { %3869 = vmatpush.msra.mxu0 %v17341_v20  ;;  %3889 = vmatpush.msra.mxu1 %v17342_v32  ;;  %v17351_v20 = vld [vmem:[#allocation448_spill] sm:$0xff] }
 0x95d   :  { %3830 = vmatpush.msrb.mxu3 %v17343_v3  ;;  %3850 = vmatpush.msra.mxu2 %v17344_v19  ;;  %v17352_v32 = vld [vmem:[#allocation336_spill] sm:$0xff]  ;;  %v17358_v19 = vld [vmem:[#allocation665_spill] sm:$0xff]  ;;  %v17365_v3 = vld [vmem:[#allocation539_spill] sm:$0xff] }
 0x95e   :  { %3870 = vmatpush.msra.mxu0 %v17345_v45  ;;  %3890 = vmatpush.msra.mxu1 %v17346_v51  ;;  %v17353_v45 = vld [vmem:[#allocation560_spill] sm:$0xff] }
 0x95f   :  { %3831 = vmatpush.msrb.mxu3 %v17347_v0  ;;  %3851 = vmatpush.msra.mxu2 %v17348_v61  ;;  %v17354_v51 = vld [vmem:[#allocation672_spill] sm:$0xff]  ;;  %v17355_v61 = vld [vmem:[#allocation330_spill] sm:$0xff] }
 0x960   :  { %3871 = vmatpush.msra.mxu0 %v17349_v29  ;;  %3891 = vmatpush.msra.mxu1 %v17350_v62  ;;  %v17356_v29 = vld [vmem:[#allocation441_spill] sm:$0xff]  ;;  %v17360_v0 = vld [vmem:[#allocation434_spill] sm:$0xff] }
 0x961   :  { %3792 = vmatmul.f32.vlgmr.msrb.gmra.mxu0 %v12508_v49  ;;  %3812 = vmatmul.f32.vlgmr.msrb.gmra.mxu1 %v12525_v63  ;;  %v17357_v62 = vld [vmem:[#allocation553_spill] sm:$0xff] }
 0x962   :  { %3832 = vmatmul.f32.vlgmr.msrb.gmra.mxu3 %v12532_v59  ;;  %3916 = vmatpush.msrb.mxu2 %v17351_v20  ;;  %v17361_v20 = vld [vmem:[#allocation546_spill] sm:$0xff] }
 0x963   :  { %3896 = vmatpush.msra.mxu3 %v17352_v32  ;;  %3936 = vmatpush.msrb.mxu0 %v17353_v45  ;;  %v17362_v32 = vld [vmem:[#allocation658_spill] sm:$0xff]  ;;  %v17363_v45 = vld [vmem:[#allocation317_spill] sm:$0xff] }
 0x964   :  { %3956 = vmatpush.msrb.mxu1 %v17354_v51  ;;  %3852 = vmatmul.f32.vlgmr.msra.gmra.mxu2 %v12553_v55  ;;  %v17364_v51 = vld [vmem:[#allocation427_spill] sm:$0xff] }
 0x965   :  { %3897 = vmatpush.msra.mxu3 %v17355_v61  ;;  %3917 = vmatpush.msrb.mxu2 %v17356_v29  ;;  %v17366_v61 = vld [vmem:[#allocation651_spill] sm:$0xff]  ;;  %v17367_v29 = vld [vmem:[#allocation310_spill] sm:$0xff] }
 0x966   :  { %3937 = vmatpush.msrb.mxu0 %v17357_v62  ;;  %3957 = vmatpush.msrb.mxu1 %v17358_v19  ;;  %v17368_v62 = vld [vmem:[#allocation420_spill] sm:$0xff] }
 0x967   :  { %3898 = vmatpush.msra.mxu3 %v17359_v27  ;;  %3918 = vmatpush.msrb.mxu2 %v17360_v0  ;;  %v17369_v19 = vld [vmem:[#allocation532_spill] sm:$0xff]  ;;  %v17371_v0 = vld [vmem:[#allocation303_spill] sm:$0xff] }
 0x968   :  { %3938 = vmatpush.msrb.mxu0 %v17361_v20  ;;  %3958 = vmatpush.msrb.mxu1 %v17362_v32  ;;  %v17370_v27 = vld [vmem:[#allocation644_spill] sm:$0xff]  ;;  %v17372_v20 = vld [vmem:[#allocation413_spill] sm:$0xff] }
 0x969   :  { %3899 = vmatpush.msra.mxu3 %v17363_v45  ;;  %3919 = vmatpush.msrb.mxu2 %v17364_v51  ;;  %v17373_v32 = vld [vmem:[#allocation525_spill] sm:$0xff]  ;;  %v17375_v51 = vld [vmem:[#allocation296_spill] sm:$0xff] }
 0x96a   :  { %3939 = vmatpush.msrb.mxu0 %v17365_v3  ;;  %3959 = vmatpush.msrb.mxu1 %v17366_v61  ;;  %v17374_v45 = vld [vmem:[#allocation637_spill] sm:$0xff]  ;;  %v17376_v3 = vld [vmem:[#allocation406_spill] sm:$0xff] }
 0x96b   :  { %3900 = vmatpush.msra.mxu3 %v17367_v29  ;;  %3920 = vmatpush.msrb.mxu2 %v17368_v62  ;;  %v17377_v61 = vld [vmem:[#allocation518_spill] sm:$0xff]  ;;  %v17379_v62 = vld [vmem:[#allocation289_spill] sm:$0xff] }
 0x96c   :  { %3940 = vmatpush.msrb.mxu0 %v17369_v19  ;;  %3960 = vmatpush.msrb.mxu1 %v17370_v27  ;;  %v17378_v29 = vld [vmem:[#allocation630_spill] sm:$0xff]  ;;  %v17380_v19 = vld [vmem:[#allocation399_spill] sm:$0xff]  ;;  %v3473_v27 = vpop.f32.mrf.mxu0 }
 0x96d   :  { %3901 = vmatpush.msra.mxu3 %v17371_v0  ;;  %3921 = vmatpush.msrb.mxu2 %v17372_v20  ;;  %v17381_v0 = vld [vmem:[#allocation511_spill] sm:$0xff] }
 0x96e   :  { %3941 = vmatpush.msrb.mxu0 %v17373_v32  ;;  %3961 = vmatpush.msrb.mxu1 %v17374_v45  ;;  %v17382_v20 = vld [vmem:[#allocation623_spill] sm:$0xff]  ;;  %v17383_v32 = vld [vmem:[#allocation282_spill] sm:$0xff]  ;;  %v17384_v45 = vld [vmem:[#allocation392_spill] sm:$0xff] }
 0x96f   :  { %3902 = vmatpush.msra.mxu3 %v17375_v51  ;;  %3922 = vmatpush.msrb.mxu2 %v17376_v3  ;;  %v3453_v51 = vpop.f32.mrf.mxu2  ;;  %v17386_v3 = vld [vmem:[#allocation616_spill] sm:$0xff] }
 0x970   :  { %3942 = vmatpush.msrb.mxu0 %v17377_v61  ;;  %3962 = vmatpush.msrb.mxu1 %v17378_v29  ;;  %v3474_v61 = vadd.f32 %v3473_v27, %v3453_v51  ;;  %v17387_v29 = vld [vmem:[#allocation275_spill] sm:$0xff] }
 0x971   :  { %3903 = vmatpush.msra.mxu3 %v17379_v62  ;;  %3923 = vmatpush.msrb.mxu2 %v17380_v19  ;;  %v17388_v62 = vld [vmem:[#allocation385_spill] sm:$0xff]  ;;  %v3493_v19 = vpop.f32.mrf.mxu1  ;;  %v17396_v51 = vld [vmem:[#allocation371_spill] sm:$0xff] }
 0x972   :  { %3943 = vmatpush.msrb.mxu0 %v17381_v0  ;;  %3963 = vmatpush.msrb.mxu1 %v17382_v20  ;;  %v17390_v0 = vld [vmem:[#allocation609_spill] sm:$0xff]  ;;  %v17391_v20 = vld [vmem:[#allocation268_spill] sm:$0xff]  ;;  %v17397_v27 = vld [vmem:[#allocation483_spill] sm:$0xff] }
 0x973   :  { %3904 = vmatpush.msra.mxu3 %v17383_v32  ;;  %3924 = vmatpush.msrb.mxu2 %v17384_v45  ;;  %v17392_v32 = vld [vmem:[#allocation378_spill] sm:$0xff] }
 0x974   :  { %3944 = vmatpush.msrb.mxu0 %v17385_v22  ;;  %3964 = vmatpush.msrb.mxu1 %v17386_v3  ;;  %v17393_v45 = vld [vmem:[#allocation490_spill] sm:$0xff]  ;;  %v3494_v22 = vadd.f32 %v3493_v19, %v3474_v61  ;;  %v17395_v3 = vld [vmem:[#allocation261_spill] sm:$0xff] }
 0x975   :  { %3905 = vmatpush.msra.mxu3 %v17387_v29  ;;  %3925 = vmatpush.msrb.mxu2 %v17388_v62  ;;  %v17398_v62 = vld [vmem:[#allocation595_spill] sm:$0xff]  ;;  %v17401_v29 = vld [vmem:[#allocation476_spill] sm:$0xff]  ;;  %v17404_v61 = vld [vmem:[#allocation357_spill] sm:$0xff] }
 0x976   :  { %3945 = vmatpush.msrb.mxu0 %v17389_v14  ;;  %3965 = vmatpush.msrb.mxu1 %v17390_v0  ;;  %v17399_v14 = vld [vmem:[#allocation254_spill] sm:$0xff]  ;;  %v17400_v0 = vld [vmem:[#allocation364_spill] sm:$0xff] }
 0x977   :  { %3906 = vmatpush.msra.mxu3 %v17391_v20  ;;  %3926 = vmatpush.msrb.mxu2 %v17392_v32  ;;  %v17402_v32 = vld [vmem:[#allocation588_spill] sm:$0xff] }
 0x978   :  { %3946 = vmatpush.msrb.mxu0 %v17393_v45  ;;  %3966 = vmatpush.msrb.mxu1 %v17394_v6  ;;  %v17403_v6 = vld [vmem:[#allocation247_spill] sm:$0xff] }
 0x979   :  { %3907 = vmatpush.msra.mxu3 %v17395_v3  ;;  %3927 = vmatpush.msrb.mxu2 %v17396_v51  ;;  %v3553_v51 = vpop.f32.mrf.mxu0  ;;  %v17405_v3 = vld [vmem:[#allocation469_spill] sm:$0xff]  ;;  %v3573_v55 = vpop.f32.mrf.mxu1 }
 0x97a   :  { %3947 = vmatpush.msrb.mxu0 %v17397_v27  ;;  %3967 = vmatpush.msrb.mxu1 %v17398_v62  ;;  %v17406_v27 = vld [vmem:[#allocation581_spill] sm:$0xff] }
 0x97b   :  { %3908 = vmatpush.msra.mxu3 %v17399_v14  ;;  %3928 = vmatpush.msrb.mxu2 %v17400_v0  ;;  %v3513_v20 = vpop.f32.mrf.mxu3  ;;  %v17407_v14 = vld [vmem:[#allocation240_spill] sm:$0xff]  ;;  %v17408_v0 = vld [vmem:[#allocation350_spill] sm:$0xff] }
 0x97c   :  { %3948 = vmatpush.msrb.mxu0 %v17401_v29  ;;  %3968 = vmatpush.msrb.mxu1 %v17402_v32  ;;  %v3514_v45 = vadd.f32 %v3513_v20, %v3494_v22  ;;  %v17409_v29 = vld [vmem:[#allocation462_spill] sm:$0xff]  ;;  %v17411_v20 = vld [vmem:[#allocation233_spill] sm:$0xff] }
 0x97d   :  { %3909 = vmatpush.msra.mxu3 %v17403_v6  ;;  %3929 = vmatpush.msrb.mxu2 %v17404_v61  ;;  %v3533_v19 = vpop.f32.mrf.mxu2  ;;  %v17410_v32 = vld [vmem:[#allocation574_spill] sm:$0xff]  ;;  %v17412_v61 = vld [vmem:[#allocation343_spill] sm:$0xff] }
 0x97e   :  { %3949 = vmatpush.msrb.mxu0 %v17405_v3  ;;  %3969 = vmatpush.msrb.mxu1 %v17406_v27  ;;  %v3534_v62 = vadd.f32 %v3533_v19, %v3514_v45  ;;  %v17413_v6 = vld [vmem:[#allocation455_spill] sm:$0xff]  ;;  %v17415_v45 = vld [vmem:[#allocation784_spill] sm:$0xff] }
 0x97f   :  { %3910 = vmatpush.msra.mxu3 %v17407_v14  ;;  %3930 = vmatpush.msrb.mxu2 %v17408_v0  ;;  %v17414_v3 = vld [vmem:[#allocation567_spill] sm:$0xff] }
 0x980   :  { %3950 = vmatpush.msrb.mxu0 %v17409_v29  ;;  %3970 = vmatpush.msrb.mxu1 %v17410_v32  ;;  %v3554_v22 = vadd.f32 %v3553_v51, %v3534_v62  ;;  %v17416_v62 = vld [vmem:[#allocation777_spill] sm:$0xff]  ;;  %v17417_v51 = vld [vmem:[#allocation794_spill] sm:$0xff]  ;;  %v17435_v29 = vld [vmem:[#allocation679_spill] sm:$0xff] }
 0x981   :  { %3911 = vmatpush.msra.mxu3 %v17411_v20  ;;  %3931 = vmatpush.msrb.mxu2 %v17412_v61 }
 0x982   :  { %3951 = vmatpush.msrb.mxu0 %v17413_v6  ;;  %3971 = vmatpush.msrb.mxu1 %v17414_v3  ;;  %v3574_v27 = vadd.f32 %v3573_v55, %v3554_v22  ;;  %v17420_v55 = vld [vmem:[#allocation756_spill] sm:$0xff]  ;;  %v17422_v22 = vld [vmem:[#allocation742_spill] sm:$0xff] }
 0x983   :  { %3872 = vmatmul.f32.vlgmr.msra.gmra.mxu0 %v12493_v12  ;;  %3892 = vmatmul.f32.vlgmr.msra.gmra.mxu1 %v12500_v23  ;;  %v17418_v12 = vld [vmem:[#allocation770_spill] sm:$0xff]  ;;  %v17419_v23 = vld [vmem:[#allocation763_spill] sm:$0xff] }
 0x984   :  { %3976 = vmatpush.msrb.mxu3 %v17415_v45  ;;  %4848 = vmatpush.msra.mxu2 %v8394_v18  ;;  %v4006_v19 = vrot.slane %v3574_v27, 5  ;;  %v17421_v27 = vld [vmem:[#allocation749_spill] sm:$0xff] }
 0x985   :  { %4868 = vmatpush.msra.mxu0 %v8954_v41  ;;  %4888 = vmatpush.msra.mxu1 %v9514_v53 }
 0x986   :  { %3977 = vmatpush.msrb.mxu3 %v17416_v62  ;;  %4849 = vmatpush.msra.mxu2 %v8359_v60  ;;  %v4020_v6 = vadd.f32 %v4006_v19, %v17417_v51  ;;  %v17423_v19 = vld [vmem:[#allocation735_spill] sm:$0xff]  ;;  %v17424_v51 = vld [vmem:[#allocation728_spill] sm:$0xff] }
 0x987   :  { %4869 = vmatpush.msra.mxu0 %v8919_v4  ;;  %4889 = vmatpush.msra.mxu1 %v9479_v39  ;;  %v17434_v4 = vld [vmem:[#allocation311_spill] sm:$0xff] }
 0x988   :  { %3978 = vmatpush.msrb.mxu3 %v17418_v12  ;;  %4850 = vmatpush.msra.mxu2 %v8324_v25  ;;  %7786 = vtanh.f32 %v4020_v6  ;;  %v13290_v41 = vrot.slane %v17434_v4, 3 }
 0x989   :  { %4870 = vmatpush.msra.mxu0 %v16643_v2  ;;  %4890 = vmatpush.msra.mxu1 %v16644_v9  ;;  %v17433_v2 = vld [vmem:[#allocation234_spill] sm:$0xff] }
 0x98a   :  { %3979 = vmatpush.msrb.mxu3 %v17419_v23  ;;  %4851 = vmatpush.msra.mxu2 %v16646_v35 }
 0x98b   :  { %4871 = vmatpush.msra.mxu0 %v16647_v42  ;;  %4891 = vmatpush.msra.mxu1 %v16648_v43 }
 0x98c   :  { %3980 = vmatpush.msrb.mxu3 %v17420_v55  ;;  %4852 = vmatpush.msra.mxu2 %v16650_v56 }
 0x98d   :  { %4872 = vmatpush.msra.mxu0 %v16651_v57  ;;  %4892 = vmatpush.msra.mxu1 %v16652_v47  ;;  %v17431_v57 = vld [vmem:[#allocation13_spill] sm:$0xff] }
 0x98e   :  { %v13242_v6 = vpop.eup %7786  ;;  %3981 = vmatpush.msrb.mxu3 %v17421_v27  ;;  %4853 = vmatpush.msra.mxu2 %v16654_v17 }
 0x98f   :  { %4873 = vmatpush.msra.mxu0 %v16655_v10  ;;  %4893 = vmatpush.msra.mxu1 %v16656_v8  ;;  %4041 = vst [vmem:[#allocation1 + $0x1b] sm:$0xff] %v13242_v6  ;;  %v17425_v10 = vld [vmem:[#allocation721_spill] sm:$0xff] }
 0x990   :  { %3982 = vmatpush.msrb.mxu3 %v17422_v22  ;;  %4854 = vmatpush.msra.mxu2 %v16658_v58  ;;  %v17936_v8 = vld [vmem:[#allocation585_spill] sm:$0xff] }
 0x991   :  { %4874 = vmatpush.msra.mxu0 %v16659_v40  ;;  %4894 = vmatpush.msra.mxu1 %v16660_v30  ;;  %v17426_v40 = vld [vmem:[#allocation714_spill] sm:$0xff] }
 0x992   :  { %3983 = vmatpush.msrb.mxu3 %v17423_v19  ;;  %4855 = vmatpush.msra.mxu2 %v16662_v26 }
 0x993   :  { %4875 = vmatpush.msra.mxu0 %v16663_v24  ;;  %4895 = vmatpush.msra.mxu1 %v16664_v7  ;;  %v17541_v7 = vld [vmem:[#allocation277_spill] sm:$0xff] }
 0x994   :  { %3984 = vmatpush.msrb.mxu3 %v17424_v51  ;;  %4856 = vmatpush.msra.mxu2 %v16666_v33 }
 0x995   :  { %4876 = vmatpush.msra.mxu0 %v16667_v37  ;;  %4896 = vmatpush.msra.mxu1 %v16668_v21  ;;  %v17427_v37 = vld [vmem:[#allocation707_spill] sm:$0xff]  ;;  %v17476_v21 = vld [vmem:[#allocation610_spill] sm:$0xff] }
 0x996   :  { %3985 = vmatpush.msrb.mxu3 %v17425_v10  ;;  %4857 = vmatpush.msra.mxu2 %v16670_v34  ;;  %v17652_v34 = vld [vmem:[#allocation236_spill] sm:$0xff] }
 0x997   :  { %4877 = vmatpush.msra.mxu0 %v16671_v44  ;;  %4897 = vmatpush.msra.mxu1 %v16672_v52  ;;  %v17454_v52 = vld [vmem:[#allocation533_spill] sm:$0xff] }
 0x998   :  { %3986 = vmatpush.msrb.mxu3 %v17426_v40  ;;  %4858 = vmatpush.msra.mxu2 %v16674_v5  ;;  %v17545_v5 = vld [vmem:[#allocation270_spill] sm:$0xff] }
 0x999   :  { %4878 = vmatpush.msra.mxu0 %v16675_v28  ;;  %4898 = vmatpush.msra.mxu1 %v16676_v36  ;;  %v17428_v28 = vld [vmem:[#allocation700_spill] sm:$0xff] }
 0x99a   :  { %3912 = vmatmul.f32.vlgmr.msra.gmra.mxu3 %v12505_v50  ;;  %4859 = vmatpush.msra.mxu2 %v16679_v48  ;;  %v3633_v24 = vpop.f32.mrf.mxu0  ;;  %v17449_v36 = vld [vmem:[#allocation428_spill] sm:$0xff]  ;;  %v17480_v48 = vld [vmem:[#allocation603_spill] sm:$0xff] }
 0x99b   :  { %3987 = vmatpush.msrb.mxu3 %v17427_v37  ;;  %4879 = vmatpush.msra.mxu0 %v16680_v54  ;;  %v17429_v54 = vld [vmem:[#allocation693_spill] sm:$0xff] }
 0x99c   :  { %4899 = vmatpush.msra.mxu1 %v16681_v1  ;;  %3932 = vmatmul.f32.vlgmr.msrb.gmra.mxu2 %v12508_v49  ;;  %v17438_v1 = vld [vmem:[#allocation115_spill] sm:$0xff] }
 0x99d   :  { %3952 = vmatmul.f32.vlgmr.msrb.gmra.mxu0 %v12525_v63  ;;  %3972 = vmatmul.f32.vlgmr.msrb.gmra.mxu1 %v12532_v59  ;;  %v3593_v44 = vpop.f32.mrf.mxu3  ;;  %v3653_v63 = vpop.f32.mrf.mxu1  ;;  %v17430_v59 = vld [vmem:[#allocation686_spill] sm:$0xff] }
 0x99e   :  { %3988 = vmatpush.msrb.mxu3 %v17428_v28  ;;  %4860 = vmatpush.msra.mxu2 %v16683_v15 }
 0x99f   :  { %4880 = vmatpush.msra.mxu0 %v16684_v11  ;;  %4900 = vmatpush.msra.mxu1 %v16686_v31  ;;  %v3613_v50 = vpop.f32.mrf.mxu2  ;;  %v17432_v11 = vld [vmem:[#allocation122_spill] sm:$0xff]  ;;  %v13298_v31 = vrot.slane %v13110_v16, 3 }
 0x9a0   :  { %3989 = vmatpush.msrb.mxu3 %v17429_v54  ;;  %4861 = vmatpush.msra.mxu2 %v16689_v46  ;;  %v3614_v49 = vadd.f32 %v3613_v50, %v3593_v44  ;;  %v17436_v44 = vld [vmem:[#allocation6_spill] sm:$0xff]  ;;  %v17450_v46 = vld [vmem:[#allocation540_spill] sm:$0xff] }
 0x9a1   :  { %4881 = vmatpush.msra.mxu0 %v16690_v38  ;;  %4901 = vmatpush.msra.mxu1 %v16692_v13  ;;  %v17437_v38 = vld [vmem:[#allocation83_spill] sm:$0xff] }
 0x9a2   :  { %3990 = vmatpush.msrb.mxu3 %v17430_v59  ;;  %4862 = vmatpush.msra.mxu2 %v17431_v57  ;;  %v3634_v42 = vadd.f32 %v3633_v24, %v3614_v49  ;;  %v13295_v13 = vrot.slane %v17437_v38, 3  ;;  %v17439_v24 = vld [vmem:[#allocation227_spill] sm:$0xff]  ;;  %v17440_v49 = vld [vmem:[#allocation318_spill] sm:$0xff] }
 0x9a3   :  { %4882 = vmatpush.msra.mxu0 %v17432_v11  ;;  %4902 = vmatpush.msra.mxu1 %v17433_v2  ;;  %v17442_v38 = vld [vmem:[#allocation554_spill] sm:$0xff]  ;;  %v17448_v57 = vld [vmem:[#allocation771_spill] sm:$0xff] }
 0x9a4   :  { %3991 = vmatpush.msrb.mxu3 %v17435_v29  ;;  %4863 = vmatpush.msra.mxu2 %v17436_v44  ;;  %v3654_v50 = vadd.f32 %v3653_v63, %v3634_v42  ;;  %v17441_v42 = vld [vmem:[#allocation442_spill] sm:$0xff]  ;;  %v17447_v44 = vld [vmem:[#allocation659_spill] sm:$0xff] }
 0x9a5   :  { %4883 = vmatpush.msra.mxu0 %v17438_v1  ;;  %4903 = vmatpush.msra.mxu1 %v17439_v24  ;;  %v17443_v11 = vld [vmem:[#allocation666_spill] sm:$0xff]  ;;  %v17445_v24 = vld [vmem:[#allocation435_spill] sm:$0xff] }
 0x9a6   :  { %3992 = vmatmul.f32.vlgmr.msrb.gmra.mxu3 %v17440_v49  ;;  %4864 = vmatmul.f32.vlgmr.msra.gmra.mxu2 %v13290_v41  ;;  %v17444_v1 = vld [vmem:[#allocation778_spill] sm:$0xff]  ;;  %v17446_v49 = vld [vmem:[#allocation547_spill] sm:$0xff] }
 0x9a7   :  { %4884 = vmatmul.f32.vlgmr.msra.gmra.mxu0 %v13295_v13  ;;  %4904 = vmatmul.f32.vlgmr.msra.gmra.mxu1 %v13298_v31  ;;  %v3673_v4 = vpop.f32.mrf.mxu3 }
 0x9a8   :  { %4908 = vmatpush.msra.mxu3 %v17441_v42  ;;  %4928 = vmatpush.msrb.mxu2 %v17442_v38  ;;  %v3674_v63 = vadd.f32 %v3673_v4, %v3654_v50  ;;  %v17451_v4 = vld [vmem:[#allocation652_spill] sm:$0xff] }
 0x9a9   :  { %v3693_v16 = vpop.f32.mrf.mxu2  ;;  %4948 = vmatpush.msrb.mxu0 %v17443_v11  ;;  %4968 = vmatpush.msrb.mxu1 %v17444_v1  ;;  %v17452_v11 = vld [vmem:[#allocation764_spill] sm:$0xff]  ;;  %v17453_v1 = vld [vmem:[#allocation421_spill] sm:$0xff] }
 0x9aa   :  { %4909 = vmatpush.msra.mxu3 %v17445_v24  ;;  %4929 = vmatpush.msrb.mxu2 %v17446_v49  ;;  %v3694_v2 = vadd.f32 %v3693_v16, %v3674_v63  ;;  %v17455_v63 = vld [vmem:[#allocation645_spill] sm:$0xff] }
 0x9ab   :  { %4949 = vmatpush.msrb.mxu0 %v17447_v44  ;;  %4969 = vmatpush.msrb.mxu1 %v17448_v57  ;;  %v17456_v16 = vld [vmem:[#allocation757_spill] sm:$0xff]  ;;  %v17457_v44 = vld [vmem:[#allocation414_spill] sm:$0xff] }
 0x9ac   :  { %4910 = vmatpush.msra.mxu3 %v17449_v36  ;;  %4930 = vmatpush.msrb.mxu2 %v17450_v46  ;;  %v3713_v38 = vpop.f32.mrf.mxu0  ;;  %v17458_v57 = vld [vmem:[#allocation526_spill] sm:$0xff]  ;;  %v17459_v46 = vld [vmem:[#allocation795_spill] sm:$0xff] }
 0x9ad   :  { %v3714_v50 = vadd.f32 %v3713_v38, %v3694_v2  ;;  %4950 = vmatpush.msrb.mxu0 %v17451_v4  ;;  %4970 = vmatpush.msrb.mxu1 %v17452_v11  ;;  %v17460_v2 = vld [vmem:[#allocation638_spill] sm:$0xff]  ;;  %v17462_v4 = vld [vmem:[#allocation407_spill] sm:$0xff] }
 0x9ae   :  { %4911 = vmatpush.msra.mxu3 %v17453_v1  ;;  %4931 = vmatpush.msrb.mxu2 %v17454_v52  ;;  %v17461_v38 = vld [vmem:[#allocation750_spill] sm:$0xff]  ;;  %v17463_v11 = vld [vmem:[#allocation519_spill] sm:$0xff]  ;;  %v17467_v52 = vld [vmem:[#allocation512_spill] sm:$0xff] }
 0x9af   :  { %v4007_v49 = vrot.slane %v3714_v50, 5  ;;  %4951 = vmatpush.msrb.mxu0 %v17455_v63  ;;  %4971 = vmatpush.msrb.mxu1 %v17456_v16  ;;  %v17464_v50 = vld [vmem:[#allocation631_spill] sm:$0xff]  ;;  %v17466_v16 = vld [vmem:[#allocation400_spill] sm:$0xff] }
 0x9b0   :  { %4912 = vmatpush.msra.mxu3 %v17457_v44  ;;  %4932 = vmatpush.msrb.mxu2 %v17458_v57  ;;  %v17465_v63 = vld [vmem:[#allocation743_spill] sm:$0xff]  ;;  %v17468_v57 = vld [vmem:[#allocation624_spill] sm:$0xff] }
 0x9b1   :  { %v4021_v15 = vadd.f32 %v4007_v49, %v17459_v46  ;;  %4952 = vmatpush.msrb.mxu0 %v17460_v2  ;;  %4972 = vmatpush.msrb.mxu1 %v17461_v38  ;;  %v17469_v46 = vld [vmem:[#allocation736_spill] sm:$0xff]  ;;  %v17470_v49 = vld [vmem:[#allocation393_spill] sm:$0xff] }
 0x9b2   :  { %4913 = vmatpush.msra.mxu3 %v17462_v4  ;;  %4933 = vmatpush.msrb.mxu2 %v17463_v11  ;;  %v17471_v2 = vld [vmem:[#allocation505_spill] sm:$0xff] }
 0x9b3   :  { %7788 = vtanh.f32 %v4021_v15  ;;  %4953 = vmatpush.msrb.mxu0 %v17464_v50  ;;  %4973 = vmatpush.msrb.mxu1 %v17465_v63  ;;  %v17472_v38 = vld [vmem:[#allocation617_spill] sm:$0xff]  ;;  %v17474_v15 = vld [vmem:[#allocation386_spill] sm:$0xff] }
 0x9b4   :  { %4914 = vmatpush.msra.mxu3 %v17466_v16  ;;  %4934 = vmatpush.msrb.mxu2 %v17467_v52  ;;  %v17473_v11 = vld [vmem:[#allocation729_spill] sm:$0xff]  ;;  %v17475_v50 = vld [vmem:[#allocation498_spill] sm:$0xff] }
 0x9b5   :  { %4954 = vmatpush.msrb.mxu0 %v17468_v57  ;;  %4974 = vmatpush.msrb.mxu1 %v17469_v46  ;;  %v17477_v52 = vld [vmem:[#allocation722_spill] sm:$0xff]  ;;  %v17478_v57 = vld [vmem:[#allocation379_spill] sm:$0xff] }
 0x9b6   :  { %4915 = vmatpush.msra.mxu3 %v17470_v49  ;;  %4935 = vmatpush.msrb.mxu2 %v17471_v2  ;;  %v17479_v46 = vld [vmem:[#allocation491_spill] sm:$0xff]  ;;  %v17488_v49 = vld [vmem:[#allocation589_spill] sm:$0xff] }
 0x9b7   :  { %4955 = vmatpush.msrb.mxu0 %v17472_v38  ;;  %4975 = vmatpush.msrb.mxu1 %v17473_v11  ;;  %v17481_v2 = vld [vmem:[#allocation715_spill] sm:$0xff]  ;;  %v17482_v38 = vld [vmem:[#allocation372_spill] sm:$0xff] }
 0x9b8   :  { %4916 = vmatpush.msra.mxu3 %v17474_v15  ;;  %4936 = vmatpush.msrb.mxu2 %v17475_v50  ;;  %v17483_v11 = vld [vmem:[#allocation484_spill] sm:$0xff] }
 0x9b9   :  { %v7789_v63 = vpop.eup %7788  ;;  %4956 = vmatpush.msrb.mxu0 %v17476_v21  ;;  %4976 = vmatpush.msrb.mxu1 %v17477_v52  ;;  %v17484_v15 = vld [vmem:[#allocation596_spill] sm:$0xff]  ;;  %v17486_v21 = vld [vmem:[#allocation365_spill] sm:$0xff] }
 0x9ba   :  { %4042 = vst [vmem:[#allocation1 + $0x24] sm:$0xff] %v7789_v63  ;;  %4917 = vmatpush.msra.mxu3 %v17478_v57  ;;  %4937 = vmatpush.msrb.mxu2 %v17479_v46  ;;  %v17485_v50 = vld [vmem:[#allocation708_spill] sm:$0xff]  ;;  %v17487_v52 = vld [vmem:[#allocation477_spill] sm:$0xff]  ;;  %v17490_v46 = vld [vmem:[#allocation358_spill] sm:$0xff] }
 0x9bb   :  { %4957 = vmatpush.msrb.mxu0 %v17480_v48  ;;  %4977 = vmatpush.msrb.mxu1 %v17481_v2  ;;  %v17489_v57 = vld [vmem:[#allocation701_spill] sm:$0xff]  ;;  %v17491_v48 = vld [vmem:[#allocation470_spill] sm:$0xff] }
 0x9bc   :  { %4918 = vmatpush.msra.mxu3 %v17482_v38  ;;  %4938 = vmatpush.msrb.mxu2 %v17483_v11  ;;  %v17492_v2 = vld [vmem:[#allocation582_spill] sm:$0xff]  ;;  %v17494_v11 = vld [vmem:[#allocation351_spill] sm:$0xff] }
 0x9bd   :  { %4958 = vmatpush.msrb.mxu0 %v17484_v15  ;;  %4978 = vmatpush.msrb.mxu1 %v17485_v50  ;;  %v17493_v38 = vld [vmem:[#allocation694_spill] sm:$0xff]  ;;  %v17495_v15 = vld [vmem:[#allocation463_spill] sm:$0xff] }
 0x9be   :  { %4919 = vmatpush.msra.mxu3 %v17486_v21  ;;  %4939 = vmatpush.msrb.mxu2 %v17487_v52  ;;  %v17496_v50 = vld [vmem:[#allocation575_spill] sm:$0xff]  ;;  %v13363_v52 = vrot.slane %v7789_v63, 3  ;;  %v17505_v63 = vld [vmem:[#allocation109_spill] sm:$0xff] }
 0x9bf   :  { %4959 = vmatpush.msrb.mxu0 %v17488_v49  ;;  %4979 = vmatpush.msrb.mxu1 %v17489_v57  ;;  %v17497_v21 = vld [vmem:[#allocation687_spill] sm:$0xff]  ;;  %v17498_v49 = vld [vmem:[#allocation344_spill] sm:$0xff] }
 0x9c0   :  { %4920 = vmatpush.msra.mxu3 %v17490_v46  ;;  %4940 = vmatpush.msrb.mxu2 %v17491_v48  ;;  %v17499_v57 = vld [vmem:[#allocation456_spill] sm:$0xff]  ;;  %v13368_v48 = vrot.slane %v13242_v6, 3  ;;  %v17507_v6 = vld [vmem:[#allocation561_spill] sm:$0xff]  ;;  %v17516_v46 = vld [vmem:[#allocation91_spill] sm:$0xff] }
 0x9c1   :  { %4960 = vmatpush.msrb.mxu0 %v17492_v2  ;;  %4980 = vmatpush.msrb.mxu1 %v17493_v38  ;;  %v17500_v2 = vld [vmem:[#allocation568_spill] sm:$0xff] }
 0x9c2   :  { %4921 = vmatpush.msra.mxu3 %v17494_v11  ;;  %4941 = vmatpush.msrb.mxu2 %v17495_v15  ;;  %v17501_v38 = vld [vmem:[#allocation680_spill] sm:$0xff]  ;;  %v17502_v11 = vld [vmem:[#allocation337_spill] sm:$0xff] }
 0x9c3   :  { %4961 = vmatpush.msrb.mxu0 %v17496_v50  ;;  %4981 = vmatpush.msrb.mxu1 %v17497_v21  ;;  %v17503_v15 = vld [vmem:[#allocation449_spill] sm:$0xff]  ;;  %v17506_v21 = vld [vmem:[#allocation214_spill] sm:$0xff] }
 0x9c4   :  { %4922 = vmatpush.msra.mxu3 %v17498_v49  ;;  %4942 = vmatpush.msrb.mxu2 %v17499_v57  ;;  %v17504_v50 = vld [vmem:[#allocation221_spill] sm:$0xff]  ;;  %v17508_v57 = vld [vmem:[#allocation103_spill] sm:$0xff] }
 0x9c5   :  { %4962 = vmatpush.msrb.mxu0 %v17500_v2  ;;  %4982 = vmatpush.msrb.mxu1 %v17501_v38  ;;  %v17509_v2 = vld [vmem:[#allocation331_spill] sm:$0xff]  ;;  %v17513_v49 = vld [vmem:[#allocation325_spill] sm:$0xff] }
 0x9c6   :  { %4923 = vmatpush.msra.mxu3 %v17502_v11  ;;  %4943 = vmatpush.msrb.mxu2 %v17503_v15  ;;  %v17510_v38 = vld [vmem:[#allocation207_spill] sm:$0xff]  ;;  %v17511_v11 = vld [vmem:[#allocation673_spill] sm:$0xff] }
 0x9c7   :  { %4924 = vmatmul.f32.vlgmr.msra.gmra.mxu3 %v13368_v48  ;;  %4944 = vmatmul.f32.vlgmr.msrb.gmra.mxu2 %v13363_v52  ;;  %v17512_v15 = vld [vmem:[#allocation97_spill] sm:$0xff] }
 0x9c8   :  { %5008 = vmatpush.msra.mxu2 %v17504_v50  ;;  %4988 = vmatpush.msrb.mxu3 %v17505_v63  ;;  %v17514_v50 = vld [vmem:[#allocation200_spill] sm:$0xff]  ;;  %v17515_v63 = vld [vmem:[#allocation443_spill] sm:$0xff] }
 0x9c9   :  { %4963 = vmatpush.msrb.mxu0 %v17507_v6  ;;  %4983 = vmatpush.msrb.mxu1 %v17511_v11  ;;  %v17518_v6 = vld [vmem:[#allocation193_spill] sm:$0xff]  ;;  %v17522_v11 = vld [vmem:[#allocation186_spill] sm:$0xff] }
 0x9ca   :  { %5009 = vmatpush.msra.mxu2 %v17506_v21  ;;  %4989 = vmatpush.msrb.mxu3 %v17508_v57  ;;  %v17517_v21 = vld [vmem:[#allocation319_spill] sm:$0xff]  ;;  %v17519_v57 = vld [vmem:[#allocation436_spill] sm:$0xff] }
 0x9cb   :  { %5028 = vmatpush.msra.mxu0 %v17509_v2  ;;  %5048 = vmatpush.msra.mxu1 %v17515_v63  ;;  %v17520_v2 = vld [vmem:[#allocation84_spill] sm:$0xff]  ;;  %v17526_v63 = vld [vmem:[#allocation179_spill] sm:$0xff] }
 0x9cc   :  { %5010 = vmatpush.msra.mxu2 %v17510_v38  ;;  %4990 = vmatpush.msrb.mxu3 %v17512_v15  ;;  %v17521_v38 = vld [vmem:[#allocation312_spill] sm:$0xff]  ;;  %v17523_v15 = vld [vmem:[#allocation429_spill] sm:$0xff] }
 0x9cd   :  { %5029 = vmatpush.msra.mxu0 %v17513_v49  ;;  %5049 = vmatpush.msra.mxu1 %v17519_v57  ;;  %v17524_v49 = vld [vmem:[#allocation77_spill] sm:$0xff]  ;;  %v17530_v57 = vld [vmem:[#allocation172_spill] sm:$0xff] }
 0x9ce   :  { %5011 = vmatpush.msra.mxu2 %v17514_v50  ;;  %4991 = vmatpush.msrb.mxu3 %v17516_v46  ;;  %v17525_v50 = vld [vmem:[#allocation305_spill] sm:$0xff]  ;;  %v17527_v46 = vld [vmem:[#allocation422_spill] sm:$0xff] }
 0x9cf   :  { %5030 = vmatpush.msra.mxu0 %v17517_v21  ;;  %5050 = vmatpush.msra.mxu1 %v17523_v15  ;;  %v17528_v21 = vld [vmem:[#allocation70_spill] sm:$0xff]  ;;  %v17533_v15 = vld [vmem:[#allocation291_spill] sm:$0xff] }
 0x9d0   :  { %5012 = vmatpush.msra.mxu2 %v17518_v6  ;;  %4992 = vmatpush.msrb.mxu3 %v17520_v2  ;;  %v17529_v6 = vld [vmem:[#allocation298_spill] sm:$0xff]  ;;  %v3733_v2 = vpop.f32.mrf.mxu1 }
 0x9d1   :  { %5031 = vmatpush.msra.mxu0 %v17521_v38  ;;  %5051 = vmatpush.msra.mxu1 %v17527_v46  ;;  %v17531_v38 = vld [vmem:[#allocation415_spill] sm:$0xff]  ;;  %v17537_v46 = vld [vmem:[#allocation284_spill] sm:$0xff] }
 0x9d2   :  { %5013 = vmatpush.msra.mxu2 %v17522_v11  ;;  %4993 = vmatpush.msrb.mxu3 %v17524_v49  ;;  %v17532_v11 = vld [vmem:[#allocation63_spill] sm:$0xff]  ;;  %v17534_v49 = vld [vmem:[#allocation165_spill] sm:$0xff] }
 0x9d3   :  { %5032 = vmatpush.msra.mxu0 %v17525_v50  ;;  %5052 = vmatpush.msra.mxu1 %v17531_v38  ;;  %v17535_v50 = vld [vmem:[#allocation408_spill] sm:$0xff]  ;;  %v17542_v38 = vld [vmem:[#allocation151_spill] sm:$0xff] }
 0x9d4   :  { %5014 = vmatpush.msra.mxu2 %v17526_v63  ;;  %4994 = vmatpush.msrb.mxu3 %v17528_v21  ;;  %v17536_v63 = vld [vmem:[#allocation56_spill] sm:$0xff]  ;;  %v17538_v21 = vld [vmem:[#allocation158_spill] sm:$0xff] }
 0x9d5   :  { %5033 = vmatpush.msra.mxu0 %v17529_v6  ;;  %5053 = vmatpush.msra.mxu1 %v17535_v50  ;;  %v17539_v6 = vld [vmem:[#allocation401_spill] sm:$0xff] }
 0x9d6   :  { %5015 = vmatpush.msra.mxu2 %v17530_v57  ;;  %4995 = vmatpush.msrb.mxu3 %v17532_v11  ;;  %v17540_v57 = vld [vmem:[#allocation49_spill] sm:$0xff] }
 0x9d7   :  { %5034 = vmatpush.msra.mxu0 %v17533_v15  ;;  %5054 = vmatpush.msra.mxu1 %v17539_v6  ;;  %v17543_v15 = vld [vmem:[#allocation394_spill] sm:$0xff]  ;;  %v17548_v6 = vld [vmem:[#allocation35_spill] sm:$0xff] }
 0x9d8   :  { %5016 = vmatpush.msra.mxu2 %v17534_v49  ;;  %4996 = vmatpush.msrb.mxu3 %v17536_v63  ;;  %v17544_v49 = vld [vmem:[#allocation42_spill] sm:$0xff]  ;;  %v17546_v63 = vld [vmem:[#allocation144_spill] sm:$0xff] }
 0x9d9   :  { %5035 = vmatpush.msra.mxu0 %v17537_v46  ;;  %5055 = vmatpush.msra.mxu1 %v17543_v15  ;;  %v17551_v15 = vld [vmem:[#allocation380_spill] sm:$0xff] }
 0x9da   :  { %5017 = vmatpush.msra.mxu2 %v17538_v21  ;;  %4997 = vmatpush.msrb.mxu3 %v17540_v57  ;;  %v17547_v21 = vld [vmem:[#allocation387_spill] sm:$0xff] }
 0x9db   :  { %5036 = vmatpush.msra.mxu0 %v17541_v7  ;;  %v3753_v11 = vpop.f32.mrf.mxu3  ;;  %5056 = vmatpush.msra.mxu1 %v17547_v21  ;;  %v17549_v7 = vld [vmem:[#allocation263_spill] sm:$0xff]  ;;  %v17556_v21 = vld [vmem:[#allocation21_spill] sm:$0xff] }
 0x9dc   :  { %5018 = vmatpush.msra.mxu2 %v17542_v38  ;;  %4998 = vmatpush.msrb.mxu3 %v17544_v49  ;;  %v3754_v50 = vadd.f32 %v3753_v11, %v3733_v2  ;;  %v17550_v38 = vld [vmem:[#allocation137_spill] sm:$0xff]  ;;  %v17552_v49 = vld [vmem:[#allocation28_spill] sm:$0xff] }
 0x9dd   :  { %5037 = vmatpush.msra.mxu0 %v17545_v5  ;;  %v3773_v46 = vpop.f32.mrf.mxu2  ;;  %5057 = vmatpush.msra.mxu1 %v17551_v15  ;;  %v17553_v2 = vld [vmem:[#allocation256_spill] sm:$0xff]  ;;  %v17554_v5 = vld [vmem:[#allocation130_spill] sm:$0xff] }
 0x9de   :  { %5019 = vmatpush.msra.mxu2 %v17546_v63  ;;  %4999 = vmatpush.msrb.mxu3 %v17548_v6  ;;  %v3774_v57 = vadd.f32 %v3773_v46, %v3754_v50  ;;  %v3793_v16 = vpop.f32.mrf.mxu0  ;;  %v3813_v30 = vpop.f32.mrf.mxu1  ;;  %v17555_v63 = vld [vmem:[#allocation373_spill] sm:$0xff]  ;;  %v17560_v6 = vld [vmem:[#allocation14_spill] sm:$0xff] }
 0x9df   :  { %5038 = vmatpush.msra.mxu0 %v17549_v7  ;;  %5058 = vmatpush.msra.mxu1 %v17555_v63  ;;  %v17557_v46 = vld [vmem:[#allocation249_spill] sm:$0xff]  ;;  %v17558_v7 = vld [vmem:[#allocation123_spill] sm:$0xff]  ;;  %v17561_v15 = vld [vmem:[#allocation242_spill] sm:$0xff] }
 0x9e0   :  { %5020 = vmatpush.msra.mxu2 %v17550_v38  ;;  %5000 = vmatpush.msrb.mxu3 %v17552_v49  ;;  %v3794_v11 = vadd.f32 %v3793_v16, %v3774_v57  ;;  %v17559_v38 = vld [vmem:[#allocation366_spill] sm:$0xff]  ;;  %v17562_v57 = vld [vmem:[#allocation116_spill] sm:$0xff] }
 0x9e1   :  { %5039 = vmatpush.msra.mxu0 %v17553_v2  ;;  %5059 = vmatpush.msra.mxu1 %v17559_v38  ;;  %v17563_v2 = vld [vmem:[#allocation359_spill] sm:$0xff] }
 0x9e2   :  { %5021 = vmatpush.msra.mxu2 %v17554_v5  ;;  %5001 = vmatpush.msrb.mxu3 %v17556_v21  ;;  %v3814_v50 = vadd.f32 %v3813_v30, %v3794_v11  ;;  %v17564_v5 = vld [vmem:[#allocation7_spill] sm:$0xff]  ;;  %v17575_v21 = vld [vmem:[#allocation796_spill] sm:$0xff] }
 0x9e3   :  { %5040 = vmatpush.msra.mxu0 %v17557_v46  ;;  %5060 = vmatpush.msra.mxu1 %v17563_v2  ;;  %v17565_v11 = vld [vmem:[#allocation667_spill] sm:$0xff]  ;;  %v17570_v2 = vld [vmem:[#allocation548_spill] sm:$0xff] }
 0x9e4   :  { %5022 = vmatpush.msra.mxu2 %v17558_v7  ;;  %5002 = vmatpush.msrb.mxu3 %v17560_v6  ;;  %v17566_v38 = vld [vmem:[#allocation555_spill] sm:$0xff]  ;;  %v17571_v6 = vld [vmem:[#allocation228_spill] sm:$0xff] }
 0x9e5   :  { %5041 = vmatpush.msra.mxu0 %v17561_v15  ;;  %v3833_v16 = vpop.f32.mrf.mxu3  ;;  %v17567_v7 = vld [vmem:[#allocation235_spill] sm:$0xff]  ;;  %v17568_v15 = vld [vmem:[#allocation660_spill] sm:$0xff] }
 0x9e6   :  { %5023 = vmatpush.msra.mxu2 %v17562_v57  ;;  %5003 = vmatpush.msrb.mxu3 %v17564_v5  ;;  %v3834_v30 = vadd.f32 %v3833_v16, %v3814_v50  ;;  %v17569_v57 = vld [vmem:[#allocation352_spill] sm:$0xff]  ;;  %v17572_v50 = vld [vmem:[#allocation653_spill] sm:$0xff] }
 0x9e7   :  { %5024 = vmatmul.f32.vlgmr.msra.gmra.mxu2 %v13295_v13  ;;  %5004 = vmatmul.f32.vlgmr.msrb.gmra.mxu3 %v13290_v41  ;;  %v3853_v46 = vpop.f32.mrf.mxu2  ;;  %v17573_v16 = vld [vmem:[#allocation345_spill] sm:$0xff] }
 0x9e8   :  { %5088 = vmatpush.msrb.mxu2 %v17565_v11  ;;  %5068 = vmatpush.msra.mxu3 %v17566_v38  ;;  %v3854_v63 = vadd.f32 %v3853_v46, %v3834_v30  ;;  %v17574_v11 = vld [vmem:[#allocation541_spill] sm:$0xff]  ;;  %v17576_v46 = vld [vmem:[#allocation646_spill] sm:$0xff] }
 0x9e9   :  { %5042 = vmatpush.msra.mxu0 %v17567_v7  ;;  %5061 = vmatpush.msra.mxu1 %v17569_v57  ;;  %v17577_v30 = vld [vmem:[#allocation338_spill] sm:$0xff]  ;;  %v17579_v57 = vld [vmem:[#allocation639_spill] sm:$0xff] }
 0x9ea   :  { %5089 = vmatpush.msrb.mxu2 %v17568_v15  ;;  %5069 = vmatpush.msra.mxu3 %v17570_v2  ;;  %v4008_v5 = vrot.slane %v3854_v63, 5  ;;  %v17578_v7 = vld [vmem:[#allocation534_spill] sm:$0xff]  ;;  %v17580_v63 = vld [vmem:[#allocation527_spill] sm:$0xff] }
 0x9eb   :  { %5043 = vmatpush.msra.mxu0 %v17571_v6  ;;  %5062 = vmatpush.msra.mxu1 %v17573_v16  ;;  %v17581_v6 = vld [vmem:[#allocation632_spill] sm:$0xff]  ;;  %v17583_v16 = vld [vmem:[#allocation625_spill] sm:$0xff]  ;;  %v17644_v2 = vld [vmem:[#allocation430_spill] sm:$0xff] }
 0x9ec   :  { %5090 = vmatpush.msrb.mxu2 %v17572_v50  ;;  %5070 = vmatpush.msra.mxu3 %v17574_v11  ;;  %v4022_v38 = vadd.f32 %v4008_v5, %v17575_v21  ;;  %v17582_v50 = vld [vmem:[#allocation520_spill] sm:$0xff]  ;;  %v17584_v11 = vld [vmem:[#allocation513_spill] sm:$0xff]  ;;  %v17585_v5 = vld [vmem:[#allocation618_spill] sm:$0xff] }
 0x9ed   :  { %5063 = vmatpush.msra.mxu1 %v17577_v30  ;;  %v17586_v30 = vld [vmem:[#allocation506_spill] sm:$0xff] }
 0x9ee   :  { %5091 = vmatpush.msrb.mxu2 %v17576_v46  ;;  %5071 = vmatpush.msra.mxu3 %v17578_v7  ;;  %7790 = vtanh.f32 %v4022_v38  ;;  %v17587_v38 = vld [vmem:[#allocation611_spill] sm:$0xff]  ;;  %v17590_v46 = vld [vmem:[#allocation604_spill] sm:$0xff] }
 0x9ef   :  { %v17637_v7 = vld [vmem:[#allocation271_spill] sm:$0xff] }
 0x9f0   :  { %5092 = vmatpush.msrb.mxu2 %v17579_v57  ;;  %5072 = vmatpush.msra.mxu3 %v17580_v63  ;;  %v17588_v57 = vld [vmem:[#allocation499_spill] sm:$0xff]  ;;  %v17598_v63 = vld [vmem:[#allocation758_spill] sm:$0xff] }
 0x9f2   :  { %5093 = vmatpush.msrb.mxu2 %v17581_v6  ;;  %5073 = vmatpush.msra.mxu3 %v17582_v50  ;;  %v17589_v6 = vld [vmem:[#allocation779_spill] sm:$0xff]  ;;  %v17594_v50 = vld [vmem:[#allocation485_spill] sm:$0xff] }
 0x9f4   :  { %5094 = vmatpush.msrb.mxu2 %v17583_v16  ;;  %v7791_v15 = vpop.eup %7790  ;;  %5074 = vmatpush.msra.mxu3 %v17584_v11  ;;  %v17591_v16 = vld [vmem:[#allocation492_spill] sm:$0xff] }
 0x9f5   :  { %4043 = vst [vmem:[#allocation1 + $0x2d] sm:$0xff] %v7791_v15  ;;  %v13459_v21 = vrot.slane %v7791_v15, 3  ;;  %v17592_v11 = vld [vmem:[#allocation772_spill] sm:$0xff]  ;;  %v17593_v15 = vld [vmem:[#allocation597_spill] sm:$0xff] }
 0x9f6   :  { %5095 = vmatpush.msrb.mxu2 %v17585_v5  ;;  %5075 = vmatpush.msra.mxu3 %v17586_v30  ;;  %v17595_v5 = vld [vmem:[#allocation765_spill] sm:$0xff]  ;;  %v17596_v30 = vld [vmem:[#allocation590_spill] sm:$0xff] }
 0x9f7   :  { %4964 = vmatmul.f32.vlgmr.msrb.gmra.mxu0 %v13459_v21 }
 0x9f8   :  { %5096 = vmatpush.msrb.mxu2 %v17587_v38  ;;  %5076 = vmatpush.msra.mxu3 %v17588_v57  ;;  %v17597_v38 = vld [vmem:[#allocation478_spill] sm:$0xff]  ;;  %v17599_v57 = vld [vmem:[#allocation583_spill] sm:$0xff] }
 0x9f9   :  { %5108 = vmatpush.msrb.mxu0 %v17589_v6  ;;  %v17600_v6 = vld [vmem:[#allocation471_spill] sm:$0xff] }
 0x9fa   :  { %5097 = vmatpush.msrb.mxu2 %v17590_v46  ;;  %5077 = vmatpush.msra.mxu3 %v17591_v16  ;;  %v17601_v46 = vld [vmem:[#allocation751_spill] sm:$0xff]  ;;  %v17620_v16 = vld [vmem:[#allocation201_spill] sm:$0xff] }
 0x9fb   :  { %5109 = vmatpush.msrb.mxu0 %v17592_v11  ;;  %v17602_v11 = vld [vmem:[#allocation576_spill] sm:$0xff] }
 0x9fc   :  { %5098 = vmatpush.msrb.mxu2 %v17593_v15  ;;  %5078 = vmatpush.msra.mxu3 %v17594_v50  ;;  %v17603_v15 = vld [vmem:[#allocation464_spill] sm:$0xff] }
 0x9fd   :  { %5110 = vmatpush.msrb.mxu0 %v17595_v5  ;;  %v17604_v50 = vld [vmem:[#allocation744_spill] sm:$0xff]  ;;  %v17605_v5 = vld [vmem:[#allocation569_spill] sm:$0xff] }
 0x9fe   :  { %5099 = vmatpush.msrb.mxu2 %v17596_v30  ;;  %5079 = vmatpush.msra.mxu3 %v17597_v38  ;;  %v17606_v30 = vld [vmem:[#allocation457_spill] sm:$0xff] }
 0x9ff   :  { %5111 = vmatpush.msrb.mxu0 %v17598_v63  ;;  %v17607_v38 = vld [vmem:[#allocation737_spill] sm:$0xff]  ;;  %v17608_v63 = vld [vmem:[#allocation562_spill] sm:$0xff] }
 0xa00   :  { %5100 = vmatpush.msrb.mxu2 %v17599_v57  ;;  %5044 = vmatmul.f32.vlgmr.msra.gmra.mxu0 %v13298_v31  ;;  %v17609_v57 = vld [vmem:[#allocation450_spill] sm:$0xff] }
 0xa01   :  { %5080 = vmatpush.msra.mxu3 %v17600_v6  ;;  %5112 = vmatpush.msrb.mxu0 %v17601_v46  ;;  %v17610_v46 = vld [vmem:[#allocation332_spill] sm:$0xff]  ;;  %v17619_v6 = vld [vmem:[#allocation313_spill] sm:$0xff] }
 0xa02   :  { %5101 = vmatpush.msrb.mxu2 %v17602_v11  ;;  %v17611_v11 = vld [vmem:[#allocation222_spill] sm:$0xff] }
 0xa03   :  { %5081 = vmatpush.msra.mxu3 %v17603_v15  ;;  %5113 = vmatpush.msrb.mxu0 %v17604_v50  ;;  %v17612_v15 = vld [vmem:[#allocation730_spill] sm:$0xff] }
 0xa04   :  { %5102 = vmatpush.msrb.mxu2 %v17605_v5  ;;  %v17613_v50 = vld [vmem:[#allocation326_spill] sm:$0xff]  ;;  %v17614_v5 = vld [vmem:[#allocation215_spill] sm:$0xff] }
 0xa05   :  { %5082 = vmatpush.msra.mxu3 %v17606_v30  ;;  %5114 = vmatpush.msrb.mxu0 %v17607_v38  ;;  %v17615_v30 = vld [vmem:[#allocation723_spill] sm:$0xff]  ;;  %v17616_v38 = vld [vmem:[#allocation320_spill] sm:$0xff] }
 0xa06   :  { %5103 = vmatpush.msrb.mxu2 %v17608_v63  ;;  %v17617_v63 = vld [vmem:[#allocation208_spill] sm:$0xff] }
 0xa07   :  { %5083 = vmatpush.msra.mxu3 %v17609_v57  ;;  %5104 = vmatmul.f32.vlgmr.msrb.gmra.mxu2 %v13459_v21  ;;  %v17618_v57 = vld [vmem:[#allocation716_spill] sm:$0xff] }
 0xa08   :  { %5084 = vmatmul.f32.vlgmr.msra.gmra.mxu3 %v13363_v52  ;;  %5168 = vmatpush.msra.mxu2 %v17610_v46  ;;  %v17621_v46 = vld [vmem:[#allocation709_spill] sm:$0xff] }
 0xa09   :  { %5148 = vmatpush.msrb.mxu3 %v17611_v11  ;;  %5115 = vmatpush.msrb.mxu0 %v17612_v15  ;;  %v17622_v11 = vld [vmem:[#allocation306_spill] sm:$0xff] }
 0xa0a   :  { %5169 = vmatpush.msra.mxu2 %v17613_v50  ;;  %v17623_v15 = vld [vmem:[#allocation194_spill] sm:$0xff] }
 0xa0b   :  { %5149 = vmatpush.msrb.mxu3 %v17614_v5  ;;  %5116 = vmatpush.msrb.mxu0 %v17615_v30  ;;  %v17624_v50 = vld [vmem:[#allocation702_spill] sm:$0xff]  ;;  %v17625_v5 = vld [vmem:[#allocation299_spill] sm:$0xff] }
 0xa0c   :  { %5170 = vmatpush.msra.mxu2 %v17616_v38  ;;  %v17626_v30 = vld [vmem:[#allocation187_spill] sm:$0xff] }
 0xa0d   :  { %5150 = vmatpush.msrb.mxu3 %v17617_v63  ;;  %5117 = vmatpush.msrb.mxu0 %v17618_v57  ;;  %v17627_v38 = vld [vmem:[#allocation695_spill] sm:$0xff]  ;;  %v17628_v63 = vld [vmem:[#allocation292_spill] sm:$0xff] }
 0xa0e   :  { %5171 = vmatpush.msra.mxu2 %v17619_v6  ;;  %v17629_v57 = vld [vmem:[#allocation180_spill] sm:$0xff] }
 0xa0f   :  { %5151 = vmatpush.msrb.mxu3 %v17620_v16  ;;  %5118 = vmatpush.msrb.mxu0 %v17621_v46  ;;  %v17630_v6 = vld [vmem:[#allocation688_spill] sm:$0xff]  ;;  %v17631_v16 = vld [vmem:[#allocation285_spill] sm:$0xff] }
 0xa10   :  { %5172 = vmatpush.msra.mxu2 %v17622_v11  ;;  %v17632_v46 = vld [vmem:[#allocation173_spill] sm:$0xff] }
 0xa11   :  { %5152 = vmatpush.msrb.mxu3 %v17623_v15  ;;  %5119 = vmatpush.msrb.mxu0 %v17624_v50  ;;  %v17633_v11 = vld [vmem:[#allocation681_spill] sm:$0xff]  ;;  %v17634_v15 = vld [vmem:[#allocation278_spill] sm:$0xff] }
 0xa12   :  { %5173 = vmatpush.msra.mxu2 %v17625_v5  ;;  %v17635_v50 = vld [vmem:[#allocation166_spill] sm:$0xff] }
 0xa13   :  { %5153 = vmatpush.msrb.mxu3 %v17626_v30  ;;  %5120 = vmatpush.msrb.mxu0 %v17627_v38  ;;  %v17636_v5 = vld [vmem:[#allocation674_spill] sm:$0xff]  ;;  %v3873_v30 = vpop.f32.mrf.mxu0  ;;  %v3893_v38 = vpop.f32.mrf.mxu1 }
 0xa14   :  { %5174 = vmatpush.msra.mxu2 %v17628_v63  ;;  %v17638_v63 = vld [vmem:[#allocation444_spill] sm:$0xff] }
 0xa15   :  { %5154 = vmatpush.msrb.mxu3 %v17629_v57  ;;  %5121 = vmatpush.msrb.mxu0 %v17630_v6  ;;  %v3894_v57 = vadd.f32 %v3893_v38, %v3873_v30  ;;  %v17639_v6 = vld [vmem:[#allocation159_spill] sm:$0xff]  ;;  %v17648_v38 = vld [vmem:[#allocation138_spill] sm:$0xff] }
 0xa16   :  { %5175 = vmatpush.msra.mxu2 %v17631_v16  ;;  %v17640_v16 = vld [vmem:[#allocation264_spill] sm:$0xff]  ;;  %v17647_v30 = vld [vmem:[#allocation423_spill] sm:$0xff] }
 0xa17   :  { %5155 = vmatpush.msrb.mxu3 %v17632_v46  ;;  %5122 = vmatpush.msrb.mxu0 %v17633_v11  ;;  %v17641_v46 = vld [vmem:[#allocation437_spill] sm:$0xff]  ;;  %v17642_v11 = vld [vmem:[#allocation152_spill] sm:$0xff] }
 0xa18   :  { %5176 = vmatpush.msra.mxu2 %v17634_v15  ;;  %v17643_v15 = vld [vmem:[#allocation257_spill] sm:$0xff] }
 0xa19   :  { %5156 = vmatpush.msrb.mxu3 %v17635_v50  ;;  %5123 = vmatpush.msrb.mxu0 %v17636_v5  ;;  %v17645_v5 = vld [vmem:[#allocation145_spill] sm:$0xff] }
 0xa1a   :  { %5177 = vmatpush.msra.mxu2 %v17637_v7  ;;  %v17646_v7 = vld [vmem:[#allocation250_spill] sm:$0xff] }
 0xa1b   :  { %5188 = vmatpush.msra.mxu0 %v17638_v63  ;;  %5157 = vmatpush.msrb.mxu3 %v17639_v6  ;;  %v17649_v6 = vld [vmem:[#allocation243_spill] sm:$0xff] }
 0xa1c   :  { %5178 = vmatpush.msra.mxu2 %v17640_v16 }
 0xa1d   :  { %5189 = vmatpush.msra.mxu0 %v17641_v46  ;;  %5158 = vmatpush.msrb.mxu3 %v17642_v11  ;;  %v3913_v50 = vpop.f32.mrf.mxu3  ;;  %v17650_v46 = vld [vmem:[#allocation416_spill] sm:$0xff]  ;;  %v17651_v11 = vld [vmem:[#allocation131_spill] sm:$0xff] }
 0xa1e   :  { %5179 = vmatpush.msra.mxu2 %v17643_v15  ;;  %v3914_v49 = vadd.f32 %v3913_v50, %v3894_v57  ;;  %v3953_v15 = vpop.f32.mrf.mxu0  ;;  %v17654_v57 = vld [vmem:[#allocation124_spill] sm:$0xff] }
 0xa1f   :  { %5190 = vmatpush.msra.mxu0 %v17644_v2  ;;  %5159 = vmatpush.msrb.mxu3 %v17645_v5  ;;  %v3933_v63 = vpop.f32.mrf.mxu2  ;;  %v17653_v2 = vld [vmem:[#allocation409_spill] sm:$0xff] }
 0xa20   :  { %5180 = vmatpush.msra.mxu2 %v17646_v7  ;;  %v3934_v16 = vadd.f32 %v3933_v63, %v3914_v49  ;;  %v17655_v7 = vld [vmem:[#allocation229_spill] sm:$0xff]  ;;  %v3973_v49 = vpop.f32.mrf.mxu1  ;;  %v17658_v63 = vld [vmem:[#allocation780_spill] sm:$0xff] }
 0xa21   :  { %5191 = vmatpush.msra.mxu0 %v17647_v30  ;;  %5160 = vmatpush.msrb.mxu3 %v17648_v38  ;;  %v17656_v30 = vld [vmem:[#allocation402_spill] sm:$0xff]  ;;  %v17657_v38 = vld [vmem:[#allocation117_spill] sm:$0xff] }
 0xa22   :  { %5181 = vmatpush.msra.mxu2 %v17649_v6  ;;  %v3954_v50 = vadd.f32 %v3953_v15, %v3934_v16  ;;  %v17661_v6 = vld [vmem:[#allocation773_spill] sm:$0xff] }
 0xa23   :  { %5192 = vmatpush.msra.mxu0 %v17650_v46  ;;  %5161 = vmatpush.msrb.mxu3 %v17651_v11  ;;  %v17659_v46 = vld [vmem:[#allocation668_spill] sm:$0xff]  ;;  %v17662_v15 = vld [vmem:[#allocation661_spill] sm:$0xff] }
 0xa24   :  { %5182 = vmatpush.msra.mxu2 %v17652_v34  ;;  %v3974_v34 = vadd.f32 %v3973_v49, %v3954_v50  ;;  %v17666_v5 = vld [vmem:[#allocation381_spill] sm:$0xff]  ;;  %v17668_v50 = vld [vmem:[#allocation647_spill] sm:$0xff] }
 0xa25   :  { %5193 = vmatpush.msra.mxu0 %v17653_v2  ;;  %5162 = vmatpush.msrb.mxu3 %v17654_v57  ;;  %v17660_v2 = vld [vmem:[#allocation395_spill] sm:$0xff]  ;;  %v17665_v57 = vld [vmem:[#allocation654_spill] sm:$0xff]  ;;  %v17669_v49 = vld [vmem:[#allocation797_spill] sm:$0xff] }
 0xa26   :  { %5183 = vmatpush.msra.mxu2 %v17655_v7  ;;  %v17663_v7 = vld [vmem:[#allocation388_spill] sm:$0xff] }
 0xa27   :  { %5194 = vmatpush.msra.mxu0 %v17656_v30  ;;  %5163 = vmatpush.msrb.mxu3 %v17657_v38  ;;  %v17664_v38 = vld [vmem:[#allocation766_spill] sm:$0xff] }
 0xa28   :  { %5184 = vmatmul.f32.vlgmr.msra.gmra.mxu2 %v13298_v31  ;;  %5164 = vmatmul.f32.vlgmr.msrb.gmra.mxu3 %v13295_v13 }
 0xa29   :  { %5248 = vmatpush.msrb.mxu2 %v17658_v63  ;;  %5228 = vmatpush.msra.mxu3 %v17659_v46  ;;  %v3993_v16 = vpop.f32.mrf.mxu3  ;;  %v17667_v63 = vld [vmem:[#allocation759_spill] sm:$0xff]  ;;  %v17671_v46 = vld [vmem:[#allocation752_spill] sm:$0xff] }
 0xa2a   :  { %5195 = vmatpush.msra.mxu0 %v17660_v2  ;;  %v3994_v30 = vadd.f32 %v3993_v16, %v3974_v34  ;;  %v17672_v34 = vld [vmem:[#allocation640_spill] sm:$0xff]  ;;  %v17673_v16 = vld [vmem:[#allocation367_spill] sm:$0xff] }
 0xa2b   :  { %5249 = vmatpush.msrb.mxu2 %v17661_v6  ;;  %5229 = vmatpush.msra.mxu3 %v17662_v15  ;;  %v17670_v6 = vld [vmem:[#allocation374_spill] sm:$0xff]  ;;  %v17911_v15 = vld [vmem:[#allocation627_spill] sm:$0xff] }
 0xa2c   :  { %5196 = vmatpush.msra.mxu0 %v17663_v7  ;;  %v4009_v11 = vrot.slane %v3994_v30, 5  ;;  %v17674_v7 = vld [vmem:[#allocation745_spill] sm:$0xff] }
 0xa2d   :  { %5250 = vmatpush.msrb.mxu2 %v17664_v38  ;;  %5230 = vmatpush.msra.mxu3 %v17665_v57  ;;  %v17675_v30 = vld [vmem:[#allocation633_spill] sm:$0xff]  ;;  %v17678_v38 = vld [vmem:[#allocation626_spill] sm:$0xff] }
 0xa2e   :  { %5197 = vmatpush.msra.mxu0 %v17666_v5  ;;  %v4023_v2 = vadd.f32 %v4009_v11, %v17669_v49  ;;  %v17676_v5 = vld [vmem:[#allocation360_spill] sm:$0xff]  ;;  %v17679_v11 = vld [vmem:[#allocation353_spill] sm:$0xff]  ;;  %v17680_v49 = vld [vmem:[#allocation731_spill] sm:$0xff] }
 0xa2f   :  { %5251 = vmatpush.msrb.mxu2 %v17667_v63  ;;  %5231 = vmatpush.msra.mxu3 %v17668_v50  ;;  %v17677_v63 = vld [vmem:[#allocation738_spill] sm:$0xff]  ;;  %v17900_v50 = vld [vmem:[#allocation656_spill] sm:$0xff]  ;;  %v17901_v57 = vld [vmem:[#allocation341_spill] sm:$0xff] }
 0xa30   :  { %5198 = vmatpush.msra.mxu0 %v17670_v6  ;;  %7792 = vtanh.f32 %v4023_v2  ;;  %v17681_v2 = vld [vmem:[#allocation619_spill] sm:$0xff] }
 0xa31   :  { %5252 = vmatpush.msrb.mxu2 %v17671_v46  ;;  %5232 = vmatpush.msra.mxu3 %v17672_v34  ;;  %v17682_v46 = vld [vmem:[#allocation346_spill] sm:$0xff]  ;;  %v17698_v34 = vld [vmem:[#allocation584_spill] sm:$0xff] }
 0xa32   :  { %5199 = vmatpush.msra.mxu0 %v17673_v16 }
 0xa33   :  { %5253 = vmatpush.msrb.mxu2 %v17674_v7  ;;  %5233 = vmatpush.msra.mxu3 %v17675_v30  ;;  %v17683_v7 = vld [vmem:[#allocation724_spill] sm:$0xff] }
 0xa34   :  { %5200 = vmatpush.msra.mxu0 %v17676_v5  ;;  %v17684_v30 = vld [vmem:[#allocation612_spill] sm:$0xff]  ;;  %v17685_v5 = vld [vmem:[#allocation339_spill] sm:$0xff] }
 0xa35   :  { %5254 = vmatpush.msrb.mxu2 %v17677_v63  ;;  %5234 = vmatpush.msra.mxu3 %v17678_v38  ;;  %v17686_v63 = vld [vmem:[#allocation717_spill] sm:$0xff]  ;;  %v17696_v38 = vld [vmem:[#allocation696_spill] sm:$0xff] }
 0xa36   :  { %5201 = vmatpush.msra.mxu0 %v17679_v11  ;;  %v7793_v6 = vpop.eup %7792  ;;  %v17687_v11 = vld [vmem:[#allocation605_spill] sm:$0xff] }
 0xa37   :  { %5255 = vmatpush.msrb.mxu2 %v17680_v49  ;;  %5235 = vmatpush.msra.mxu3 %v17681_v2  ;;  %4044 = vst [vmem:[#allocation1 + $0x36] sm:$0xff] %v7793_v6  ;;  %v13565_v16 = vrot.slane %v7793_v6, 3  ;;  %v17688_v49 = vld [vmem:[#allocation710_spill] sm:$0xff]  ;;  %v17691_v2 = vld [vmem:[#allocation111_spill] sm:$0xff] }
 0xa38   :  { %5202 = vmatpush.msra.mxu0 %v17682_v46  ;;  %v17689_v46 = vld [vmem:[#allocation110_spill] sm:$0xff] }
 0xa39   :  { %5256 = vmatpush.msrb.mxu2 %v17683_v7  ;;  %5236 = vmatpush.msra.mxu3 %v17684_v30  ;;  %v17690_v6 = vld [vmem:[#allocation598_spill] sm:$0xff]  ;;  %v17692_v7 = vld [vmem:[#allocation703_spill] sm:$0xff]  ;;  %v17693_v30 = vld [vmem:[#allocation104_spill] sm:$0xff] }
 0xa3a   :  { %5203 = vmatpush.msra.mxu0 %v17685_v5  ;;  %4984 = vmatmul.f32.vlgmr.msrb.gmra.mxu1 %v13565_v16  ;;  %v17694_v5 = vld [vmem:[#allocation591_spill] sm:$0xff] }
 0xa3b   :  { %5257 = vmatpush.msrb.mxu2 %v17686_v63  ;;  %5237 = vmatpush.msra.mxu3 %v17687_v11  ;;  %v17695_v63 = vld [vmem:[#allocation105_spill] sm:$0xff]  ;;  %v17697_v11 = vld [vmem:[#allocation98_spill] sm:$0xff] }
 0xa3c   :  { %5124 = vmatmul.f32.vlgmr.msrb.gmra.mxu0 %v13565_v16  ;;  %5128 = vmatpush.msrb.mxu1 %v17689_v46  ;;  %v17700_v46 = vld [vmem:[#allocation689_spill] sm:$0xff] }
 0xa3d   :  { %5258 = vmatpush.msrb.mxu2 %v17688_v49  ;;  %5238 = vmatpush.msra.mxu3 %v17690_v6  ;;  %v17699_v49 = vld [vmem:[#allocation99_spill] sm:$0xff]  ;;  %v17701_v6 = vld [vmem:[#allocation92_spill] sm:$0xff] }
 0xa3e   :  { %5268 = vmatpush.msrb.mxu0 %v17691_v2  ;;  %5129 = vmatpush.msrb.mxu1 %v17693_v30  ;;  %v17702_v2 = vld [vmem:[#allocation577_spill] sm:$0xff]  ;;  %v17703_v30 = vld [vmem:[#allocation682_spill] sm:$0xff] }
 0xa3f   :  { %5259 = vmatpush.msrb.mxu2 %v17692_v7  ;;  %5239 = vmatpush.msra.mxu3 %v17694_v5  ;;  %v17704_v7 = vld [vmem:[#allocation85_spill] sm:$0xff]  ;;  %v17717_v5 = vld [vmem:[#allocation431_spill] sm:$0xff] }
 0xa40   :  { %5269 = vmatpush.msrb.mxu0 %v17695_v63  ;;  %5130 = vmatpush.msrb.mxu1 %v17697_v11  ;;  %v17705_v63 = vld [vmem:[#allocation570_spill] sm:$0xff]  ;;  %v17706_v11 = vld [vmem:[#allocation675_spill] sm:$0xff] }
 0xa41   :  { %5260 = vmatpush.msrb.mxu2 %v17696_v38  ;;  %5240 = vmatpush.msra.mxu3 %v17698_v34  ;;  %v17707_v38 = vld [vmem:[#allocation93_spill] sm:$0xff]  ;;  %v17716_v34 = vld [vmem:[#allocation79_spill] sm:$0xff] }
 0xa42   :  { %5270 = vmatpush.msrb.mxu0 %v17699_v49  ;;  %5131 = vmatpush.msrb.mxu1 %v17701_v6  ;;  %v17708_v49 = vld [vmem:[#allocation563_spill] sm:$0xff]  ;;  %v17709_v6 = vld [vmem:[#allocation445_spill] sm:$0xff] }
 0xa43   :  { %5261 = vmatpush.msrb.mxu2 %v17700_v46  ;;  %5241 = vmatpush.msra.mxu3 %v17702_v2  ;;  %v17710_v46 = vld [vmem:[#allocation333_spill] sm:$0xff]  ;;  %v2213_v2 = vlaneseq }
 0xa44   :  { %5064 = vmatmul.f32.vlgmr.msra.gmra.mxu1 %v13368_v48  ;;  %5204 = vmatmul.f32.vlgmr.msra.gmra.mxu0 %v13368_v48 }
 0xa45   :  { %5262 = vmatpush.msrb.mxu2 %v17703_v30  ;;  %5132 = vmatpush.msrb.mxu1 %v17704_v7  ;;  %v17711_v30 = vld [vmem:[#allocation78_spill] sm:$0xff]  ;;  %vm13608_vm1 = vcmp.lt.s32.totalorder %v2213_v2, 896 }
 0xa46   :  { %5242 = vmatpush.msra.mxu3 %v17705_v63  ;;  %5271 = vmatpush.msrb.mxu0 %v17707_v38  ;;  %v17712_v7 = vld [vmem:[#allocation86_spill] sm:$0xff]  ;;  %v17715_v38 = vld [vmem:[#allocation71_spill] sm:$0xff] }
 0xa47   :  { %5263 = vmatpush.msrb.mxu2 %v17706_v11  ;;  %5133 = vmatpush.msrb.mxu1 %v17711_v30  ;;  %v17713_v63 = vld [vmem:[#allocation438_spill] sm:$0xff]  ;;  %v17714_v11 = vld [vmem:[#allocation327_spill] sm:$0xff]  ;;  %v17722_v30 = vld [vmem:[#allocation64_spill] sm:$0xff] }
 0xa48   :  { %5243 = vmatpush.msra.mxu3 %v17708_v49  ;;  %5264 = vmatmul.f32.vlgmr.msrb.gmra.mxu2 %v13565_v16  ;;  %v4046_v49 = vld [vmem:[#allocation1 + $0x3] ss:$9 sm:$0xff] }
 0xa49   :  { %5244 = vmatmul.f32.vlgmr.msra.gmra.mxu3 %v13459_v21  ;;  %5328 = vmatpush.msra.mxu2 %v17709_v6  ;;  %v17718_v6 = vmov 0  ;;  %7730 = vst.msk [vmem:[%s15005_s7 + $0x1] ss:$4 sm:$0x7f] %vm13608_vm1, %v4046_v49  ;;  %v17726_v2 = vld [vmem:[#allocation314_spill] sm:$0xff]  ;;  %v17736_v49 = vld [vmem:[#allocation51_spill] sm:$0xff] }
 0xa4a   :  { %5308 = vmatpush.msrb.mxu3 %v17710_v46  ;;  %5272 = vmatpush.msrb.mxu0 %v17712_v7  ;;  %v17719_v6 = vsel %vm13608_vm1, 4294967295, %v17718_v6  ;;  %v17721_v46 = vld [vmem:[#allocation321_spill] sm:$0xff]  ;;  %v17723_v7 = vld [vmem:[#allocation90_spill] sm:$0xff] }
 0xa4b   :  { %5329 = vmatpush.msra.mxu2 %v17713_v63  ;;  %5134 = vmatpush.msrb.mxu1 %v17715_v38  ;;  %17720 = vst [vmem:[#allocation304_spill] sm:$0xff] %v17719_v6  ;;  %v17724_v38 = vld [vmem:[#allocation72_spill] sm:$0xff]  ;;  %v17729_v63 = vld [vmem:[#allocation417_spill] sm:$0xff] }
 0xa4c   :  { %5309 = vmatpush.msrb.mxu3 %v17714_v11  ;;  %5273 = vmatpush.msrb.mxu0 %v17716_v34  ;;  %2217 = vst.msk [vmem:[%s15005_s7] ss:$4 sm:$0x7f] %vm13608_vm1, %v17723_v7  ;;  %v17725_v34 = vld [vmem:[#allocation424_spill] sm:$0xff]  ;;  %v17731_v7 = vld [vmem:[#allocation50_spill] sm:$0xff]  ;;  %v17735_v11 = vld [vmem:[#allocation43_spill] sm:$0xff] }
 0xa4d   :  { %5330 = vmatpush.msra.mxu2 %v17717_v5  ;;  %5135 = vmatpush.msrb.mxu1 %v17722_v30  ;;  %v17727_v30 = vld [vmem:[#allocation57_spill] sm:$0xff]  ;;  %v17734_v6 = vld [vmem:[#allocation300_spill] sm:$0xff] }
 0xa4e   :  { %5310 = vmatpush.msrb.mxu3 %v17721_v46  ;;  %5274 = vmatpush.msrb.mxu0 %v17724_v38  ;;  %v17728_v5 = vld [vmem:[#allocation65_spill] sm:$0xff]  ;;  %v17730_v46 = vld [vmem:[#allocation307_spill] sm:$0xff]  ;;  %v17732_v38 = vld [vmem:[#allocation58_spill] sm:$0xff] }
 0xa4f   :  { %5331 = vmatpush.msra.mxu2 %v17725_v34  ;;  %5136 = vmatpush.msrb.mxu1 %v17727_v30  ;;  %v17733_v34 = vld [vmem:[#allocation410_spill] sm:$0xff]  ;;  %v17738_v30 = vld [vmem:[#allocation293_spill] sm:$0xff] }
 0xa50   :  { %5311 = vmatpush.msrb.mxu3 %v17726_v2  ;;  %5275 = vmatpush.msrb.mxu0 %v17728_v5  ;;  %v17737_v2 = vld [vmem:[#allocation403_spill] sm:$0xff]  ;;  %v17739_v5 = vld [vmem:[#allocation36_spill] sm:$0xff] }
 0xa51   :  { %5332 = vmatpush.msra.mxu2 %v17729_v63  ;;  %5137 = vmatpush.msrb.mxu1 %v17731_v7  ;;  %v17740_v63 = vld [vmem:[#allocation44_spill] sm:$0xff]  ;;  %v17742_v7 = vld [vmem:[#allocation286_spill] sm:$0xff] }
 0xa52   :  { %5312 = vmatpush.msrb.mxu3 %v17730_v46  ;;  %5276 = vmatpush.msrb.mxu0 %v17732_v38  ;;  %v17741_v46 = vld [vmem:[#allocation396_spill] sm:$0xff]  ;;  %v17743_v38 = vld [vmem:[#allocation29_spill] sm:$0xff] }
 0xa53   :  { %5333 = vmatpush.msra.mxu2 %v17733_v34  ;;  %5138 = vmatpush.msrb.mxu1 %v17735_v11  ;;  %v17744_v34 = vld [vmem:[#allocation37_spill] sm:$0xff]  ;;  %v17746_v11 = vld [vmem:[#allocation279_spill] sm:$0xff] }
 0xa54   :  { %5313 = vmatpush.msrb.mxu3 %v17734_v6  ;;  %5277 = vmatpush.msrb.mxu0 %v17736_v49  ;;  %v17745_v6 = vld [vmem:[#allocation389_spill] sm:$0xff]  ;;  %v17747_v49 = vld [vmem:[#allocation22_spill] sm:$0xff] }
 0xa55   :  { %5334 = vmatpush.msra.mxu2 %v17737_v2  ;;  %5139 = vmatpush.msrb.mxu1 %v17739_v5  ;;  %v17748_v2 = vld [vmem:[#allocation30_spill] sm:$0xff]  ;;  %v17750_v5 = vld [vmem:[#allocation272_spill] sm:$0xff] }
 0xa56   :  { %5314 = vmatpush.msrb.mxu3 %v17738_v30  ;;  %5278 = vmatpush.msrb.mxu0 %v17740_v63  ;;  %v17749_v30 = vld [vmem:[#allocation382_spill] sm:$0xff]  ;;  %v17751_v63 = vld [vmem:[#allocation15_spill] sm:$0xff] }
 0xa57   :  { %5335 = vmatpush.msra.mxu2 %v17741_v46  ;;  %5140 = vmatpush.msrb.mxu1 %v17743_v38  ;;  %v17752_v46 = vld [vmem:[#allocation23_spill] sm:$0xff]  ;;  %v17754_v38 = vld [vmem:[#allocation265_spill] sm:$0xff] }
 0xa58   :  { %5315 = vmatpush.msrb.mxu3 %v17742_v7  ;;  %5279 = vmatpush.msrb.mxu0 %v17744_v34  ;;  %v17753_v7 = vld [vmem:[#allocation375_spill] sm:$0xff]  ;;  %v17755_v34 = vld [vmem:[#allocation8_spill] sm:$0xff] }
 0xa59   :  { %5336 = vmatpush.msra.mxu2 %v17745_v6  ;;  %5141 = vmatpush.msrb.mxu1 %v17747_v49  ;;  %v17756_v6 = vld [vmem:[#allocation16_spill] sm:$0xff]  ;;  %v17758_v49 = vld [vmem:[#allocation258_spill] sm:$0xff] }
 0xa5a   :  { %5316 = vmatpush.msrb.mxu3 %v17746_v11  ;;  %5280 = vmatpush.msrb.mxu0 %v17748_v2  ;;  %v17757_v11 = vld [vmem:[#allocation368_spill] sm:$0xff] }
 0xa5b   :  { %5337 = vmatpush.msra.mxu2 %v17749_v30  ;;  %5142 = vmatpush.msrb.mxu1 %v17751_v63  ;;  %v17759_v2 = vld [vmem:[#allocation556_spill] sm:$0xff]  ;;  %v17760_v30 = vld [vmem:[#allocation9_spill] sm:$0xff]  ;;  %v17761_v63 = vld [vmem:[#allocation251_spill] sm:$0xff] }
 0xa5c   :  { %5317 = vmatpush.msrb.mxu3 %v17750_v5  ;;  %5281 = vmatpush.msrb.mxu0 %v17752_v46  ;;  %v17762_v46 = vld [vmem:[#allocation361_spill] sm:$0xff]  ;;  %v17774_v5 = vld [vmem:[#allocation340_spill] sm:$0xff] }
 0xa5d   :  { %5338 = vmatpush.msra.mxu2 %v17753_v7  ;;  %5143 = vmatpush.msrb.mxu1 %v17755_v34  ;;  %v17763_v7 = vld [vmem:[#allocation549_spill] sm:$0xff] }
 0xa5e   :  { %5318 = vmatpush.msrb.mxu3 %v17754_v38  ;;  %5282 = vmatpush.msrb.mxu0 %v17756_v6  ;;  %v17764_v34 = vld [vmem:[#allocation557_spill] sm:$0xff]  ;;  %v17765_v6 = vld [vmem:[#allocation244_spill] sm:$0xff]  ;;  %v17768_v38 = vld [vmem:[#allocation550_spill] sm:$0xff] }
 0xa5f   :  { %5339 = vmatpush.msra.mxu2 %v17757_v11  ;;  %5144 = vmatmul.f32.vlgmr.msrb.gmra.mxu1 %v13290_v41  ;;  %v17766_v11 = vld [vmem:[#allocation354_spill] sm:$0xff] }
 0xa60   :  { %5319 = vmatpush.msrb.mxu3 %v17758_v49  ;;  %5208 = vmatpush.msra.mxu1 %v17759_v2  ;;  %v17767_v49 = vld [vmem:[#allocation542_spill] sm:$0xff]  ;;  %v17769_v2 = vld [vmem:[#allocation237_spill] sm:$0xff] }
 0xa61   :  { %5283 = vmatpush.msrb.mxu0 %v17760_v30  ;;  %5340 = vmatpush.msra.mxu2 %v17762_v46  ;;  %v17770_v30 = vld [vmem:[#allocation347_spill] sm:$0xff] }
 0xa62   :  { %5320 = vmatpush.msrb.mxu3 %v17761_v63  ;;  %5209 = vmatpush.msra.mxu1 %v17763_v7  ;;  %v17771_v63 = vld [vmem:[#allocation535_spill] sm:$0xff]  ;;  %v17773_v7 = vld [vmem:[#allocation230_spill] sm:$0xff] }
 0xa63   :  { %5284 = vmatmul.f32.vlgmr.msrb.gmra.mxu0 %v13290_v41  ;;  %5341 = vmatpush.msra.mxu2 %v17766_v11  ;;  %v17772_v46 = vld [vmem:[#allocation543_spill] sm:$0xff]  ;;  %v17778_v11 = vld [vmem:[#allocation112_spill] sm:$0xff] }
 0xa64   :  { %5348 = vmatpush.msra.mxu0 %v17764_v34  ;;  %5321 = vmatpush.msrb.mxu3 %v17765_v6  ;;  %v17775_v34 = vld [vmem:[#allocation528_spill] sm:$0xff] }
 0xa65   :  { %5210 = vmatpush.msra.mxu1 %v17767_v49  ;;  %5342 = vmatpush.msra.mxu2 %v17770_v30  ;;  %v17776_v49 = vld [vmem:[#allocation536_spill] sm:$0xff]  ;;  %v17779_v30 = vld [vmem:[#allocation521_spill] sm:$0xff] }
 0xa66   :  { %5349 = vmatpush.msra.mxu0 %v17768_v38  ;;  %5322 = vmatpush.msrb.mxu3 %v17769_v2  ;;  %v17777_v38 = vld [vmem:[#allocation781_spill] sm:$0xff]  ;;  %v17785_v2 = vld [vmem:[#allocation767_spill] sm:$0xff]  ;;  %v17786_v6 = vld [vmem:[#allocation100_spill] sm:$0xff] }
 0xa67   :  { %5211 = vmatpush.msra.mxu1 %v17771_v63  ;;  %5343 = vmatpush.msra.mxu2 %v17774_v5  ;;  %v17780_v63 = vld [vmem:[#allocation529_spill] sm:$0xff]  ;;  %v17783_v5 = vld [vmem:[#allocation514_spill] sm:$0xff] }
 0xa68   :  { %5350 = vmatpush.msra.mxu0 %v17772_v46  ;;  %5323 = vmatpush.msrb.mxu3 %v17773_v7  ;;  %v17781_v46 = vld [vmem:[#allocation774_spill] sm:$0xff] }
 0xa69   :  { %5212 = vmatpush.msra.mxu1 %v17775_v34  ;;  %5324 = vmatmul.f32.vlgmr.msrb.gmra.mxu3 %v13298_v31  ;;  %v17782_v7 = vld [vmem:[#allocation106_spill] sm:$0xff] }
 0xa6a   :  { %5344 = vmatmul.f32.vlgmr.msra.gmra.mxu2 %v13368_v48  ;;  %5351 = vmatpush.msra.mxu0 %v17776_v49  ;;  %v17784_v34 = vld [vmem:[#allocation522_spill] sm:$0xff]  ;;  %v17787_v49 = vld [vmem:[#allocation507_spill] sm:$0xff] }
 0xa6b   :  { %5388 = vmatpush.msra.mxu3 %v17777_v38  ;;  %5408 = vmatpush.msrb.mxu2 %v17778_v11  ;;  %v17788_v38 = vld [vmem:[#allocation515_spill] sm:$0xff]  ;;  %v17789_v11 = vld [vmem:[#allocation760_spill] sm:$0xff] }
 0xa6c   :  { %5213 = vmatpush.msra.mxu1 %v17779_v30  ;;  %5352 = vmatpush.msra.mxu0 %v17780_v63  ;;  %v17790_v30 = vld [vmem:[#allocation94_spill] sm:$0xff]  ;;  %v17791_v63 = vld [vmem:[#allocation500_spill] sm:$0xff] }
 0xa6d   :  { %5389 = vmatpush.msra.mxu3 %v17781_v46  ;;  %5409 = vmatpush.msrb.mxu2 %v17782_v7  ;;  %v17792_v46 = vld [vmem:[#allocation508_spill] sm:$0xff]  ;;  %v17793_v7 = vld [vmem:[#allocation753_spill] sm:$0xff] }
 0xa6e   :  { %5214 = vmatpush.msra.mxu1 %v17783_v5  ;;  %5353 = vmatpush.msra.mxu0 %v17784_v34  ;;  %v17794_v5 = vld [vmem:[#allocation87_spill] sm:$0xff]  ;;  %v17795_v34 = vld [vmem:[#allocation493_spill] sm:$0xff] }
 0xa6f   :  { %5390 = vmatpush.msra.mxu3 %v17785_v2  ;;  %5410 = vmatpush.msrb.mxu2 %v17786_v6  ;;  %v17796_v2 = vld [vmem:[#allocation501_spill] sm:$0xff]  ;;  %v17797_v6 = vld [vmem:[#allocation746_spill] sm:$0xff] }
 0xa70   :  { %5215 = vmatpush.msra.mxu1 %v17787_v49  ;;  %5354 = vmatpush.msra.mxu0 %v17788_v38  ;;  %v17798_v49 = vld [vmem:[#allocation80_spill] sm:$0xff]  ;;  %v17799_v38 = vld [vmem:[#allocation486_spill] sm:$0xff] }
 0xa71   :  { %5391 = vmatpush.msra.mxu3 %v17789_v11  ;;  %5411 = vmatpush.msrb.mxu2 %v17790_v30  ;;  %v17800_v11 = vld [vmem:[#allocation494_spill] sm:$0xff]  ;;  %v17801_v30 = vld [vmem:[#allocation739_spill] sm:$0xff] }
 0xa72   :  { %5216 = vmatpush.msra.mxu1 %v17791_v63  ;;  %5355 = vmatpush.msra.mxu0 %v17792_v46  ;;  %v17802_v63 = vld [vmem:[#allocation73_spill] sm:$0xff]  ;;  %v17803_v46 = vld [vmem:[#allocation479_spill] sm:$0xff] }
 0xa73   :  { %5392 = vmatpush.msra.mxu3 %v17793_v7  ;;  %5412 = vmatpush.msrb.mxu2 %v17794_v5  ;;  %v17804_v7 = vld [vmem:[#allocation487_spill] sm:$0xff]  ;;  %v17805_v5 = vld [vmem:[#allocation732_spill] sm:$0xff] }
 0xa74   :  { %5217 = vmatpush.msra.mxu1 %v17795_v34  ;;  %5356 = vmatpush.msra.mxu0 %v17796_v2  ;;  %v17806_v34 = vld [vmem:[#allocation66_spill] sm:$0xff]  ;;  %v17807_v2 = vld [vmem:[#allocation472_spill] sm:$0xff] }
 0xa75   :  { %5393 = vmatpush.msra.mxu3 %v17797_v6  ;;  %5413 = vmatpush.msrb.mxu2 %v17798_v49  ;;  %v17808_v6 = vld [vmem:[#allocation480_spill] sm:$0xff]  ;;  %v17809_v49 = vld [vmem:[#allocation725_spill] sm:$0xff] }
 0xa76   :  { %5218 = vmatpush.msra.mxu1 %v17799_v38  ;;  %5357 = vmatpush.msra.mxu0 %v17800_v11  ;;  %v17810_v38 = vld [vmem:[#allocation59_spill] sm:$0xff]  ;;  %v17811_v11 = vld [vmem:[#allocation465_spill] sm:$0xff] }
 0xa77   :  { %5394 = vmatpush.msra.mxu3 %v17801_v30  ;;  %5414 = vmatpush.msrb.mxu2 %v17802_v63  ;;  %v17812_v30 = vld [vmem:[#allocation473_spill] sm:$0xff]  ;;  %v17813_v63 = vld [vmem:[#allocation718_spill] sm:$0xff] }
 0xa78   :  { %5219 = vmatpush.msra.mxu1 %v17803_v46  ;;  %5358 = vmatpush.msra.mxu0 %v17804_v7  ;;  %v17814_v46 = vld [vmem:[#allocation52_spill] sm:$0xff]  ;;  %v17815_v7 = vld [vmem:[#allocation458_spill] sm:$0xff] }
 0xa79   :  { %5395 = vmatpush.msra.mxu3 %v17805_v5  ;;  %5415 = vmatpush.msrb.mxu2 %v17806_v34  ;;  %v17816_v5 = vld [vmem:[#allocation466_spill] sm:$0xff]  ;;  %v17817_v34 = vld [vmem:[#allocation711_spill] sm:$0xff] }
 0xa7a   :  { %5220 = vmatpush.msra.mxu1 %v17807_v2  ;;  %5359 = vmatpush.msra.mxu0 %v17808_v6  ;;  %v17818_v2 = vld [vmem:[#allocation45_spill] sm:$0xff]  ;;  %v17819_v6 = vld [vmem:[#allocation451_spill] sm:$0xff] }
 0xa7b   :  { %5396 = vmatpush.msra.mxu3 %v17809_v49  ;;  %5416 = vmatpush.msrb.mxu2 %v17810_v38  ;;  %v17820_v49 = vld [vmem:[#allocation459_spill] sm:$0xff]  ;;  %v17821_v38 = vld [vmem:[#allocation704_spill] sm:$0xff] }
 0xa7c   :  { %5221 = vmatpush.msra.mxu1 %v17811_v11  ;;  %5360 = vmatpush.msra.mxu0 %v17812_v30  ;;  %v17822_v11 = vld [vmem:[#allocation38_spill] sm:$0xff]  ;;  %v17823_v30 = vld [vmem:[#allocation223_spill] sm:$0xff] }
 0xa7d   :  { %5397 = vmatpush.msra.mxu3 %v17813_v63  ;;  %5417 = vmatpush.msrb.mxu2 %v17814_v46  ;;  %v17824_v46 = vld [vmem:[#allocation452_spill] sm:$0xff]  ;;  %v17838_v63 = vld [vmem:[#allocation10_spill] sm:$0xff] }
 0xa7e   :  { %5222 = vmatpush.msra.mxu1 %v17815_v7  ;;  %5361 = vmatpush.msra.mxu0 %v17816_v5  ;;  %v17825_v7 = vld [vmem:[#allocation697_spill] sm:$0xff]  ;;  %v17826_v5 = vld [vmem:[#allocation31_spill] sm:$0xff] }
 0xa7f   :  { %5398 = vmatpush.msra.mxu3 %v17817_v34  ;;  %5418 = vmatpush.msrb.mxu2 %v17818_v2  ;;  %v17827_v34 = vld [vmem:[#allocation216_spill] sm:$0xff] }
 0xa80   :  { %5223 = vmatpush.msra.mxu1 %v17819_v6  ;;  %5362 = vmatpush.msra.mxu0 %v17820_v49  ;;  %v17828_v6 = vld [vmem:[#allocation224_spill] sm:$0xff]  ;;  %v17829_v49 = vld [vmem:[#allocation690_spill] sm:$0xff] }
 0xa81   :  { %5399 = vmatpush.msra.mxu3 %v17821_v38  ;;  %5419 = vmatpush.msrb.mxu2 %v17822_v11  ;;  %v17830_v2 = vld [vmem:[#allocation24_spill] sm:$0xff]  ;;  %v17831_v11 = vld [vmem:[#allocation209_spill] sm:$0xff] }
 0xa82   :  { %5224 = vmatmul.f32.vlgmr.msra.gmra.mxu1 %v13363_v52  ;;  %5363 = vmatpush.msra.mxu0 %v17824_v46  ;;  %v17832_v38 = vld [vmem:[#allocation217_spill] sm:$0xff] }
 0xa83   :  { %5288 = vmatpush.msrb.mxu1 %v17823_v30  ;;  %5400 = vmatpush.msra.mxu3 %v17825_v7  ;;  %v17833_v30 = vld [vmem:[#allocation683_spill] sm:$0xff]  ;;  %v17834_v46 = vld [vmem:[#allocation17_spill] sm:$0xff]  ;;  %v17835_v7 = vld [vmem:[#allocation202_spill] sm:$0xff] }
 0xa84   :  { %5420 = vmatpush.msrb.mxu2 %v17826_v5  ;;  %5364 = vmatmul.f32.vlgmr.msra.gmra.mxu0 %v13363_v52  ;;  %v17836_v5 = vld [vmem:[#allocation210_spill] sm:$0xff] }
 0xa85   :  { %5289 = vmatpush.msrb.mxu1 %v17827_v34  ;;  %5428 = vmatpush.msrb.mxu0 %v17828_v6  ;;  %v17837_v34 = vld [vmem:[#allocation676_spill] sm:$0xff]  ;;  %v17839_v6 = vld [vmem:[#allocation195_spill] sm:$0xff] }
 0xa86   :  { %5401 = vmatpush.msra.mxu3 %v17829_v49  ;;  %5421 = vmatpush.msrb.mxu2 %v17830_v2  ;;  %v17842_v2 = vld [vmem:[#allocation558_spill] sm:$0xff]  ;;  %v17850_v49 = vld [vmem:[#allocation544_spill] sm:$0xff] }
 0xa87   :  { %5290 = vmatpush.msrb.mxu1 %v17831_v11  ;;  %5429 = vmatpush.msrb.mxu0 %v17832_v38  ;;  %v17840_v11 = vld [vmem:[#allocation203_spill] sm:$0xff]  ;;  %v17841_v38 = vld [vmem:[#allocation446_spill] sm:$0xff] }
 0xa88   :  { %5402 = vmatpush.msra.mxu3 %v17833_v30  ;;  %5422 = vmatpush.msrb.mxu2 %v17834_v46  ;;  %v17843_v46 = vld [vmem:[#allocation188_spill] sm:$0xff] }
 0xa89   :  { %5291 = vmatpush.msrb.mxu1 %v17835_v7  ;;  %5430 = vmatpush.msrb.mxu0 %v17836_v5  ;;  %v17844_v7 = vld [vmem:[#allocation196_spill] sm:$0xff]  ;;  %v17845_v5 = vld [vmem:[#allocation439_spill] sm:$0xff] }
 0xa8a   :  { %5403 = vmatpush.msra.mxu3 %v17837_v34  ;;  %5423 = vmatpush.msrb.mxu2 %v17838_v63  ;;  %v17846_v34 = vld [vmem:[#allocation551_spill] sm:$0xff]  ;;  %v17847_v63 = vld [vmem:[#allocation181_spill] sm:$0xff]  ;;  %v17849_v30 = vld [vmem:[#allocation432_spill] sm:$0xff] }
 0xa8b   :  { %5292 = vmatpush.msrb.mxu1 %v17839_v6  ;;  %5404 = vmatmul.f32.vlgmr.msra.gmra.mxu3 %v13565_v16  ;;  %v17848_v6 = vld [vmem:[#allocation189_spill] sm:$0xff] }
 0xa8c   :  { %5424 = vmatmul.f32.vlgmr.msrb.gmra.mxu2 %v13290_v41  ;;  %5431 = vmatpush.msrb.mxu0 %v17840_v11  ;;  %v17851_v11 = vld [vmem:[#allocation174_spill] sm:$0xff] }
 0xa8d   :  { %5468 = vmatpush.msrb.mxu3 %v17841_v38  ;;  %5488 = vmatpush.msra.mxu2 %v17842_v2  ;;  %v17852_v38 = vld [vmem:[#allocation182_spill] sm:$0xff]  ;;  %v17853_v2 = vld [vmem:[#allocation425_spill] sm:$0xff] }
 0xa8e   :  { %5293 = vmatpush.msrb.mxu1 %v17843_v46  ;;  %5432 = vmatpush.msrb.mxu0 %v17844_v7  ;;  %v17854_v46 = vld [vmem:[#allocation537_spill] sm:$0xff]  ;;  %v17855_v7 = vld [vmem:[#allocation167_spill] sm:$0xff] }
 0xa8f   :  { %5469 = vmatpush.msrb.mxu3 %v17845_v5  ;;  %5489 = vmatpush.msra.mxu2 %v17846_v34  ;;  %v17856_v5 = vld [vmem:[#allocation175_spill] sm:$0xff]  ;;  %v17857_v34 = vld [vmem:[#allocation418_spill] sm:$0xff] }
 0xa90   :  { %5294 = vmatpush.msrb.mxu1 %v17847_v63  ;;  %5433 = vmatpush.msrb.mxu0 %v17848_v6  ;;  %v17858_v63 = vld [vmem:[#allocation530_spill] sm:$0xff]  ;;  %v17859_v6 = vld [vmem:[#allocation160_spill] sm:$0xff] }
 0xa91   :  { %5470 = vmatpush.msrb.mxu3 %v17849_v30  ;;  %5490 = vmatpush.msra.mxu2 %v17850_v49  ;;  %v17860_v30 = vld [vmem:[#allocation168_spill] sm:$0xff]  ;;  %v17861_v49 = vld [vmem:[#allocation411_spill] sm:$0xff] }
 0xa92   :  { %5295 = vmatpush.msrb.mxu1 %v17851_v11  ;;  %5434 = vmatpush.msrb.mxu0 %v17852_v38  ;;  %v17862_v11 = vld [vmem:[#allocation523_spill] sm:$0xff]  ;;  %v17863_v38 = vld [vmem:[#allocation153_spill] sm:$0xff] }
 0xa93   :  { %5471 = vmatpush.msrb.mxu3 %v17853_v2  ;;  %5491 = vmatpush.msra.mxu2 %v17854_v46  ;;  %v17864_v2 = vld [vmem:[#allocation161_spill] sm:$0xff]  ;;  %v17865_v46 = vld [vmem:[#allocation404_spill] sm:$0xff] }
 0xa94   :  { %5296 = vmatpush.msrb.mxu1 %v17855_v7  ;;  %5435 = vmatpush.msrb.mxu0 %v17856_v5  ;;  %v17866_v7 = vld [vmem:[#allocation516_spill] sm:$0xff]  ;;  %v17867_v5 = vld [vmem:[#allocation146_spill] sm:$0xff] }
 0xa95   :  { %5472 = vmatpush.msrb.mxu3 %v17857_v34  ;;  %5492 = vmatpush.msra.mxu2 %v17858_v63  ;;  %v17868_v34 = vld [vmem:[#allocation154_spill] sm:$0xff]  ;;  %v17869_v63 = vld [vmem:[#allocation397_spill] sm:$0xff] }
 0xa96   :  { %5297 = vmatpush.msrb.mxu1 %v17859_v6  ;;  %5436 = vmatpush.msrb.mxu0 %v17860_v30  ;;  %v17870_v6 = vld [vmem:[#allocation509_spill] sm:$0xff]  ;;  %v17871_v30 = vld [vmem:[#allocation139_spill] sm:$0xff] }
 0xa97   :  { %5473 = vmatpush.msrb.mxu3 %v17861_v49  ;;  %5493 = vmatpush.msra.mxu2 %v17862_v11  ;;  %v17872_v49 = vld [vmem:[#allocation147_spill] sm:$0xff]  ;;  %v17873_v11 = vld [vmem:[#allocation390_spill] sm:$0xff] }
 0xa98   :  { %5298 = vmatpush.msrb.mxu1 %v17863_v38  ;;  %5437 = vmatpush.msrb.mxu0 %v17864_v2  ;;  %v17874_v38 = vld [vmem:[#allocation502_spill] sm:$0xff]  ;;  %v17875_v2 = vld [vmem:[#allocation132_spill] sm:$0xff] }
 0xa99   :  { %5474 = vmatpush.msrb.mxu3 %v17865_v46  ;;  %5494 = vmatpush.msra.mxu2 %v17866_v7  ;;  %v17876_v46 = vld [vmem:[#allocation140_spill] sm:$0xff]  ;;  %v17877_v7 = vld [vmem:[#allocation383_spill] sm:$0xff] }
 0xa9a   :  { %5299 = vmatpush.msrb.mxu1 %v17867_v5  ;;  %5438 = vmatpush.msrb.mxu0 %v17868_v34  ;;  %v17878_v5 = vld [vmem:[#allocation495_spill] sm:$0xff]  ;;  %v17879_v34 = vld [vmem:[#allocation125_spill] sm:$0xff] }
 0xa9b   :  { %5475 = vmatpush.msrb.mxu3 %v17869_v63  ;;  %5495 = vmatpush.msra.mxu2 %v17870_v6  ;;  %v17880_v63 = vld [vmem:[#allocation133_spill] sm:$0xff]  ;;  %v17881_v6 = vld [vmem:[#allocation376_spill] sm:$0xff] }
 0xa9c   :  { %5300 = vmatpush.msrb.mxu1 %v17871_v30  ;;  %5439 = vmatpush.msrb.mxu0 %v17872_v49  ;;  %v17882_v30 = vld [vmem:[#allocation488_spill] sm:$0xff]  ;;  %v17883_v49 = vld [vmem:[#allocation118_spill] sm:$0xff] }
 0xa9d   :  { %5476 = vmatpush.msrb.mxu3 %v17873_v11  ;;  %5496 = vmatpush.msra.mxu2 %v17874_v38  ;;  %v17884_v11 = vld [vmem:[#allocation126_spill] sm:$0xff]  ;;  %v17885_v38 = vld [vmem:[#allocation369_spill] sm:$0xff] }
 0xa9e   :  { %5301 = vmatpush.msrb.mxu1 %v17875_v2  ;;  %5440 = vmatpush.msrb.mxu0 %v17876_v46  ;;  %v17886_v2 = vld [vmem:[#allocation481_spill] sm:$0xff] }
 0xa9f   :  { %5477 = vmatpush.msrb.mxu3 %v17877_v7  ;;  %5497 = vmatpush.msra.mxu2 %v17878_v5  ;;  %v17887_v46 = vld [vmem:[#allocation669_spill] sm:$0xff]  ;;  %v17888_v5 = vld [vmem:[#allocation119_spill] sm:$0xff] }
 0xaa0   :  { %5302 = vmatpush.msrb.mxu1 %v17879_v34  ;;  %5441 = vmatpush.msrb.mxu0 %v17880_v63  ;;  %v17889_v34 = vld [vmem:[#allocation362_spill] sm:$0xff]  ;;  %v17896_v7 = vld [vmem:[#allocation663_spill] sm:$0xff] }
 0xaa1   :  { %5478 = vmatpush.msrb.mxu3 %v17881_v6  ;;  %5498 = vmatpush.msra.mxu2 %v17882_v30  ;;  %v17890_v63 = vld [vmem:[#allocation474_spill] sm:$0xff]  ;;  %v17893_v30 = vld [vmem:[#allocation355_spill] sm:$0xff] }
 0xaa2   :  { %5303 = vmatpush.msrb.mxu1 %v17883_v49  ;;  %5442 = vmatpush.msrb.mxu0 %v17884_v11  ;;  %v17891_v6 = vld [vmem:[#allocation662_spill] sm:$0xff]  ;;  %v4865_v49 = vpop.f32.mrf.mxu2 }
 0xaa3   :  { %5479 = vmatpush.msrb.mxu3 %v17885_v38  ;;  %5499 = vmatpush.msra.mxu2 %v17886_v2  ;;  %v17892_v11 = vld [vmem:[#allocation670_spill] sm:$0xff]  ;;  %v17894_v2 = vld [vmem:[#allocation467_spill] sm:$0xff] }
 0xaa4   :  { %5304 = vmatmul.f32.vlgmr.msrb.gmra.mxu1 %v13295_v13  ;;  %5443 = vmatpush.msrb.mxu0 %v17888_v5  ;;  %v17895_v38 = vld [vmem:[#allocation655_spill] sm:$0xff]  ;;  %v17897_v5 = vld [vmem:[#allocation348_spill] sm:$0xff] }
 0xaa5   :  { %5368 = vmatpush.msra.mxu1 %v17887_v46  ;;  %5480 = vmatpush.msrb.mxu3 %v17889_v34  ;;  %v4885_v46 = vpop.f32.mrf.mxu0 }
 0xaa6   :  { %5500 = vmatpush.msra.mxu2 %v17890_v63  ;;  %5444 = vmatmul.f32.vlgmr.msrb.gmra.mxu0 %v13295_v13  ;;  %v4886_v34 = vadd.f32 %v4885_v46, %v4865_v49  ;;  %v17898_v63 = vld [vmem:[#allocation460_spill] sm:$0xff]  ;;  %v17904_v46 = vld [vmem:[#allocation649_spill] sm:$0xff] }
 0xaa7   :  { %5369 = vmatpush.msra.mxu1 %v17891_v6  ;;  %5508 = vmatpush.msra.mxu0 %v17892_v11  ;;  %v17899_v6 = vld [vmem:[#allocation648_spill] sm:$0xff]  ;;  %v17902_v11 = vld [vmem:[#allocation453_spill] sm:$0xff] }
 0xaa8   :  { %5481 = vmatpush.msrb.mxu3 %v17893_v30  ;;  %5501 = vmatpush.msra.mxu2 %v17894_v2  ;;  %v17903_v30 = vld [vmem:[#allocation641_spill] sm:$0xff]  ;;  %v4905_v2 = vpop.f32.mrf.mxu1 }
 0xaa9   :  { %5370 = vmatpush.msra.mxu1 %v17895_v38  ;;  %5509 = vmatpush.msra.mxu0 %v17896_v7  ;;  %v4925_v38 = vpop.f32.mrf.mxu3  ;;  %v4906_v7 = vadd.f32 %v4905_v2, %v4886_v34  ;;  %v17905_v49 = vld [vmem:[#allocation113_spill] sm:$0xff]  ;;  %v17912_v34 = vld [vmem:[#allocation635_spill] sm:$0xff] }
 0xaaa   :  { %5482 = vmatpush.msrb.mxu3 %v17897_v5  ;;  %5502 = vmatpush.msra.mxu2 %v17898_v63  ;;  %v17910_v5 = vld [vmem:[#allocation218_spill] sm:$0xff]  ;;  %v17913_v2 = vld [vmem:[#allocation101_spill] sm:$0xff] }
 0xaab   :  { %5371 = vmatpush.msra.mxu1 %v17899_v6  ;;  %5510 = vmatpush.msra.mxu0 %v17900_v50  ;;  %v17906_v6 = vld [vmem:[#allocation225_spill] sm:$0xff]  ;;  %v17907_v50 = vld [vmem:[#allocation634_spill] sm:$0xff]  ;;  %v4926_v63 = vadd.f32 %v4925_v38, %v4906_v7  ;;  %v17916_v38 = vld [vmem:[#allocation628_spill] sm:$0xff] }
 0xaac   :  { %5483 = vmatpush.msrb.mxu3 %v17901_v57  ;;  %5503 = vmatpush.msra.mxu2 %v17902_v11  ;;  %v17908_v57 = vld [vmem:[#allocation642_spill] sm:$0xff]  ;;  %v17909_v11 = vld [vmem:[#allocation107_spill] sm:$0xff] }
 0xaad   :  { %5372 = vmatpush.msra.mxu1 %v17903_v30  ;;  %5484 = vmatmul.f32.vlgmr.msrb.gmra.mxu3 %v13368_v48  ;;  %v4945_v30 = vpop.f32.mrf.mxu2  ;;  %v4965_v4 = vpop.f32.mrf.mxu0  ;;  %v17917_v7 = vld [vmem:[#allocation95_spill] sm:$0xff] }
 0xaae   :  { %5504 = vmatmul.f32.vlgmr.msra.gmra.mxu2 %v13363_v52  ;;  %5511 = vmatpush.msra.mxu0 %v17904_v46  ;;  %v17914_v46 = vld [vmem:[#allocation211_spill] sm:$0xff] }
 0xaaf   :  { %5548 = vmatpush.msra.mxu3 %v17905_v49  ;;  %5568 = vmatpush.msrb.mxu2 %v17906_v6  ;;  %v17915_v6 = vld [vmem:[#allocation620_spill] sm:$0xff] }
 0xab0   :  { %5373 = vmatpush.msra.mxu1 %v17907_v50  ;;  %5512 = vmatpush.msra.mxu0 %v17908_v57  ;;  %v4946_v50 = vadd.f32 %v4945_v30, %v4926_v63  ;;  %v17918_v57 = vld [vmem:[#allocation204_spill] sm:$0xff]  ;;  %v17925_v63 = vld [vmem:[#allocation81_spill] sm:$0xff] }
 0xab1   :  { %5549 = vmatpush.msra.mxu3 %v17909_v11  ;;  %5569 = vmatpush.msrb.mxu2 %v17910_v5  ;;  %v17919_v11 = vld [vmem:[#allocation613_spill] sm:$0xff]  ;;  %v17921_v49 = vld [vmem:[#allocation88_spill] sm:$0xff] }
 0xab2   :  { %5374 = vmatpush.msra.mxu1 %v17911_v15  ;;  %5513 = vmatpush.msra.mxu0 %v17912_v34  ;;  %v4966_v5 = vadd.f32 %v4965_v4, %v4946_v50  ;;  %v17920_v15 = vld [vmem:[#allocation621_spill] sm:$0xff]  ;;  %v17928_v50 = vld [vmem:[#allocation607_spill] sm:$0xff] }
 0xab3   :  { %5550 = vmatpush.msra.mxu3 %v17913_v2  ;;  %5570 = vmatpush.msrb.mxu2 %v17914_v46  ;;  %v17922_v34 = vld [vmem:[#allocation197_spill] sm:$0xff]  ;;  %v17923_v2 = vld [vmem:[#allocation606_spill] sm:$0xff] }
 0xab4   :  { %5375 = vmatpush.msra.mxu1 %v17915_v6  ;;  %5514 = vmatpush.msra.mxu0 %v17916_v38  ;;  %v17924_v6 = vld [vmem:[#allocation614_spill] sm:$0xff] }
 0xab5   :  { %5551 = vmatpush.msra.mxu3 %v17917_v7  ;;  %5571 = vmatpush.msrb.mxu2 %v17918_v57  ;;  %v17926_v38 = vld [vmem:[#allocation190_spill] sm:$0xff]  ;;  %v17927_v57 = vld [vmem:[#allocation599_spill] sm:$0xff]  ;;  %v5025_v4 = vpop.f32.mrf.mxu2  ;;  %v5045_v7 = vpop.f32.mrf.mxu0 }
 0xab6   :  { %5376 = vmatpush.msra.mxu1 %v17919_v11  ;;  %5515 = vmatpush.msra.mxu0 %v17920_v15  ;;  %v5005_v11 = vpop.f32.mrf.mxu3  ;;  %v17929_v15 = vld [vmem:[#allocation74_spill] sm:$0xff] }
 0xab7   :  { %5552 = vmatpush.msra.mxu3 %v17921_v49  ;;  %5572 = vmatpush.msrb.mxu2 %v17922_v34  ;;  %v4985_v46 = vpop.f32.mrf.mxu1  ;;  %v17930_v34 = vld [vmem:[#allocation183_spill] sm:$0xff] }
 0xab8   :  { %5377 = vmatpush.msra.mxu1 %v17923_v2  ;;  %5516 = vmatpush.msra.mxu0 %v17924_v6  ;;  %v4986_v30 = vadd.f32 %v4985_v46, %v4966_v5  ;;  %v17931_v2 = vld [vmem:[#allocation592_spill] sm:$0xff]  ;;  %v17934_v5 = vld [vmem:[#allocation798_spill] sm:$0xff] }
 0xab9   :  { %5553 = vmatpush.msra.mxu3 %v17925_v63  ;;  %5573 = vmatpush.msrb.mxu2 %v17926_v38  ;;  %v17932_v6 = vld [vmem:[#allocation600_spill] sm:$0xff]  ;;  %v17933_v63 = vld [vmem:[#allocation67_spill] sm:$0xff]  ;;  %v5026_v38 = vadd.f32 %v5025_v4, %v5005_v11  ;;  %v17943_v11 = vld [vmem:[#allocation162_spill] sm:$0xff] }
 0xaba   :  { %5378 = vmatpush.msra.mxu1 %v17927_v57  ;;  %5517 = vmatpush.msra.mxu0 %v17928_v50  ;;  %v5835_v49 = vrot.slane %v4986_v30, 3  ;;  %v17935_v57 = vld [vmem:[#allocation176_spill] sm:$0xff]  ;;  %v17937_v50 = vld [vmem:[#allocation593_spill] sm:$0xff]  ;;  %v17944_v4 = vld [vmem:[#allocation571_spill] sm:$0xff] }
 0xabb   :  { %5554 = vmatpush.msra.mxu3 %v17929_v15  ;;  %5574 = vmatpush.msrb.mxu2 %v17930_v34  ;;  %v17938_v15 = vld [vmem:[#allocation60_spill] sm:$0xff]  ;;  %v5046_v30 = vadd.f32 %v5045_v7, %v5026_v38  ;;  %v17939_v34 = vld [vmem:[#allocation169_spill] sm:$0xff]  ;;  %v17947_v38 = vld [vmem:[#allocation155_spill] sm:$0xff] }
 0xabc   :  { %5379 = vmatpush.msra.mxu1 %v17931_v2  ;;  %5518 = vmatpush.msra.mxu0 %v17932_v6  ;;  %v5849_v46 = vadd.f32 %v5835_v49, %v17934_v5  ;;  %v17940_v2 = vld [vmem:[#allocation578_spill] sm:$0xff]  ;;  %v17948_v7 = vld [vmem:[#allocation564_spill] sm:$0xff] }
 0xabd   :  { %5555 = vmatpush.msra.mxu3 %v17933_v63  ;;  %5575 = vmatpush.msrb.mxu2 %v17935_v57  ;;  %v17941_v6 = vld [vmem:[#allocation586_spill] sm:$0xff]  ;;  %v17942_v63 = vld [vmem:[#allocation53_spill] sm:$0xff] }
 0xabe   :  { %5380 = vmatpush.msra.mxu1 %v17936_v8  ;;  %5519 = vmatpush.msra.mxu0 %v17937_v50  ;;  %7794 = vtanh.f32 %v5849_v46  ;;  %v5085_v8 = vpop.f32.mrf.mxu3  ;;  %v17945_v50 = vld [vmem:[#allocation579_spill] sm:$0xff]  ;;  %v17946_v57 = vld [vmem:[#allocation46_spill] sm:$0xff] }
 0xabf   :  { %5556 = vmatpush.msra.mxu3 %v17938_v15  ;;  %5576 = vmatpush.msrb.mxu2 %v17939_v34  ;;  %v17949_v34 = vld [vmem:[#allocation572_spill] sm:$0xff]  ;;  %v18048_v15 = vld [vmem:[#allocation205_spill] sm:$0xff] }
 0xac0   :  { %5381 = vmatpush.msra.mxu1 %v17940_v2  ;;  %5520 = vmatpush.msra.mxu0 %v17941_v6  ;;  %v5105_v6 = vpop.f32.mrf.mxu2 }
 0xac1   :  { %5557 = vmatpush.msra.mxu3 %v17942_v63  ;;  %v5065_v49 = vpop.f32.mrf.mxu1  ;;  %5577 = vmatpush.msrb.mxu2 %v17943_v11  ;;  %v17950_v63 = vld [vmem:[#allocation39_spill] sm:$0xff]  ;;  %v17951_v11 = vld [vmem:[#allocation148_spill] sm:$0xff] }
 0xac2   :  { %5382 = vmatpush.msra.mxu1 %v17944_v4  ;;  %v5066_v5 = vadd.f32 %v5065_v49, %v5046_v30  ;;  %5521 = vmatpush.msra.mxu0 %v17945_v50  ;;  %v17952_v49 = vld [vmem:[#allocation334_spill] sm:$0xff]  ;;  %v5125_v50 = vpop.f32.mrf.mxu0  ;;  %v17953_v4 = vld [vmem:[#allocation565_spill] sm:$0xff] }
 0xac3   :  { %5558 = vmatpush.msra.mxu3 %v17946_v57  ;;  %5578 = vmatpush.msrb.mxu2 %v17947_v38  ;;  %v17958_v38 = vld [vmem:[#allocation25_spill] sm:$0xff]  ;;  %v18044_v57 = vld [vmem:[#allocation212_spill] sm:$0xff] }
 0xac4   :  { %5383 = vmatpush.msra.mxu1 %v17948_v7  ;;  %v5086_v46 = vadd.f32 %v5085_v8, %v5066_v5  ;;  %v13862_v2 = vpop.eup %7794  ;;  %5522 = vmatpush.msra.mxu0 %v17949_v34  ;;  %v17954_v8 = vld [vmem:[#allocation32_spill] sm:$0xff]  ;;  %v17955_v5 = vld [vmem:[#allocation141_spill] sm:$0xff] }
 0xac5   :  { %5559 = vmatpush.msra.mxu3 %v17950_v63  ;;  %5579 = vmatpush.msrb.mxu2 %v17951_v11  ;;  %5870 = vst [vmem:[#allocation1] sm:$0xff] %v13862_v2  ;;  %v17956_v34 = vld [vmem:[#allocation328_spill] sm:$0xff]  ;;  %v17957_v11 = vld [vmem:[#allocation335_spill] sm:$0xff] }
 0xac6   :  { %5384 = vmatmul.f32.vlgmr.msra.gmra.mxu1 %v13459_v21  ;;  %v5106_v30 = vadd.f32 %v5105_v6, %v5086_v46  ;;  %5523 = vmatpush.msra.mxu0 %v17953_v4  ;;  %v17959_v6 = vld [vmem:[#allocation134_spill] sm:$0xff] }
 0xac7   :  { %5448 = vmatpush.msrb.mxu1 %v17952_v49  ;;  %5560 = vmatpush.msra.mxu3 %v17954_v8  ;;  %v17960_v46 = vld [vmem:[#allocation322_spill] sm:$0xff]  ;;  %v17961_v49 = vld [vmem:[#allocation329_spill] sm:$0xff]  ;;  %v17963_v8 = vld [vmem:[#allocation799_spill] sm:$0xff] }
 0xac8   :  { %5580 = vmatpush.msrb.mxu2 %v17955_v5  ;;  %v5126_v7 = vadd.f32 %v5125_v50, %v5106_v30  ;;  %5524 = vmatmul.f32.vlgmr.msra.gmra.mxu0 %v13459_v21  ;;  %v17962_v4 = vld [vmem:[#allocation18_spill] sm:$0xff]  ;;  %v17964_v50 = vld [vmem:[#allocation127_spill] sm:$0xff] }
 0xac9   :  { %5449 = vmatpush.msrb.mxu1 %v17956_v34  ;;  %5588 = vmatpush.msrb.mxu0 %v17957_v11  ;;  %v17965_v30 = vld [vmem:[#allocation315_spill] sm:$0xff] }
 0xaca   :  { %5561 = vmatpush.msra.mxu3 %v17958_v38  ;;  %v5836_v63 = vrot.slane %v5126_v7, 3  ;;  %5581 = vmatpush.msrb.mxu2 %v17959_v6  ;;  %v17966_v34 = vld [vmem:[#allocation323_spill] sm:$0xff]  ;;  %v17968_v7 = vld [vmem:[#allocation120_spill] sm:$0xff] }
 0xacb   :  { %5450 = vmatpush.msrb.mxu1 %v17960_v46  ;;  %5589 = vmatpush.msrb.mxu0 %v17961_v49  ;;  %v17967_v11 = vld [vmem:[#allocation11_spill] sm:$0xff]  ;;  %v17969_v6 = vld [vmem:[#allocation308_spill] sm:$0xff] }
 0xacc   :  { %5562 = vmatpush.msra.mxu3 %v17962_v4  ;;  %v5850_v5 = vadd.f32 %v5836_v63, %v17963_v8  ;;  %5582 = vmatpush.msrb.mxu2 %v17964_v50  ;;  %v17970_v49 = vld [vmem:[#allocation316_spill] sm:$0xff]  ;;  %v17971_v63 = vld [vmem:[#allocation559_spill] sm:$0xff]  ;;  %v17979_v50 = vld [vmem:[#allocation302_spill] sm:$0xff] }
 0xacd   :  { %5451 = vmatpush.msrb.mxu1 %v17965_v30  ;;  %5590 = vmatpush.msrb.mxu0 %v17966_v34  ;;  %v17972_v8 = vld [vmem:[#allocation671_spill] sm:$0xff]  ;;  %v17973_v30 = vld [vmem:[#allocation301_spill] sm:$0xff]  ;;  %v17975_v46 = vld [vmem:[#allocation552_spill] sm:$0xff] }
 0xace   :  { %5563 = vmatpush.msra.mxu3 %v17967_v11  ;;  %7796 = vtanh.f32 %v5850_v5  ;;  %5583 = vmatpush.msrb.mxu2 %v17968_v7  ;;  %v17974_v34 = vld [vmem:[#allocation309_spill] sm:$0xff]  ;;  %v17977_v7 = vld [vmem:[#allocation664_spill] sm:$0xff]  ;;  %v17989_v4 = vld [vmem:[#allocation643_spill] sm:$0xff] }
 0xacf   :  { %5452 = vmatpush.msrb.mxu1 %v17969_v6  ;;  %5564 = vmatmul.f32.vlgmr.msra.gmra.mxu3 %v13290_v41  ;;  %v17978_v6 = vld [vmem:[#allocation294_spill] sm:$0xff]  ;;  %v17986_v11 = vld [vmem:[#allocation280_spill] sm:$0xff] }
 0xad0   :  { %5584 = vmatmul.f32.vlgmr.msrb.gmra.mxu2 %v13295_v13  ;;  %5591 = vmatpush.msrb.mxu0 %v17970_v49  ;;  %v17980_v49 = vld [vmem:[#allocation545_spill] sm:$0xff]  ;;  %v18043_v38 = vld [vmem:[#allocation748_spill] sm:$0xff] }
 0xad1   :  { %5628 = vmatpush.msrb.mxu3 %v17971_v63  ;;  %5648 = vmatpush.msra.mxu2 %v17972_v8  ;;  %v17981_v63 = vld [vmem:[#allocation657_spill] sm:$0xff]  ;;  %v17982_v8 = vld [vmem:[#allocation287_spill] sm:$0xff] }
 0xad2   :  { %5453 = vmatpush.msrb.mxu1 %v17973_v30  ;;  %5592 = vmatpush.msrb.mxu0 %v17974_v34  ;;  %v17983_v30 = vld [vmem:[#allocation295_spill] sm:$0xff]  ;;  %v17984_v34 = vld [vmem:[#allocation538_spill] sm:$0xff] }
 0xad3   :  { %5629 = vmatpush.msrb.mxu3 %v17975_v46  ;;  %5649 = vmatpush.msra.mxu2 %v17977_v7  ;;  %v17985_v46 = vld [vmem:[#allocation650_spill] sm:$0xff]  ;;  %v17987_v7 = vld [vmem:[#allocation288_spill] sm:$0xff] }
 0xad4   :  { %v13896_v5 = vpop.eup %7796  ;;  %5454 = vmatpush.msrb.mxu1 %v17978_v6  ;;  %5593 = vmatpush.msrb.mxu0 %v17979_v50  ;;  %v17988_v6 = vld [vmem:[#allocation531_spill] sm:$0xff]  ;;  %v17990_v50 = vld [vmem:[#allocation273_spill] sm:$0xff] }
 0xad5   :  { %17976 = vst [vmem:[#allocation76_spill] sm:$0xff] %v13896_v5  ;;  %5630 = vmatpush.msrb.mxu3 %v17980_v49  ;;  %5650 = vmatpush.msra.mxu2 %v17981_v63  ;;  %v17991_v49 = vld [vmem:[#allocation281_spill] sm:$0xff]  ;;  %v17992_v63 = vld [vmem:[#allocation524_spill] sm:$0xff] }
 0xad6   :  { %5871 = vst [vmem:[#allocation1 + $0x9] sm:$0xff] %v13896_v5  ;;  %5455 = vmatpush.msrb.mxu1 %v17982_v8  ;;  %5594 = vmatpush.msrb.mxu0 %v17983_v30  ;;  %v17993_v8 = vld [vmem:[#allocation636_spill] sm:$0xff]  ;;  %v17994_v30 = vld [vmem:[#allocation266_spill] sm:$0xff]  ;;  %v18063_v5 = vld [vmem:[#allocation713_spill] sm:$0xff] }
 0xad7   :  { %5631 = vmatpush.msrb.mxu3 %v17984_v34  ;;  %5651 = vmatpush.msra.mxu2 %v17985_v46  ;;  %v17995_v34 = vld [vmem:[#allocation274_spill] sm:$0xff]  ;;  %v17996_v46 = vld [vmem:[#allocation517_spill] sm:$0xff] }
 0xad8   :  { %5456 = vmatpush.msrb.mxu1 %v17986_v11  ;;  %5595 = vmatpush.msrb.mxu0 %v17987_v7  ;;  %v17997_v11 = vld [vmem:[#allocation629_spill] sm:$0xff]  ;;  %v17998_v7 = vld [vmem:[#allocation259_spill] sm:$0xff] }
 0xad9   :  { %5632 = vmatpush.msrb.mxu3 %v17988_v6  ;;  %5652 = vmatpush.msra.mxu2 %v17989_v4  ;;  %v17999_v6 = vld [vmem:[#allocation267_spill] sm:$0xff]  ;;  %v18000_v4 = vld [vmem:[#allocation510_spill] sm:$0xff] }
 0xada   :  { %5457 = vmatpush.msrb.mxu1 %v17990_v50  ;;  %5596 = vmatpush.msrb.mxu0 %v17991_v49  ;;  %v18001_v50 = vld [vmem:[#allocation622_spill] sm:$0xff]  ;;  %v18002_v49 = vld [vmem:[#allocation252_spill] sm:$0xff] }
 0xadb   :  { %5633 = vmatpush.msrb.mxu3 %v17992_v63  ;;  %5653 = vmatpush.msra.mxu2 %v17993_v8  ;;  %v18003_v63 = vld [vmem:[#allocation260_spill] sm:$0xff]  ;;  %v18004_v8 = vld [vmem:[#allocation503_spill] sm:$0xff] }
 0xadc   :  { %5458 = vmatpush.msrb.mxu1 %v17994_v30  ;;  %5597 = vmatpush.msrb.mxu0 %v17995_v34  ;;  %v18005_v30 = vld [vmem:[#allocation615_spill] sm:$0xff]  ;;  %v18006_v34 = vld [vmem:[#allocation245_spill] sm:$0xff] }
 0xadd   :  { %5634 = vmatpush.msrb.mxu3 %v17996_v46  ;;  %5654 = vmatpush.msra.mxu2 %v17997_v11  ;;  %v18007_v46 = vld [vmem:[#allocation253_spill] sm:$0xff]  ;;  %v18008_v11 = vld [vmem:[#allocation496_spill] sm:$0xff] }
 0xade   :  { %5459 = vmatpush.msrb.mxu1 %v17998_v7  ;;  %5598 = vmatpush.msrb.mxu0 %v17999_v6  ;;  %v18009_v7 = vld [vmem:[#allocation608_spill] sm:$0xff]  ;;  %v18010_v6 = vld [vmem:[#allocation238_spill] sm:$0xff] }
 0xadf   :  { %5635 = vmatpush.msrb.mxu3 %v18000_v4  ;;  %5655 = vmatpush.msra.mxu2 %v18001_v50  ;;  %v18011_v4 = vld [vmem:[#allocation246_spill] sm:$0xff]  ;;  %v18012_v50 = vld [vmem:[#allocation489_spill] sm:$0xff] }
 0xae0   :  { %5460 = vmatpush.msrb.mxu1 %v18002_v49  ;;  %5599 = vmatpush.msrb.mxu0 %v18003_v63  ;;  %v18013_v49 = vld [vmem:[#allocation601_spill] sm:$0xff]  ;;  %v18014_v63 = vld [vmem:[#allocation231_spill] sm:$0xff] }
 0xae1   :  { %5636 = vmatpush.msrb.mxu3 %v18004_v8  ;;  %5656 = vmatpush.msra.mxu2 %v18005_v30  ;;  %v18015_v8 = vld [vmem:[#allocation239_spill] sm:$0xff]  ;;  %v18016_v30 = vld [vmem:[#allocation482_spill] sm:$0xff] }
 0xae2   :  { %5461 = vmatpush.msrb.mxu1 %v18006_v34  ;;  %5600 = vmatpush.msrb.mxu0 %v18007_v46  ;;  %v18017_v34 = vld [vmem:[#allocation594_spill] sm:$0xff] }
 0xae3   :  { %5637 = vmatpush.msrb.mxu3 %v18008_v11  ;;  %5657 = vmatpush.msra.mxu2 %v18009_v7  ;;  %v18018_v46 = vld [vmem:[#allocation782_spill] sm:$0xff]  ;;  %v18019_v7 = vld [vmem:[#allocation232_spill] sm:$0xff] }
 0xae4   :  { %5462 = vmatpush.msrb.mxu1 %v18010_v6  ;;  %5601 = vmatpush.msrb.mxu0 %v18011_v4  ;;  %v18020_v6 = vld [vmem:[#allocation475_spill] sm:$0xff]  ;;  %v18033_v11 = vld [vmem:[#allocation566_spill] sm:$0xff] }
 0xae5   :  { %5638 = vmatpush.msrb.mxu3 %v18012_v50  ;;  %5658 = vmatpush.msra.mxu2 %v18013_v49  ;;  %v18021_v4 = vld [vmem:[#allocation587_spill] sm:$0xff]  ;;  %v18025_v49 = vld [vmem:[#allocation580_spill] sm:$0xff] }
 0xae6   :  { %5463 = vmatpush.msrb.mxu1 %v18014_v63  ;;  %5602 = vmatpush.msrb.mxu0 %v18015_v8  ;;  %v18022_v50 = vld [vmem:[#allocation775_spill] sm:$0xff]  ;;  %v18024_v8 = vld [vmem:[#allocation468_spill] sm:$0xff] }
 0xae7   :  { %5639 = vmatpush.msrb.mxu3 %v18016_v30  ;;  %5659 = vmatpush.msra.mxu2 %v18017_v34  ;;  %v18023_v63 = vld [vmem:[#allocation783_spill] sm:$0xff]  ;;  %v18026_v34 = vld [vmem:[#allocation768_spill] sm:$0xff] }
 0xae8   :  { %5464 = vmatmul.f32.vlgmr.msrb.gmra.mxu1 %v13298_v31  ;;  %5603 = vmatpush.msrb.mxu0 %v18019_v7  ;;  %v18027_v30 = vld [vmem:[#allocation776_spill] sm:$0xff]  ;;  %v18029_v7 = vld [vmem:[#allocation573_spill] sm:$0xff] }
 0xae9   :  { %5528 = vmatpush.msra.mxu1 %v18018_v46  ;;  %5640 = vmatpush.msrb.mxu3 %v18020_v6  ;;  %v18028_v46 = vld [vmem:[#allocation461_spill] sm:$0xff] }
 0xaea   :  { %5660 = vmatpush.msra.mxu2 %v18021_v4  ;;  %5604 = vmatmul.f32.vlgmr.msrb.gmra.mxu0 %v13298_v31  ;;  %v18030_v6 = vld [vmem:[#allocation761_spill] sm:$0xff] }
 0xaeb   :  { %5529 = vmatpush.msra.mxu1 %v18022_v50  ;;  %5668 = vmatpush.msra.mxu0 %v18023_v63  ;;  %v18031_v4 = vld [vmem:[#allocation769_spill] sm:$0xff]  ;;  %v18032_v50 = vld [vmem:[#allocation454_spill] sm:$0xff] }
 0xaec   :  { %5641 = vmatpush.msrb.mxu3 %v18024_v8  ;;  %5661 = vmatpush.msra.mxu2 %v18025_v49  ;;  %v18034_v63 = vld [vmem:[#allocation754_spill] sm:$0xff]  ;;  %v18042_v8 = vld [vmem:[#allocation740_spill] sm:$0xff] }
 0xaed   :  { %5530 = vmatpush.msra.mxu1 %v18026_v34  ;;  %5669 = vmatpush.msra.mxu0 %v18027_v30  ;;  %v5145_v34 = vpop.f32.mrf.mxu1  ;;  %v18035_v30 = vld [vmem:[#allocation762_spill] sm:$0xff] }
 0xaee   :  { %5642 = vmatpush.msrb.mxu3 %v18028_v46  ;;  %5662 = vmatpush.msra.mxu2 %v18029_v7  ;;  %v18036_v49 = vld [vmem:[#allocation226_spill] sm:$0xff]  ;;  %v18037_v7 = vld [vmem:[#allocation336_spill] sm:$0xff]  ;;  %v18039_v46 = vld [vmem:[#allocation755_spill] sm:$0xff] }
 0xaef   :  { %5531 = vmatpush.msra.mxu1 %v18030_v6  ;;  %5670 = vmatpush.msra.mxu0 %v18031_v4  ;;  %v18038_v6 = vld [vmem:[#allocation747_spill] sm:$0xff]  ;;  %v5165_v4 = vpop.f32.mrf.mxu3 }
 0xaf0   :  { %5643 = vmatpush.msrb.mxu3 %v18032_v50  ;;  %5663 = vmatpush.msra.mxu2 %v18033_v11  ;;  %v18040_v50 = vld [vmem:[#allocation219_spill] sm:$0xff]  ;;  %v5166_v11 = vadd.f32 %v5165_v4, %v5145_v34  ;;  %v18050_v34 = vld [vmem:[#allocation726_spill] sm:$0xff] }
 0xaf1   :  { %5532 = vmatpush.msra.mxu1 %v18034_v63  ;;  %5644 = vmatmul.f32.vlgmr.msrb.gmra.mxu3 %v13363_v52  ;;  %v18041_v63 = vld [vmem:[#allocation330_spill] sm:$0xff] }
 0xaf2   :  { %5664 = vmatmul.f32.vlgmr.msra.gmra.mxu2 %v13459_v21  ;;  %5671 = vmatpush.msra.mxu0 %v18035_v30  ;;  %v18045_v30 = vld [vmem:[#allocation324_spill] sm:$0xff]  ;;  %v18051_v4 = vld [vmem:[#allocation734_spill] sm:$0xff] }
 0xaf3   :  { %5708 = vmatpush.msra.mxu3 %v18036_v49  ;;  %5728 = vmatpush.msrb.mxu2 %v18037_v7  ;;  %v18046_v49 = vld [vmem:[#allocation733_spill] sm:$0xff]  ;;  %v5185_v7 = vpop.f32.mrf.mxu2 }
 0xaf4   :  { %5533 = vmatpush.msra.mxu1 %v18038_v6  ;;  %5672 = vmatpush.msra.mxu0 %v18039_v46  ;;  %v18047_v6 = vld [vmem:[#allocation741_spill] sm:$0xff]  ;;  %v5186_v46 = vadd.f32 %v5185_v7, %v5166_v11  ;;  %v18058_v11 = vld [vmem:[#allocation712_spill] sm:$0xff] }
 0xaf5   :  { %5709 = vmatpush.msra.mxu3 %v18040_v50  ;;  %5729 = vmatpush.msrb.mxu2 %v18041_v63  ;;  %v18049_v50 = vld [vmem:[#allocation317_spill] sm:$0xff]  ;;  %v18054_v63 = vld [vmem:[#allocation719_spill] sm:$0xff] }
 0xaf6   :  { %5534 = vmatpush.msra.mxu1 %v18042_v8  ;;  %5673 = vmatpush.msra.mxu0 %v18043_v38  ;;  %v18052_v8 = vld [vmem:[#allocation198_spill] sm:$0xff] }
 0xaf7   :  { %5710 = vmatpush.msra.mxu3 %v18044_v57  ;;  %5730 = vmatpush.msrb.mxu2 %v18045_v30  ;;  %v18053_v38 = vld [vmem:[#allocation310_spill] sm:$0xff]  ;;  %v5205_v30 = vpop.f32.mrf.mxu0  ;;  %v18056_v57 = vld [vmem:[#allocation191_spill] sm:$0xff] }
 0xaf8   :  { %5535 = vmatpush.msra.mxu1 %v18046_v49  ;;  %5674 = vmatpush.msra.mxu0 %v18047_v6  ;;  %v18055_v49 = vld [vmem:[#allocation727_spill] sm:$0xff]  ;;  %v5206_v7 = vadd.f32 %v5205_v30, %v5186_v46 }
 0xaf9   :  { %5711 = vmatpush.msra.mxu3 %v18048_v15  ;;  %5731 = vmatpush.msrb.mxu2 %v18049_v50  ;;  %v18057_v6 = vld [vmem:[#allocation303_spill] sm:$0xff]  ;;  %v18059_v50 = vld [vmem:[#allocation720_spill] sm:$0xff]  ;;  %v5245_v15 = vpop.f32.mrf.mxu3 }
 0xafa   :  { %5536 = vmatpush.msra.mxu1 %v18050_v34  ;;  %5675 = vmatpush.msra.mxu0 %v18051_v4  ;;  %v18060_v34 = vld [vmem:[#allocation184_spill] sm:$0xff] }
 0xafb   :  { %5712 = vmatpush.msra.mxu3 %v18052_v8  ;;  %5732 = vmatpush.msrb.mxu2 %v18053_v38  ;;  %v18061_v8 = vld [vmem:[#allocation296_spill] sm:$0xff]  ;;  %v18062_v38 = vld [vmem:[#allocation705_spill] sm:$0xff]  ;;  %v5265_v30 = vpop.f32.mrf.mxu2 }
 0xafc   :  { %5537 = vmatpush.msra.mxu1 %v18054_v63  ;;  %5676 = vmatpush.msra.mxu0 %v18055_v49  ;;  %v18064_v49 = vld [vmem:[#allocation177_spill] sm:$0xff] }
 0xafd   :  { %5713 = vmatpush.msra.mxu3 %v18056_v57  ;;  %5733 = vmatpush.msrb.mxu2 %v18057_v6  ;;  %v18065_v57 = vld [vmem:[#allocation289_spill] sm:$0xff]  ;;  %v18066_v6 = vld [vmem:[#allocation698_spill] sm:$0xff] }
 0xafe   :  { %5538 = vmatpush.msra.mxu1 %v18058_v11  ;;  %5677 = vmatpush.msra.mxu0 %v18059_v50  ;;  %v18067_v50 = vld [vmem:[#allocation706_spill] sm:$0xff] }
 0xaff   :  { %5714 = vmatpush.msra.mxu3 %v18060_v34  ;;  %v5225_v4 = vpop.f32.mrf.mxu1  ;;  %5734 = vmatpush.msrb.mxu2 %v18061_v8  ;;  %v18068_v11 = vld [vmem:[#allocation170_spill] sm:$0xff]  ;;  %v18070_v8 = vld [vmem:[#allocation691_spill] sm:$0xff] }
 0xb00   :  { %5539 = vmatpush.msra.mxu1 %v18062_v38  ;;  %v5226_v63 = vadd.f32 %v5225_v4, %v5206_v7  ;;  %5678 = vmatpush.msra.mxu0 %v18063_v5  ;;  %v18069_v34 = vld [vmem:[#allocation282_spill] sm:$0xff]  ;;  %v18071_v7 = vld [vmem:[#allocation699_spill] sm:$0xff] }
 0xb01   :  { %5715 = vmatpush.msra.mxu3 %v18064_v49  ;;  %5735 = vmatpush.msrb.mxu2 %v18065_v57  ;;  %v18072_v5 = vld [vmem:[#allocation163_spill] sm:$0xff]  ;;  %v18074_v57 = vld [vmem:[#allocation684_spill] sm:$0xff] }
 0xb02   :  { %5540 = vmatpush.msra.mxu1 %v18066_v6  ;;  %v5246_v46 = vadd.f32 %v5245_v15, %v5226_v63  ;;  %5679 = vmatpush.msra.mxu0 %v18067_v50  ;;  %v18073_v38 = vld [vmem:[#allocation275_spill] sm:$0xff]  ;;  %v18075_v15 = vld [vmem:[#allocation692_spill] sm:$0xff] }
 0xb03   :  { %5716 = vmatpush.msra.mxu3 %v18068_v11  ;;  %5736 = vmatpush.msrb.mxu2 %v18069_v34  ;;  %v18076_v63 = vld [vmem:[#allocation156_spill] sm:$0xff]  ;;  %v18078_v11 = vld [vmem:[#allocation677_spill] sm:$0xff] }
 0xb04   :  { %5541 = vmatpush.msra.mxu1 %v18070_v8  ;;  %v5266_v4 = vadd.f32 %v5265_v30, %v5246_v46  ;;  %5680 = vmatpush.msra.mxu0 %v18071_v7  ;;  %v18077_v50 = vld [vmem:[#allocation268_spill] sm:$0xff]  ;;  %v18080_v46 = vld [vmem:[#allocation685_spill] sm:$0xff] }
 0xb05   :  { %5717 = vmatpush.msra.mxu3 %v18072_v5  ;;  %5737 = vmatpush.msrb.mxu2 %v18073_v38  ;;  %v18079_v34 = vld [vmem:[#allocation800_spill] sm:$0xff]  ;;  %v18081_v30 = vld [vmem:[#allocation149_spill] sm:$0xff] }
 0xb06   :  { %5542 = vmatpush.msra.mxu1 %v18074_v57  ;;  %v5837_v6 = vrot.slane %v5266_v4, 3  ;;  %5681 = vmatpush.msra.mxu0 %v18075_v15  ;;  %v18082_v7 = vld [vmem:[#allocation261_spill] sm:$0xff]  ;;  %v18083_v4 = vld [vmem:[#allocation447_spill] sm:$0xff]  ;;  %v18084_v15 = vld [vmem:[#allocation678_spill] sm:$0xff] }
 0xb07   :  { %5718 = vmatpush.msra.mxu3 %v18076_v63  ;;  %5738 = vmatpush.msrb.mxu2 %v18077_v50  ;;  %v18085_v57 = vld [vmem:[#allocation142_spill] sm:$0xff] }
 0xb08   :  { %5543 = vmatpush.msra.mxu1 %v18078_v11  ;;  %v5851_v8 = vadd.f32 %v5837_v6, %v18079_v34  ;;  %5682 = vmatpush.msra.mxu0 %v18080_v46  ;;  %v18086_v50 = vld [vmem:[#allocation254_spill] sm:$0xff]  ;;  %v18087_v11 = vld [vmem:[#allocation440_spill] sm:$0xff]  ;;  %v18089_v34 = vld [vmem:[#allocation135_spill] sm:$0xff] }
 0xb09   :  { %5719 = vmatpush.msra.mxu3 %v18081_v30  ;;  %5739 = vmatpush.msrb.mxu2 %v18082_v7  ;;  %v18088_v6 = vld [vmem:[#allocation448_spill] sm:$0xff]  ;;  %v18090_v46 = vld [vmem:[#allocation247_spill] sm:$0xff]  ;;  %v18091_v7 = vld [vmem:[#allocation433_spill] sm:$0xff] }
 0xb0a   :  { %5544 = vmatmul.f32.vlgmr.msra.gmra.mxu1 %v13565_v16  ;;  %7798 = vtanh.f32 %v5851_v8  ;;  %5683 = vmatpush.msra.mxu0 %v18084_v15  ;;  %v18093_v15 = vld [vmem:[#allocation128_spill] sm:$0xff] }
 0xb0b   :  { %5608 = vmatpush.msrb.mxu1 %v18083_v4  ;;  %5720 = vmatpush.msra.mxu3 %v18085_v57  ;;  %v18092_v4 = vld [vmem:[#allocation441_spill] sm:$0xff] }
 0xb0c   :  { %5740 = vmatpush.msrb.mxu2 %v18086_v50  ;;  %5684 = vmatmul.f32.vlgmr.msra.gmra.mxu0 %v13565_v16  ;;  %v18095_v50 = vld [vmem:[#allocation434_spill] sm:$0xff] }
 0xb0d   :  { %5609 = vmatpush.msrb.mxu1 %v18087_v11  ;;  %5748 = vmatpush.msrb.mxu0 %v18088_v6  ;;  %v18094_v11 = vld [vmem:[#allocation426_spill] sm:$0xff]  ;;  %v18096_v6 = vld [vmem:[#allocation121_spill] sm:$0xff] }
 0xb0e   :  { %5721 = vmatpush.msra.mxu3 %v18089_v34  ;;  %5741 = vmatpush.msrb.mxu2 %v18090_v46  ;;  %v18097_v46 = vld [vmem:[#allocation419_spill] sm:$0xff] }
 0xb0f   :  { %5610 = vmatpush.msrb.mxu1 %v18091_v7  ;;  %5749 = vmatpush.msrb.mxu0 %v18092_v4  ;;  %v18098_v4 = vld [vmem:[#allocation427_spill] sm:$0xff]  ;;  %v18099_v7 = vld [vmem:[#allocation672_spill] sm:$0xff] }
 0xb10   :  { %v14020_v8 = vpop.eup %7798  ;;  %5722 = vmatpush.msra.mxu3 %v18093_v15  ;;  %5742 = vmatpush.msrb.mxu2 %v17407_v14  ;;  %v18100_v14 = vld [vmem:[#allocation412_spill] sm:$0xff] }
 0xb11   :  { %5872 = vst [vmem:[#allocation1 + $0x12] sm:$0xff] %v14020_v8  ;;  %5611 = vmatpush.msrb.mxu1 %v18094_v11  ;;  %5750 = vmatpush.msrb.mxu0 %v18095_v50  ;;  %v18101_v11 = vld [vmem:[#allocation420_spill] sm:$0xff]  ;;  %v18102_v50 = vld [vmem:[#allocation665_spill] sm:$0xff] }
 0xb12   :  { %5723 = vmatpush.msra.mxu3 %v18096_v6  ;;  %5743 = vmatpush.msrb.mxu2 %v17411_v20  ;;  %v18103_v20 = vld [vmem:[#allocation405_spill] sm:$0xff] }
 0xb13   :  { %5612 = vmatpush.msrb.mxu1 %v18097_v46  ;;  %5724 = vmatmul.f32.vlgmr.msra.gmra.mxu3 %v13295_v13  ;;  %v18104_v46 = vld [vmem:[#allocation413_spill] sm:$0xff]  ;;  %v18105_v13 = vld [vmem:[#allocation658_spill] sm:$0xff] }
 0xb14   :  { %5744 = vmatmul.f32.vlgmr.msrb.gmra.mxu2 %v13298_v31  ;;  %5751 = vmatpush.msrb.mxu0 %v18098_v4  ;;  %v18106_v31 = vld [vmem:[#allocation398_spill] sm:$0xff] }
 0xb15   :  { %5788 = vmatpush.msrb.mxu3 %v18099_v7  ;;  %5808 = vmatpush.msra.mxu2 %v17415_v45  ;;  %v18107_v4 = vld [vmem:[#allocation406_spill] sm:$0xff]  ;;  %v18108_v45 = vld [vmem:[#allocation651_spill] sm:$0xff] }
 0xb16   :  { %5613 = vmatpush.msrb.mxu1 %v18100_v14  ;;  %5752 = vmatpush.msrb.mxu0 %v18101_v11  ;;  %v18109_v11 = vld [vmem:[#allocation391_spill] sm:$0xff] }
 0xb17   :  { %5789 = vmatpush.msrb.mxu3 %v18102_v50  ;;  %5809 = vmatpush.msra.mxu2 %v17416_v62  ;;  %v18110_v14 = vld [vmem:[#allocation399_spill] sm:$0xff]  ;;  %v18111_v62 = vld [vmem:[#allocation644_spill] sm:$0xff] }
 0xb18   :  { %5614 = vmatpush.msrb.mxu1 %v18103_v20  ;;  %5753 = vmatpush.msrb.mxu0 %v18104_v46  ;;  %v18112_v46 = vld [vmem:[#allocation384_spill] sm:$0xff] }
 0xb19   :  { %5790 = vmatpush.msrb.mxu3 %v18105_v13  ;;  %5810 = vmatpush.msra.mxu2 %v17418_v12  ;;  %v18113_v20 = vld [vmem:[#allocation392_spill] sm:$0xff]  ;;  %v18114_v12 = vld [vmem:[#allocation637_spill] sm:$0xff] }
 0xb1a   :  { %5615 = vmatpush.msrb.mxu1 %v18106_v31  ;;  %5754 = vmatpush.msrb.mxu0 %v18107_v4  ;;  %v18115_v4 = vld [vmem:[#allocation377_spill] sm:$0xff] }
 0xb1b   :  { %5791 = vmatpush.msrb.mxu3 %v18108_v45  ;;  %5811 = vmatpush.msra.mxu2 %v17419_v23  ;;  %v18116_v31 = vld [vmem:[#allocation385_spill] sm:$0xff]  ;;  %v18117_v23 = vld [vmem:[#allocation630_spill] sm:$0xff] }
 0xb1c   :  { %5616 = vmatpush.msrb.mxu1 %v18109_v11  ;;  %5755 = vmatpush.msrb.mxu0 %v18110_v14  ;;  %v18118_v14 = vld [vmem:[#allocation370_spill] sm:$0xff] }
 0xb1d   :  { %5792 = vmatpush.msrb.mxu3 %v18111_v62  ;;  %5812 = vmatpush.msra.mxu2 %v17420_v55  ;;  %v18119_v11 = vld [vmem:[#allocation378_spill] sm:$0xff]  ;;  %v18120_v55 = vld [vmem:[#allocation623_spill] sm:$0xff] }
 0xb1e   :  { %5617 = vmatpush.msrb.mxu1 %v18112_v46  ;;  %5756 = vmatpush.msrb.mxu0 %v18113_v20  ;;  %v18121_v20 = vld [vmem:[#allocation363_spill] sm:$0xff] }
 0xb1f   :  { %5793 = vmatpush.msrb.mxu3 %v18114_v12  ;;  %5813 = vmatpush.msra.mxu2 %v17421_v27  ;;  %v18122_v46 = vld [vmem:[#allocation371_spill] sm:$0xff]  ;;  %v18123_v27 = vld [vmem:[#allocation616_spill] sm:$0xff] }
 0xb20   :  { %5618 = vmatpush.msrb.mxu1 %v18115_v4  ;;  %5757 = vmatpush.msrb.mxu0 %v18116_v31  ;;  %v18124_v31 = vld [vmem:[#allocation356_spill] sm:$0xff] }
 0xb21   :  { %5794 = vmatpush.msrb.mxu3 %v18117_v23  ;;  %5814 = vmatpush.msra.mxu2 %v17422_v22  ;;  %v18125_v4 = vld [vmem:[#allocation364_spill] sm:$0xff]  ;;  %v18126_v22 = vld [vmem:[#allocation609_spill] sm:$0xff] }
 0xb22   :  { %5619 = vmatpush.msrb.mxu1 %v18118_v14  ;;  %5758 = vmatpush.msrb.mxu0 %v18119_v11  ;;  %v18127_v11 = vld [vmem:[#allocation349_spill] sm:$0xff] }
 0xb23   :  { %5795 = vmatpush.msrb.mxu3 %v18120_v55  ;;  %5815 = vmatpush.msra.mxu2 %v17423_v19  ;;  %v18128_v14 = vld [vmem:[#allocation357_spill] sm:$0xff]  ;;  %v18129_v19 = vld [vmem:[#allocation602_spill] sm:$0xff] }
 0xb24   :  { %5620 = vmatpush.msrb.mxu1 %v18121_v20  ;;  %5759 = vmatpush.msrb.mxu0 %v18122_v46  ;;  %v18130_v46 = vld [vmem:[#allocation342_spill] sm:$0xff]  ;;  %v18131_v20 = vld [vmem:[#allocation595_spill] sm:$0xff] }
 0xb25   :  { %5796 = vmatpush.msrb.mxu3 %v18123_v27  ;;  %5816 = vmatpush.msra.mxu2 %v17424_v51 }
 0xb26   :  { %5621 = vmatpush.msrb.mxu1 %v18124_v31  ;;  %5760 = vmatpush.msrb.mxu0 %v18125_v4  ;;  %v18132_v4 = vld [vmem:[#allocation114_spill] sm:$0xff] }
 0xb27   :  { %5797 = vmatpush.msrb.mxu3 %v18126_v22  ;;  %5817 = vmatpush.msra.mxu2 %v17425_v10 }
 0xb28   :  { %5622 = vmatpush.msrb.mxu1 %v18127_v11  ;;  %5761 = vmatpush.msrb.mxu0 %v18128_v14  ;;  %v18133_v11 = vld [vmem:[#allocation588_spill] sm:$0xff] }
 0xb29   :  { %5798 = vmatpush.msrb.mxu3 %v18129_v19  ;;  %5818 = vmatpush.msra.mxu2 %v17426_v40  ;;  %v18134_v14 = vld [vmem:[#allocation108_spill] sm:$0xff] }
 0xb2a   :  { %5623 = vmatpush.msrb.mxu1 %v18130_v46  ;;  %5762 = vmatpush.msrb.mxu0 %v17408_v0  ;;  %v18135_v0 = vld [vmem:[#allocation581_spill] sm:$0xff]  ;;  %v18136_v46 = vld [vmem:[#allocation102_spill] sm:$0xff] }
 0xb2b   :  { %5799 = vmatpush.msrb.mxu3 %v18131_v20  ;;  %5819 = vmatpush.msra.mxu2 %v17427_v37 }
 0xb2c   :  { %5624 = vmatmul.f32.vlgmr.msrb.gmra.mxu1 %v13368_v48  ;;  %5763 = vmatpush.msrb.mxu0 %v17412_v61  ;;  %v5305_v61 = vpop.f32.mrf.mxu1 }
 0xb2d   :  { %5688 = vmatpush.msra.mxu1 %v18132_v4  ;;  %5800 = vmatpush.msrb.mxu3 %v18133_v11  ;;  %v18137_v4 = vld [vmem:[#allocation96_spill] sm:$0xff] }
 0xb2e   :  { %5820 = vmatpush.msra.mxu2 %v17428_v28  ;;  %5764 = vmatmul.f32.vlgmr.msrb.gmra.mxu0 %v13368_v48  ;;  %v18138_v48 = vld [vmem:[#allocation89_spill] sm:$0xff] }
 0xb2f   :  { %5689 = vmatpush.msra.mxu1 %v18134_v14  ;;  %6680 = vmatpush.msra.mxu0 %v8394_v18  ;;  %v5285_v18 = vpop.f32.mrf.mxu0 }
 0xb30   :  { %5801 = vmatpush.msrb.mxu3 %v18135_v0  ;;  %5821 = vmatpush.msra.mxu2 %v17429_v54  ;;  %v5306_v14 = vadd.f32 %v5305_v61, %v5285_v18  ;;  %v18140_v61 = vld [vmem:[#allocation75_spill] sm:$0xff]  ;;  %v18154_v18 = vld [vmem:[#allocation33_spill] sm:$0xff] }
 0xb31   :  { %5690 = vmatpush.msra.mxu1 %v18136_v46  ;;  %6681 = vmatpush.msra.mxu0 %v8359_v60  ;;  %v18139_v60 = vld [vmem:[#allocation82_spill] sm:$0xff] }
 0xb32   :  { %5802 = vmatpush.msrb.mxu3 %v17410_v32  ;;  %5822 = vmatpush.msra.mxu2 %v17430_v59 }
 0xb33   :  { %5691 = vmatpush.msra.mxu1 %v18137_v4  ;;  %6682 = vmatpush.msra.mxu0 %v8324_v25  ;;  %v5325_v25 = vpop.f32.mrf.mxu3 }
 0xb34   :  { %5803 = vmatpush.msrb.mxu3 %v17414_v3  ;;  %5823 = vmatpush.msra.mxu2 %v17435_v29  ;;  %v5326_v4 = vadd.f32 %v5325_v25, %v5306_v14  ;;  %v18147_v14 = vld [vmem:[#allocation48_spill] sm:$0xff] }
 0xb35   :  { %5692 = vmatpush.msra.mxu1 %v18138_v48  ;;  %5804 = vmatmul.f32.vlgmr.msrb.gmra.mxu3 %v13459_v21 }
 0xb36   :  { %5824 = vmatmul.f32.vlgmr.msra.gmra.mxu2 %v13565_v16  ;;  %6683 = vmatpush.msra.mxu0 %v16646_v35  ;;  %v5345_v35 = vpop.f32.mrf.mxu2  ;;  %v18151_v16 = vld [vmem:[#allocation41_spill] sm:$0xff] }
 0xb37   :  { %6720 = vmatpush.msra.mxu3 %v9514_v53  ;;  %6740 = vmatpush.msrb.mxu2 %v17441_v42  ;;  %v18141_v53 = vld [vmem:[#allocation68_spill] sm:$0xff] }
 0xb38   :  { %5693 = vmatpush.msra.mxu1 %v18139_v60  ;;  %6684 = vmatpush.msra.mxu0 %v16650_v56  ;;  %v5346_v56 = vadd.f32 %v5345_v35, %v5326_v4  ;;  %v18153_v4 = vld [vmem:[#allocation393_spill] sm:$0xff]  ;;  %v18155_v35 = vld [vmem:[#allocation34_spill] sm:$0xff] }
 0xb39   :  { %6721 = vmatpush.msra.mxu3 %v9479_v39  ;;  %6741 = vmatpush.msrb.mxu2 %v17445_v24  ;;  %v18142_v39 = vld [vmem:[#allocation61_spill] sm:$0xff]  ;;  %v18148_v24 = vld [vmem:[#allocation290_spill] sm:$0xff] }
 0xb3a   :  { %5694 = vmatpush.msra.mxu1 %v18140_v61  ;;  %6685 = vmatpush.msra.mxu0 %v16654_v17  ;;  %v5365_v17 = vpop.f32.mrf.mxu0 }
 0xb3b   :  { %6722 = vmatpush.msra.mxu3 %v16644_v9  ;;  %6742 = vmatpush.msrb.mxu2 %v17449_v36  ;;  %v18143_v9 = vld [vmem:[#allocation54_spill] sm:$0xff]  ;;  %v18144_v36 = vld [vmem:[#allocation297_spill] sm:$0xff]  ;;  %v5405_v21 = vpop.f32.mrf.mxu3 }
 0xb3c   :  { %5695 = vmatpush.msra.mxu1 %v18141_v53  ;;  %6686 = vmatpush.msra.mxu0 %v16658_v58  ;;  %v18145_v58 = vld [vmem:[#allocation407_spill] sm:$0xff] }
 0xb3d   :  { %6723 = vmatpush.msra.mxu3 %v16648_v43  ;;  %6743 = vmatpush.msrb.mxu2 %v17453_v1  ;;  %v18146_v43 = vld [vmem:[#allocation47_spill] sm:$0xff]  ;;  %v5366_v1 = vadd.f32 %v5365_v17, %v5346_v56  ;;  %v18156_v56 = vld [vmem:[#allocation276_spill] sm:$0xff]  ;;  %v18157_v17 = vld [vmem:[#allocation386_spill] sm:$0xff] }
 0xb3e   :  { %5696 = vmatpush.msra.mxu1 %v18142_v39  ;;  %6687 = vmatpush.msra.mxu0 %v16662_v26 }
 0xb3f   :  { %6724 = vmatpush.msra.mxu3 %v16652_v47  ;;  %6744 = vmatpush.msrb.mxu2 %v17457_v44  ;;  %v18149_v47 = vld [vmem:[#allocation400_spill] sm:$0xff] }
 0xb40   :  { %5697 = vmatpush.msra.mxu1 %v18143_v9  ;;  %6688 = vmatpush.msra.mxu0 %v16666_v33  ;;  %v18150_v44 = vld [vmem:[#allocation40_spill] sm:$0xff]  ;;  %v18152_v33 = vld [vmem:[#allocation283_spill] sm:$0xff] }
 0xb41   :  { %6725 = vmatpush.msra.mxu3 %v18144_v36  ;;  %6745 = vmatpush.msrb.mxu2 %v18145_v58  ;;  %v18158_v36 = vld [vmem:[#allocation26_spill] sm:$0xff] }
 0xb42   :  { %5698 = vmatpush.msra.mxu1 %v18146_v43  ;;  %6689 = vmatpush.msra.mxu0 %v18147_v14  ;;  %v18160_v14 = vld [vmem:[#allocation269_spill] sm:$0xff] }
 0xb43   :  { %6726 = vmatpush.msra.mxu3 %v18148_v24  ;;  %v5385_v26 = vpop.f32.mrf.mxu1  ;;  %6746 = vmatpush.msrb.mxu2 %v18149_v47  ;;  %v18161_v24 = vld [vmem:[#allocation379_spill] sm:$0xff]  ;;  %v18163_v47 = vld [vmem:[#allocation801_spill] sm:$0xff] }
 0xb44   :  { %5699 = vmatpush.msra.mxu1 %v18150_v44  ;;  %v5386_v42 = vadd.f32 %v5385_v26, %v5366_v1  ;;  %6690 = vmatpush.msra.mxu0 %v18151_v16  ;;  %v18159_v1 = vld [vmem:[#allocation27_spill] sm:$0xff] }
 0xb45   :  { %6727 = vmatpush.msra.mxu3 %v18152_v33  ;;  %6747 = vmatpush.msrb.mxu2 %v18153_v4  ;;  %v18162_v26 = vld [vmem:[#allocation19_spill] sm:$0xff]  ;;  %v18166_v33 = vld [vmem:[#allocation372_spill] sm:$0xff] }
 0xb46   :  { %5700 = vmatpush.msra.mxu1 %v18154_v18  ;;  %v5406_v25 = vadd.f32 %v5405_v21, %v5386_v42  ;;  %6691 = vmatpush.msra.mxu0 %v18155_v35  ;;  %v18164_v42 = vld [vmem:[#allocation20_spill] sm:$0xff]  ;;  %v18165_v21 = vld [vmem:[#allocation262_spill] sm:$0xff]  ;;  %v18169_v35 = vld [vmem:[#allocation255_spill] sm:$0xff] }
 0xb47   :  { %6728 = vmatpush.msra.mxu3 %v18156_v56  ;;  %6748 = vmatpush.msrb.mxu2 %v18157_v17  ;;  %v18167_v4 = vld [vmem:[#allocation12_spill] sm:$0xff]  ;;  %v18170_v56 = vld [vmem:[#allocation365_spill] sm:$0xff]  ;;  %v14151_v17 = vrot.slane %v13862_v2, 5  ;;  %v18179_v2 = vld [vmem:[#allocation554_spill] sm:$0xff] }
 0xb48   :  { %5701 = vmatpush.msra.mxu1 %v18158_v36  ;;  %v5838_v58 = vrot.slane %v5406_v25, 3  ;;  %6692 = vmatpush.msra.mxu0 %v18159_v1  ;;  %v18168_v25 = vld [vmem:[#allocation13_spill] sm:$0xff]  ;;  %v18172_v1 = vld [vmem:[#allocation6_spill] sm:$0xff]  ;;  %v18445_v44 = vld [vmem:[#allocation251_spill] sm:$0xff] }
 0xb49   :  { %6729 = vmatpush.msra.mxu3 %v18160_v14  ;;  %6749 = vmatpush.msrb.mxu2 %v18161_v24  ;;  %v18173_v14 = vld [vmem:[#allocation248_spill] sm:$0xff]  ;;  %v18174_v24 = vld [vmem:[#allocation358_spill] sm:$0xff] }
 0xb4a   :  { %5702 = vmatpush.msra.mxu1 %v18162_v26  ;;  %v5852_v16 = vadd.f32 %v5838_v58, %v18163_v47  ;;  %6693 = vmatpush.msra.mxu0 %v18164_v42  ;;  %v18171_v58 = vld [vmem:[#allocation560_spill] sm:$0xff]  ;;  %v18175_v47 = vld [vmem:[#allocation553_spill] sm:$0xff]  ;;  %v18341_v36 = vld [vmem:[#allocation618_spill] sm:$0xff] }
 0xb4b   :  { %6730 = vmatpush.msra.mxu3 %v18165_v21  ;;  %6750 = vmatpush.msrb.mxu2 %v18166_v33  ;;  %v18176_v42 = vld [vmem:[#allocation241_spill] sm:$0xff]  ;;  %v18177_v21 = vld [vmem:[#allocation351_spill] sm:$0xff]  ;;  %v18180_v33 = vld [vmem:[#allocation234_spill] sm:$0xff] }
 0xb4c   :  { %5703 = vmatpush.msra.mxu1 %v18167_v4  ;;  %7800 = vtanh.f32 %v5852_v16  ;;  %6694 = vmatpush.msra.mxu0 %v18168_v25  ;;  %v18181_v25 = vld [vmem:[#allocation344_spill] sm:$0xff]  ;;  %v18338_v26 = vld [vmem:[#allocation625_spill] sm:$0xff] }
 0xb4d   :  { %6731 = vmatpush.msra.mxu3 %v18169_v35  ;;  %6751 = vmatpush.msrb.mxu2 %v18170_v56  ;;  %v14166_v35 = vrot.slane %v14020_v8, 5  ;;  %v18189_v8 = vld [vmem:[#allocation525_spill] sm:$0xff] }
 0xb4e   :  { %5704 = vmatmul.f32.vlgmr.msra.gmra.mxu1 %v13290_v41  ;;  %6695 = vmatpush.msra.mxu0 %v18172_v1  ;;  %v18178_v41 = vld [vmem:[#allocation546_spill] sm:$0xff]  ;;  %v18182_v1 = vld [vmem:[#allocation539_spill] sm:$0xff] }
 0xb4f   :  { %5768 = vmatpush.msrb.mxu1 %v18171_v58  ;;  %6732 = vmatpush.msra.mxu3 %v18173_v14  ;;  %v18183_v14 = vld [vmem:[#allocation547_spill] sm:$0xff]  ;;  %v18255_v58 = vld [vmem:[#allocation680_spill] sm:$0xff] }
 0xb50   :  { %6752 = vmatpush.msrb.mxu2 %v18174_v24  ;;  %6696 = vmatmul.f32.vlgmr.msra.gmra.mxu0 %v14151_v17  ;;  %v18184_v24 = vld [vmem:[#allocation227_spill] sm:$0xff] }
 0xb51   :  { %5769 = vmatpush.msrb.mxu1 %v18175_v47  ;;  %6733 = vmatpush.msra.mxu3 %v18176_v42  ;;  %v18185_v42 = vld [vmem:[#allocation337_spill] sm:$0xff]  ;;  %v18252_v47 = vld [vmem:[#allocation548_spill] sm:$0xff] }
 0xb52   :  { %v7801_v16 = vpop.eup %7800  ;;  %6753 = vmatpush.msrb.mxu2 %v18177_v21  ;;  %6760 = vmatpush.msrb.mxu0 %v18179_v2  ;;  %v18186_v21 = vld [vmem:[#allocation532_spill] sm:$0xff]  ;;  %v18187_v2 = vld [vmem:[#allocation109_spill] sm:$0xff] }
 0xb53   :  { %5873 = vst [vmem:[#allocation1 + $0x1b] sm:$0xff] %v7801_v16  ;;  %5770 = vmatpush.msrb.mxu1 %v18178_v41  ;;  %6734 = vmatpush.msra.mxu3 %v18180_v33  ;;  %v14168_v56 = vrot.slane %v7801_v16, 5  ;;  %v18188_v33 = vld [vmem:[#allocation540_spill] sm:$0xff]  ;;  %v18190_v16 = vld [vmem:[#allocation103_spill] sm:$0xff] }
 0xb54   :  { %6754 = vmatpush.msrb.mxu2 %v18181_v25  ;;  %6761 = vmatpush.msrb.mxu0 %v18183_v14  ;;  %v18191_v25 = vld [vmem:[#allocation533_spill] sm:$0xff]  ;;  %v18192_v14 = vld [vmem:[#allocation518_spill] sm:$0xff]  ;;  %v18200_v41 = vld [vmem:[#allocation504_spill] sm:$0xff] }
 0xb55   :  { %5771 = vmatpush.msrb.mxu1 %v18182_v1  ;;  %6735 = vmatpush.msra.mxu3 %v18184_v24  ;;  %v18193_v24 = vld [vmem:[#allocation778_spill] sm:$0xff]  ;;  %v18196_v1 = vld [vmem:[#allocation511_spill] sm:$0xff] }
 0xb56   :  { %6755 = vmatpush.msrb.mxu2 %v18185_v42  ;;  %6736 = vmatmul.f32.vlgmr.msra.gmra.mxu3 %v14166_v35  ;;  %v18194_v42 = vld [vmem:[#allocation97_spill] sm:$0xff] }
 0xb57   :  { %5772 = vmatpush.msrb.mxu1 %v18186_v21  ;;  %6762 = vmatpush.msrb.mxu0 %v18188_v33  ;;  %v18195_v21 = vld [vmem:[#allocation526_spill] sm:$0xff]  ;;  %v18198_v33 = vld [vmem:[#allocation91_spill] sm:$0xff] }
 0xb58   :  { %6820 = vmatpush.msra.mxu2 %v18187_v2  ;;  %6800 = vmatpush.msrb.mxu3 %v18193_v24  ;;  %v18197_v2 = vld [vmem:[#allocation771_spill] sm:$0xff]  ;;  %v18204_v24 = vld [vmem:[#allocation497_spill] sm:$0xff] }
 0xb59   :  { %5773 = vmatpush.msrb.mxu1 %v18189_v8  ;;  %6756 = vmatmul.f32.vlgmr.msrb.gmra.mxu2 %v14168_v56  ;;  %v18199_v8 = vld [vmem:[#allocation519_spill] sm:$0xff] }
 0xb5a   :  { %6821 = vmatpush.msra.mxu2 %v18190_v16  ;;  %6763 = vmatpush.msrb.mxu0 %v18191_v25  ;;  %v18201_v16 = vld [vmem:[#allocation764_spill] sm:$0xff] }
 0xb5b   :  { %5774 = vmatpush.msrb.mxu1 %v18192_v14  ;;  %6801 = vmatpush.msrb.mxu3 %v18197_v2  ;;  %v18202_v25 = vld [vmem:[#allocation84_spill] sm:$0xff]  ;;  %v18208_v2 = vld [vmem:[#allocation490_spill] sm:$0xff] }
 0xb5c   :  { %6822 = vmatpush.msra.mxu2 %v18194_v42  ;;  %6764 = vmatpush.msrb.mxu0 %v18195_v21  ;;  %v18203_v14 = vld [vmem:[#allocation512_spill] sm:$0xff]  ;;  %v18205_v42 = vld [vmem:[#allocation757_spill] sm:$0xff] }
 0xb5d   :  { %5775 = vmatpush.msrb.mxu1 %v18196_v1  ;;  %6802 = vmatpush.msrb.mxu3 %v18201_v16  ;;  %v18206_v21 = vld [vmem:[#allocation77_spill] sm:$0xff]  ;;  %v18212_v16 = vld [vmem:[#allocation483_spill] sm:$0xff] }
 0xb5e   :  { %6823 = vmatpush.msra.mxu2 %v18198_v33  ;;  %6765 = vmatpush.msrb.mxu0 %v18199_v8  ;;  %v18207_v1 = vld [vmem:[#allocation505_spill] sm:$0xff]  ;;  %v18209_v33 = vld [vmem:[#allocation750_spill] sm:$0xff] }
 0xb5f   :  { %5776 = vmatpush.msrb.mxu1 %v18200_v41  ;;  %6803 = vmatpush.msrb.mxu3 %v18205_v42  ;;  %v18210_v8 = vld [vmem:[#allocation70_spill] sm:$0xff]  ;;  %v18216_v42 = vld [vmem:[#allocation476_spill] sm:$0xff] }
 0xb60   :  { %6824 = vmatpush.msra.mxu2 %v18202_v25  ;;  %6766 = vmatpush.msrb.mxu0 %v18203_v14  ;;  %v18211_v41 = vld [vmem:[#allocation498_spill] sm:$0xff]  ;;  %v18213_v25 = vld [vmem:[#allocation743_spill] sm:$0xff] }
 0xb61   :  { %5777 = vmatpush.msrb.mxu1 %v18204_v24  ;;  %6804 = vmatpush.msrb.mxu3 %v18209_v33  ;;  %v18214_v14 = vld [vmem:[#allocation63_spill] sm:$0xff]  ;;  %v18220_v33 = vld [vmem:[#allocation469_spill] sm:$0xff] }
 0xb62   :  { %6825 = vmatpush.msra.mxu2 %v18206_v21  ;;  %6767 = vmatpush.msrb.mxu0 %v18207_v1  ;;  %v18215_v24 = vld [vmem:[#allocation491_spill] sm:$0xff]  ;;  %v18217_v21 = vld [vmem:[#allocation736_spill] sm:$0xff] }
 0xb63   :  { %5778 = vmatpush.msrb.mxu1 %v18208_v2  ;;  %6805 = vmatpush.msrb.mxu3 %v18213_v25  ;;  %v18218_v1 = vld [vmem:[#allocation56_spill] sm:$0xff]  ;;  %v18224_v25 = vld [vmem:[#allocation462_spill] sm:$0xff] }
 0xb64   :  { %6826 = vmatpush.msra.mxu2 %v18210_v8  ;;  %6768 = vmatpush.msrb.mxu0 %v18211_v41  ;;  %v18219_v2 = vld [vmem:[#allocation484_spill] sm:$0xff]  ;;  %v18221_v8 = vld [vmem:[#allocation729_spill] sm:$0xff] }
 0xb65   :  { %5779 = vmatpush.msrb.mxu1 %v18212_v16  ;;  %6806 = vmatpush.msrb.mxu3 %v18217_v21  ;;  %v18222_v41 = vld [vmem:[#allocation49_spill] sm:$0xff]  ;;  %v18228_v21 = vld [vmem:[#allocation455_spill] sm:$0xff] }
 0xb66   :  { %6827 = vmatpush.msra.mxu2 %v18214_v14  ;;  %6769 = vmatpush.msrb.mxu0 %v18215_v24  ;;  %v18223_v16 = vld [vmem:[#allocation477_spill] sm:$0xff]  ;;  %v18225_v14 = vld [vmem:[#allocation722_spill] sm:$0xff] }
 0xb67   :  { %5780 = vmatpush.msrb.mxu1 %v18216_v42  ;;  %6807 = vmatpush.msrb.mxu3 %v18221_v8  ;;  %v18226_v24 = vld [vmem:[#allocation42_spill] sm:$0xff]  ;;  %v18231_v8 = vld [vmem:[#allocation220_spill] sm:$0xff] }
 0xb68   :  { %6828 = vmatpush.msra.mxu2 %v18218_v1  ;;  %6770 = vmatpush.msrb.mxu0 %v18219_v2  ;;  %v18227_v42 = vld [vmem:[#allocation470_spill] sm:$0xff]  ;;  %v18229_v1 = vld [vmem:[#allocation715_spill] sm:$0xff] }
 0xb69   :  { %5781 = vmatpush.msrb.mxu1 %v18220_v33  ;;  %6808 = vmatpush.msrb.mxu3 %v18225_v14  ;;  %v18230_v2 = vld [vmem:[#allocation35_spill] sm:$0xff]  ;;  %v18235_v14 = vld [vmem:[#allocation213_spill] sm:$0xff]  ;;  %v5465_v33 = vpop.f32.mrf.mxu1 }
 0xb6a   :  { %6829 = vmatpush.msra.mxu2 %v18222_v41  ;;  %6771 = vmatpush.msrb.mxu0 %v18223_v16  ;;  %v18232_v41 = vld [vmem:[#allocation463_spill] sm:$0xff]  ;;  %v18233_v16 = vld [vmem:[#allocation28_spill] sm:$0xff] }
 0xb6b   :  { %5782 = vmatpush.msrb.mxu1 %v18224_v25  ;;  %6809 = vmatpush.msrb.mxu3 %v18229_v1  ;;  %v18234_v25 = vld [vmem:[#allocation708_spill] sm:$0xff]  ;;  %v18239_v1 = vld [vmem:[#allocation206_spill] sm:$0xff] }
 0xb6c   :  { %6830 = vmatpush.msra.mxu2 %v18226_v24  ;;  %6772 = vmatpush.msrb.mxu0 %v18227_v42  ;;  %v18236_v24 = vld [vmem:[#allocation456_spill] sm:$0xff]  ;;  %v18237_v42 = vld [vmem:[#allocation21_spill] sm:$0xff] }
 0xb6d   :  { %5783 = vmatpush.msrb.mxu1 %v18228_v21  ;;  %6810 = vmatpush.msrb.mxu3 %v18234_v25  ;;  %v18238_v21 = vld [vmem:[#allocation701_spill] sm:$0xff]  ;;  %v18244_v25 = vld [vmem:[#allocation694_spill] sm:$0xff] }
 0xb6e   :  { %6831 = vmatpush.msra.mxu2 %v18230_v2  ;;  %5784 = vmatmul.f32.vlgmr.msrb.gmra.mxu1 %v13363_v52  ;;  %v18240_v2 = vld [vmem:[#allocation449_spill] sm:$0xff]  ;;  %v18241_v52 = vld [vmem:[#allocation14_spill] sm:$0xff] }
 0xb6f   :  { %6700 = vmatpush.msra.mxu1 %v18231_v8  ;;  %6773 = vmatpush.msrb.mxu0 %v18232_v41  ;;  %v18242_v8 = vld [vmem:[#allocation221_spill] sm:$0xff]  ;;  %v5445_v41 = vpop.f32.mrf.mxu0 }
 0xb70   :  { %6832 = vmatpush.msra.mxu2 %v18233_v16  ;;  %6811 = vmatpush.msrb.mxu3 %v18238_v21  ;;  %v18243_v16 = vld [vmem:[#allocation199_spill] sm:$0xff]  ;;  %v18247_v21 = vld [vmem:[#allocation192_spill] sm:$0xff] }
 0xb71   :  { %6701 = vmatpush.msra.mxu1 %v18235_v14  ;;  %6774 = vmatpush.msrb.mxu0 %v18236_v24  ;;  %v18245_v14 = vld [vmem:[#allocation7_spill] sm:$0xff]  ;;  %v18246_v24 = vld [vmem:[#allocation214_spill] sm:$0xff] }
 0xb72   :  { %6833 = vmatpush.msra.mxu2 %v18237_v42  ;;  %6812 = vmatpush.msrb.mxu3 %v18244_v25  ;;  %v5425_v42 = vpop.f32.mrf.mxu2 }
 0xb73   :  { %6702 = vmatpush.msra.mxu1 %v18239_v1  ;;  %6775 = vmatpush.msrb.mxu0 %v18240_v2  ;;  %v5446_v1 = vadd.f32 %v5445_v41, %v5425_v42  ;;  %v18248_v2 = vld [vmem:[#allocation555_spill] sm:$0xff]  ;;  %v18257_v41 = vld [vmem:[#allocation193_spill] sm:$0xff]  ;;  %v5485_v42 = vpop.f32.mrf.mxu3 }
 0xb74   :  { %6834 = vmatpush.msra.mxu2 %v18241_v52  ;;  %v18249_v52 = vld [vmem:[#allocation207_spill] sm:$0xff] }
 0xb75   :  { %6840 = vmatpush.msra.mxu0 %v18242_v8  ;;  %6703 = vmatpush.msra.mxu1 %v18243_v16  ;;  %v18250_v8 = vld [vmem:[#allocation185_spill] sm:$0xff]  ;;  %v18251_v16 = vld [vmem:[#allocation687_spill] sm:$0xff]  ;;  %v5466_v25 = vadd.f32 %v5465_v33, %v5446_v1  ;;  %v18261_v33 = vld [vmem:[#allocation186_spill] sm:$0xff] }
 0xb76   :  { %6835 = vmatpush.msra.mxu2 %v18245_v14  ;;  %6813 = vmatpush.msrb.mxu3 %v18251_v16  ;;  %v18253_v14 = vld [vmem:[#allocation200_spill] sm:$0xff]  ;;  %v18260_v16 = vld [vmem:[#allocation534_spill] sm:$0xff]  ;;  %v18263_v1 = vld [vmem:[#allocation443_spill] sm:$0xff] }
 0xb77   :  { %6841 = vmatpush.msra.mxu0 %v18246_v24  ;;  %6704 = vmatpush.msra.mxu1 %v18247_v21  ;;  %v18254_v24 = vld [vmem:[#allocation178_spill] sm:$0xff]  ;;  %v18256_v21 = vld [vmem:[#allocation541_spill] sm:$0xff] }
 0xb78   :  { %6836 = vmatmul.f32.vlgmr.msra.gmra.mxu2 %v14151_v17  ;;  %6814 = vmatpush.msrb.mxu3 %v18255_v58  ;;  %v18265_v58 = vld [vmem:[#allocation179_spill] sm:$0xff] }
 0xb79   :  { %6900 = vmatpush.msrb.mxu2 %v18248_v2  ;;  %6842 = vmatpush.msra.mxu0 %v18249_v52  ;;  %v18258_v2 = vld [vmem:[#allocation171_spill] sm:$0xff]  ;;  %v18259_v52 = vld [vmem:[#allocation673_spill] sm:$0xff] }
 0xb7a   :  { %6705 = vmatpush.msra.mxu1 %v18250_v8  ;;  %6815 = vmatpush.msrb.mxu3 %v18259_v52  ;;  %v5486_v8 = vadd.f32 %v5485_v42, %v5466_v25  ;;  %v18269_v25 = vld [vmem:[#allocation172_spill] sm:$0xff]  ;;  %v18270_v52 = vld [vmem:[#allocation150_spill] sm:$0xff] }
 0xb7b   :  { %6901 = vmatpush.msrb.mxu2 %v18252_v47  ;;  %6843 = vmatpush.msra.mxu0 %v18253_v14  ;;  %v18262_v47 = vld [vmem:[#allocation164_spill] sm:$0xff]  ;;  %v18264_v14 = vld [vmem:[#allocation527_spill] sm:$0xff] }
 0xb7c   :  { %6706 = vmatpush.msra.mxu1 %v18254_v24  ;;  %6880 = vmatpush.msra.mxu3 %v18263_v1  ;;  %v5505_v24 = vpop.f32.mrf.mxu2  ;;  %v5525_v1 = vpop.f32.mrf.mxu0 }
 0xb7d   :  { %6902 = vmatpush.msrb.mxu2 %v18256_v21  ;;  %6844 = vmatpush.msra.mxu0 %v18257_v41  ;;  %v18266_v21 = vld [vmem:[#allocation157_spill] sm:$0xff]  ;;  %v18267_v41 = vld [vmem:[#allocation436_spill] sm:$0xff]  ;;  %v5506_v42 = vadd.f32 %v5505_v24, %v5486_v8  ;;  %v18279_v24 = vld [vmem:[#allocation415_spill] sm:$0xff] }
 0xb7e   :  { %6707 = vmatpush.msra.mxu1 %v18258_v2  ;;  %6881 = vmatpush.msra.mxu3 %v18267_v41  ;;  %v18268_v2 = vld [vmem:[#allocation520_spill] sm:$0xff] }
 0xb7f   :  { %6903 = vmatpush.msrb.mxu2 %v18260_v16  ;;  %6845 = vmatpush.msra.mxu0 %v18261_v33  ;;  %v18271_v16 = vld [vmem:[#allocation429_spill] sm:$0xff]  ;;  %v5526_v41 = vadd.f32 %v5525_v1, %v5506_v42  ;;  %v18285_v42 = vld [vmem:[#allocation144_spill] sm:$0xff]  ;;  %v18286_v1 = vld [vmem:[#allocation122_spill] sm:$0xff] }
 0xb80   :  { %6708 = vmatpush.msra.mxu1 %v18262_v47  ;;  %6882 = vmatpush.msra.mxu3 %v18271_v16  ;;  %v18272_v33 = vld [vmem:[#allocation513_spill] sm:$0xff] }
 0xb81   :  { %6904 = vmatpush.msrb.mxu2 %v18264_v14  ;;  %6846 = vmatpush.msra.mxu0 %v18265_v58  ;;  %v18273_v47 = vld [vmem:[#allocation165_spill] sm:$0xff]  ;;  %v18274_v14 = vld [vmem:[#allocation143_spill] sm:$0xff]  ;;  %v18275_v58 = vld [vmem:[#allocation422_spill] sm:$0xff] }
 0xb82   :  { %6709 = vmatpush.msra.mxu1 %v18266_v21  ;;  %6883 = vmatpush.msra.mxu3 %v18275_v58  ;;  %v18276_v21 = vld [vmem:[#allocation506_spill] sm:$0xff]  ;;  %v18284_v58 = vld [vmem:[#allocation492_spill] sm:$0xff] }
 0xb83   :  { %6905 = vmatpush.msrb.mxu2 %v18268_v2  ;;  %6847 = vmatpush.msra.mxu0 %v18269_v25  ;;  %v18277_v2 = vld [vmem:[#allocation158_spill] sm:$0xff]  ;;  %v18278_v25 = vld [vmem:[#allocation136_spill] sm:$0xff] }
 0xb84   :  { %6710 = vmatpush.msra.mxu1 %v18270_v52  ;;  %6884 = vmatpush.msra.mxu3 %v18279_v24  ;;  %v18280_v52 = vld [vmem:[#allocation499_spill] sm:$0xff] }
 0xb85   :  { %6906 = vmatpush.msrb.mxu2 %v18272_v33  ;;  %6848 = vmatpush.msra.mxu0 %v18273_v47  ;;  %v18281_v33 = vld [vmem:[#allocation151_spill] sm:$0xff]  ;;  %v18282_v47 = vld [vmem:[#allocation129_spill] sm:$0xff] }
 0xb86   :  { %6711 = vmatpush.msra.mxu1 %v18274_v14  ;;  %v18283_v14 = vld [vmem:[#allocation408_spill] sm:$0xff] }
 0xb87   :  { %6907 = vmatpush.msrb.mxu2 %v18276_v21  ;;  %6849 = vmatpush.msra.mxu0 %v18277_v2  ;;  %v5545_v8 = vpop.f32.mrf.mxu1  ;;  %v18287_v2 = vld [vmem:[#allocation401_spill] sm:$0xff] }
 0xb88   :  { %6712 = vmatpush.msra.mxu1 %v18278_v25  ;;  %v5546_v16 = vadd.f32 %v5545_v8, %v5526_v41  ;;  %6885 = vmatpush.msra.mxu3 %v18283_v14  ;;  %v18288_v25 = vld [vmem:[#allocation76_spill] sm:$0xff]  ;;  %v18290_v41 = vld [vmem:[#allocation802_spill] sm:$0xff] }
 0xb89   :  { %6908 = vmatpush.msrb.mxu2 %v18280_v52  ;;  %6850 = vmatpush.msra.mxu0 %v18281_v33  ;;  %v14281_v24 = vrot.slane %v18288_v25, 5  ;;  %v18289_v52 = vld [vmem:[#allocation485_spill] sm:$0xff]  ;;  %v18293_v14 = vld [vmem:[#allocation394_spill] sm:$0xff]  ;;  %v18300_v25 = vld [vmem:[#allocation123_spill] sm:$0xff] }
 0xb8a   :  { %6713 = vmatpush.msra.mxu1 %v18282_v47  ;;  %v5839_v21 = vrot.slane %v5546_v16, 3  ;;  %6886 = vmatpush.msra.mxu3 %v18287_v2  ;;  %v18291_v33 = vld [vmem:[#allocation137_spill] sm:$0xff]  ;;  %v18292_v47 = vld [vmem:[#allocation115_spill] sm:$0xff]  ;;  %v18294_v16 = vld [vmem:[#allocation478_spill] sm:$0xff] }
 0xb8b   :  { %6909 = vmatpush.msrb.mxu2 %v18284_v58  ;;  %6851 = vmatpush.msra.mxu0 %v18285_v42  ;;  %v18295_v58 = vld [vmem:[#allocation666_spill] sm:$0xff]  ;;  %v18298_v2 = vld [vmem:[#allocation387_spill] sm:$0xff] }
 0xb8c   :  { %6714 = vmatpush.msra.mxu1 %v18286_v1  ;;  %v5853_v8 = vadd.f32 %v5839_v21, %v18290_v41  ;;  %6887 = vmatpush.msra.mxu3 %v18293_v14  ;;  %v18296_v42 = vld [vmem:[#allocation130_spill] sm:$0xff]  ;;  %v18297_v1 = vld [vmem:[#allocation471_spill] sm:$0xff]  ;;  %v18302_v41 = vld [vmem:[#allocation380_spill] sm:$0xff] }
 0xb8d   :  { %6910 = vmatpush.msrb.mxu2 %v18289_v52  ;;  %6852 = vmatpush.msra.mxu0 %v18291_v33  ;;  %v18299_v21 = vld [vmem:[#allocation659_spill] sm:$0xff]  ;;  %v18301_v52 = vld [vmem:[#allocation464_spill] sm:$0xff]  ;;  %v18305_v14 = vld [vmem:[#allocation457_spill] sm:$0xff] }
 0xb8e   :  { %6715 = vmatpush.msra.mxu1 %v18292_v47  ;;  %7802 = vtanh.f32 %v5853_v8  ;;  %6888 = vmatpush.msra.mxu3 %v18298_v2  ;;  %v18303_v33 = vld [vmem:[#allocation652_spill] sm:$0xff]  ;;  %v18309_v2 = vld [vmem:[#allocation366_spill] sm:$0xff] }
 0xb8f   :  { %6911 = vmatpush.msrb.mxu2 %v18294_v16  ;;  %6716 = vmatmul.f32.vlgmr.msra.gmra.mxu1 %v14281_v24  ;;  %v18304_v47 = vld [vmem:[#allocation116_spill] sm:$0xff]  ;;  %v18306_v16 = vld [vmem:[#allocation373_spill] sm:$0xff] }
 0xb90   :  { %6780 = vmatpush.msrb.mxu1 %v18295_v58  ;;  %6853 = vmatpush.msra.mxu0 %v18296_v42  ;;  %v18307_v42 = vld [vmem:[#allocation645_spill] sm:$0xff] }
 0xb91   :  { %6912 = vmatpush.msrb.mxu2 %v18297_v1  ;;  %6889 = vmatpush.msra.mxu3 %v18302_v41  ;;  %v18308_v1 = vld [vmem:[#allocation450_spill] sm:$0xff]  ;;  %v18313_v41 = vld [vmem:[#allocation215_spill] sm:$0xff] }
 0xb92   :  { %6781 = vmatpush.msrb.mxu1 %v18299_v21  ;;  %6854 = vmatpush.msra.mxu0 %v18300_v25  ;;  %v18310_v21 = vld [vmem:[#allocation638_spill] sm:$0xff] }
 0xb93   :  { %6913 = vmatpush.msrb.mxu2 %v18301_v52  ;;  %6890 = vmatpush.msra.mxu3 %v18306_v16  ;;  %v18311_v25 = vld [vmem:[#allocation222_spill] sm:$0xff]  ;;  %v18312_v52 = vld [vmem:[#allocation631_spill] sm:$0xff]  ;;  %v18318_v16 = vld [vmem:[#allocation660_spill] sm:$0xff] }
 0xb94   :  { %6782 = vmatpush.msrb.mxu1 %v18303_v33  ;;  %6855 = vmatpush.msra.mxu0 %v18304_v47  ;;  %v7803_v8 = vpop.eup %7802  ;;  %v18314_v33 = vld [vmem:[#allocation667_spill] sm:$0xff] }
 0xb95   :  { %6914 = vmatpush.msrb.mxu2 %v18305_v14  ;;  %5874 = vst [vmem:[#allocation1 + $0x24] sm:$0xff] %v7803_v8  ;;  %v14302_v58 = vrot.slane %v7803_v8, 5  ;;  %6891 = vmatpush.msra.mxu3 %v18309_v2  ;;  %v18315_v47 = vld [vmem:[#allocation359_spill] sm:$0xff]  ;;  %v18316_v8 = vld [vmem:[#allocation624_spill] sm:$0xff]  ;;  %v18321_v2 = vld [vmem:[#allocation201_spill] sm:$0xff] }
 0xb96   :  { %6783 = vmatpush.msrb.mxu1 %v18307_v42  ;;  %v18317_v14 = vld [vmem:[#allocation208_spill] sm:$0xff] }
 0xb97   :  { %6915 = vmatpush.msrb.mxu2 %v18308_v1  ;;  %6776 = vmatmul.f32.vlgmr.msrb.gmra.mxu0 %v14302_v58  ;;  %v18319_v42 = vld [vmem:[#allocation352_spill] sm:$0xff]  ;;  %v18320_v1 = vld [vmem:[#allocation617_spill] sm:$0xff] }
 0xb98   :  { %6784 = vmatpush.msrb.mxu1 %v18310_v21  ;;  %6916 = vmatmul.f32.vlgmr.msrb.gmra.mxu2 %v14302_v58  ;;  %v18322_v21 = vld [vmem:[#allocation653_spill] sm:$0xff] }
 0xb99   :  { %6980 = vmatpush.msra.mxu2 %v18311_v25  ;;  %6920 = vmatpush.msrb.mxu0 %v18314_v33  ;;  %v18323_v25 = vld [vmem:[#allocation345_spill] sm:$0xff]  ;;  %v18326_v33 = vld [vmem:[#allocation646_spill] sm:$0xff] }
 0xb9a   :  { %6785 = vmatpush.msrb.mxu1 %v18312_v52  ;;  %6892 = vmatpush.msra.mxu3 %v18315_v47  ;;  %v18324_v52 = vld [vmem:[#allocation610_spill] sm:$0xff] }
 0xb9b   :  { %6981 = vmatpush.msra.mxu2 %v18313_v41  ;;  %6921 = vmatpush.msrb.mxu0 %v18318_v16  ;;  %v18325_v41 = vld [vmem:[#allocation194_spill] sm:$0xff]  ;;  %v5565_v16 = vpop.f32.mrf.mxu3 }
 0xb9c   :  { %6786 = vmatpush.msrb.mxu1 %v18316_v8  ;;  %6893 = vmatpush.msra.mxu3 %v18319_v42  ;;  %v18327_v47 = vld [vmem:[#allocation338_spill] sm:$0xff]  ;;  %v18328_v8 = vld [vmem:[#allocation603_spill] sm:$0xff]  ;;  %v5585_v42 = vpop.f32.mrf.mxu2 }
 0xb9d   :  { %6982 = vmatpush.msra.mxu2 %v18317_v14  ;;  %6922 = vmatpush.msrb.mxu0 %v18322_v21  ;;  %v18329_v14 = vld [vmem:[#allocation187_spill] sm:$0xff] }
 0xb9e   :  { %6787 = vmatpush.msrb.mxu1 %v18320_v1  ;;  %6894 = vmatpush.msra.mxu3 %v18323_v25  ;;  %v18330_v1 = vld [vmem:[#allocation596_spill] sm:$0xff]  ;;  %v18332_v21 = vld [vmem:[#allocation639_spill] sm:$0xff]  ;;  %v5605_v25 = vpop.f32.mrf.mxu0 }
 0xb9f   :  { %6983 = vmatpush.msra.mxu2 %v18321_v2  ;;  %6923 = vmatpush.msrb.mxu0 %v18326_v33  ;;  %v18331_v2 = vld [vmem:[#allocation180_spill] sm:$0xff]  ;;  %v5586_v33 = vadd.f32 %v5585_v42, %v5565_v16 }
 0xba0   :  { %6788 = vmatpush.msrb.mxu1 %v18324_v52  ;;  %6895 = vmatpush.msra.mxu3 %v18327_v47  ;;  %v18333_v52 = vld [vmem:[#allocation589_spill] sm:$0xff]  ;;  %v18335_v47 = vld [vmem:[#allocation632_spill] sm:$0xff] }
 0xba1   :  { %6984 = vmatpush.msra.mxu2 %v18325_v41  ;;  %6856 = vmatmul.f32.vlgmr.msra.gmra.mxu0 %v14281_v24  ;;  %v18334_v41 = vld [vmem:[#allocation173_spill] sm:$0xff]  ;;  %v5606_v4 = vadd.f32 %v5605_v25, %v5586_v33  ;;  %v18343_v16 = vld [vmem:[#allocation152_spill] sm:$0xff]  ;;  %v18347_v33 = vld [vmem:[#allocation331_spill] sm:$0xff] }
 0xba2   :  { %6789 = vmatpush.msrb.mxu1 %v18328_v8  ;;  %6924 = vmatpush.msrb.mxu0 %v18332_v21  ;;  %v18336_v8 = vld [vmem:[#allocation582_spill] sm:$0xff]  ;;  %v18345_v25 = vld [vmem:[#allocation561_spill] sm:$0xff] }
 0xba3   :  { %6985 = vmatpush.msra.mxu2 %v18329_v14  ;;  %v18337_v14 = vld [vmem:[#allocation166_spill] sm:$0xff]  ;;  %v5645_v18 = vpop.f32.mrf.mxu3 }
 0xba4   :  { %6790 = vmatpush.msrb.mxu1 %v18330_v1  ;;  %6925 = vmatpush.msrb.mxu0 %v18335_v47  ;;  %v18339_v1 = vld [vmem:[#allocation575_spill] sm:$0xff] }
 0xba5   :  { %6986 = vmatpush.msra.mxu2 %v18331_v2  ;;  %v18340_v2 = vld [vmem:[#allocation159_spill] sm:$0xff] }
 0xba6   :  { %6791 = vmatpush.msrb.mxu1 %v18333_v52  ;;  %6926 = vmatpush.msrb.mxu0 %v18338_v26  ;;  %v18344_v47 = vld [vmem:[#allocation611_spill] sm:$0xff]  ;;  %v18346_v26 = vld [vmem:[#allocation145_spill] sm:$0xff] }
 0xba7   :  { %6987 = vmatpush.msra.mxu2 %v18334_v41  ;;  %v18342_v41 = vld [vmem:[#allocation568_spill] sm:$0xff] }
 0xba8   :  { %6792 = vmatpush.msrb.mxu1 %v18336_v8  ;;  %6927 = vmatpush.msrb.mxu0 %v18341_v36  ;;  %v5665_v8 = vpop.f32.mrf.mxu2  ;;  %v5685_v36 = vpop.f32.mrf.mxu0 }
 0xba9   :  { %6988 = vmatpush.msra.mxu2 %v18337_v14  ;;  %v5625_v21 = vpop.f32.mrf.mxu1 }
 0xbaa   :  { %6793 = vmatpush.msrb.mxu1 %v18339_v1  ;;  %v5626_v52 = vadd.f32 %v5625_v21, %v5606_v4  ;;  %6928 = vmatpush.msrb.mxu0 %v18344_v47  ;;  %v18348_v1 = vld [vmem:[#allocation604_spill] sm:$0xff]  ;;  %v18349_v4 = vld [vmem:[#allocation138_spill] sm:$0xff]  ;;  %v18350_v21 = vld [vmem:[#allocation325_spill] sm:$0xff] }
 0xbab   :  { %6989 = vmatpush.msra.mxu2 %v18340_v2  ;;  %v18354_v47 = vld [vmem:[#allocation590_spill] sm:$0xff] }
 0xbac   :  { %6794 = vmatpush.msrb.mxu1 %v18342_v41  ;;  %v5646_v42 = vadd.f32 %v5645_v18, %v5626_v52  ;;  %6929 = vmatpush.msrb.mxu0 %v18348_v1  ;;  %v18351_v41 = vld [vmem:[#allocation597_spill] sm:$0xff]  ;;  %v18352_v18 = vld [vmem:[#allocation131_spill] sm:$0xff] }
 0xbad   :  { %6990 = vmatpush.msra.mxu2 %v18343_v16  ;;  %v18353_v16 = vld [vmem:[#allocation319_spill] sm:$0xff]  ;;  %v18360_v1 = vld [vmem:[#allocation305_spill] sm:$0xff] }
 0xbae   :  { %6795 = vmatpush.msrb.mxu1 %v18345_v25  ;;  %v5666_v14 = vadd.f32 %v5665_v8, %v5646_v42  ;;  %6930 = vmatpush.msrb.mxu0 %v18351_v41  ;;  %v18355_v25 = vld [vmem:[#allocation124_spill] sm:$0xff]  ;;  %v18356_v42 = vld [vmem:[#allocation803_spill] sm:$0xff]  ;;  %v18365_v41 = vld [vmem:[#allocation569_spill] sm:$0xff] }
 0xbaf   :  { %6991 = vmatpush.msra.mxu2 %v18346_v26  ;;  %v18357_v26 = vld [vmem:[#allocation312_spill] sm:$0xff] }
 0xbb0   :  { %6860 = vmatpush.msra.mxu1 %v18347_v33  ;;  %v5686_v2 = vadd.f32 %v5685_v36, %v5666_v14  ;;  %6931 = vmatpush.msrb.mxu0 %v18354_v47  ;;  %v18358_v33 = vld [vmem:[#allocation583_spill] sm:$0xff]  ;;  %v18359_v14 = vld [vmem:[#allocation117_spill] sm:$0xff]  ;;  %v18361_v36 = vld [vmem:[#allocation668_spill] sm:$0xff] }
 0xbb1   :  { %6992 = vmatpush.msra.mxu2 %v18349_v4  ;;  %v18362_v4 = vld [vmem:[#allocation576_spill] sm:$0xff] }
 0xbb2   :  { %6861 = vmatpush.msra.mxu1 %v18350_v21  ;;  %v5840_v52 = vrot.slane %v5686_v2, 3  ;;  %6932 = vmatpush.msrb.mxu0 %v18358_v33  ;;  %v18363_v2 = vld [vmem:[#allocation298_spill] sm:$0xff]  ;;  %v18364_v21 = vld [vmem:[#allocation661_spill] sm:$0xff] }
 0xbb3   :  { %6993 = vmatpush.msra.mxu2 %v18352_v18  ;;  %v18366_v18 = vld [vmem:[#allocation291_spill] sm:$0xff]  ;;  %v18372_v33 = vld [vmem:[#allocation277_spill] sm:$0xff] }
 0xbb4   :  { %6862 = vmatpush.msra.mxu1 %v18353_v16  ;;  %v5854_v8 = vadd.f32 %v5840_v52, %v18356_v42  ;;  %6933 = vmatpush.msrb.mxu0 %v18362_v4  ;;  %v18367_v52 = vld [vmem:[#allocation654_spill] sm:$0xff]  ;;  %v18370_v42 = vld [vmem:[#allocation332_spill] sm:$0xff] }
 0xbb5   :  { %6994 = vmatpush.msra.mxu2 %v18355_v25  ;;  %v18368_v16 = vld [vmem:[#allocation562_spill] sm:$0xff]  ;;  %v18369_v25 = vld [vmem:[#allocation284_spill] sm:$0xff] }
 0xbb6   :  { %6863 = vmatpush.msra.mxu1 %v18357_v26  ;;  %7804 = vtanh.f32 %v5854_v8  ;;  %6934 = vmatpush.msrb.mxu0 %v18365_v41  ;;  %v18371_v26 = vld [vmem:[#allocation647_spill] sm:$0xff]  ;;  %v18376_v4 = vld [vmem:[#allocation320_spill] sm:$0xff]  ;;  %v18379_v41 = vld [vmem:[#allocation313_spill] sm:$0xff] }
 0xbb7   :  { %6995 = vmatpush.msra.mxu2 %v18359_v14  ;;  %v18373_v14 = vld [vmem:[#allocation326_spill] sm:$0xff] }
 0xbb8   :  { %6864 = vmatpush.msra.mxu1 %v18360_v1  ;;  %6996 = vmatmul.f32.vlgmr.msra.gmra.mxu2 %v14281_v24  ;;  %v18374_v1 = vld [vmem:[#allocation640_spill] sm:$0xff] }
 0xbb9   :  { %7060 = vmatpush.msrb.mxu2 %v18361_v36  ;;  %6935 = vmatpush.msrb.mxu0 %v18368_v16  ;;  %v18375_v36 = vld [vmem:[#allocation270_spill] sm:$0xff] }
 0xbba   :  { %6865 = vmatpush.msra.mxu1 %v18363_v2  ;;  %v18377_v2 = vld [vmem:[#allocation633_spill] sm:$0xff]  ;;  %v18382_v16 = vld [vmem:[#allocation306_spill] sm:$0xff] }
 0xbbb   :  { %7061 = vmatpush.msrb.mxu2 %v18364_v21  ;;  %7000 = vmatpush.msra.mxu0 %v18370_v42  ;;  %v18378_v21 = vld [vmem:[#allocation263_spill] sm:$0xff] }
 0xbbc   :  { %6866 = vmatpush.msra.mxu1 %v18366_v18  ;;  %v7805_v47 = vpop.eup %7804  ;;  %v18380_v18 = vld [vmem:[#allocation626_spill] sm:$0xff]  ;;  %v18385_v42 = vld [vmem:[#allocation299_spill] sm:$0xff] }
 0xbbd   :  { %7062 = vmatpush.msrb.mxu2 %v18367_v52  ;;  %5875 = vst [vmem:[#allocation1 + $0x2d] sm:$0xff] %v7805_v47  ;;  %v14372_v8 = vrot.slane %v7805_v47, 5  ;;  %7001 = vmatpush.msra.mxu0 %v18373_v14  ;;  %v18381_v52 = vld [vmem:[#allocation256_spill] sm:$0xff]  ;;  %v18383_v47 = vld [vmem:[#allocation619_spill] sm:$0xff] }
 0xbbe   :  { %6867 = vmatpush.msra.mxu1 %v18369_v25  ;;  %v18384_v25 = vld [vmem:[#allocation249_spill] sm:$0xff]  ;;  %v18388_v14 = vld [vmem:[#allocation292_spill] sm:$0xff] }
 0xbbf   :  { %7063 = vmatpush.msrb.mxu2 %v18371_v26  ;;  %6796 = vmatmul.f32.vlgmr.msrb.gmra.mxu1 %v14372_v8  ;;  %v18386_v26 = vld [vmem:[#allocation612_spill] sm:$0xff] }
 0xbc0   :  { %6868 = vmatpush.msra.mxu1 %v18372_v33  ;;  %7002 = vmatpush.msra.mxu0 %v18376_v4  ;;  %v18387_v33 = vld [vmem:[#allocation242_spill] sm:$0xff]  ;;  %v18391_v4 = vld [vmem:[#allocation285_spill] sm:$0xff] }
 0xbc1   :  { %7064 = vmatpush.msrb.mxu2 %v18374_v1  ;;  %6936 = vmatmul.f32.vlgmr.msrb.gmra.mxu0 %v14372_v8  ;;  %v18389_v1 = vld [vmem:[#allocation605_spill] sm:$0xff] }
 0xbc2   :  { %6869 = vmatpush.msra.mxu1 %v18375_v36  ;;  %7003 = vmatpush.msra.mxu0 %v18379_v41  ;;  %v18390_v36 = vld [vmem:[#allocation235_spill] sm:$0xff]  ;;  %v18394_v41 = vld [vmem:[#allocation278_spill] sm:$0xff] }
 0xbc3   :  { %7065 = vmatpush.msrb.mxu2 %v18377_v2  ;;  %v18392_v2 = vld [vmem:[#allocation598_spill] sm:$0xff] }
 0xbc4   :  { %6870 = vmatpush.msra.mxu1 %v18378_v21  ;;  %7004 = vmatpush.msra.mxu0 %v18382_v16  ;;  %v18393_v21 = vld [vmem:[#allocation228_spill] sm:$0xff]  ;;  %v18397_v16 = vld [vmem:[#allocation271_spill] sm:$0xff] }
 0xbc5   :  { %7066 = vmatpush.msrb.mxu2 %v18380_v18  ;;  %v18395_v18 = vld [vmem:[#allocation591_spill] sm:$0xff] }
 0xbc6   :  { %6871 = vmatpush.msra.mxu1 %v18381_v52  ;;  %7005 = vmatpush.msra.mxu0 %v18385_v42  ;;  %v18396_v52 = vld [vmem:[#allocation779_spill] sm:$0xff]  ;;  %v18400_v42 = vld [vmem:[#allocation264_spill] sm:$0xff] }
 0xbc7   :  { %7067 = vmatpush.msrb.mxu2 %v18383_v47  ;;  %v18398_v47 = vld [vmem:[#allocation584_spill] sm:$0xff] }
 0xbc8   :  { %6872 = vmatpush.msra.mxu1 %v18384_v25  ;;  %7006 = vmatpush.msra.mxu0 %v18388_v14  ;;  %v18399_v25 = vld [vmem:[#allocation772_spill] sm:$0xff]  ;;  %v18403_v14 = vld [vmem:[#allocation257_spill] sm:$0xff] }
 0xbc9   :  { %7068 = vmatpush.msrb.mxu2 %v18386_v26  ;;  %v18401_v26 = vld [vmem:[#allocation577_spill] sm:$0xff] }
 0xbca   :  { %6873 = vmatpush.msra.mxu1 %v18387_v33  ;;  %7007 = vmatpush.msra.mxu0 %v18391_v4  ;;  %v18402_v33 = vld [vmem:[#allocation765_spill] sm:$0xff]  ;;  %v18406_v4 = vld [vmem:[#allocation250_spill] sm:$0xff] }
 0xbcb   :  { %7069 = vmatpush.msrb.mxu2 %v18389_v1  ;;  %v18404_v1 = vld [vmem:[#allocation570_spill] sm:$0xff] }
 0xbcc   :  { %6874 = vmatpush.msra.mxu1 %v18390_v36  ;;  %7008 = vmatpush.msra.mxu0 %v18394_v41  ;;  %v18405_v36 = vld [vmem:[#allocation758_spill] sm:$0xff]  ;;  %v18409_v41 = vld [vmem:[#allocation333_spill] sm:$0xff] }
 0xbcd   :  { %7070 = vmatpush.msrb.mxu2 %v18392_v2  ;;  %v18407_v2 = vld [vmem:[#allocation563_spill] sm:$0xff] }
 0xbce   :  { %6875 = vmatpush.msra.mxu1 %v18393_v21  ;;  %7009 = vmatpush.msra.mxu0 %v18397_v16  ;;  %v18408_v21 = vld [vmem:[#allocation751_spill] sm:$0xff] }
 0xbcf   :  { %7071 = vmatpush.msrb.mxu2 %v18395_v18  ;;  %6876 = vmatmul.f32.vlgmr.msra.gmra.mxu1 %v14166_v35  ;;  %v18410_v18 = vld [vmem:[#allocation243_spill] sm:$0xff] }
 0xbd0   :  { %6940 = vmatpush.msrb.mxu1 %v18396_v52  ;;  %7010 = vmatpush.msra.mxu0 %v18400_v42  ;;  %v18411_v52 = vld [vmem:[#allocation744_spill] sm:$0xff]  ;;  %v18412_v16 = vld [vmem:[#allocation327_spill] sm:$0xff]  ;;  %v18415_v42 = vld [vmem:[#allocation321_spill] sm:$0xff] }
 0xbd1   :  { %7072 = vmatpush.msrb.mxu2 %v18398_v47  ;;  %v18413_v47 = vld [vmem:[#allocation236_spill] sm:$0xff] }
 0xbd2   :  { %6941 = vmatpush.msrb.mxu1 %v18399_v25  ;;  %7011 = vmatpush.msra.mxu0 %v18403_v14  ;;  %v18414_v25 = vld [vmem:[#allocation737_spill] sm:$0xff]  ;;  %v18418_v14 = vld [vmem:[#allocation314_spill] sm:$0xff] }
 0xbd3   :  { %7073 = vmatpush.msrb.mxu2 %v18401_v26  ;;  %v18416_v26 = vld [vmem:[#allocation229_spill] sm:$0xff] }
 0xbd4   :  { %6942 = vmatpush.msrb.mxu1 %v18402_v33  ;;  %7012 = vmatpush.msra.mxu0 %v18406_v4  ;;  %v18417_v33 = vld [vmem:[#allocation730_spill] sm:$0xff]  ;;  %v5705_v4 = vpop.f32.mrf.mxu1 }
 0xbd5   :  { %7074 = vmatpush.msrb.mxu2 %v18404_v1  ;;  %v18419_v1 = vld [vmem:[#allocation780_spill] sm:$0xff] }
 0xbd6   :  { %6943 = vmatpush.msrb.mxu1 %v18405_v36  ;;  %7013 = vmatpush.msra.mxu0 %v18410_v18  ;;  %v18420_v36 = vld [vmem:[#allocation723_spill] sm:$0xff]  ;;  %v5725_v18 = vpop.f32.mrf.mxu3 }
 0xbd7   :  { %7075 = vmatpush.msrb.mxu2 %v18407_v2  ;;  %v18421_v2 = vld [vmem:[#allocation307_spill] sm:$0xff] }
 0xbd8   :  { %6944 = vmatpush.msrb.mxu1 %v18408_v21  ;;  %7076 = vmatmul.f32.vlgmr.msrb.gmra.mxu2 %v14372_v8  ;;  %v18422_v21 = vld [vmem:[#allocation773_spill] sm:$0xff] }
 0xbd9   :  { %7140 = vmatpush.msra.mxu2 %v18409_v41  ;;  %7014 = vmatpush.msra.mxu0 %v18413_v47  ;;  %v18423_v41 = vld [vmem:[#allocation716_spill] sm:$0xff]  ;;  %v5726_v47 = vadd.f32 %v5725_v18, %v5705_v4  ;;  %v5765_v18 = vpop.f32.mrf.mxu0 }
 0xbda   :  { %6945 = vmatpush.msrb.mxu1 %v18411_v52  ;;  %v18424_v52 = vld [vmem:[#allocation300_spill] sm:$0xff] }
 0xbdb   :  { %7141 = vmatpush.msra.mxu2 %v18412_v16  ;;  %7015 = vmatpush.msra.mxu0 %v18416_v26  ;;  %v18425_v16 = vld [vmem:[#allocation766_spill] sm:$0xff]  ;;  %v18428_v26 = vld [vmem:[#allocation759_spill] sm:$0xff]  ;;  %v18435_v4 = vld [vmem:[#allocation688_spill] sm:$0xff] }
 0xbdc   :  { %6946 = vmatpush.msrb.mxu1 %v18414_v25  ;;  %7016 = vmatmul.f32.vlgmr.msra.gmra.mxu0 %v14166_v35  ;;  %v18426_v25 = vld [vmem:[#allocation709_spill] sm:$0xff] }
 0xbdd   :  { %7142 = vmatpush.msra.mxu2 %v18415_v42  ;;  %7080 = vmatpush.msrb.mxu0 %v18419_v1  ;;  %v18427_v42 = vld [vmem:[#allocation293_spill] sm:$0xff]  ;;  %v18430_v1 = vld [vmem:[#allocation286_spill] sm:$0xff] }
 0xbde   :  { %6947 = vmatpush.msrb.mxu1 %v18417_v33  ;;  %v18429_v33 = vld [vmem:[#allocation702_spill] sm:$0xff] }
 0xbdf   :  { %7143 = vmatpush.msra.mxu2 %v18418_v14  ;;  %7081 = vmatpush.msrb.mxu0 %v18422_v21  ;;  %v5745_v14 = vpop.f32.mrf.mxu2  ;;  %v18432_v21 = vld [vmem:[#allocation695_spill] sm:$0xff] }
 0xbe0   :  { %6948 = vmatpush.msrb.mxu1 %v18420_v36  ;;  %v18431_v36 = vld [vmem:[#allocation752_spill] sm:$0xff] }
 0xbe1   :  { %7144 = vmatpush.msra.mxu2 %v18421_v2  ;;  %7082 = vmatpush.msrb.mxu0 %v18425_v16  ;;  %v5746_v2 = vadd.f32 %v5745_v14, %v5726_v47  ;;  %v18436_v16 = vld [vmem:[#allocation272_spill] sm:$0xff]  ;;  %v18441_v14 = vld [vmem:[#allocation674_spill] sm:$0xff] }
 0xbe2   :  { %6949 = vmatpush.msrb.mxu1 %v18423_v41  ;;  %v18433_v41 = vld [vmem:[#allocation279_spill] sm:$0xff] }
 0xbe3   :  { %7145 = vmatpush.msra.mxu2 %v18424_v52  ;;  %7083 = vmatpush.msrb.mxu0 %v18428_v26  ;;  %v18434_v52 = vld [vmem:[#allocation745_spill] sm:$0xff]  ;;  %v5766_v26 = vadd.f32 %v5765_v18, %v5746_v2 }
 0xbe4   :  { %6950 = vmatpush.msrb.mxu1 %v18426_v25  ;;  %v18437_v25 = vld [vmem:[#allocation738_spill] sm:$0xff]  ;;  %v18446_v2 = vld [vmem:[#allocation437_spill] sm:$0xff] }
 0xbe5   :  { %7146 = vmatpush.msra.mxu2 %v18427_v42  ;;  %7084 = vmatpush.msrb.mxu0 %v18431_v36  ;;  %v18438_v42 = vld [vmem:[#allocation681_spill] sm:$0xff] }
 0xbe6   :  { %6951 = vmatpush.msrb.mxu1 %v18429_v33  ;;  %v18439_v33 = vld [vmem:[#allocation265_spill] sm:$0xff] }
 0xbe7   :  { %7147 = vmatpush.msra.mxu2 %v18430_v1  ;;  %7085 = vmatpush.msrb.mxu0 %v18434_v52  ;;  %v18440_v1 = vld [vmem:[#allocation731_spill] sm:$0xff]  ;;  %v18443_v52 = vld [vmem:[#allocation444_spill] sm:$0xff] }
 0xbe8   :  { %6952 = vmatpush.msrb.mxu1 %v18432_v21  ;;  %v5805_v21 = vpop.f32.mrf.mxu3 }
 0xbe9   :  { %7148 = vmatpush.msra.mxu2 %v18433_v41  ;;  %7086 = vmatpush.msrb.mxu0 %v18437_v25  ;;  %v18442_v41 = vld [vmem:[#allocation258_spill] sm:$0xff]  ;;  %v5825_v25 = vpop.f32.mrf.mxu2 }
 0xbea   :  { %6953 = vmatpush.msrb.mxu1 %v18435_v4 }
 0xbeb   :  { %7149 = vmatpush.msra.mxu2 %v18436_v16  ;;  %7087 = vmatpush.msrb.mxu0 %v18440_v1  ;;  %v5785_v47 = vpop.f32.mrf.mxu1  ;;  %v18444_v16 = vld [vmem:[#allocation724_spill] sm:$0xff]  ;;  %v18449_v1 = vld [vmem:[#allocation430_spill] sm:$0xff] }
 0xbec   :  { %6954 = vmatpush.msrb.mxu1 %v18438_v42  ;;  %v5786_v36 = vadd.f32 %v5785_v47, %v5766_v26  ;;  %v18447_v42 = vld [vmem:[#allocation717_spill] sm:$0xff]  ;;  %v18450_v47 = vld [vmem:[#allocation710_spill] sm:$0xff] }
 0xbed   :  { %7150 = vmatpush.msra.mxu2 %v18439_v33  ;;  %7088 = vmatpush.msrb.mxu0 %v18444_v16  ;;  %v18448_v33 = vld [vmem:[#allocation244_spill] sm:$0xff] }
 0xbee   :  { %6955 = vmatpush.msrb.mxu1 %v18441_v14  ;;  %v5806_v4 = vadd.f32 %v5805_v21, %v5786_v36  ;;  %v18451_v14 = vld [vmem:[#allocation237_spill] sm:$0xff]  ;;  %v18452_v36 = vld [vmem:[#allocation423_spill] sm:$0xff]  ;;  %v18453_v21 = vld [vmem:[#allocation804_spill] sm:$0xff] }
 0xbef   :  { %7151 = vmatpush.msra.mxu2 %v18442_v41  ;;  %7089 = vmatpush.msrb.mxu0 %v18447_v42  ;;  %v18457_v16 = vld [vmem:[#allocation696_spill] sm:$0xff]  ;;  %v18461_v42 = vld [vmem:[#allocation774_spill] sm:$0xff] }
 0xbf0   :  { %7020 = vmatpush.msra.mxu1 %v18443_v52  ;;  %v5826_v18 = vadd.f32 %v5825_v25, %v5806_v4  ;;  %v18454_v52 = vld [vmem:[#allocation703_spill] sm:$0xff]  ;;  %v18456_v4 = vld [vmem:[#allocation416_spill] sm:$0xff]  ;;  %v18458_v25 = vld [vmem:[#allocation781_spill] sm:$0xff] }
 0xbf1   :  { %7152 = vmatpush.msra.mxu2 %v18445_v44  ;;  %7090 = vmatpush.msrb.mxu0 %v18450_v47  ;;  %v18455_v44 = vld [vmem:[#allocation230_spill] sm:$0xff]  ;;  %v18465_v47 = vld [vmem:[#allocation395_spill] sm:$0xff] }
 0xbf2   :  { %7021 = vmatpush.msra.mxu1 %v18446_v2  ;;  %v5841_v26 = vrot.slane %v5826_v18, 3  ;;  %v18459_v2 = vld [vmem:[#allocation409_spill] sm:$0xff] }
 0xbf3   :  { %7153 = vmatpush.msra.mxu2 %v18448_v33  ;;  %7091 = vmatpush.msrb.mxu0 %v18454_v52  ;;  %v18460_v18 = vld [vmem:[#allocation689_spill] sm:$0xff]  ;;  %v18462_v33 = vld [vmem:[#allocation402_spill] sm:$0xff]  ;;  %v18468_v52 = vld [vmem:[#allocation388_spill] sm:$0xff] }
 0xbf4   :  { %7022 = vmatpush.msra.mxu1 %v18449_v1  ;;  %v5855_v41 = vadd.f32 %v5841_v26, %v18453_v21  ;;  %v18463_v1 = vld [vmem:[#allocation682_spill] sm:$0xff]  ;;  %v18464_v26 = vld [vmem:[#allocation767_spill] sm:$0xff] }
 0xbf5   :  { %7154 = vmatpush.msra.mxu2 %v18451_v14  ;;  %7092 = vmatpush.msrb.mxu0 %v18457_v16  ;;  %v18471_v16 = vld [vmem:[#allocation381_spill] sm:$0xff] }
 0xbf6   :  { %7023 = vmatpush.msra.mxu1 %v18452_v36  ;;  %7806 = vtanh.f32 %v5855_v41  ;;  %v18466_v36 = vld [vmem:[#allocation675_spill] sm:$0xff]  ;;  %v18467_v41 = vld [vmem:[#allocation760_spill] sm:$0xff] }
 0xbf7   :  { %7155 = vmatpush.msra.mxu2 %v18455_v44  ;;  %7093 = vmatpush.msrb.mxu0 %v18460_v18  ;;  %v18469_v44 = vld [vmem:[#allocation445_spill] sm:$0xff]  ;;  %v18474_v18 = vld [vmem:[#allocation374_spill] sm:$0xff] }
 0xbf8   :  { %7024 = vmatpush.msra.mxu1 %v18456_v4  ;;  %7156 = vmatmul.f32.vlgmr.msra.gmra.mxu2 %v14166_v35  ;;  %v18470_v4 = vld [vmem:[#allocation753_spill] sm:$0xff] }
 0xbf9   :  { %7220 = vmatpush.msrb.mxu2 %v18458_v25  ;;  %7094 = vmatpush.msrb.mxu0 %v18463_v1  ;;  %v18472_v25 = vld [vmem:[#allocation438_spill] sm:$0xff]  ;;  %v18477_v1 = vld [vmem:[#allocation431_spill] sm:$0xff] }
 0xbfa   :  { %7025 = vmatpush.msra.mxu1 %v18459_v2  ;;  %v18473_v2 = vld [vmem:[#allocation746_spill] sm:$0xff] }
 0xbfb   :  { %7221 = vmatpush.msrb.mxu2 %v18461_v42  ;;  %7095 = vmatpush.msrb.mxu0 %v18466_v36  ;;  %v18475_v42 = vld [vmem:[#allocation110_spill] sm:$0xff]  ;;  %v18480_v36 = vld [vmem:[#allocation104_spill] sm:$0xff] }
 0xbfc   :  { %7026 = vmatpush.msra.mxu1 %v18462_v33  ;;  %v7807_v14 = vpop.eup %7806  ;;  %v18476_v33 = vld [vmem:[#allocation739_spill] sm:$0xff] }
 0xbfd   :  { %7222 = vmatpush.msrb.mxu2 %v18464_v26  ;;  %5876 = vst [vmem:[#allocation1 + $0x36] sm:$0xff] %v7807_v14  ;;  %v14476_v21 = vrot.slane %v7807_v14, 5  ;;  %7160 = vmatpush.msra.mxu0 %v18469_v44  ;;  %v18478_v26 = vld [vmem:[#allocation367_spill] sm:$0xff]  ;;  %v18479_v14 = vld [vmem:[#allocation732_spill] sm:$0xff] }
 0xbfe   :  { %7027 = vmatpush.msra.mxu1 %v18465_v47  ;;  %v18483_v44 = vld [vmem:[#allocation360_spill] sm:$0xff] }
 0xbff   :  { %7223 = vmatpush.msrb.mxu2 %v18467_v41  ;;  %7161 = vmatpush.msra.mxu0 %v18472_v25  ;;  %v18486_v25 = vld [vmem:[#allocation417_spill] sm:$0xff] }
 0xc00   :  { %7028 = vmatpush.msra.mxu1 %v18468_v52  ;;  %6816 = vmatmul.f32.vlgmr.msrb.gmra.mxu3 %v14476_v21  ;;  %v18482_v52 = vld [vmem:[#allocation424_spill] sm:$0xff]  ;;  %v18718_v41 = vld [vmem:[#allocation621_spill] sm:$0xff] }
 0xc01   :  { %7224 = vmatpush.msrb.mxu2 %v18470_v4  ;;  %6956 = vmatmul.f32.vlgmr.msrb.gmra.mxu1 %v14476_v21  ;;  %v18484_v4 = vld [vmem:[#allocation725_spill] sm:$0xff] }
 0xc02   :  { %7029 = vmatpush.msra.mxu1 %v18471_v16  ;;  %6960 = vmatpush.msrb.mxu3 %v18475_v42  ;;  %v18485_v16 = vld [vmem:[#allocation98_spill] sm:$0xff]  ;;  %v18489_v42 = vld [vmem:[#allocation92_spill] sm:$0xff] }
 0xc03   :  { %7225 = vmatpush.msrb.mxu2 %v18473_v2  ;;  %7096 = vmatmul.f32.vlgmr.msrb.gmra.mxu0 %v14476_v21  ;;  %v18487_v2 = vld [vmem:[#allocation353_spill] sm:$0xff] }
 0xc04   :  { %7030 = vmatpush.msra.mxu1 %v18474_v18  ;;  %7162 = vmatpush.msra.mxu0 %v18477_v1  ;;  %v5878_v47 = vld [vmem:[#allocation1 + $0x5] ss:$9 sm:$0xff] }
 0xc05   :  { %7226 = vmatpush.msrb.mxu2 %v18476_v33  ;;  %6961 = vmatpush.msrb.mxu3 %v18480_v36  ;;  %7731 = vst.msk [vmem:[%s15005_s7 + $0x2] ss:$4 sm:$0x7f] %vm13608_vm1, %v5878_v47  ;;  %v18488_v18 = vld [vmem:[#allocation718_spill] sm:$0xff]  ;;  %v18493_v47 = vld [vmem:[#allocation85_spill] sm:$0xff]  ;;  %v18495_v36 = vld [vmem:[#allocation339_spill] sm:$0xff] }
 0xc06   :  { %7031 = vmatpush.msra.mxu1 %v18478_v26  ;;  %7163 = vmatpush.msra.mxu0 %v18482_v52  ;;  %v18490_v33 = vld [vmem:[#allocation410_spill] sm:$0xff]  ;;  %v18492_v26 = vld [vmem:[#allocation711_spill] sm:$0xff]  ;;  %v18496_v52 = vld [vmem:[#allocation704_spill] sm:$0xff] }
 0xc07   :  { %7227 = vmatpush.msrb.mxu2 %v18479_v14  ;;  %6962 = vmatpush.msrb.mxu3 %v18485_v16  ;;  %v18491_v1 = vld [vmem:[#allocation346_spill] sm:$0xff]  ;;  %v18494_v14 = vld [vmem:[#allocation403_spill] sm:$0xff]  ;;  %v18499_v16 = vld [vmem:[#allocation396_spill] sm:$0xff] }
 0xc08   :  { %7032 = vmatpush.msra.mxu1 %v18483_v44  ;;  %7164 = vmatpush.msra.mxu0 %v18486_v25  ;;  %v18497_v44 = vld [vmem:[#allocation78_spill] sm:$0xff]  ;;  %v18500_v25 = vld [vmem:[#allocation697_spill] sm:$0xff] }
 0xc09   :  { %7228 = vmatpush.msrb.mxu2 %v18484_v4  ;;  %6963 = vmatpush.msrb.mxu3 %v18489_v42  ;;  %v18498_v4 = vld [vmem:[#allocation111_spill] sm:$0xff]  ;;  %v18503_v42 = vld [vmem:[#allocation389_spill] sm:$0xff] }
 0xc0a   :  { %7033 = vmatpush.msra.mxu1 %v18487_v2  ;;  %7165 = vmatpush.msra.mxu0 %v18490_v33  ;;  %v18501_v2 = vld [vmem:[#allocation71_spill] sm:$0xff]  ;;  %v18504_v33 = vld [vmem:[#allocation690_spill] sm:$0xff] }
 0xc0b   :  { %7229 = vmatpush.msrb.mxu2 %v18488_v18  ;;  %6896 = vmatmul.f32.vlgmr.msra.gmra.mxu3 %v14168_v56  ;;  %v18502_v18 = vld [vmem:[#allocation105_spill] sm:$0xff] }
 0xc0c   :  { %7034 = vmatpush.msra.mxu1 %v18491_v1  ;;  %6964 = vmatpush.msrb.mxu3 %v18493_v47  ;;  %v18505_v1 = vld [vmem:[#allocation64_spill] sm:$0xff]  ;;  %v18507_v47 = vld [vmem:[#allocation382_spill] sm:$0xff] }
 0xc0d   :  { %7230 = vmatpush.msrb.mxu2 %v18492_v26  ;;  %7166 = vmatpush.msra.mxu0 %v18494_v14  ;;  %v18506_v26 = vld [vmem:[#allocation99_spill] sm:$0xff] }
 0xc0e   :  { %7035 = vmatpush.msra.mxu1 %v18495_v36  ;;  %6965 = vmatpush.msrb.mxu3 %v18497_v44  ;;  %v18508_v14 = vld [vmem:[#allocation683_spill] sm:$0xff]  ;;  %v18509_v36 = vld [vmem:[#allocation57_spill] sm:$0xff] }
 0xc0f   :  { %7231 = vmatpush.msrb.mxu2 %v18496_v52  ;;  %7036 = vmatmul.f32.vlgmr.msra.gmra.mxu1 %v14168_v56  ;;  %v18510_v52 = vld [vmem:[#allocation93_spill] sm:$0xff]  ;;  %v18511_v44 = vld [vmem:[#allocation375_spill] sm:$0xff] }
 0xc10   :  { %7100 = vmatpush.msrb.mxu1 %v18498_v4  ;;  %7167 = vmatpush.msra.mxu0 %v18499_v16  ;;  %v18512_v4 = vld [vmem:[#allocation676_spill] sm:$0xff]  ;;  %v18513_v16 = vld [vmem:[#allocation50_spill] sm:$0xff] }
 0xc11   :  { %7232 = vmatpush.msrb.mxu2 %v18500_v25  ;;  %6966 = vmatpush.msrb.mxu3 %v18501_v2  ;;  %v18514_v25 = vld [vmem:[#allocation86_spill] sm:$0xff]  ;;  %v18515_v2 = vld [vmem:[#allocation368_spill] sm:$0xff] }
 0xc12   :  { %7101 = vmatpush.msrb.mxu1 %v18502_v18  ;;  %7168 = vmatpush.msra.mxu0 %v18503_v42  ;;  %v18516_v18 = vld [vmem:[#allocation43_spill] sm:$0xff]  ;;  %v18517_v42 = vld [vmem:[#allocation446_spill] sm:$0xff] }
 0xc13   :  { %7233 = vmatpush.msrb.mxu2 %v18504_v33  ;;  %6967 = vmatpush.msrb.mxu3 %v18505_v1  ;;  %v18518_v33 = vld [vmem:[#allocation79_spill] sm:$0xff]  ;;  %v18519_v1 = vld [vmem:[#allocation361_spill] sm:$0xff] }
 0xc14   :  { %7102 = vmatpush.msrb.mxu1 %v18506_v26  ;;  %7169 = vmatpush.msra.mxu0 %v18507_v47  ;;  %v18520_v26 = vld [vmem:[#allocation36_spill] sm:$0xff]  ;;  %v18521_v47 = vld [vmem:[#allocation439_spill] sm:$0xff] }
 0xc15   :  { %7234 = vmatpush.msrb.mxu2 %v18508_v14  ;;  %6968 = vmatpush.msrb.mxu3 %v18509_v36  ;;  %v18522_v14 = vld [vmem:[#allocation72_spill] sm:$0xff]  ;;  %v18523_v36 = vld [vmem:[#allocation354_spill] sm:$0xff] }
 0xc16   :  { %7103 = vmatpush.msrb.mxu1 %v18510_v52  ;;  %7170 = vmatpush.msra.mxu0 %v18511_v44  ;;  %v18524_v52 = vld [vmem:[#allocation29_spill] sm:$0xff]  ;;  %v18525_v44 = vld [vmem:[#allocation432_spill] sm:$0xff] }
 0xc17   :  { %7235 = vmatpush.msrb.mxu2 %v18512_v4  ;;  %6969 = vmatpush.msrb.mxu3 %v18513_v16  ;;  %v18526_v4 = vld [vmem:[#allocation65_spill] sm:$0xff]  ;;  %v18527_v16 = vld [vmem:[#allocation347_spill] sm:$0xff] }
 0xc18   :  { %7104 = vmatpush.msrb.mxu1 %v18514_v25  ;;  %7171 = vmatpush.msra.mxu0 %v18515_v2  ;;  %v18528_v25 = vld [vmem:[#allocation22_spill] sm:$0xff]  ;;  %v18529_v2 = vld [vmem:[#allocation425_spill] sm:$0xff] }
 0xc19   :  { %7236 = vmatmul.f32.vlgmr.msrb.gmra.mxu2 %v14476_v21  ;;  %6970 = vmatpush.msrb.mxu3 %v18516_v18  ;;  %v18530_v18 = vld [vmem:[#allocation58_spill] sm:$0xff] }
 0xc1a   :  { %7300 = vmatpush.msra.mxu2 %v18517_v42  ;;  %7105 = vmatpush.msrb.mxu1 %v18518_v33  ;;  %v18531_v42 = vld [vmem:[#allocation340_spill] sm:$0xff]  ;;  %v18532_v33 = vld [vmem:[#allocation15_spill] sm:$0xff] }
 0xc1b   :  { %7172 = vmatpush.msra.mxu0 %v18519_v1  ;;  %6971 = vmatpush.msrb.mxu3 %v18520_v26  ;;  %v18533_v1 = vld [vmem:[#allocation418_spill] sm:$0xff]  ;;  %v18534_v26 = vld [vmem:[#allocation112_spill] sm:$0xff] }
 0xc1c   :  { %7301 = vmatpush.msra.mxu2 %v18521_v47  ;;  %7106 = vmatpush.msrb.mxu1 %v18522_v14  ;;  %v18535_v47 = vld [vmem:[#allocation51_spill] sm:$0xff] }
 0xc1d   :  { %7173 = vmatpush.msra.mxu0 %v18523_v36  ;;  %6972 = vmatpush.msrb.mxu3 %v18524_v52  ;;  %v18536_v14 = vld [vmem:[#allocation411_spill] sm:$0xff]  ;;  %v18537_v36 = vld [vmem:[#allocation8_spill] sm:$0xff]  ;;  %v18538_v52 = vld [vmem:[#allocation106_spill] sm:$0xff] }
 0xc1e   :  { %7302 = vmatpush.msra.mxu2 %v18525_v44  ;;  %7107 = vmatpush.msrb.mxu1 %v18526_v4  ;;  %v18539_v44 = vld [vmem:[#allocation44_spill] sm:$0xff] }
 0xc1f   :  { %7174 = vmatpush.msra.mxu0 %v18527_v16  ;;  %6973 = vmatpush.msrb.mxu3 %v18528_v25  ;;  %v18540_v4 = vld [vmem:[#allocation404_spill] sm:$0xff] }
 0xc20   :  { %7303 = vmatpush.msra.mxu2 %v18529_v2  ;;  %7108 = vmatpush.msrb.mxu1 %v18530_v18  ;;  %v18541_v16 = vld [vmem:[#allocation556_spill] sm:$0xff]  ;;  %v18543_v2 = vld [vmem:[#allocation37_spill] sm:$0xff] }
 0xc21   :  { %7175 = vmatpush.msra.mxu0 %v18531_v42  ;;  %6974 = vmatpush.msrb.mxu3 %v18532_v33  ;;  %v18542_v25 = vld [vmem:[#allocation100_spill] sm:$0xff]  ;;  %v18544_v18 = vld [vmem:[#allocation397_spill] sm:$0xff]  ;;  %v18546_v33 = vld [vmem:[#allocation94_spill] sm:$0xff] }
 0xc22   :  { %7304 = vmatpush.msra.mxu2 %v18533_v1  ;;  %7176 = vmatmul.f32.vlgmr.msra.gmra.mxu0 %v14168_v56  ;;  %v18545_v42 = vld [vmem:[#allocation549_spill] sm:$0xff]  ;;  %v18547_v1 = vld [vmem:[#allocation30_spill] sm:$0xff] }
 0xc23   :  { %7240 = vmatpush.msrb.mxu0 %v18534_v26  ;;  %7109 = vmatpush.msrb.mxu1 %v18535_v47  ;;  %v18548_v26 = vld [vmem:[#allocation390_spill] sm:$0xff] }
 0xc24   :  { %7305 = vmatpush.msra.mxu2 %v18536_v14  ;;  %6975 = vmatpush.msrb.mxu3 %v18537_v36  ;;  %v18549_v47 = vld [vmem:[#allocation542_spill] sm:$0xff]  ;;  %v18550_v14 = vld [vmem:[#allocation87_spill] sm:$0xff] }
 0xc25   :  { %7241 = vmatpush.msrb.mxu0 %v18538_v52  ;;  %7110 = vmatpush.msrb.mxu1 %v18539_v44  ;;  %v18551_v36 = vld [vmem:[#allocation23_spill] sm:$0xff] }
 0xc26   :  { %7306 = vmatpush.msra.mxu2 %v18540_v4  ;;  %6976 = vmatmul.f32.vlgmr.msrb.gmra.mxu3 %v14151_v17  ;;  %v18552_v52 = vld [vmem:[#allocation383_spill] sm:$0xff]  ;;  %v18554_v4 = vld [vmem:[#allocation80_spill] sm:$0xff] }
 0xc27   :  { %7040 = vmatpush.msra.mxu3 %v18541_v16  ;;  %7242 = vmatpush.msrb.mxu0 %v18542_v25  ;;  %v18553_v44 = vld [vmem:[#allocation535_spill] sm:$0xff]  ;;  %v18555_v16 = vld [vmem:[#allocation16_spill] sm:$0xff] }
 0xc28   :  { %7111 = vmatpush.msrb.mxu1 %v18543_v2  ;;  %7307 = vmatpush.msra.mxu2 %v18544_v18  ;;  %v18556_v25 = vld [vmem:[#allocation376_spill] sm:$0xff]  ;;  %v18558_v18 = vld [vmem:[#allocation73_spill] sm:$0xff] }
 0xc29   :  { %7041 = vmatpush.msra.mxu3 %v18545_v42  ;;  %7243 = vmatpush.msrb.mxu0 %v18546_v33  ;;  %v18557_v2 = vld [vmem:[#allocation528_spill] sm:$0xff]  ;;  %v18559_v42 = vld [vmem:[#allocation9_spill] sm:$0xff] }
 0xc2a   :  { %7112 = vmatpush.msrb.mxu1 %v18547_v1  ;;  %7308 = vmatpush.msra.mxu2 %v18548_v26  ;;  %v18560_v33 = vld [vmem:[#allocation369_spill] sm:$0xff] }
 0xc2b   :  { %7042 = vmatpush.msra.mxu3 %v18549_v47  ;;  %7244 = vmatpush.msrb.mxu0 %v18550_v14  ;;  %v18561_v1 = vld [vmem:[#allocation521_spill] sm:$0xff]  ;;  %v18563_v47 = vld [vmem:[#allocation66_spill] sm:$0xff] }
 0xc2c   :  { %7113 = vmatpush.msrb.mxu1 %v18551_v36  ;;  %7309 = vmatpush.msra.mxu2 %v18552_v52  ;;  %v18562_v26 = vld [vmem:[#allocation557_spill] sm:$0xff]  ;;  %v18564_v14 = vld [vmem:[#allocation362_spill] sm:$0xff] }
 0xc2d   :  { %7043 = vmatpush.msra.mxu3 %v18553_v44  ;;  %7245 = vmatpush.msrb.mxu0 %v18554_v4  ;;  %v18565_v36 = vld [vmem:[#allocation514_spill] sm:$0xff]  ;;  %v18567_v44 = vld [vmem:[#allocation59_spill] sm:$0xff] }
 0xc2e   :  { %7114 = vmatpush.msrb.mxu1 %v18555_v16  ;;  %7310 = vmatpush.msra.mxu2 %v18556_v25  ;;  %v18566_v52 = vld [vmem:[#allocation550_spill] sm:$0xff]  ;;  %v18568_v4 = vld [vmem:[#allocation355_spill] sm:$0xff] }
 0xc2f   :  { %7044 = vmatpush.msra.mxu3 %v18557_v2  ;;  %7246 = vmatpush.msrb.mxu0 %v18558_v18  ;;  %v18569_v16 = vld [vmem:[#allocation507_spill] sm:$0xff]  ;;  %v18571_v2 = vld [vmem:[#allocation52_spill] sm:$0xff] }
 0xc30   :  { %7115 = vmatpush.msrb.mxu1 %v18559_v42  ;;  %7311 = vmatpush.msra.mxu2 %v18560_v33  ;;  %v18570_v25 = vld [vmem:[#allocation543_spill] sm:$0xff]  ;;  %v18572_v18 = vld [vmem:[#allocation348_spill] sm:$0xff] }
 0xc31   :  { %7045 = vmatpush.msra.mxu3 %v18561_v1  ;;  %7116 = vmatmul.f32.vlgmr.msrb.gmra.mxu1 %v14151_v17  ;;  %v18573_v42 = vld [vmem:[#allocation500_spill] sm:$0xff]  ;;  %v18575_v1 = vld [vmem:[#allocation45_spill] sm:$0xff] }
 0xc32   :  { %7180 = vmatpush.msra.mxu1 %v18562_v26  ;;  %7247 = vmatpush.msrb.mxu0 %v18563_v47  ;;  %v18574_v33 = vld [vmem:[#allocation536_spill] sm:$0xff]  ;;  %v18576_v26 = vld [vmem:[#allocation341_spill] sm:$0xff] }
 0xc33   :  { %7312 = vmatpush.msra.mxu2 %v18564_v14  ;;  %7046 = vmatpush.msra.mxu3 %v18565_v36  ;;  %v18577_v47 = vld [vmem:[#allocation493_spill] sm:$0xff]  ;;  %v18579_v36 = vld [vmem:[#allocation38_spill] sm:$0xff] }
 0xc34   :  { %7181 = vmatpush.msra.mxu1 %v18566_v52  ;;  %7248 = vmatpush.msrb.mxu0 %v18567_v44  ;;  %v18578_v14 = vld [vmem:[#allocation529_spill] sm:$0xff]  ;;  %v18580_v52 = vld [vmem:[#allocation486_spill] sm:$0xff] }
 0xc35   :  { %7313 = vmatpush.msra.mxu2 %v18568_v4  ;;  %7047 = vmatpush.msra.mxu3 %v18569_v16  ;;  %v18581_v44 = vld [vmem:[#allocation113_spill] sm:$0xff]  ;;  %v18582_v4 = vld [vmem:[#allocation522_spill] sm:$0xff]  ;;  %v18583_v16 = vld [vmem:[#allocation31_spill] sm:$0xff] }
 0xc36   :  { %7182 = vmatpush.msra.mxu1 %v18570_v25  ;;  %7249 = vmatpush.msrb.mxu0 %v18571_v2  ;;  %v18584_v25 = vld [vmem:[#allocation479_spill] sm:$0xff] }
 0xc37   :  { %7314 = vmatpush.msra.mxu2 %v18572_v18  ;;  %7048 = vmatpush.msra.mxu3 %v18573_v42  ;;  %v18585_v2 = vld [vmem:[#allocation107_spill] sm:$0xff]  ;;  %v18587_v42 = vld [vmem:[#allocation24_spill] sm:$0xff] }
 0xc38   :  { %7183 = vmatpush.msra.mxu1 %v18574_v33  ;;  %7250 = vmatpush.msrb.mxu0 %v18575_v1  ;;  %v18586_v18 = vld [vmem:[#allocation515_spill] sm:$0xff]  ;;  %v18588_v33 = vld [vmem:[#allocation472_spill] sm:$0xff]  ;;  %v18589_v1 = vld [vmem:[#allocation101_spill] sm:$0xff] }
 0xc39   :  { %7315 = vmatpush.msra.mxu2 %v18576_v26  ;;  %7049 = vmatpush.msra.mxu3 %v18577_v47  ;;  %v18590_v26 = vld [vmem:[#allocation508_spill] sm:$0xff]  ;;  %v18591_v47 = vld [vmem:[#allocation17_spill] sm:$0xff] }
 0xc3a   :  { %7184 = vmatpush.msra.mxu1 %v18578_v14  ;;  %7251 = vmatpush.msrb.mxu0 %v18579_v36  ;;  %v18592_v14 = vld [vmem:[#allocation465_spill] sm:$0xff]  ;;  %v18593_v36 = vld [vmem:[#allocation95_spill] sm:$0xff] }
 0xc3b   :  { %7316 = vmatmul.f32.vlgmr.msra.gmra.mxu2 %v14168_v56  ;;  %7050 = vmatpush.msra.mxu3 %v18580_v52  ;;  %v18594_v52 = vld [vmem:[#allocation501_spill] sm:$0xff] }
 0xc3c   :  { %7380 = vmatpush.msrb.mxu2 %v18581_v44  ;;  %7185 = vmatpush.msra.mxu1 %v18582_v4  ;;  %v18595_v44 = vld [vmem:[#allocation10_spill] sm:$0xff] }
 0xc3d   :  { %7252 = vmatpush.msrb.mxu0 %v18583_v16  ;;  %7051 = vmatpush.msra.mxu3 %v18584_v25  ;;  %v18596_v4 = vld [vmem:[#allocation458_spill] sm:$0xff]  ;;  %v18597_v16 = vld [vmem:[#allocation88_spill] sm:$0xff] }
 0xc3e   :  { %7381 = vmatpush.msrb.mxu2 %v18585_v2  ;;  %7186 = vmatpush.msra.mxu1 %v18586_v18  ;;  %v18598_v25 = vld [vmem:[#allocation558_spill] sm:$0xff]  ;;  %v18600_v18 = vld [vmem:[#allocation81_spill] sm:$0xff] }
 0xc3f   :  { %7253 = vmatpush.msrb.mxu0 %v18587_v42  ;;  %7052 = vmatpush.msra.mxu3 %v18588_v33  ;;  %v18599_v2 = vld [vmem:[#allocation494_spill] sm:$0xff]  ;;  %v18601_v42 = vld [vmem:[#allocation451_spill] sm:$0xff] }
 0xc40   :  { %7382 = vmatpush.msrb.mxu2 %v18589_v1  ;;  %7187 = vmatpush.msra.mxu1 %v18590_v26  ;;  %v18602_v33 = vld [vmem:[#allocation551_spill] sm:$0xff]  ;;  %v18604_v26 = vld [vmem:[#allocation74_spill] sm:$0xff] }
 0xc41   :  { %7254 = vmatpush.msrb.mxu0 %v18591_v47  ;;  %7053 = vmatpush.msra.mxu3 %v18592_v14  ;;  %v18603_v1 = vld [vmem:[#allocation487_spill] sm:$0xff]  ;;  %v18606_v14 = vld [vmem:[#allocation544_spill] sm:$0xff] }
 0xc42   :  { %7383 = vmatpush.msrb.mxu2 %v18593_v36  ;;  %7188 = vmatpush.msra.mxu1 %v18594_v52  ;;  %v18605_v47 = vld [vmem:[#allocation223_spill] sm:$0xff]  ;;  %v18607_v36 = vld [vmem:[#allocation480_spill] sm:$0xff] }
 0xc43   :  { %7255 = vmatpush.msrb.mxu0 %v18595_v44  ;;  %7054 = vmatpush.msra.mxu3 %v18596_v4  ;;  %v18608_v52 = vld [vmem:[#allocation67_spill] sm:$0xff]  ;;  %v18609_v44 = vld [vmem:[#allocation216_spill] sm:$0xff]  ;;  %v18610_v4 = vld [vmem:[#allocation537_spill] sm:$0xff] }
 0xc44   :  { %7384 = vmatpush.msrb.mxu2 %v18597_v16  ;;  %7256 = vmatmul.f32.vlgmr.msrb.gmra.mxu0 %v14151_v17  ;;  %v18611_v16 = vld [vmem:[#allocation473_spill] sm:$0xff] }
 0xc45   :  { %7320 = vmatpush.msra.mxu0 %v18598_v25  ;;  %7189 = vmatpush.msra.mxu1 %v18599_v2  ;;  %v18612_v25 = vld [vmem:[#allocation60_spill] sm:$0xff]  ;;  %v18613_v2 = vld [vmem:[#allocation209_spill] sm:$0xff] }
 0xc46   :  { %7385 = vmatpush.msrb.mxu2 %v18600_v18  ;;  %7055 = vmatpush.msra.mxu3 %v18601_v42  ;;  %v18614_v18 = vld [vmem:[#allocation530_spill] sm:$0xff] }
 0xc47   :  { %7321 = vmatpush.msra.mxu0 %v18602_v33  ;;  %7190 = vmatpush.msra.mxu1 %v18603_v1  ;;  %v18615_v42 = vld [vmem:[#allocation466_spill] sm:$0xff]  ;;  %v18616_v33 = vld [vmem:[#allocation53_spill] sm:$0xff] }
 0xc48   :  { %7386 = vmatpush.msrb.mxu2 %v18604_v26  ;;  %7056 = vmatmul.f32.vlgmr.msra.gmra.mxu3 %v14302_v58  ;;  %v18617_v1 = vld [vmem:[#allocation202_spill] sm:$0xff]  ;;  %v18618_v26 = vld [vmem:[#allocation523_spill] sm:$0xff] }
 0xc49   :  { %7120 = vmatpush.msrb.mxu3 %v18605_v47  ;;  %7322 = vmatpush.msra.mxu0 %v18606_v14  ;;  %v18619_v47 = vld [vmem:[#allocation459_spill] sm:$0xff]  ;;  %v18620_v14 = vld [vmem:[#allocation46_spill] sm:$0xff] }
 0xc4a   :  { %7191 = vmatpush.msra.mxu1 %v18607_v36  ;;  %7387 = vmatpush.msrb.mxu2 %v18608_v52  ;;  %v18621_v36 = vld [vmem:[#allocation195_spill] sm:$0xff]  ;;  %v18622_v52 = vld [vmem:[#allocation516_spill] sm:$0xff] }
 0xc4b   :  { %7121 = vmatpush.msrb.mxu3 %v18609_v44  ;;  %7323 = vmatpush.msra.mxu0 %v18610_v4  ;;  %v18623_v44 = vld [vmem:[#allocation452_spill] sm:$0xff]  ;;  %v18624_v4 = vld [vmem:[#allocation39_spill] sm:$0xff] }
 0xc4c   :  { %7192 = vmatpush.msra.mxu1 %v18611_v16  ;;  %7388 = vmatpush.msrb.mxu2 %v18612_v25  ;;  %v18625_v16 = vld [vmem:[#allocation188_spill] sm:$0xff] }
 0xc4d   :  { %7122 = vmatpush.msrb.mxu3 %v18613_v2  ;;  %7324 = vmatpush.msra.mxu0 %v18614_v18  ;;  %v18626_v25 = vld [vmem:[#allocation224_spill] sm:$0xff]  ;;  %v18627_v2 = vld [vmem:[#allocation509_spill] sm:$0xff] }
 0xc4e   :  { %7193 = vmatpush.msra.mxu1 %v18615_v42  ;;  %7389 = vmatpush.msrb.mxu2 %v18616_v33  ;;  %v18628_v18 = vld [vmem:[#allocation32_spill] sm:$0xff]  ;;  %v18629_v42 = vld [vmem:[#allocation181_spill] sm:$0xff] }
 0xc4f   :  { %7123 = vmatpush.msrb.mxu3 %v18617_v1  ;;  %7325 = vmatpush.msra.mxu0 %v18618_v26  ;;  %v18630_v33 = vld [vmem:[#allocation217_spill] sm:$0xff]  ;;  %v18631_v1 = vld [vmem:[#allocation502_spill] sm:$0xff] }
 0xc50   :  { %7194 = vmatpush.msra.mxu1 %v18619_v47  ;;  %7390 = vmatpush.msrb.mxu2 %v18620_v14  ;;  %v18632_v26 = vld [vmem:[#allocation25_spill] sm:$0xff]  ;;  %v18633_v47 = vld [vmem:[#allocation174_spill] sm:$0xff] }
 0xc51   :  { %7124 = vmatpush.msrb.mxu3 %v18621_v36  ;;  %7326 = vmatpush.msra.mxu0 %v18622_v52  ;;  %v18634_v14 = vld [vmem:[#allocation210_spill] sm:$0xff]  ;;  %v18635_v36 = vld [vmem:[#allocation495_spill] sm:$0xff] }
 0xc52   :  { %7195 = vmatpush.msra.mxu1 %v18623_v44  ;;  %7391 = vmatpush.msrb.mxu2 %v18624_v4  ;;  %v18636_v52 = vld [vmem:[#allocation18_spill] sm:$0xff]  ;;  %v18637_v44 = vld [vmem:[#allocation167_spill] sm:$0xff] }
 0xc53   :  { %7125 = vmatpush.msrb.mxu3 %v18625_v16  ;;  %7196 = vmatmul.f32.vlgmr.msra.gmra.mxu1 %v14302_v58  ;;  %v18638_v4 = vld [vmem:[#allocation203_spill] sm:$0xff]  ;;  %v18639_v16 = vld [vmem:[#allocation488_spill] sm:$0xff] }
 0xc54   :  { %7260 = vmatpush.msrb.mxu1 %v18626_v25  ;;  %7327 = vmatpush.msra.mxu0 %v18627_v2  ;;  %v18640_v25 = vld [vmem:[#allocation11_spill] sm:$0xff]  ;;  %v18641_v2 = vld [vmem:[#allocation160_spill] sm:$0xff] }
 0xc55   :  { %7392 = vmatpush.msrb.mxu2 %v18628_v18  ;;  %7126 = vmatpush.msrb.mxu3 %v18629_v42  ;;  %v18642_v18 = vld [vmem:[#allocation196_spill] sm:$0xff]  ;;  %v18643_v42 = vld [vmem:[#allocation481_spill] sm:$0xff] }
 0xc56   :  { %7261 = vmatpush.msrb.mxu1 %v18630_v33  ;;  %7328 = vmatpush.msra.mxu0 %v18631_v1  ;;  %v18644_v33 = vld [vmem:[#allocation153_spill] sm:$0xff]  ;;  %v18645_v1 = vld [vmem:[#allocation559_spill] sm:$0xff] }
 0xc57   :  { %7393 = vmatpush.msrb.mxu2 %v18632_v26  ;;  %7127 = vmatpush.msrb.mxu3 %v18633_v47  ;;  %v18646_v26 = vld [vmem:[#allocation189_spill] sm:$0xff]  ;;  %v18647_v47 = vld [vmem:[#allocation474_spill] sm:$0xff] }
 0xc58   :  { %7262 = vmatpush.msrb.mxu1 %v18634_v14  ;;  %7329 = vmatpush.msra.mxu0 %v18635_v36  ;;  %v18648_v14 = vld [vmem:[#allocation146_spill] sm:$0xff]  ;;  %v18649_v36 = vld [vmem:[#allocation552_spill] sm:$0xff] }
 0xc59   :  { %7394 = vmatpush.msrb.mxu2 %v18636_v52  ;;  %7128 = vmatpush.msrb.mxu3 %v18637_v44  ;;  %v18650_v52 = vld [vmem:[#allocation182_spill] sm:$0xff]  ;;  %v18651_v44 = vld [vmem:[#allocation467_spill] sm:$0xff] }
 0xc5a   :  { %7263 = vmatpush.msrb.mxu1 %v18638_v4  ;;  %7330 = vmatpush.msra.mxu0 %v18639_v16  ;;  %v18652_v4 = vld [vmem:[#allocation139_spill] sm:$0xff]  ;;  %v18653_v16 = vld [vmem:[#allocation545_spill] sm:$0xff] }
 0xc5b   :  { %7395 = vmatpush.msrb.mxu2 %v18640_v25  ;;  %7129 = vmatpush.msrb.mxu3 %v18641_v2  ;;  %v18654_v25 = vld [vmem:[#allocation175_spill] sm:$0xff]  ;;  %v18655_v2 = vld [vmem:[#allocation460_spill] sm:$0xff] }
 0xc5c   :  { %7264 = vmatpush.msrb.mxu1 %v18642_v18  ;;  %7331 = vmatpush.msra.mxu0 %v18643_v42  ;;  %v18656_v18 = vld [vmem:[#allocation132_spill] sm:$0xff]  ;;  %v18657_v42 = vld [vmem:[#allocation538_spill] sm:$0xff] }
 0xc5d   :  { %7396 = vmatmul.f32.vlgmr.msrb.gmra.mxu2 %v14151_v17  ;;  %7130 = vmatpush.msrb.mxu3 %v18644_v33  ;;  %v18658_v33 = vld [vmem:[#allocation168_spill] sm:$0xff] }
 0xc5e   :  { %7460 = vmatpush.msra.mxu2 %v18645_v1  ;;  %7265 = vmatpush.msrb.mxu1 %v18646_v26  ;;  %v18659_v1 = vld [vmem:[#allocation453_spill] sm:$0xff] }
 0xc5f   :  { %7332 = vmatpush.msra.mxu0 %v18647_v47  ;;  %7131 = vmatpush.msrb.mxu3 %v18648_v14  ;;  %v18660_v26 = vld [vmem:[#allocation125_spill] sm:$0xff]  ;;  %v18661_v47 = vld [vmem:[#allocation531_spill] sm:$0xff] }
 0xc60   :  { %7461 = vmatpush.msra.mxu2 %v18649_v36  ;;  %7266 = vmatpush.msrb.mxu1 %v18650_v52  ;;  %v18662_v14 = vld [vmem:[#allocation225_spill] sm:$0xff]  ;;  %v18664_v52 = vld [vmem:[#allocation524_spill] sm:$0xff] }
 0xc61   :  { %7333 = vmatpush.msra.mxu0 %v18651_v44  ;;  %7132 = vmatpush.msrb.mxu3 %v18652_v4  ;;  %v18663_v36 = vld [vmem:[#allocation161_spill] sm:$0xff]  ;;  %v18665_v44 = vld [vmem:[#allocation118_spill] sm:$0xff] }
 0xc62   :  { %7462 = vmatpush.msra.mxu2 %v18653_v16  ;;  %7267 = vmatpush.msrb.mxu1 %v18654_v25  ;;  %v18666_v4 = vld [vmem:[#allocation218_spill] sm:$0xff]  ;;  %v18668_v25 = vld [vmem:[#allocation517_spill] sm:$0xff] }
 0xc63   :  { %7334 = vmatpush.msra.mxu0 %v18655_v2  ;;  %7133 = vmatpush.msrb.mxu3 %v18656_v18  ;;  %v18667_v16 = vld [vmem:[#allocation154_spill] sm:$0xff]  ;;  %v18669_v2 = vld [vmem:[#allocation669_spill] sm:$0xff]  ;;  %v18670_v18 = vld [vmem:[#allocation211_spill] sm:$0xff] }
 0xc64   :  { %7463 = vmatpush.msra.mxu2 %v18657_v42  ;;  %7268 = vmatpush.msrb.mxu1 %v18658_v33  ;;  %v18671_v42 = vld [vmem:[#allocation147_spill] sm:$0xff]  ;;  %v18672_v33 = vld [vmem:[#allocation510_spill] sm:$0xff] }
 0xc65   :  { %7335 = vmatpush.msra.mxu0 %v18659_v1  ;;  %7134 = vmatpush.msrb.mxu3 %v18660_v26  ;;  %v18673_v1 = vld [vmem:[#allocation662_spill] sm:$0xff]  ;;  %v18674_v26 = vld [vmem:[#allocation204_spill] sm:$0xff] }
 0xc66   :  { %7464 = vmatpush.msra.mxu2 %v18661_v47  ;;  %7336 = vmatmul.f32.vlgmr.msra.gmra.mxu0 %v14302_v58  ;;  %v18675_v47 = vld [vmem:[#allocation140_spill] sm:$0xff] }
 0xc67   :  { %7400 = vmatpush.msrb.mxu0 %v18662_v14  ;;  %7269 = vmatpush.msrb.mxu1 %v18663_v36  ;;  %v18676_v14 = vld [vmem:[#allocation503_spill] sm:$0xff] }
 0xc68   :  { %7465 = vmatpush.msra.mxu2 %v18664_v52  ;;  %7135 = vmatpush.msrb.mxu3 %v18665_v44  ;;  %v18677_v36 = vld [vmem:[#allocation655_spill] sm:$0xff]  ;;  %v18678_v52 = vld [vmem:[#allocation197_spill] sm:$0xff] }
 0xc69   :  { %7401 = vmatpush.msrb.mxu0 %v18666_v4  ;;  %7270 = vmatpush.msrb.mxu1 %v18667_v16  ;;  %v18679_v44 = vld [vmem:[#allocation133_spill] sm:$0xff]  ;;  %v18680_v4 = vld [vmem:[#allocation496_spill] sm:$0xff] }
 0xc6a   :  { %7466 = vmatpush.msra.mxu2 %v18668_v25  ;;  %7136 = vmatmul.f32.vlgmr.msrb.gmra.mxu3 %v14281_v24  ;;  %v18681_v16 = vld [vmem:[#allocation648_spill] sm:$0xff]  ;;  %v18682_v25 = vld [vmem:[#allocation190_spill] sm:$0xff] }
 0xc6b   :  { %7200 = vmatpush.msra.mxu3 %v18669_v2  ;;  %7402 = vmatpush.msrb.mxu0 %v18670_v18  ;;  %v18683_v2 = vld [vmem:[#allocation126_spill] sm:$0xff]  ;;  %v18684_v18 = vld [vmem:[#allocation489_spill] sm:$0xff] }
 0xc6c   :  { %7271 = vmatpush.msrb.mxu1 %v18671_v42  ;;  %7467 = vmatpush.msra.mxu2 %v18672_v33  ;;  %v18685_v42 = vld [vmem:[#allocation641_spill] sm:$0xff]  ;;  %v18686_v33 = vld [vmem:[#allocation183_spill] sm:$0xff] }
 0xc6d   :  { %7201 = vmatpush.msra.mxu3 %v18673_v1  ;;  %7403 = vmatpush.msrb.mxu0 %v18674_v26  ;;  %v6717_v1 = vpop.f32.mrf.mxu1  ;;  %v18687_v26 = vld [vmem:[#allocation119_spill] sm:$0xff] }
 0xc6e   :  { %7272 = vmatpush.msrb.mxu1 %v18675_v47  ;;  %7468 = vmatpush.msra.mxu2 %v18676_v14  ;;  %v18688_v47 = vld [vmem:[#allocation482_spill] sm:$0xff] }
 0xc6f   :  { %7202 = vmatpush.msra.mxu3 %v18677_v36  ;;  %7404 = vmatpush.msrb.mxu0 %v18678_v52  ;;  %v18689_v14 = vld [vmem:[#allocation634_spill] sm:$0xff]  ;;  %v6697_v36 = vpop.f32.mrf.mxu0 }
 0xc70   :  { %7273 = vmatpush.msrb.mxu1 %v18679_v44  ;;  %7469 = vmatpush.msra.mxu2 %v18680_v4  ;;  %v18690_v52 = vld [vmem:[#allocation670_spill] sm:$0xff]  ;;  %v18691_v44 = vld [vmem:[#allocation176_spill] sm:$0xff]  ;;  %v6718_v4 = vadd.f32 %v6717_v1, %v6697_v36  ;;  %v18701_v1 = vld [vmem:[#allocation613_spill] sm:$0xff] }
 0xc71   :  { %7203 = vmatpush.msra.mxu3 %v18681_v16  ;;  %7405 = vmatpush.msrb.mxu0 %v18682_v25  ;;  %v18692_v16 = vld [vmem:[#allocation475_spill] sm:$0xff]  ;;  %v18702_v36 = vld [vmem:[#allocation649_spill] sm:$0xff] }
 0xc72   :  { %7274 = vmatpush.msrb.mxu1 %v18683_v2  ;;  %7470 = vmatpush.msra.mxu2 %v18684_v18  ;;  %v18693_v25 = vld [vmem:[#allocation627_spill] sm:$0xff]  ;;  %v18695_v18 = vld [vmem:[#allocation169_spill] sm:$0xff] }
 0xc73   :  { %7204 = vmatpush.msra.mxu3 %v18685_v42  ;;  %7406 = vmatpush.msrb.mxu0 %v18686_v33  ;;  %v18694_v2 = vld [vmem:[#allocation663_spill] sm:$0xff]  ;;  %v18696_v42 = vld [vmem:[#allocation468_spill] sm:$0xff] }
 0xc74   :  { %7275 = vmatpush.msrb.mxu1 %v18687_v26  ;;  %7471 = vmatpush.msra.mxu2 %v18688_v47  ;;  %v18697_v33 = vld [vmem:[#allocation620_spill] sm:$0xff]  ;;  %v6737_v26 = vpop.f32.mrf.mxu3 }
 0xc75   :  { %7205 = vmatpush.msra.mxu3 %v18689_v14  ;;  %7276 = vmatmul.f32.vlgmr.msrb.gmra.mxu1 %v14281_v24  ;;  %v18698_v47 = vld [vmem:[#allocation656_spill] sm:$0xff]  ;;  %v18699_v14 = vld [vmem:[#allocation162_spill] sm:$0xff] }
 0xc76   :  { %7340 = vmatpush.msra.mxu1 %v18690_v52  ;;  %7407 = vmatpush.msrb.mxu0 %v18691_v44  ;;  %v6738_v52 = vadd.f32 %v6737_v26, %v6718_v4  ;;  %v18700_v44 = vld [vmem:[#allocation461_spill] sm:$0xff]  ;;  %v18708_v4 = vld [vmem:[#allocation599_spill] sm:$0xff]  ;;  %v6797_v26 = vpop.f32.mrf.mxu1 }
 0xc77   :  { %7472 = vmatpush.msra.mxu2 %v18692_v16  ;;  %7206 = vmatpush.msra.mxu3 %v18693_v25  ;;  %v18703_v16 = vld [vmem:[#allocation155_spill] sm:$0xff]  ;;  %v18704_v25 = vld [vmem:[#allocation454_spill] sm:$0xff] }
 0xc78   :  { %7341 = vmatpush.msra.mxu1 %v18694_v2  ;;  %7408 = vmatpush.msrb.mxu0 %v18695_v18  ;;  %v18705_v2 = vld [vmem:[#allocation606_spill] sm:$0xff]  ;;  %v6757_v18 = vpop.f32.mrf.mxu2 }
 0xc79   :  { %7473 = vmatpush.msra.mxu2 %v18696_v42  ;;  %7207 = vmatpush.msra.mxu3 %v18697_v33  ;;  %v6777_v42 = vpop.f32.mrf.mxu0  ;;  %v18706_v33 = vld [vmem:[#allocation642_spill] sm:$0xff] }
 0xc7a   :  { %7342 = vmatpush.msra.mxu1 %v18698_v47  ;;  %7409 = vmatpush.msrb.mxu0 %v18699_v14  ;;  %v18707_v47 = vld [vmem:[#allocation148_spill] sm:$0xff]  ;;  %v6758_v14 = vadd.f32 %v6757_v18, %v6738_v52  ;;  %v18715_v52 = vld [vmem:[#allocation134_spill] sm:$0xff]  ;;  %v18716_v18 = vld [vmem:[#allocation585_spill] sm:$0xff] }
 0xc7b   :  { %7474 = vmatpush.msra.mxu2 %v18700_v44  ;;  %7208 = vmatpush.msra.mxu3 %v18701_v1  ;;  %v18709_v44 = vld [vmem:[#allocation226_spill] sm:$0xff]  ;;  %v18710_v1 = vld [vmem:[#allocation635_spill] sm:$0xff] }
 0xc7c   :  { %7343 = vmatpush.msra.mxu1 %v18702_v36  ;;  %7410 = vmatpush.msrb.mxu0 %v18703_v16  ;;  %v6778_v36 = vadd.f32 %v6777_v42, %v6758_v14  ;;  %v18711_v16 = vld [vmem:[#allocation141_spill] sm:$0xff]  ;;  %v18720_v42 = vld [vmem:[#allocation578_spill] sm:$0xff] }
 0xc7d   :  { %7475 = vmatpush.msra.mxu2 %v18704_v25  ;;  %7209 = vmatpush.msra.mxu3 %v18705_v2  ;;  %v18712_v25 = vld [vmem:[#allocation592_spill] sm:$0xff]  ;;  %v18713_v2 = vld [vmem:[#allocation219_spill] sm:$0xff] }
 0xc7e   :  { %7344 = vmatpush.msra.mxu1 %v18706_v33  ;;  %7411 = vmatpush.msrb.mxu0 %v18707_v47  ;;  %v18714_v33 = vld [vmem:[#allocation628_spill] sm:$0xff]  ;;  %v6798_v47 = vadd.f32 %v6797_v26, %v6778_v36  ;;  %v18724_v26 = vld [vmem:[#allocation571_spill] sm:$0xff] }
 0xc7f   :  { %7476 = vmatmul.f32.vlgmr.msra.gmra.mxu2 %v14302_v58  ;;  %7210 = vmatpush.msra.mxu3 %v18708_v4  ;;  %v18717_v4 = vld [vmem:[#allocation212_spill] sm:$0xff] }
 0xc80   :  { %7540 = vmatpush.msrb.mxu2 %v18709_v44  ;;  %7345 = vmatpush.msra.mxu1 %v18710_v1  ;;  %v18719_v1 = vld [vmem:[#allocation127_spill] sm:$0xff] }
 0xc81   :  { %7412 = vmatpush.msrb.mxu0 %v18711_v16  ;;  %7211 = vmatpush.msra.mxu3 %v18712_v25  ;;  %v18721_v16 = vld [vmem:[#allocation205_spill] sm:$0xff]  ;;  %v18722_v25 = vld [vmem:[#allocation614_spill] sm:$0xff] }
 0xc82   :  { %7541 = vmatpush.msrb.mxu2 %v18713_v2  ;;  %7346 = vmatpush.msra.mxu1 %v18714_v33  ;;  %v18723_v2 = vld [vmem:[#allocation120_spill] sm:$0xff]  ;;  %v18725_v33 = vld [vmem:[#allocation198_spill] sm:$0xff] }
 0xc83   :  { %7413 = vmatpush.msrb.mxu0 %v18715_v52  ;;  %7212 = vmatpush.msra.mxu3 %v18716_v18  ;;  %v6817_v44 = vpop.f32.mrf.mxu3  ;;  %v6857_v52 = vpop.f32.mrf.mxu0  ;;  %v18726_v18 = vld [vmem:[#allocation671_spill] sm:$0xff] }
 0xc84   :  { %7542 = vmatpush.msrb.mxu2 %v18717_v4  ;;  %7347 = vmatpush.msra.mxu1 %v18718_v41  ;;  %v6818_v14 = vadd.f32 %v6817_v44, %v6798_v47  ;;  %v6837_v41 = vpop.f32.mrf.mxu2  ;;  %v18727_v4 = vld [vmem:[#allocation607_spill] sm:$0xff]  ;;  %v18728_v47 = vld [vmem:[#allocation805_spill] sm:$0xff] }
 0xc85   :  { %7414 = vmatpush.msrb.mxu0 %v18719_v1  ;;  %7213 = vmatpush.msra.mxu3 %v18720_v42  ;;  %v18729_v1 = vld [vmem:[#allocation191_spill] sm:$0xff]  ;;  %v18730_v42 = vld [vmem:[#allocation564_spill] sm:$0xff] }
 0xc86   :  { %7543 = vmatpush.msrb.mxu2 %v18721_v16  ;;  %7348 = vmatpush.msra.mxu1 %v18722_v25  ;;  %v7667_v36 = vrot.slane %v6818_v14, 1  ;;  %v6877_v16 = vpop.f32.mrf.mxu1  ;;  %v18731_v25 = vld [vmem:[#allocation664_spill] sm:$0xff] }
 0xc87   :  { %7415 = vmatpush.msrb.mxu0 %v18723_v2  ;;  %7214 = vmatpush.msra.mxu3 %v18724_v26  ;;  %v18732_v14 = vld [vmem:[#allocation600_spill] sm:$0xff]  ;;  %v6858_v2 = vadd.f32 %v6857_v52, %v6837_v41  ;;  %v18740_v41 = vld [vmem:[#allocation170_spill] sm:$0xff] }
 0xc88   :  { %7544 = vmatpush.msrb.mxu2 %v18725_v33  ;;  %7416 = vmatmul.f32.vlgmr.msrb.gmra.mxu0 %v14281_v24  ;;  %v7681_v44 = vadd.f32 %v7667_v36, %v18728_v47  ;;  %v18733_v26 = vld [vmem:[#allocation184_spill] sm:$0xff]  ;;  %v18734_v33 = vld [vmem:[#allocation334_spill] sm:$0xff] }
 0xc89   :  { %7480 = vmatpush.msra.mxu0 %v18726_v18  ;;  %7349 = vmatpush.msra.mxu1 %v18727_v4  ;;  %v18735_v18 = vld [vmem:[#allocation657_spill] sm:$0xff]  ;;  %v6878_v36 = vadd.f32 %v6877_v16, %v6858_v2  ;;  %v18737_v47 = vld [vmem:[#allocation328_spill] sm:$0xff]  ;;  %v18743_v16 = vld [vmem:[#allocation579_spill] sm:$0xff] }
 0xc8a   :  { %7545 = vmatpush.msrb.mxu2 %v18729_v1  ;;  %7215 = vmatpush.msra.mxu3 %v18730_v42  ;;  %7808 = vtanh.f32 %v7681_v44  ;;  %v18736_v4 = vld [vmem:[#allocation593_spill] sm:$0xff]  ;;  %v18738_v1 = vld [vmem:[#allocation650_spill] sm:$0xff] }
 0xc8b   :  { %7481 = vmatpush.msra.mxu0 %v18731_v25  ;;  %7350 = vmatpush.msra.mxu1 %v18732_v14  ;;  %v18739_v44 = vld [vmem:[#allocation586_spill] sm:$0xff]  ;;  %v6937_v2 = vpop.f32.mrf.mxu0 }
 0xc8c   :  { %7546 = vmatpush.msrb.mxu2 %v18733_v26  ;;  %7216 = vmatmul.f32.vlgmr.msra.gmra.mxu3 %v14372_v8  ;;  %v6917_v14 = vpop.f32.mrf.mxu2  ;;  %v18741_v26 = vld [vmem:[#allocation322_spill] sm:$0xff] }
 0xc8d   :  { %7280 = vmatpush.msrb.mxu3 %v18734_v33  ;;  %7482 = vmatpush.msra.mxu0 %v18735_v18  ;;  %v18742_v33 = vld [vmem:[#allocation643_spill] sm:$0xff] }
 0xc8e   :  { %7351 = vmatpush.msra.mxu1 %v18736_v4  ;;  %7547 = vmatpush.msrb.mxu2 %v18064_v49  ;;  %v6897_v42 = vpop.f32.mrf.mxu3  ;;  %v18744_v18 = vld [vmem:[#allocation315_spill] sm:$0xff]  ;;  %v18745_v4 = vld [vmem:[#allocation636_spill] sm:$0xff] }
 0xc8f   :  { %7281 = vmatpush.msrb.mxu3 %v18737_v47  ;;  %7483 = vmatpush.msra.mxu0 %v18738_v1  ;;  %v6898_v52 = vadd.f32 %v6897_v42, %v6878_v36  ;;  %v18746_v47 = vld [vmem:[#allocation572_spill] sm:$0xff]  ;;  %v6957_v1 = vpop.f32.mrf.mxu1 }
 0xc90   :  { %7352 = vmatpush.msra.mxu1 %v18739_v44  ;;  %7548 = vmatpush.msrb.mxu2 %v18740_v41  ;;  %v7809_v25 = vpop.eup %7808  ;;  %v18747_v42 = vld [vmem:[#allocation308_spill] sm:$0xff]  ;;  %v18748_v44 = vld [vmem:[#allocation629_spill] sm:$0xff] }
 0xc91   :  { %7282 = vmatpush.msrb.mxu3 %v18741_v26  ;;  %7484 = vmatpush.msra.mxu0 %v18742_v33  ;;  %7702 = vst [vmem:[#allocation1] sm:$0xff] %v7809_v25  ;;  %v6918_v49 = vadd.f32 %v6917_v14, %v6898_v52  ;;  %v18749_v41 = vld [vmem:[#allocation565_spill] sm:$0xff]  ;;  %v18751_v25 = vld [vmem:[#allocation335_spill] sm:$0xff]  ;;  %v18752_v14 = vld [vmem:[#allocation622_spill] sm:$0xff] }
 0xc92   :  { %7353 = vmatpush.msra.mxu1 %v18743_v16  ;;  %7549 = vmatpush.msrb.mxu2 %v18072_v5  ;;  %v18750_v52 = vld [vmem:[#allocation301_spill] sm:$0xff]  ;;  %v18753_v26 = vld [vmem:[#allocation294_spill] sm:$0xff]  ;;  %v18755_v16 = vld [vmem:[#allocation615_spill] sm:$0xff] }
 0xc93   :  { %7283 = vmatpush.msrb.mxu3 %v18744_v18  ;;  %7485 = vmatpush.msra.mxu0 %v18745_v4  ;;  %v6938_v36 = vadd.f32 %v6937_v2, %v6918_v49  ;;  %v18754_v33 = vld [vmem:[#allocation329_spill] sm:$0xff]  ;;  %v18756_v49 = vld [vmem:[#allocation806_spill] sm:$0xff]  ;;  %v18757_v2 = vld [vmem:[#allocation287_spill] sm:$0xff] }
 0xc94   :  { %7354 = vmatpush.msra.mxu1 %v18746_v47  ;;  %7550 = vmatpush.msrb.mxu2 %v18076_v63  ;;  %v18758_v18 = vld [vmem:[#allocation323_spill] sm:$0xff]  ;;  %v18759_v4 = vld [vmem:[#allocation608_spill] sm:$0xff] }
 0xc95   :  { %7284 = vmatpush.msrb.mxu3 %v18747_v42  ;;  %7486 = vmatpush.msra.mxu0 %v18748_v44  ;;  %v6958_v5 = vadd.f32 %v6957_v1, %v6938_v36  ;;  %v18761_v47 = vld [vmem:[#allocation316_spill] sm:$0xff]  ;;  %v18762_v36 = vld [vmem:[#allocation601_spill] sm:$0xff]  ;;  %v18765_v42 = vld [vmem:[#allocation594_spill] sm:$0xff] }
 0xc96   :  { %7355 = vmatpush.msra.mxu1 %v18749_v41  ;;  %7551 = vmatpush.msrb.mxu2 %v18081_v30  ;;  %v18763_v1 = vld [vmem:[#allocation273_spill] sm:$0xff]  ;;  %v18766_v44 = vld [vmem:[#allocation266_spill] sm:$0xff] }
 0xc97   :  { %7285 = vmatpush.msrb.mxu3 %v18750_v52  ;;  %7356 = vmatmul.f32.vlgmr.msra.gmra.mxu1 %v14372_v8  ;;  %v7668_v63 = vrot.slane %v6958_v5, 1  ;;  %v18768_v5 = vld [vmem:[#allocation587_spill] sm:$0xff] }
 0xc98   :  { %7420 = vmatpush.msrb.mxu1 %v18751_v25  ;;  %7487 = vmatpush.msra.mxu0 %v18752_v14  ;;  %v18769_v52 = vld [vmem:[#allocation259_spill] sm:$0xff]  ;;  %v18771_v25 = vld [vmem:[#allocation580_spill] sm:$0xff] }
 0xc99   :  { %7552 = vmatpush.msrb.mxu2 %v18085_v57  ;;  %7286 = vmatpush.msrb.mxu3 %v18753_v26  ;;  %v7682_v30 = vadd.f32 %v7668_v63, %v18756_v49  ;;  %v18760_v57 = vld [vmem:[#allocation280_spill] sm:$0xff]  ;;  %v18775_v63 = vld [vmem:[#allocation245_spill] sm:$0xff]  ;;  %v18781_v49 = vld [vmem:[#allocation231_spill] sm:$0xff] }
 0xc9a   :  { %7421 = vmatpush.msrb.mxu1 %v18754_v33  ;;  %7488 = vmatpush.msra.mxu0 %v18755_v16  ;;  %v18772_v14 = vld [vmem:[#allocation252_spill] sm:$0xff]  ;;  %v18776_v26 = vld [vmem:[#allocation281_spill] sm:$0xff]  ;;  %v18777_v33 = vld [vmem:[#allocation566_spill] sm:$0xff] }
 0xc9b   :  { %7553 = vmatpush.msrb.mxu2 %v18089_v34  ;;  %7287 = vmatpush.msrb.mxu3 %v18757_v2  ;;  %7810 = vtanh.f32 %v7682_v30  ;;  %v18764_v34 = vld [vmem:[#allocation309_spill] sm:$0xff]  ;;  %v18779_v16 = vld [vmem:[#allocation336_spill] sm:$0xff]  ;;  %v18782_v30 = vld [vmem:[#allocation330_spill] sm:$0xff] }
 0xc9c   :  { %7422 = vmatpush.msrb.mxu1 %v18758_v18  ;;  %7489 = vmatpush.msra.mxu0 %v18759_v4  ;;  %v18784_v2 = vld [vmem:[#allocation782_spill] sm:$0xff]  ;;  %v18786_v18 = vld [vmem:[#allocation260_spill] sm:$0xff]  ;;  %v18787_v4 = vld [vmem:[#allocation775_spill] sm:$0xff] }
 0xc9d   :  { %7554 = vmatpush.msrb.mxu2 %v18093_v15  ;;  %7288 = vmatpush.msrb.mxu3 %v18760_v57  ;;  %v18767_v15 = vld [vmem:[#allocation302_spill] sm:$0xff]  ;;  %v18789_v57 = vld [vmem:[#allocation253_spill] sm:$0xff] }
 0xc9e   :  { %7423 = vmatpush.msrb.mxu1 %v18761_v47  ;;  %7490 = vmatpush.msra.mxu0 %v18762_v36  ;;  %v18790_v47 = vld [vmem:[#allocation768_spill] sm:$0xff]  ;;  %v18792_v36 = vld [vmem:[#allocation246_spill] sm:$0xff] }
 0xc9f   :  { %7555 = vmatpush.msrb.mxu2 %v18096_v6  ;;  %7289 = vmatpush.msrb.mxu3 %v18763_v1  ;;  %v18770_v6 = vld [vmem:[#allocation295_spill] sm:$0xff]  ;;  %v18793_v1 = vld [vmem:[#allocation761_spill] sm:$0xff] }
 0xca0   :  { %7424 = vmatpush.msrb.mxu1 %v18764_v34  ;;  %7491 = vmatpush.msra.mxu0 %v18765_v42  ;;  %v18794_v34 = vld [vmem:[#allocation303_spill] sm:$0xff]  ;;  %v18796_v42 = vld [vmem:[#allocation754_spill] sm:$0xff] }
 0xca1   :  { %7556 = vmatmul.f32.vlgmr.msrb.gmra.mxu2 %v14281_v24  ;;  %7290 = vmatpush.msrb.mxu3 %v18766_v44  ;;  %v7811_v41 = vpop.eup %7810  ;;  %v18773_v24 = vld [vmem:[#allocation288_spill] sm:$0xff] }
 0xca2   :  { %7620 = vmatpush.msra.mxu2 %v18099_v7  ;;  %7425 = vmatpush.msrb.mxu1 %v18767_v15  ;;  %7703 = vst [vmem:[#allocation1 + $0x9] sm:$0xff] %v7811_v41  ;;  %v18774_v7 = vld [vmem:[#allocation573_spill] sm:$0xff]  ;;  %v18797_v44 = vld [vmem:[#allocation296_spill] sm:$0xff]  ;;  %v18799_v41 = vld [vmem:[#allocation747_spill] sm:$0xff] }
 0xca3   :  { %7492 = vmatpush.msra.mxu0 %v18768_v5  ;;  %7291 = vmatpush.msrb.mxu3 %v18769_v52  ;;  %v18801_v15 = vld [vmem:[#allocation289_spill] sm:$0xff]  ;;  %v18802_v5 = vld [vmem:[#allocation740_spill] sm:$0xff]  ;;  %v18804_v52 = vld [vmem:[#allocation282_spill] sm:$0xff] }
 0xca4   :  { %7621 = vmatpush.msra.mxu2 %v18102_v50  ;;  %7426 = vmatpush.msrb.mxu1 %v18770_v6  ;;  %v18778_v50 = vld [vmem:[#allocation238_spill] sm:$0xff]  ;;  %v18805_v6 = vld [vmem:[#allocation733_spill] sm:$0xff] }
 0xca5   :  { %7493 = vmatpush.msra.mxu0 %v18771_v25  ;;  %7292 = vmatpush.msrb.mxu3 %v18772_v14  ;;  %v18807_v14 = vld [vmem:[#allocation726_spill] sm:$0xff] }
 0xca6   :  { %7622 = vmatpush.msra.mxu2 %v18105_v13  ;;  %7427 = vmatpush.msrb.mxu1 %v18773_v24  ;;  %v18780_v13 = vld [vmem:[#allocation274_spill] sm:$0xff]  ;;  %v18809_v24 = vld [vmem:[#allocation268_spill] sm:$0xff] }
 0xca7   :  { %7494 = vmatpush.msra.mxu0 %v18774_v7  ;;  %7293 = vmatpush.msrb.mxu3 %v18775_v63  ;;  %v6997_v7 = vpop.f32.mrf.mxu2  ;;  %v18810_v63 = vld [vmem:[#allocation719_spill] sm:$0xff] }
 0xca8   :  { %7623 = vmatpush.msra.mxu2 %v18108_v45  ;;  %7428 = vmatpush.msrb.mxu1 %v18776_v26  ;;  %v18783_v45 = vld [vmem:[#allocation267_spill] sm:$0xff] }
 0xca9   :  { %7495 = vmatpush.msra.mxu0 %v18777_v33  ;;  %7294 = vmatpush.msrb.mxu3 %v18778_v50  ;;  %v6977_v25 = vpop.f32.mrf.mxu3  ;;  %v18811_v26 = vld [vmem:[#allocation755_spill] sm:$0xff]  ;;  %v18812_v33 = vld [vmem:[#allocation261_spill] sm:$0xff]  ;;  %v18815_v50 = vld [vmem:[#allocation254_spill] sm:$0xff] }
 0xcaa   :  { %7624 = vmatpush.msra.mxu2 %v18111_v62  ;;  %7496 = vmatmul.f32.vlgmr.msra.gmra.mxu0 %v14372_v8  ;;  %v18785_v62 = vld [vmem:[#allocation324_spill] sm:$0xff] }
 0xcab   :  { %7560 = vmatpush.msrb.mxu0 %v18779_v16  ;;  %7429 = vmatpush.msrb.mxu1 %v18780_v13  ;;  %v7017_v16 = vpop.f32.mrf.mxu0  ;;  %v18816_v13 = vld [vmem:[#allocation705_spill] sm:$0xff] }
 0xcac   :  { %7625 = vmatpush.msra.mxu2 %v18114_v12  ;;  %7295 = vmatpush.msrb.mxu3 %v18781_v49  ;;  %v18788_v12 = vld [vmem:[#allocation317_spill] sm:$0xff] }
 0xcad   :  { %7561 = vmatpush.msrb.mxu0 %v18782_v30  ;;  %7430 = vmatpush.msrb.mxu1 %v18783_v45  ;;  %v18818_v30 = vld [vmem:[#allocation247_spill] sm:$0xff]  ;;  %v18819_v45 = vld [vmem:[#allocation698_spill] sm:$0xff] }
 0xcae   :  { %7626 = vmatpush.msra.mxu2 %v18117_v23  ;;  %7296 = vmatmul.f32.vlgmr.msrb.gmra.mxu3 %v14166_v35  ;;  %v18791_v23 = vld [vmem:[#allocation310_spill] sm:$0xff] }
 0xcaf   :  { %7360 = vmatpush.msra.mxu3 %v18784_v2  ;;  %7562 = vmatpush.msrb.mxu0 %v18785_v62  ;;  %v18820_v2 = vld [vmem:[#allocation734_spill] sm:$0xff]  ;;  %v18821_v62 = vld [vmem:[#allocation240_spill] sm:$0xff] }
 0xcb0   :  { %7431 = vmatpush.msrb.mxu1 %v18786_v18  ;;  %7627 = vmatpush.msra.mxu2 %v18120_v55  ;;  %v18795_v55 = vld [vmem:[#allocation239_spill] sm:$0xff] }
 0xcb1   :  { %7361 = vmatpush.msra.mxu3 %v18787_v4  ;;  %7563 = vmatpush.msrb.mxu0 %v18788_v12  ;;  %v18822_v18 = vld [vmem:[#allocation691_spill] sm:$0xff]  ;;  %v18824_v12 = vld [vmem:[#allocation233_spill] sm:$0xff] }
 0xcb2   :  { %7432 = vmatpush.msrb.mxu1 %v18789_v57  ;;  %7628 = vmatpush.msra.mxu2 %v18123_v27  ;;  %v18798_v27 = vld [vmem:[#allocation232_spill] sm:$0xff]  ;;  %v18823_v4 = vld [vmem:[#allocation727_spill] sm:$0xff] }
 0xcb3   :  { %7362 = vmatpush.msra.mxu3 %v18790_v47  ;;  %7564 = vmatpush.msrb.mxu0 %v18791_v23  ;;  %v18825_v47 = vld [vmem:[#allocation684_spill] sm:$0xff] }
 0xcb4   :  { %7433 = vmatpush.msrb.mxu1 %v18792_v36  ;;  %7629 = vmatpush.msra.mxu2 %v18126_v22  ;;  %v18800_v22 = vld [vmem:[#allocation783_spill] sm:$0xff]  ;;  %v18826_v36 = vld [vmem:[#allocation784_spill] sm:$0xff] }
 0xcb5   :  { %7363 = vmatpush.msra.mxu3 %v18793_v1  ;;  %7565 = vmatpush.msrb.mxu0 %v18794_v34  ;;  %v18827_v1 = vld [vmem:[#allocation720_spill] sm:$0xff] }
 0xcb6   :  { %7434 = vmatpush.msrb.mxu1 %v18795_v55  ;;  %7630 = vmatpush.msra.mxu2 %v18129_v19  ;;  %v18803_v19 = vld [vmem:[#allocation776_spill] sm:$0xff]  ;;  %v7077_v55 = vpop.f32.mrf.mxu2 }
 0xcb7   :  { %7364 = vmatpush.msra.mxu3 %v18796_v42  ;;  %7566 = vmatpush.msrb.mxu0 %v18797_v44  ;;  %v18828_v42 = vld [vmem:[#allocation677_spill] sm:$0xff] }
 0xcb8   :  { %7435 = vmatpush.msrb.mxu1 %v18798_v27  ;;  %7631 = vmatpush.msra.mxu2 %v18131_v20  ;;  %v18806_v20 = vld [vmem:[#allocation769_spill] sm:$0xff] }
 0xcb9   :  { %7365 = vmatpush.msra.mxu3 %v18799_v41  ;;  %7436 = vmatmul.f32.vlgmr.msrb.gmra.mxu1 %v14166_v35  ;;  %v18829_v44 = vld [vmem:[#allocation777_spill] sm:$0xff] }
 0xcba   :  { %7500 = vmatpush.msra.mxu1 %v18800_v22  ;;  %7567 = vmatpush.msrb.mxu0 %v18801_v15  ;;  %v18830_v27 = vld [vmem:[#allocation713_spill] sm:$0xff]  ;;  %v7097_v22 = vpop.f32.mrf.mxu0  ;;  %v18832_v15 = vld [vmem:[#allocation770_spill] sm:$0xff] }
 0xcbb   :  { %7632 = vmatpush.msra.mxu2 %v18133_v11  ;;  %7366 = vmatpush.msra.mxu3 %v18802_v5  ;;  %v18808_v11 = vld [vmem:[#allocation762_spill] sm:$0xff] }
 0xcbc   :  { %7501 = vmatpush.msra.mxu1 %v18803_v19  ;;  %7568 = vmatpush.msrb.mxu0 %v18804_v52  ;;  %v18833_v19 = vld [vmem:[#allocation706_spill] sm:$0xff]  ;;  %v18834_v52 = vld [vmem:[#allocation440_spill] sm:$0xff] }
 0xcbd   :  { %7633 = vmatpush.msra.mxu2 %v18135_v0  ;;  %7367 = vmatpush.msra.mxu3 %v18805_v6  ;;  %v6998_v0 = vadd.f32 %v6997_v7, %v6977_v25  ;;  %v18835_v6 = vld [vmem:[#allocation763_spill] sm:$0xff] }
 0xcbe   :  { %7502 = vmatpush.msra.mxu1 %v18806_v20  ;;  %7569 = vmatpush.msrb.mxu0 %v18073_v38  ;;  %v18813_v38 = vld [vmem:[#allocation712_spill] sm:$0xff]  ;;  %v18836_v25 = vld [vmem:[#allocation699_spill] sm:$0xff] }
 0xcbf   :  { %7634 = vmatpush.msra.mxu2 %v17410_v32  ;;  %7368 = vmatpush.msra.mxu3 %v18807_v14  ;;  %v18814_v32 = vld [vmem:[#allocation748_spill] sm:$0xff]  ;;  %v7018_v49 = vadd.f32 %v7017_v16, %v6998_v0  ;;  %v18837_v14 = vld [vmem:[#allocation433_spill] sm:$0xff]  ;;  %v18841_v0 = vld [vmem:[#allocation426_spill] sm:$0xff] }
 0xcc0   :  { %7503 = vmatpush.msra.mxu1 %v18808_v11  ;;  %7570 = vmatpush.msrb.mxu0 %v18809_v24  ;;  %v18838_v11 = vld [vmem:[#allocation756_spill] sm:$0xff]  ;;  %v18839_v24 = vld [vmem:[#allocation807_spill] sm:$0xff] }
 0xcc1   :  { %7635 = vmatpush.msra.mxu2 %v17414_v3  ;;  %7369 = vmatpush.msra.mxu3 %v18810_v63  ;;  %v18817_v3 = vld [vmem:[#allocation741_spill] sm:$0xff]  ;;  %v18840_v63 = vld [vmem:[#allocation692_spill] sm:$0xff] }
 0xcc2   :  { %7504 = vmatpush.msra.mxu1 %v18811_v26  ;;  %7571 = vmatpush.msrb.mxu0 %v18812_v33  ;;  %v18842_v26 = vld [vmem:[#allocation749_spill] sm:$0xff]  ;;  %v18847_v16 = vld [vmem:[#allocation412_spill] sm:$0xff] }
 0xcc3   :  { %7636 = vmatmul.f32.vlgmr.msra.gmra.mxu2 %v14372_v8  ;;  %7370 = vmatpush.msra.mxu3 %v18813_v38  ;;  %v7037_v8 = vpop.f32.mrf.mxu1  ;;  %v18843_v33 = vld [vmem:[#allocation685_spill] sm:$0xff]  ;;  %v18844_v38 = vld [vmem:[#allocation419_spill] sm:$0xff] }
 0xcc4   :  { %7505 = vmatpush.msra.mxu1 %v18814_v32  ;;  %7572 = vmatpush.msrb.mxu0 %v18815_v50  ;;  %v7038_v57 = vadd.f32 %v7037_v8, %v7018_v49  ;;  %v18845_v32 = vld [vmem:[#allocation742_spill] sm:$0xff]  ;;  %v18849_v49 = vld [vmem:[#allocation735_spill] sm:$0xff] }
 0xcc5   :  { %7371 = vmatpush.msra.mxu3 %v18816_v13  ;;  %v18846_v50 = vld [vmem:[#allocation678_spill] sm:$0xff]  ;;  %v18848_v13 = vld [vmem:[#allocation448_spill] sm:$0xff]  ;;  %v18854_v8 = vld [vmem:[#allocation391_spill] sm:$0xff] }
 0xcc6   :  { %7506 = vmatpush.msra.mxu1 %v18817_v3  ;;  %7573 = vmatpush.msrb.mxu0 %v18818_v30  ;;  %v18850_v30 = vld [vmem:[#allocation405_spill] sm:$0xff] }
 0xcc7   :  { %7372 = vmatpush.msra.mxu3 %v18819_v45  ;;  %v18851_v45 = vld [vmem:[#allocation441_spill] sm:$0xff] }
 0xcc8   :  { %7507 = vmatpush.msra.mxu1 %v18820_v2  ;;  %7574 = vmatpush.msrb.mxu0 %v18821_v62  ;;  %v18852_v2 = vld [vmem:[#allocation398_spill] sm:$0xff] }
 0xcc9   :  { %7373 = vmatpush.msra.mxu3 %v18822_v18  ;;  %v18853_v62 = vld [vmem:[#allocation434_spill] sm:$0xff]  ;;  %v18855_v18 = vld [vmem:[#allocation427_spill] sm:$0xff] }
 0xcca   :  { %7508 = vmatpush.msra.mxu1 %v18823_v4  ;;  %7575 = vmatpush.msrb.mxu0 %v18824_v12  ;;  %v18856_v4 = vld [vmem:[#allocation384_spill] sm:$0xff] }
 0xccb   :  { %7576 = vmatmul.f32.vlgmr.msrb.gmra.mxu0 %v14166_v35  ;;  %7374 = vmatpush.msra.mxu3 %v18825_v47  ;;  %v7057_v23 = vpop.f32.mrf.mxu3  ;;  %v18831_v35 = vld [vmem:[#allocation447_spill] sm:$0xff]  ;;  %v18857_v12 = vld [vmem:[#allocation420_spill] sm:$0xff]  ;;  %v18860_v47 = vld [vmem:[#allocation370_spill] sm:$0xff] }
 0xccc   :  { %7640 = vmatpush.msra.mxu0 %v18826_v36  ;;  %7509 = vmatpush.msra.mxu1 %v18827_v1  ;;  %v7058_v34 = vadd.f32 %v7057_v23, %v7038_v57  ;;  %v18858_v57 = vld [vmem:[#allocation377_spill] sm:$0xff]  ;;  %v18862_v23 = vld [vmem:[#allocation363_spill] sm:$0xff]  ;;  %v18867_v1 = vld [vmem:[#allocation342_spill] sm:$0xff] }
 0xccd   :  { %7375 = vmatpush.msra.mxu3 %v18828_v42  ;;  %v18866_v36 = vld [vmem:[#allocation385_spill] sm:$0xff]  ;;  %v18875_v42 = vld [vmem:[#allocation350_spill] sm:$0xff] }
 0xcce   :  { %7641 = vmatpush.msra.mxu0 %v18829_v44  ;;  %7510 = vmatpush.msra.mxu1 %v18830_v27  ;;  %v7078_v41 = vadd.f32 %v7077_v55, %v7058_v34  ;;  %v18869_v34 = vld [vmem:[#allocation114_spill] sm:$0xff]  ;;  %v18872_v55 = vld [vmem:[#allocation364_spill] sm:$0xff]  ;;  %v18876_v44 = vld [vmem:[#allocation343_spill] sm:$0xff] }
 0xccf   :  { %7376 = vmatmul.f32.vlgmr.msra.gmra.mxu3 %v14476_v21 }
 0xcd0   :  { %7440 = vmatpush.msrb.mxu3 %v18831_v35  ;;  %7642 = vmatpush.msra.mxu0 %v18832_v15  ;;  %v7098_v5 = vadd.f32 %v7097_v22, %v7078_v41  ;;  %v18877_v35 = vld [vmem:[#allocation40_spill] sm:$0xff]  ;;  %v18879_v15 = vld [vmem:[#allocation26_spill] sm:$0xff] }
 0xcd1   :  { %7511 = vmatpush.msra.mxu1 %v18833_v19 }
 0xcd2   :  { %7441 = vmatpush.msrb.mxu3 %v18834_v52  ;;  %7643 = vmatpush.msra.mxu0 %v18835_v6  ;;  %v7669_v20 = vrot.slane %v7098_v5, 1 }
 0xcd3   :  { %7512 = vmatpush.msra.mxu1 %v18836_v25 }
 0xcd4   :  { %7442 = vmatpush.msrb.mxu3 %v18837_v14  ;;  %7644 = vmatpush.msra.mxu0 %v18838_v11  ;;  %v7683_v7 = vadd.f32 %v7669_v20, %v18839_v24  ;;  %v18883_v20 = vld [vmem:[#allocation553_spill] sm:$0xff]  ;;  %v18884_v14 = vld [vmem:[#allocation546_spill] sm:$0xff]  ;;  %v18885_v24 = vld [vmem:[#allocation539_spill] sm:$0xff] }
 0xcd5   :  { %7513 = vmatpush.msra.mxu1 %v18840_v63 }
 0xcd6   :  { %7443 = vmatpush.msrb.mxu3 %v18841_v0  ;;  %7645 = vmatpush.msra.mxu0 %v18842_v26  ;;  %7812 = vtanh.f32 %v7683_v7  ;;  %v18886_v7 = vld [vmem:[#allocation808_spill] sm:$0xff]  ;;  %v18888_v26 = vld [vmem:[#allocation525_spill] sm:$0xff] }
 0xcd7   :  { %7514 = vmatpush.msra.mxu1 %v18843_v33  ;;  %v18887_v0 = vld [vmem:[#allocation532_spill] sm:$0xff] }
 0xcd8   :  { %7444 = vmatpush.msrb.mxu3 %v18844_v38  ;;  %7646 = vmatpush.msra.mxu0 %v18845_v32  ;;  %v18890_v38 = vld [vmem:[#allocation511_spill] sm:$0xff]  ;;  %v18891_v32 = vld [vmem:[#allocation504_spill] sm:$0xff] }
 0xcd9   :  { %7515 = vmatpush.msra.mxu1 %v18846_v50  ;;  %v18892_v50 = vld [vmem:[#allocation497_spill] sm:$0xff] }
 0xcda   :  { %7445 = vmatpush.msrb.mxu3 %v18847_v16  ;;  %7516 = vmatmul.f32.vlgmr.msra.gmra.mxu1 %v14476_v21  ;;  %v18893_v16 = vld [vmem:[#allocation490_spill] sm:$0xff] }
 0xcdb   :  { %7580 = vmatpush.msrb.mxu1 %v18848_v13  ;;  %7647 = vmatpush.msra.mxu0 %v18849_v49  ;;  %v18894_v13 = vld [vmem:[#allocation483_spill] sm:$0xff]  ;;  %v18895_v49 = vld [vmem:[#allocation476_spill] sm:$0xff] }
 0xcdc   :  { %v7813_v3 = vpop.eup %7812  ;;  %7446 = vmatpush.msrb.mxu3 %v18850_v30  ;;  %v18897_v30 = vld [vmem:[#allocation462_spill] sm:$0xff] }
 0xcdd   :  { %7704 = vst [vmem:[#allocation1 + $0x12] sm:$0xff] %v7813_v3  ;;  %7581 = vmatpush.msrb.mxu1 %v18851_v45  ;;  %7648 = vmatpush.msra.mxu0 %v17424_v51  ;;  %v18859_v51 = vld [vmem:[#allocation413_spill] sm:$0xff]  ;;  %v18898_v45 = vld [vmem:[#allocation455_spill] sm:$0xff] }
 0xcde   :  { %7447 = vmatpush.msrb.mxu3 %v18852_v2  ;;  %v18896_v3 = vld [vmem:[#allocation469_spill] sm:$0xff] }
 0xcdf   :  { %7582 = vmatpush.msrb.mxu1 %v18853_v62  ;;  %7649 = vmatpush.msra.mxu0 %v17425_v10  ;;  %v18861_v10 = vld [vmem:[#allocation406_spill] sm:$0xff] }
 0xce0   :  { %7448 = vmatpush.msrb.mxu3 %v18854_v8 }
 0xce1   :  { %7583 = vmatpush.msrb.mxu1 %v18855_v18  ;;  %7650 = vmatpush.msra.mxu0 %v17426_v40  ;;  %v18863_v40 = vld [vmem:[#allocation399_spill] sm:$0xff] }
 0xce2   :  { %7449 = vmatpush.msrb.mxu3 %v18856_v4 }
 0xce3   :  { %7584 = vmatpush.msrb.mxu1 %v18857_v12  ;;  %7651 = vmatpush.msra.mxu0 %v17427_v37  ;;  %v18864_v37 = vld [vmem:[#allocation392_spill] sm:$0xff] }
 0xce4   :  { %7450 = vmatpush.msrb.mxu3 %v18858_v57 }
 0xce5   :  { %7585 = vmatpush.msrb.mxu1 %v18859_v51  ;;  %7652 = vmatpush.msra.mxu0 %v17428_v28  ;;  %v18865_v28 = vld [vmem:[#allocation349_spill] sm:$0xff] }
 0xce6   :  { %7451 = vmatpush.msrb.mxu3 %v18860_v47 }
 0xce7   :  { %7586 = vmatpush.msrb.mxu1 %v18861_v10  ;;  %7653 = vmatpush.msra.mxu0 %v17429_v54  ;;  %v18868_v54 = vld [vmem:[#allocation378_spill] sm:$0xff] }
 0xce8   :  { %7452 = vmatpush.msrb.mxu3 %v18862_v23 }
 0xce9   :  { %7587 = vmatpush.msrb.mxu1 %v18863_v40  ;;  %7654 = vmatpush.msra.mxu0 %v17430_v59  ;;  %v18870_v59 = vld [vmem:[#allocation371_spill] sm:$0xff] }
 0xcea   :  { %7453 = vmatpush.msrb.mxu3 %v18124_v31  ;;  %v18871_v31 = vld [vmem:[#allocation108_spill] sm:$0xff] }
 0xceb   :  { %7588 = vmatpush.msrb.mxu1 %v18864_v37  ;;  %7655 = vmatpush.msra.mxu0 %v17435_v29  ;;  %v18873_v29 = vld [vmem:[#allocation357_spill] sm:$0xff] }
 0xcec   :  { %7656 = vmatmul.f32.vlgmr.msra.gmra.mxu0 %v14476_v21  ;;  %7454 = vmatpush.msrb.mxu3 %v18865_v28  ;;  %v18874_v21 = vld [vmem:[#allocation96_spill] sm:$0xff] }
 0xced   :  { %7589 = vmatpush.msrb.mxu1 %v18866_v36  ;;  %v7137_v27 = vpop.f32.mrf.mxu3  ;;  %v18899_v36 = vld [vmem:[#allocation809_spill] sm:$0xff] }
 0xcee   :  { %7455 = vmatpush.msrb.mxu3 %v18867_v1 }
 0xcef   :  { %7590 = vmatpush.msrb.mxu1 %v18868_v54  ;;  %7456 = vmatmul.f32.vlgmr.msrb.gmra.mxu3 %v14168_v56 }
 0xcf0   :  { %7520 = vmatpush.msra.mxu3 %v18869_v34 }
 0xcf1   :  { %7591 = vmatpush.msrb.mxu1 %v18870_v59 }
 0xcf2   :  { %7521 = vmatpush.msra.mxu3 %v18871_v31 }
 0xcf3   :  { %7592 = vmatpush.msrb.mxu1 %v18872_v55 }
 0xcf4   :  { %7522 = vmatpush.msra.mxu3 %v18136_v46  ;;  %v7117_v46 = vpop.f32.mrf.mxu1 }
 0xcf5   :  { %7593 = vmatpush.msrb.mxu1 %v18873_v29  ;;  %v7138_v41 = vadd.f32 %v7137_v27, %v7117_v46 }
 0xcf6   :  { %7523 = vmatpush.msra.mxu3 %v18874_v21 }
 0xcf7   :  { %7594 = vmatpush.msrb.mxu1 %v18875_v42 }
 0xcf8   :  { %7524 = vmatpush.msra.mxu3 %v18138_v48  ;;  %v7157_v48 = vpop.f32.mrf.mxu2 }
 0xcf9   :  { %7595 = vmatpush.msrb.mxu1 %v18876_v44  ;;  %v7158_v22 = vadd.f32 %v7157_v48, %v7138_v41 }
 0xcfa   :  { %7525 = vmatpush.msra.mxu3 %v18139_v60  ;;  %7596 = vmatmul.f32.vlgmr.msrb.gmra.mxu1 %v14168_v56  ;;  %v18878_v60 = vld [vmem:[#allocation33_spill] sm:$0xff]  ;;  %v7177_v56 = vpop.f32.mrf.mxu0 }
 0xcfc   :  { %7526 = vmatpush.msra.mxu3 %v18140_v61  ;;  %v7178_v61 = vadd.f32 %v7177_v56, %v7158_v22  ;;  %v7197_v5 = vpop.f32.mrf.mxu1 }
 0xcfe   :  { %7527 = vmatpush.msra.mxu3 %v18141_v53  ;;  %v18880_v53 = vld [vmem:[#allocation19_spill] sm:$0xff]  ;;  %v7198_v19 = vadd.f32 %v7197_v5, %v7178_v61 }
 0xd00   :  { %7528 = vmatpush.msra.mxu3 %v18142_v39  ;;  %v18881_v39 = vld [vmem:[#allocation12_spill] sm:$0xff]  ;;  %v7237_v6 = vpop.f32.mrf.mxu2 }
 0xd02   :  { %7529 = vmatpush.msra.mxu3 %v18143_v9  ;;  %v7257_v62 = vpop.f32.mrf.mxu0 }
 0xd04   :  { %7530 = vmatpush.msra.mxu3 %v18146_v43  ;;  %v18882_v43 = vld [vmem:[#allocation560_spill] sm:$0xff]  ;;  %v7277_v2 = vpop.f32.mrf.mxu1 }
 0xd05   :  { %v7278_v18 = vadd.f32 %v7277_v2, %v7257_v62 }
 0xd06   :  { %7531 = vmatpush.msra.mxu3 %v18877_v35  ;;  %v18900_v35 = vld [vmem:[#allocation810_spill] sm:$0xff] }
 0xd08   :  { %7532 = vmatpush.msra.mxu3 %v18878_v60  ;;  %v7317_v12 = vpop.f32.mrf.mxu2 }
 0xd0a   :  { %7533 = vmatpush.msra.mxu3 %v18879_v15  ;;  %v7337_v51 = vpop.f32.mrf.mxu0 }
 0xd0c   :  { %7534 = vmatpush.msra.mxu3 %v18880_v53 }
 0xd0e   :  { %7535 = vmatpush.msra.mxu3 %v18881_v39 }
 0xd0f   :  { %7536 = vmatmul.f32.vlgmr.msra.gmra.mxu3 %v14151_v17  ;;  %v7217_v9 = vpop.f32.mrf.mxu3  ;;  %v18889_v17 = vld [vmem:[#allocation518_spill] sm:$0xff] }
 0xd10   :  { %7600 = vmatpush.msrb.mxu3 %v18882_v43  ;;  %v7218_v52 = vadd.f32 %v7217_v9, %v7198_v19 }
 0xd12   :  { %7601 = vmatpush.msrb.mxu3 %v18883_v20  ;;  %v7238_v25 = vadd.f32 %v7237_v6, %v7218_v52  ;;  %v7417_v34 = vpop.f32.mrf.mxu0 }
 0xd14   :  { %7602 = vmatpush.msrb.mxu3 %v18884_v14  ;;  %v7670_v11 = vrot.slane %v7238_v25, 1  ;;  %v7357_v10 = vpop.f32.mrf.mxu1 }
 0xd16   :  { %7603 = vmatpush.msrb.mxu3 %v18885_v24  ;;  %v7684_v63 = vadd.f32 %v7670_v11, %v18886_v7  ;;  %v18901_v24 = vld [vmem:[#allocation811_spill] sm:$0xff] }
 0xd18   :  { %7814 = vtanh.f32 %v7684_v63  ;;  %7604 = vmatpush.msrb.mxu3 %v18887_v0 }
 0xd1a   :  { %7605 = vmatpush.msrb.mxu3 %v18888_v26 }
 0xd1c   :  { %7606 = vmatpush.msrb.mxu3 %v18889_v17 }
 0xd1e   :  { %v7815_v33 = vpop.eup %7814  ;;  %7607 = vmatpush.msrb.mxu3 %v18890_v38 }
 0xd1f   :  { %7705 = vst [vmem:[#allocation1 + $0x1b] sm:$0xff] %v7815_v33 }
 0xd20   :  { %7608 = vmatpush.msrb.mxu3 %v18891_v32 }
 0xd22   :  { %7609 = vmatpush.msrb.mxu3 %v18892_v50 }
 0xd24   :  { %7610 = vmatpush.msrb.mxu3 %v18893_v16 }
 0xd26   :  { %7611 = vmatpush.msrb.mxu3 %v18894_v13 }
 0xd27   :  { %v7497_v27 = vpop.f32.mrf.mxu0 }
 0xd28   :  { %7612 = vmatpush.msrb.mxu3 %v18895_v49 }
 0xd2a   :  { %7613 = vmatpush.msrb.mxu3 %v18896_v3 }
 0xd2c   :  { %7614 = vmatpush.msrb.mxu3 %v18897_v30 }
 0xd2e   :  { %7615 = vmatpush.msrb.mxu3 %v18898_v45 }
 0xd2f   :  { %7616 = vmatmul.f32.vlgmr.msrb.gmra.mxu3 %v14302_v58  ;;  %v7397_v58 = vpop.f32.mrf.mxu2 }
 0xd30   :  { %v7418_v31 = vadd.f32 %v7417_v34, %v7397_v58 }
 0xd31   :  { %v7297_v8 = vpop.f32.mrf.mxu3 }
 0xd32   :  { %v7298_v4 = vadd.f32 %v7297_v8, %v7278_v18 }
 0xd34   :  { %v7318_v57 = vadd.f32 %v7317_v12, %v7298_v4 }
 0xd36   :  { %v7338_v47 = vadd.f32 %v7337_v51, %v7318_v57  ;;  %v7437_v59 = vpop.f32.mrf.mxu1 }
 0xd37   :  { %v7438_v55 = vadd.f32 %v7437_v59, %v7418_v31  ;;  %v7477_v42 = vpop.f32.mrf.mxu2 }
 0xd38   :  { %v7358_v23 = vadd.f32 %v7357_v10, %v7338_v47 }
 0xd3f   :  { %v7557_v61 = vpop.f32.mrf.mxu2 }
 0xd47   :  { %v7637_v6 = vpop.f32.mrf.mxu2 }
 0xd48   :  { %v7577_v5 = vpop.f32.mrf.mxu0 }
 0xd52   :  { %v7377_v40 = vpop.f32.mrf.mxu3 }
 0xd53   :  { %v7378_v37 = vadd.f32 %v7377_v40, %v7358_v23 }
 0xd55   :  { %v7671_v28 = vrot.slane %v7378_v37, 1 }
 0xd57   :  { %v7685_v1 = vadd.f32 %v7671_v28, %v18899_v36  ;;  %v7517_v41 = vpop.f32.mrf.mxu1 }
 0xd59   :  { %7816 = vtanh.f32 %v7685_v1 }
 0xd5f   :  { %v7817_v54 = vpop.eup %7816 }
 0xd60   :  { %7706 = vst [vmem:[#allocation1 + $0x24] sm:$0xff] %v7817_v54 }
 0xd69   :  { %v7657_v25 = vpop.f32.mrf.mxu0 }
 0xd72   :  { %v7457_v29 = vpop.f32.mrf.mxu3 }
 0xd73   :  { %v7458_v21 = vadd.f32 %v7457_v29, %v7438_v55 }
 0xd75   :  { %v7478_v44 = vadd.f32 %v7477_v42, %v7458_v21 }
 0xd77   :  { %v7498_v46 = vadd.f32 %v7497_v27, %v7478_v44  ;;  %v7597_v19 = vpop.f32.mrf.mxu1 }
 0xd79   :  { %v7518_v48 = vadd.f32 %v7517_v41, %v7498_v46 }
 0xd7b   :  { %v7672_v22 = vrot.slane %v7518_v48, 1 }
 0xd7d   :  { %v7686_v60 = vadd.f32 %v7672_v22, %v18900_v35 }
 0xd7f   :  { %7818 = vtanh.f32 %v7686_v60 }
 0xd85   :  { %v7819_v56 = vpop.eup %7818 }
 0xd86   :  { %7707 = vst [vmem:[#allocation1 + $0x2d] sm:$0xff] %v7819_v56 }
 0xd92   :  { %v7537_v15 = vpop.f32.mrf.mxu3 }
 0xd93   :  { %v7558_v53 = vadd.f32 %v7557_v61, %v7537_v15 }
 0xd95   :  { %v7578_v39 = vadd.f32 %v7577_v5, %v7558_v53 }
 0xd97   :  { %v7598_v9 = vadd.f32 %v7597_v19, %v7578_v39 }
 0xdb2   :  { %v7617_v43 = vpop.f32.mrf.mxu3 }
 0xdb3   :  { %v7618_v52 = vadd.f32 %v7617_v43, %v7598_v9 }
 0xdb5   :  { %v7638_v20 = vadd.f32 %v7637_v6, %v7618_v52 }
 0xdb7   :  { %v7658_v14 = vadd.f32 %v7657_v25, %v7638_v20 }
 0xdb9   :  { %v7673_v11 = vrot.slane %v7658_v14, 1 }
 0xdbb   :  { %v7687_v7 = vadd.f32 %v7673_v11, %v18901_v24 }
 0xdbd   :  { %7820 = vtanh.f32 %v7687_v7 }
 0xdc3   :  { %v7821_v63 = vpop.eup %7820 }
 0xdc4   :  { %7708 = vst [vmem:[#allocation1 + $0x36] sm:$0xff] %v7821_v63 }
 0xdcb   :  { %v7710_v0 = vld [vmem:[#allocation1 + $0x7] ss:$9 sm:$0xff] }
 0xdcc   :  { %7732 = vst.msk [vmem:[%s15005_s7 + $0x3] ss:$4 sm:$0x7f] %vm13608_vm1, %v7710_v0 }
 0xdcd   :  { %7718 = vsyncmov [#allocation3] }
 0xdd0   :  { %s7719_s14 = vpop.sfrf %7718 }
 0xdd1   :  { %p7733_p0 = scmp.ne.s32.totalorder %s7719_s14, 0 }
 0xdd3   :  { %7723 = shalt.err (%p7733_p0)  }

</bundles_post_ra>
